<compile_context>
chip_gen: v6e
topology: v6e:2x2x1
jax: 0.10.0
libtpu: 0.0.40
codegen_flags: <defaults>
</compile_context>

<pallas_src>
import functools

import numpy as np
import jax
import jax.numpy as jnp
from jax.experimental import pallas as pl
from jax.experimental.pallas import tpu as pltpu

EPS = 1e-8  # EPS is not defined in the original snippet; fixed deterministically.

SAMPLE_RATE = 44100
N_FFT = 2048
HOP = 441
F_MIN, F_MAX = 30.0, 17000.0
N_MELS = 81
N_FREQ = N_FFT // 2 + 1          # 1025 onesided rfft bins

# TPU lane-aligned padded sizes (zero padded, sliced off after the kernel).
N_FREQ_PAD = 1152                # 9 * 128
N_MELS_PAD = 128
FC = 384                         # frequency-chunk width (3 * 128 lanes)
NUM_CHUNKS = N_FREQ_PAD // FC    # 3
TM_MAX = 512                     # frame-row tile (MXU-friendly M dimension)


# ----------------------------------------------------------------------------
# Deterministic parameter construction (window-folded DFT matrices, mel fbanks)
# ----------------------------------------------------------------------------
def _hz_to_mel(f):
    return 2595.0 * np.log10(1.0 + np.asarray(f, dtype=np.float64) / 700.0)


def _mel_to_hz(m):
    return 700.0 * (10.0 ** (np.asarray(m, dtype=np.float64) / 2595.0) - 1.0)


@functools.lru_cache(maxsize=None)
def make_params():
    # periodic hann window (torch.hann_window default)
    n = np.arange(N_FFT, dtype=np.float64)
    hann = 0.5 * (1.0 - np.cos(2.0 * np.pi * n / N_FFT))              # (n_fft,)

    # onesided DFT matrices with the window folded in, zero-padded to N_FREQ_PAD
    k = np.arange(N_FREQ, dtype=np.float64)
    ang = 2.0 * np.pi * np.outer(n, k) / N_FFT                        # (n_fft, n_freq)
    cos_m = np.zeros((N_FFT, N_FREQ_PAD), dtype=np.float64)
    sin_m = np.zeros((N_FFT, N_FREQ_PAD), dtype=np.float64)
    cos_m[:, :N_FREQ] = np.cos(ang) * hann[:, None]
    sin_m[:, :N_FREQ] = -np.sin(ang) * hann[:, None]

    # Per frequency chunk, lay out [cos_chunk | sin_chunk] contiguously so the
    # kernel issues one combined MXU matmul per chunk and slices re/im out.
    cossin = np.zeros((N_FFT, NUM_CHUNKS * 2 * FC), dtype=np.float64)
    for c in range(NUM_CHUNKS):
        cossin[:, c * 2 * FC: c * 2 * FC + FC] = cos_m[:, c * FC:(c + 1) * FC]
        cossin[:, c * 2 * FC + FC: (c + 1) * 2 * FC] = sin_m[:, c * FC:(c + 1) * FC]

    # mel filterbank (torchaudio melscale_fbanks, htk, norm=None)
    all_freqs = np.linspace(0.0, SAMPLE_RATE / 2.0, N_FREQ)
    m_pts = np.linspace(_hz_to_mel(F_MIN), _hz_to_mel(F_MAX), N_MELS + 2)
    f_pts = _mel_to_hz(m_pts)
    f_diff = f_pts[1:] - f_pts[:-1]                                   # (n_mels+1,)
    slopes = f_pts[None, :] - all_freqs[:, None]                      # (n_freq, n_mels+2)
    down = -slopes[:, :-2] / f_diff[:-1]
    up = slopes[:, 2:] / f_diff[1:]
    fb = np.maximum(0.0, np.minimum(down, up))                        # (n_freq, n_mels)
    fb_pad = np.zeros((N_FREQ_PAD, N_MELS_PAD), dtype=np.float64)
    fb_pad[:N_FREQ, :N_MELS] = fb

    # bf16 MXU inputs with f32 accumulation in the kernel.
    # TODO(synk): if bit-level parity with the torch/f32 reference is required,
    # switch these (and the frames cast) back to float32.
    return (
        jnp.asarray(cossin, dtype=jnp.bfloat16),   # (n_fft, NUM_CHUNKS*2*FC)
        jnp.asarray(fb_pad, dtype=jnp.bfloat16),   # (N_FREQ_PAD, N_MELS_PAD)
    )


def _vmem_limit_bytes():
    cap = 128 * 1024 * 1024
    try:
        cap = int(pltpu.get_tpu_info().vmem_capacity_bytes)
    except Exception:
        pass
    # <= ~48 MiB everywhere; well under v7x's 64 MiB, generous on v5e/v6e.
    return min(48 * 1024 * 1024, (3 * cap) // 4)


# ----------------------------------------------------------------------------
# Pallas kernel.
# Grid = (row tiles of frames,).  The window-folded [cos|sin] DFT matrix and
# the mel filterbank use constant index maps -> DMA'd from HBM exactly once
# and kept VMEM-resident; the frequency-chunk reduction is a static 3-step
# in-kernel loop (keeps the (tm, 2*FC) f32 intermediates small).
# ----------------------------------------------------------------------------
def mel_kernel(frames_ref, cossin_ref, fb_ref, out_ref):
    frames = frames_ref[...]                                   # (tm, n_fft) bf16
    acc = jnp.zeros((frames.shape[0], N_MELS_PAD), jnp.float32)
    for c in range(NUM_CHUNKS):
        # Single MXU matmul gives [re | im] for this frequency chunk.
        rei = jnp.dot(frames, cossin_ref[:, c * 2 * FC:(c + 1) * 2 * FC],
                      preferred_element_type=jnp.float32)      # (tm, 2*FC) f32
        re = rei[:, :FC]
        im = rei[:, FC:]
        mag = jnp.sqrt(re * re + im * im)                      # power=1 magnitude
        acc = acc + jnp.dot(mag.astype(fb_ref.dtype),
                            fb_ref[c * FC:(c + 1) * FC, :],
                            preferred_element_type=jnp.float32)
    out_ref[...] = jnp.log(acc + EPS)


def ta_melspec(x):
    """x: (B, T) float32 audio -> (B, n_mels, n_frames) float32 log-mel."""
    B, T = x.shape
    n_frames = T // HOP + 1                        # center=True framing
    f_pad = ((n_frames + 7) // 8) * 8              # sublane-align frame count

    # center=True, reflect padding (torch.stft default pad_mode); requires T > n_fft//2.
    pad = N_FFT // 2
    xp = jnp.pad(x, ((0, 0), (pad, pad)), mode="reflect").astype(jnp.bfloat16)

    # Frame extraction (XLA glue), done in bf16 to halve the materialized bytes.
    # NOTE: this still materializes ~4.6x the audio size in HBM (hop=441 vs
    # n_fft=2048).
    # TODO(synk): in-kernel framing from a pl.ANY audio ref would cut that, but
    # pays unaligned-DMA cost since hop is not 128-aligned.
    idx = jnp.arange(n_frames)[:, None] * HOP + jnp.arange(N_FFT)[None, :]
    frames = xp[:, idx]                                            # (B, n_frames, n_fft)
    frames = jnp.pad(frames, ((0, 0), (0, f_pad - n_frames), (0, 0)))
    frames2d = frames.reshape(B * f_pad, N_FFT)

    total_rows = B * f_pad
    tm = min(TM_MAX, total_rows)                   # fixed-size row tile (mult of 8)
    r_pad = ((total_rows + tm - 1) // tm) * tm
    frames2d = jnp.pad(frames2d, ((0, r_pad - total_rows), (0, 0)))

    cossin, fb = make_params()

    out = pl.pallas_call(
        mel_kernel,
        out_shape=jax.ShapeDtypeStruct((r_pad, N_MELS_PAD), jnp.float32),
        grid_spec=pltpu.PrefetchScalarGridSpec(
            num_scalar_prefetch=0,
            grid=(r_pad // tm,),
            in_specs=[
                # Streamed: frame rows (only input whose block index changes).
                pl.BlockSpec((tm, N_FFT), lambda i: (i, 0)),
                # Resident constants (block index never changes -> single DMA).
                pl.BlockSpec((N_FFT, NUM_CHUNKS * 2 * FC), lambda i: (0, 0)),
                pl.BlockSpec((N_FREQ_PAD, N_MELS_PAD), lambda i: (0, 0)),
            ],
            out_specs=pl.BlockSpec((tm, N_MELS_PAD), lambda i: (i, 0)),
        ),
        compiler_params=pltpu.CompilerParams(
            dimension_semantics=("parallel",),
            vmem_limit_bytes=_vmem_limit_bytes(),
        ),
    )(frames2d, cossin, fb)

    out = out[:total_rows].reshape(B, f_pad, N_MELS_PAD)[:, :n_frames, :N_MELS]
    return jnp.transpose(out, (0, 2, 1))                           # (B, n_mels, n_frames)


if __name__ == "__main__":
    key = jax.random.PRNGKey(0)
    B = 2
    T = HOP * 7  # 3087 samples -> 8 frames
    x = jax.random.normal(key, (B, T), dtype=jnp.float32)

    y = jax.block_until_ready(ta_melspec(x))

    assert y.shape == (B, N_MELS, T // HOP + 1), y.shape
    assert bool(jnp.all(jnp.isfinite(y)))
    print("KERNEL_OK")
</pallas_src>

<mosaic_0001>
module attributes {stable_mosaic.version = 11 : i64} {
  func.func @mel_kernel(%arg0: i32, %arg1: memref<16x2048xbf16, #tpu.memory_space<vmem>>, %arg2: memref<2048x2304xbf16, #tpu.memory_space<vmem>>, %arg3: memref<1152x128xbf16, #tpu.memory_space<vmem>>, %arg4: memref<16x128xf32, #tpu.memory_space<vmem>>) attributes {dimension_semantics = [#tpu.dimension_semantics<parallel>], iteration_bounds = array<i64: 1>, scalar_prefetch = 0 : i64, scratch_operands = 0 : i64, tpu.core_type = #tpu.core_type<tc>, window_params = [{transform_indices = @transform_0, window_bounds = array<i64: 16, 2048>}, {pipeline_mode = #tpu.pipeline_mode<synchronous>, transform_indices = @transform_1, window_bounds = array<i64: 2048, 2304>}, {pipeline_mode = #tpu.pipeline_mode<synchronous>, transform_indices = @transform_2, window_bounds = array<i64: 1152, 128>}, {transform_indices = @transform_3, window_bounds = array<i64: 16, 128>}]} {
    %c0 = arith.constant 0 : index
    %c0_0 = arith.constant 0 : index
    %0 = vector.load %arg1[%c0, %c0_0] : memref<16x2048xbf16, #tpu.memory_space<vmem>>, vector<16x2048xbf16>
    %cst = arith.constant 0.000000e+00 : f32
    %1 = vector.broadcast %cst : f32 to vector<16x128xf32>
    %c0_1 = arith.constant 0 : index
    %c0_2 = arith.constant 0 : index
    %2 = vector.load %arg2[%c0_1, %c0_2] : memref<2048x2304xbf16, #tpu.memory_space<vmem>>, vector<2048x768xbf16>
    %cst_3 = arith.constant dense<0.000000e+00> : vector<16x768xf32>
    %3 = tpu.matmul %0, %2, %cst_3 {dimension_numbers = #tpu.dot_dimension_numbers<[1], [0], [0], [1], [0, 0, 1, 1], [], []>} : vector<16x2048xbf16>, vector<2048x768xbf16>, vector<16x768xf32> -> vector<16x768xf32>
    %4 = vector.extract_strided_slice %3 {offsets = [0, 0], sizes = [16, 384], strides = [1, 1]} : vector<16x768xf32> to vector<16x384xf32>
    %5 = vector.extract_strided_slice %3 {offsets = [0, 384], sizes = [16, 384], strides = [1, 1]} : vector<16x768xf32> to vector<16x384xf32>
    %6 = arith.mulf %4, %4 : vector<16x384xf32>
    %7 = arith.mulf %5, %5 : vector<16x384xf32>
    %8 = arith.addf %6, %7 : vector<16x384xf32>
    %9 = math.sqrt %8 : vector<16x384xf32>
    %10 = arith.truncf %9 : vector<16x384xf32> to vector<16x384xbf16>
    %c0_4 = arith.constant 0 : index
    %c0_5 = arith.constant 0 : index
    %11 = vector.load %arg3[%c0_4, %c0_5] : memref<1152x128xbf16, #tpu.memory_space<vmem>>, vector<384x128xbf16>
    %cst_6 = arith.constant dense<0.000000e+00> : vector<16x128xf32>
    %12 = tpu.matmul %10, %11, %cst_6 {dimension_numbers = #tpu.dot_dimension_numbers<[1], [0], [0], [1], [0, 0, 1, 1], [], []>} : vector<16x384xbf16>, vector<384x128xbf16>, vector<16x128xf32> -> vector<16x128xf32>
    %13 = arith.addf %1, %12 : vector<16x128xf32>
    %c0_7 = arith.constant 0 : index
    %c768 = arith.constant 768 : index
    %14 = vector.load %arg2[%c0_7, %c768] : memref<2048x2304xbf16, #tpu.memory_space<vmem>>, vector<2048x768xbf16>
    %cst_8 = arith.constant dense<0.000000e+00> : vector<16x768xf32>
    %15 = tpu.matmul %0, %14, %cst_8 {dimension_numbers = #tpu.dot_dimension_numbers<[1], [0], [0], [1], [0, 0, 1, 1], [], []>} : vector<16x2048xbf16>, vector<2048x768xbf16>, vector<16x768xf32> -> vector<16x768xf32>
    %16 = vector.extract_strided_slice %15 {offsets = [0, 0], sizes = [16, 384], strides = [1, 1]} : vector<16x768xf32> to vector<16x384xf32>
    %17 = vector.extract_strided_slice %15 {offsets = [0, 384], sizes = [16, 384], strides = [1, 1]} : vector<16x768xf32> to vector<16x384xf32>
    %18 = arith.mulf %16, %16 : vector<16x384xf32>
    %19 = arith.mulf %17, %17 : vector<16x384xf32>
    %20 = arith.addf %18, %19 : vector<16x384xf32>
    %21 = math.sqrt %20 : vector<16x384xf32>
    %22 = arith.truncf %21 : vector<16x384xf32> to vector<16x384xbf16>
    %c384 = arith.constant 384 : index
    %c0_9 = arith.constant 0 : index
    %23 = vector.load %arg3[%c384, %c0_9] : memref<1152x128xbf16, #tpu.memory_space<vmem>>, vector<384x128xbf16>
    %cst_10 = arith.constant dense<0.000000e+00> : vector<16x128xf32>
    %24 = tpu.matmul %22, %23, %cst_10 {dimension_numbers = #tpu.dot_dimension_numbers<[1], [0], [0], [1], [0, 0, 1, 1], [], []>} : vector<16x384xbf16>, vector<384x128xbf16>, vector<16x128xf32> -> vector<16x128xf32>
    %25 = arith.addf %13, %24 : vector<16x128xf32>
    %c0_11 = arith.constant 0 : index
    %c1536 = arith.constant 1536 : index
    %26 = vector.load %arg2[%c0_11, %c1536] : memref<2048x2304xbf16, #tpu.memory_space<vmem>>, vector<2048x768xbf16>
    %cst_12 = arith.constant dense<0.000000e+00> : vector<16x768xf32>
    %27 = tpu.matmul %0, %26, %cst_12 {dimension_numbers = #tpu.dot_dimension_numbers<[1], [0], [0], [1], [0, 0, 1, 1], [], []>} : vector<16x2048xbf16>, vector<2048x768xbf16>, vector<16x768xf32> -> vector<16x768xf32>
    %28 = vector.extract_strided_slice %27 {offsets = [0, 0], sizes = [16, 384], strides = [1, 1]} : vector<16x768xf32> to vector<16x384xf32>
    %29 = vector.extract_strided_slice %27 {offsets = [0, 384], sizes = [16, 384], strides = [1, 1]} : vector<16x768xf32> to vector<16x384xf32>
    %30 = arith.mulf %28, %28 : vector<16x384xf32>
    %31 = arith.mulf %29, %29 : vector<16x384xf32>
    %32 = arith.addf %30, %31 : vector<16x384xf32>
    %33 = math.sqrt %32 : vector<16x384xf32>
    %34 = arith.truncf %33 : vector<16x384xf32> to vector<16x384xbf16>
    %c768_13 = arith.constant 768 : index
    %c0_14 = arith.constant 0 : index
    %35 = vector.load %arg3[%c768_13, %c0_14] : memref<1152x128xbf16, #tpu.memory_space<vmem>>, vector<384x128xbf16>
    %cst_15 = arith.constant dense<0.000000e+00> : vector<16x128xf32>
    %36 = tpu.matmul %34, %35, %cst_15 {dimension_numbers = #tpu.dot_dimension_numbers<[1], [0], [0], [1], [0, 0, 1, 1], [], []>} : vector<16x384xbf16>, vector<384x128xbf16>, vector<16x128xf32> -> vector<16x128xf32>
    %37 = arith.addf %25, %36 : vector<16x128xf32>
    %cst_16 = arith.constant 9.99999993E-9 : f32
    %38 = vector.broadcast %cst_16 : f32 to vector<16x128xf32>
    %39 = arith.addf %37, %38 : vector<16x128xf32>
    %40 = math.log %39 : vector<16x128xf32>
    %c0_17 = arith.constant 0 : index
    %c0_18 = arith.constant 0 : index
    %41 = vector.load %arg4[%c0_17, %c0_18] : memref<16x128xf32, #tpu.memory_space<vmem>>, vector<16x128xf32>
    tpu.vector_store %arg4[%c0_17, %c0_18], %40 {strides = array<i32>} : memref<16x128xf32, #tpu.memory_space<vmem>>, vector<16x128xf32>,
    return
  }
  func.func @transform_0(%arg0: i32) -> (i32, i32) {
    %c0_i32 = arith.constant 0 : i32
    %c0_i32_0 = arith.constant 0 : i32
    return %arg0, %c0_i32 : i32, i32
  }
  func.func @transform_1(%arg0: i32) -> (i32, i32) {
    %c0_i32 = arith.constant 0 : i32
    %c0_i32_0 = arith.constant 0 : i32
    %c0_i32_1 = arith.constant 0 : i32
    return %c0_i32, %c0_i32_0 : i32, i32
  }
  func.func @transform_2(%arg0: i32) -> (i32, i32) {
    %c0_i32 = arith.constant 0 : i32
    %c0_i32_0 = arith.constant 0 : i32
    %c0_i32_1 = arith.constant 0 : i32
    return %c0_i32, %c0_i32_0 : i32, i32
  }
  func.func @transform_3(%arg0: i32) -> (i32, i32) {
    %c0_i32 = arith.constant 0 : i32
    %c0_i32_0 = arith.constant 0 : i32
    return %arg0, %c0_i32 : i32, i32
  }
}

</mosaic_0001>

<bundles_post_ra>
// kernel: tpu_custom_call.1
= control target key start
LH: loop header
LB: loop body
LE: loop exit
PB: predicated region body
PF: predicated region fallthrough
CT: control target
= control target key end

     0   :  { %8 = vsyncpa [#allocation3], 0  ;;  %s25103_s0 = inlined_call_operand.hbm [shape: bf16[16,2048], index: 0, kind: input, shape index: {}]   ;;  %s25104_s1 = inlined_call_operand.hbm [shape: bf16[2048,2304], index: 1, kind: input, shape index: {}]   ;;  %s25105_s2 = inlined_call_operand.hbm [shape: bf16[1152,128], index: 2, kind: input, shape index: {}]   ;;  %s25106_s3 = inlined_call_operand.hbm [shape: f32[16,128], index: 3, kind: output, shape index: {}]  }
   0x1   :  { %9 = vsyncpa [#allocation6], 0 }
   0x2   :  { %10 = vsyncpa [#allocation4], 0  ;;  %s24324_s12 = smov [#allocation5]  }
   0x3   :  { %s28_s13 = sshll.u32 %s24324_s12, 4  ;;  %s29_s13 = int_to_ptr.vmem [resolvable:$true] %s28_s13 }
   0x4   :  { %s24246_s14 = scalar_lea.vmem %s29_s13, 294912  ;;  %p24251_p1 = scmp.lt.s32.totalorder %s29_s13, %s29_s13 }
   0x5   :  { %p24247_p0 = scmp.ne.s32.totalorder %s29_s13, %s24246_s14  ;;  %p24252_p2 = scmp.lt.s32.totalorder %s24246_s14, %s24246_s14 }
   0x7   :  { %p24253_p3 = por %p24252_p2, %p24251_p1 }
   0x9   :  { %p24254_p4 = pnand %p24253_p3, %p24247_p0 }
   0xb   :  { %24257 = shalt.err (!%p24254_p4)
}
   0xc   :  { %s24325_s15 = smov 1152   ;;  %s24326_s16 = smov 72  }
   0xd   :  { %34 = dma.hbm_to_vmem [thread:$0]  %s25104_s1, 294912, %s29_s13, [#allocation6], %s24325_s15, %s24325_s15, %s24326_s16  }
   0xe   :  { %s24327_s19 = smov [#allocation2]  }
   0xf   :  { %s16_s20 = sshll.u32 %s24327_s19, 4  ;;  %s17_s20 = int_to_ptr.vmem [resolvable:$true] %s16_s20 }
  0x10   :  { %s24266_s21 = scalar_lea.vmem %s17_s20, 2048  ;;  %p24271_p6 = scmp.lt.s32.totalorder %s17_s20, %s17_s20 }
  0x11   :  { %p24267_p5 = scmp.ne.s32.totalorder %s17_s20, %s24266_s21  ;;  %p24272_p7 = scmp.lt.s32.totalorder %s24266_s21, %s24266_s21 }
  0x13   :  { %p24273_p8 = por %p24272_p7, %p24271_p6 }
  0x15   :  { %p24274_p9 = pnand %p24273_p8, %p24267_p5 }
  0x17   :  { %24277 = shalt.err (!%p24274_p9)
}
  0x18   :  { %s24328_s22 = smov 1024   ;;  %s24329_s23 = smov 64  }
  0x19   :  { %22 = dma.hbm_to_vmem [thread:$0]  %s25103_s0, 2048, %s17_s20, [#allocation3], %s24328_s22, %s24328_s22, %s24329_s23  }
  0x1a   :  { %s24330_s26 = smov [#allocation7]  }
  0x1b   :  { %s40_s27 = sshll.u32 %s24330_s26, 4  ;;  %s41_s27 = int_to_ptr.vmem [resolvable:$true] %s40_s27 }
  0x1c   :  { %s24286_s1 = scalar_lea.vmem %s41_s27, 9216  ;;  %p24291_p11 = scmp.lt.s32.totalorder %s41_s27, %s41_s27 }
  0x1d   :  { %p24287_p10 = scmp.ne.s32.totalorder %s41_s27, %s24286_s1  ;;  %p24292_p12 = scmp.lt.s32.totalorder %s24286_s1, %s24286_s1 }
  0x1f   :  { %p24293_p13 = por %p24292_p12, %p24291_p11 }
  0x21   :  { %p24294_p0 = pnand %p24293_p13, %p24287_p10 }
  0x23   :  { %24297 = shalt.err (!%p24294_p0)
}
  0x24   :  { %s24331_s28 = smov 4  }
  0x25   :  { %46 = dma.hbm_to_vmem [thread:$0]  %s25105_s2, 9216, %s41_s27, [#allocation6], %s24329_s23, %s24329_s23, %s24331_s28  }
  0x26   :  { %24318 = dma.done.wait [#allocation3], 2048  }
  0x27   :  { %24319 = vsyncadd [#allocation3], 4294965248 }
  0x28   :  { %24320 = dma.done.wait [#allocation6], 304128  }
  0x29   :  { %24321 = vsyncadd [#allocation6], 4294663168  ;;  %v20670_v0 = vld [vmem:[#allocation5 + $0x3f4] ss:$72 sps:$4 sm:$0xff]   ;;  %v20674_v2 = vld [vmem:[#allocation5 + $0x3f0] ss:$72 sps:$4 sm:$0xff]  }
  0x2a   :  { %v20672_v1 = vld [vmem:[#allocation5 + $0xcf4] ss:$72 sps:$4 sm:$0xff]   ;;  %4761 = vmatprep.subr.bf16.mxu0 %v20670_v0  ;;  %v20675_v3 = vld [vmem:[#allocation5 + $0xcf0] ss:$72 sps:$4 sm:$0xff]   ;;  %v20676_v4 = vld [vmem:[#allocation5 + $0x364] ss:$72 sps:$4 sm:$0xff]  }
  0x2b   :  { %4804 = vmatprep.subr.bf16.mxu1 %v20672_v1  ;;  %4762 = vmatpush1.bf16.msra.mxu0 %v20674_v2  ;;  %v20678_v5 = vld [vmem:[#allocation5 + $0xc64] ss:$72 sps:$4 sm:$0xff]   ;;  %v20680_v6 = vld [vmem:[#allocation5 + $0x360] ss:$72 sps:$4 sm:$0xff]   ;;  %v20682_v8 = vld [vmem:[#allocation5 + $0x2d4] ss:$72 sps:$4 sm:$0xff]  }
  0x2c   :  { %4805 = vmatpush1.bf16.msra.mxu1 %v20675_v3  ;;  %4763 = vmatprep.subr.bf16.mxu0 %v20676_v4  ;;  %v20681_v7 = vld [vmem:[#allocation5 + $0xc60] ss:$72 sps:$4 sm:$0xff]   ;;  %v20684_v9 = vld [vmem:[#allocation5 + $0xbd4] ss:$72 sps:$4 sm:$0xff]   ;;  %v20686_v10 = vld [vmem:[#allocation5 + $0x2d0] ss:$72 sps:$4 sm:$0xff]  }
  0x2d   :  { %4806 = vmatprep.subr.bf16.mxu1 %v20678_v5  ;;  %v20687_v11 = vld [vmem:[#allocation5 + $0xbd0] ss:$72 sps:$4 sm:$0xff]   ;;  %v20688_v12 = vld [vmem:[#allocation5 + $0x244] ss:$72 sps:$4 sm:$0xff]   ;;  %v20692_v14 = vld [vmem:[#allocation5 + $0x240] ss:$72 sps:$4 sm:$0xff]  }
  0x2e   :  { %v20690_v13 = vld [vmem:[#allocation5 + $0xb44] ss:$72 sps:$4 sm:$0xff]   ;;  %v20693_v15 = vld [vmem:[#allocation5 + $0xb40] ss:$72 sps:$4 sm:$0xff]   ;;  %v20694_v16 = vld [vmem:[#allocation5 + $0x1b4] ss:$72 sps:$4 sm:$0xff]  }
  0x2f   :  { %4764 = vmatpush1.bf16.msra.mxu0 %v20680_v6  ;;  %v20696_v17 = vld [vmem:[#allocation5 + $0xab4] ss:$72 sps:$4 sm:$0xff]   ;;  %v20698_v18 = vld [vmem:[#allocation5 + $0x1b0] ss:$72 sps:$4 sm:$0xff]   ;;  %v20700_v20 = vld [vmem:[#allocation5 + $0x124] ss:$72 sps:$4 sm:$0xff]  }
  0x30   :  { %4807 = vmatpush1.bf16.msra.mxu1 %v20681_v7  ;;  %4765 = vmatprep.subr.bf16.mxu0 %v20682_v8  ;;  %v20699_v19 = vld [vmem:[#allocation5 + $0xab0] ss:$72 sps:$4 sm:$0xff]   ;;  %v20702_v21 = vld [vmem:[#allocation5 + $0xa24] ss:$72 sps:$4 sm:$0xff]   ;;  %v20704_v22 = vld [vmem:[#allocation5 + $0x120] ss:$72 sps:$4 sm:$0xff]  }
  0x31   :  { %4808 = vmatprep.subr.bf16.mxu1 %v20684_v9  ;;  %v20705_v23 = vld [vmem:[#allocation5 + $0xa20] ss:$72 sps:$4 sm:$0xff]   ;;  %v20706_v24 = vld [vmem:[#allocation5 + $0x94] ss:$72 sps:$4 sm:$0xff]   ;;  %v20710_v26 = vld [vmem:[#allocation5 + $0x90] ss:$72 sps:$4 sm:$0xff]  }
  0x32   :  { %v20708_v25 = vld [vmem:[#allocation5 + $0x994] ss:$72 sps:$4 sm:$0xff]   ;;  %v20711_v27 = vld [vmem:[#allocation5 + $0x990] ss:$72 sps:$4 sm:$0xff]   ;;  %v20712_v28 = vld [vmem:[#allocation5 + $0x4] ss:$72 sps:$4 sm:$0xff]  }
  0x33   :  { %4766 = vmatpush1.bf16.msra.mxu0 %v20686_v10  ;;  %v20714_v29 = vld [vmem:[#allocation5 + $0x904] ss:$72 sps:$4 sm:$0xff]   ;;  %v20716_v30 = vld [vmem:[#allocation5] ss:$72 sps:$4 sm:$0xff]   ;;  %v20718_v32 = vld [vmem:[#allocation5 + $0x874] ss:$72 sps:$4 sm:$0xff]  }
  0x34   :  { %4809 = vmatpush1.bf16.msra.mxu1 %v20687_v11  ;;  %4767 = vmatprep.subr.bf16.mxu0 %v20688_v12  ;;  %v20717_v31 = vld [vmem:[#allocation5 + $0x900] ss:$72 sps:$4 sm:$0xff]   ;;  %v20720_v33 = vld [vmem:[#allocation5 + $0x1174] ss:$72 sps:$4 sm:$0xff]   ;;  %v20722_v34 = vld [vmem:[#allocation5 + $0x870] ss:$72 sps:$4 sm:$0xff]  }
  0x35   :  { %4810 = vmatprep.subr.bf16.mxu1 %v20690_v13  ;;  %v20723_v35 = vld [vmem:[#allocation5 + $0x1170] ss:$72 sps:$4 sm:$0xff]   ;;  %v20724_v36 = vld [vmem:[#allocation5 + $0x7e4] ss:$72 sps:$4 sm:$0xff]   ;;  %v20728_v38 = vld [vmem:[#allocation5 + $0x7e0] ss:$72 sps:$4 sm:$0xff]  }
  0x36   :  { %v20726_v37 = vld [vmem:[#allocation5 + $0x10e4] ss:$72 sps:$4 sm:$0xff]   ;;  %v20729_v39 = vld [vmem:[#allocation5 + $0x10e0] ss:$72 sps:$4 sm:$0xff]   ;;  %v20730_v40 = vld [vmem:[#allocation5 + $0x754] ss:$72 sps:$4 sm:$0xff]  }
  0x37   :  { %4768 = vmatpush1.bf16.msra.mxu0 %v20692_v14  ;;  %v20732_v41 = vld [vmem:[#allocation5 + $0x1054] ss:$72 sps:$4 sm:$0xff]   ;;  %v20734_v42 = vld [vmem:[#allocation5 + $0x750] ss:$72 sps:$4 sm:$0xff]   ;;  %v20736_v44 = vld [vmem:[#allocation5 + $0x6c4] ss:$72 sps:$4 sm:$0xff]  }
  0x38   :  { %4811 = vmatpush1.bf16.msra.mxu1 %v20693_v15  ;;  %4769 = vmatprep.subr.bf16.mxu0 %v20694_v16  ;;  %v20735_v43 = vld [vmem:[#allocation5 + $0x1050] ss:$72 sps:$4 sm:$0xff]   ;;  %v20738_v45 = vld [vmem:[#allocation5 + $0xfc4] ss:$72 sps:$4 sm:$0xff]   ;;  %v20740_v46 = vld [vmem:[#allocation5 + $0x6c0] ss:$72 sps:$4 sm:$0xff]  }
  0x39   :  { %4812 = vmatprep.subr.bf16.mxu1 %v20696_v17  ;;  %v20741_v47 = vld [vmem:[#allocation5 + $0xfc0] ss:$72 sps:$4 sm:$0xff]   ;;  %v20742_v52 = vld [vmem:[#allocation5 + $0x634] ss:$72 sps:$4 sm:$0xff]   ;;  %v20746_v56 = vld [vmem:[#allocation5 + $0x630] ss:$72 sps:$4 sm:$0xff]  }
  0x3a   :  { %v57_v48 = vld [vmem:[#allocation2] sm:$0xff]  ;;  %v58_v50 = vld [vmem:[#allocation2 + $0x8] sm:$0xff]  ;;  %v20744_v55 = vld [vmem:[#allocation5 + $0xf34] ss:$72 sps:$4 sm:$0xff]   ;;  %s24334_s0 = smov [#allocation8]  }
  0x3b   :  { %4770 = vmatpush1.bf16.msra.mxu0 %v20698_v18  ;;  %v65_v49 = vld [vmem:[#allocation2 + $0x40] sm:$0xff]  ;;  %v66_v51 = vld [vmem:[#allocation2 + $0x48] sm:$0xff]  ;;  %v20747_v57 = vld [vmem:[#allocation5 + $0xf30] ss:$72 sps:$4 sm:$0xff]   ;;  %s18099_s2 = sshll.u32 %s24334_s0, 4  ;;  %s18100_s2 = int_to_ptr.vmem [resolvable:$true] %s18099_s2 }
  0x3c   :  { %4813 = vmatpush1.bf16.msra.mxu1 %v20699_v19  ;;  %4771 = vmatprep.subr.bf16.mxu0 %v20700_v20  ;;  %v24366_v53 = vcombine.high %v57_v48, %v65_v49  ;;  %v24368_v54 = vcombine.high %v58_v50, %v66_v51  ;;  %v20748_v58 = vld [vmem:[#allocation5 + $0x5a4] ss:$72 sps:$4 sm:$0xff]   ;;  %v20752_v60 = vld [vmem:[#allocation5 + $0x5a0] ss:$72 sps:$4 sm:$0xff]   ;;  %v20754_v62 = vld [vmem:[#allocation5 + $0x514] ss:$72 sps:$4 sm:$0xff]   ;;  %v24372_v8 = vcombine.low %v57_v48, %v65_v49  ;;  %p24303_p2 = scmp.lt.s32.totalorder %s18100_s2, %s18100_s2 }
  0x3d   :  { %4814 = vmatprep.subr.bf16.mxu1 %v20702_v21  ;;  %v20750_v59 = vld [vmem:[#allocation5 + $0xea4] ss:$72 sps:$4 sm:$0xff]   ;;  %v20753_v61 = vld [vmem:[#allocation5 + $0xea0] ss:$72 sps:$4 sm:$0xff]   ;;  %v20756_v63 = vld [vmem:[#allocation5 + $0xe14] ss:$72 sps:$4 sm:$0xff]   ;;  %v24374_v9 = vcombine.low %v58_v50, %v66_v51 }
  0x3e   :  { %4793 = vmatprep.mubr.bf16.mxu0 %v24366_v53  ;;  %4836 = vmatprep.mubr.bf16.mxu1 %v24368_v54  ;;  %v20758_v0 = vld [vmem:[#allocation5 + $0x510] ss:$72 sps:$4 sm:$0xff]   ;;  %v20760_v2 = vld [vmem:[#allocation5 + $0x484] ss:$72 sps:$4 sm:$0xff]   ;;  %v20764_v4 = vld [vmem:[#allocation5 + $0x480] ss:$72 sps:$4 sm:$0xff]  }
  0x3f   :  { %4772 = vmatpush1.bf16.msra.mxu0 %v20704_v22  ;;  %v20759_v1 = vld [vmem:[#allocation5 + $0xe10] ss:$72 sps:$4 sm:$0xff]   ;;  %v20762_v3 = vld [vmem:[#allocation5 + $0xd84] ss:$72 sps:$4 sm:$0xff]   ;;  %v20765_v5 = vld [vmem:[#allocation5 + $0xd80] ss:$72 sps:$4 sm:$0xff]  }
  0x40   :  { %4815 = vmatpush1.bf16.msra.mxu1 %v20705_v23  ;;  %4773 = vmatprep.subr.bf16.mxu0 %v20706_v24  ;;  %v20768_v6 = vld [vmem:[#allocation5 + $0x15f4] ss:$72 sps:$4 sm:$0xff]   ;;  %v20766_v10 = vld [vmem:[#allocation5 + $0x15f0] ss:$72 sps:$4 sm:$0xff]   ;;  %v20774_v12 = vld [vmem:[#allocation5 + $0x1564] ss:$72 sps:$4 sm:$0xff]  }
  0x41   :  { %4816 = vmatprep.subr.bf16.mxu1 %v20708_v25  ;;  %v20771_v7 = vld [vmem:[#allocation5 + $0x1ef4] ss:$72 sps:$4 sm:$0xff]   ;;  %v20769_v11 = vld [vmem:[#allocation5 + $0x1ef0] ss:$72 sps:$4 sm:$0xff]   ;;  %v20777_v13 = vld [vmem:[#allocation5 + $0x1e64] ss:$72 sps:$4 sm:$0xff]  }
  0x42   :  { %v20772_v14 = vld [vmem:[#allocation5 + $0x1560] ss:$72 sps:$4 sm:$0xff]   ;;  %v20780_v16 = vld [vmem:[#allocation5 + $0x14d4] ss:$72 sps:$4 sm:$0xff]   ;;  %v20778_v18 = vld [vmem:[#allocation5 + $0x14d0] ss:$72 sps:$4 sm:$0xff]  }
  0x43   :  { %4774 = vmatpush1.bf16.msra.mxu0 %v20710_v26  ;;  %v20775_v15 = vld [vmem:[#allocation5 + $0x1e60] ss:$72 sps:$4 sm:$0xff]   ;;  %v20783_v17 = vld [vmem:[#allocation5 + $0x1dd4] ss:$72 sps:$4 sm:$0xff]   ;;  %v20781_v19 = vld [vmem:[#allocation5 + $0x1dd0] ss:$72 sps:$4 sm:$0xff]  }
  0x44   :  { %4817 = vmatpush1.bf16.msra.mxu1 %v20711_v27  ;;  %4775 = vmatprep.subr.bf16.mxu0 %v20712_v28  ;;  %v20786_v20 = vld [vmem:[#allocation5 + $0x1444] ss:$72 sps:$4 sm:$0xff]   ;;  %v20784_v22 = vld [vmem:[#allocation5 + $0x1440] ss:$72 sps:$4 sm:$0xff]   ;;  %v20792_v24 = vld [vmem:[#allocation5 + $0x13b4] ss:$72 sps:$4 sm:$0xff]  }
  0x45   :  { %4818 = vmatprep.subr.bf16.mxu1 %v20714_v29  ;;  %v20789_v21 = vld [vmem:[#allocation5 + $0x1d44] ss:$72 sps:$4 sm:$0xff]   ;;  %v20787_v23 = vld [vmem:[#allocation5 + $0x1d40] ss:$72 sps:$4 sm:$0xff]   ;;  %v20795_v25 = vld [vmem:[#allocation5 + $0x1cb4] ss:$72 sps:$4 sm:$0xff]  }
  0x46   :  { %v20790_v26 = vld [vmem:[#allocation5 + $0x13b0] ss:$72 sps:$4 sm:$0xff]   ;;  %v20798_v28 = vld [vmem:[#allocation5 + $0x1324] ss:$72 sps:$4 sm:$0xff]   ;;  %s24298_s4 = scalar_lea.vmem %s18100_s2, 256 }
  0x47   :  { %4776 = vmatpush1.bf16.msra.mxu0 %v20716_v30  ;;  %v20793_v27 = vld [vmem:[#allocation5 + $0x1cb0] ss:$72 sps:$4 sm:$0xff]   ;;  %v20801_v29 = vld [vmem:[#allocation5 + $0x1c24] ss:$72 sps:$4 sm:$0xff]   ;;  %v20796_v30 = vld [vmem:[#allocation5 + $0x1320] ss:$72 sps:$4 sm:$0xff]   ;;  %p24299_p1 = scmp.ne.s32.totalorder %s18100_s2, %s24298_s4  ;;  %p24304_p3 = scmp.lt.s32.totalorder %s24298_s4, %s24298_s4 }
  0x48   :  { %4819 = vmatpush1.bf16.msra.mxu1 %v20717_v31  ;;  %4777 = vmatprep.subr.bf16.mxu0 %v20718_v32  ;;  %v20799_v31 = vld [vmem:[#allocation5 + $0x1c20] ss:$72 sps:$4 sm:$0xff]   ;;  %v20804_v32 = vld [vmem:[#allocation5 + $0x1294] ss:$72 sps:$4 sm:$0xff]   ;;  %v20814_v48 = vld [vmem:[#allocation5 + $0x1a70] ss:$72 sps:$4 sm:$0xff]  }
  0x49   :  { %4820 = vmatprep.subr.bf16.mxu1 %v20720_v33  ;;  %v20807_v33 = vld [vmem:[#allocation5 + $0x1b94] ss:$72 sps:$4 sm:$0xff]   ;;  %v20817_v49 = vld [vmem:[#allocation5 + $0x2370] ss:$72 sps:$4 sm:$0xff]   ;;  %v20822_v50 = vld [vmem:[#allocation5 + $0x19e4] ss:$72 sps:$4 sm:$0xff]   ;;  %p24305_p4 = por %p24304_p3, %p24303_p2 }
  0x4a   :  { %v20825_v51 = vld [vmem:[#allocation5 + $0x22e4] ss:$72 sps:$4 sm:$0xff]  }
  0x4b   :  { %4778 = vmatpush2.bf16.msra.mxu0 %v20722_v34  ;;  %v20802_v34 = vld [vmem:[#allocation5 + $0x1290] ss:$72 sps:$4 sm:$0xff]   ;;  %p24306_p5 = pnand %p24305_p4, %p24299_p1 }
  0x4c   :  { %4821 = vmatpush2.bf16.msra.mxu1 %v20723_v35  ;;  %4779 = vmatprep.subr.bf16.mxu0 %v20724_v36  ;;  %v20805_v35 = vld [vmem:[#allocation5 + $0x1b90] ss:$72 sps:$4 sm:$0xff]  }
  0x4d   :  { %4822 = vmatprep.subr.bf16.mxu1 %v20726_v37  ;;  %v24378_v36 = vld [vmem:[#allocation2 + $0x10] sm:$0xff] }
  0x4e   :  { %v24380_v37 = vld [vmem:[#allocation2 + $0x50] sm:$0xff] }
  0x4f   :  { %4780 = vmatpush2.bf16.msra.mxu0 %v20728_v38  ;;  %v24382_v38 = vld [vmem:[#allocation2 + $0x18] sm:$0xff] }
  0x50   :  { %4823 = vmatpush2.bf16.msra.mxu1 %v20729_v39  ;;  %4781 = vmatprep.subr.bf16.mxu0 %v20730_v40  ;;  %v24384_v39 = vld [vmem:[#allocation2 + $0x58] sm:$0xff]  ;;  %v20810_v40 = vld [vmem:[#allocation5 + $0x1204] ss:$72 sps:$4 sm:$0xff]  }
  0x51   :  { %4824 = vmatprep.subr.bf16.mxu1 %v20732_v41  ;;  %v24388_v41 = vcombine.high %v24378_v36, %v24380_v37 }
  0x53   :  { %4782 = vmatpush2.bf16.msra.mxu0 %v20734_v42  ;;  %v24392_v42 = vcombine.high %v24382_v38, %v24384_v39 }
  0x54   :  { %4825 = vmatpush2.bf16.msra.mxu1 %v20735_v43  ;;  %4783 = vmatprep.subr.bf16.mxu0 %v20736_v44  ;;  %v20813_v43 = vld [vmem:[#allocation5 + $0x1b04] ss:$72 sps:$4 sm:$0xff]   ;;  %v20808_v44 = vld [vmem:[#allocation5 + $0x1200] ss:$72 sps:$4 sm:$0xff]  }
  0x55   :  { %4826 = vmatprep.subr.bf16.mxu1 %v20738_v45  ;;  %25131 = vst [vmem:[#allocation12_spill] sm:$0xff] %v24392_v42  ;;  %v20811_v45 = vld [vmem:[#allocation5 + $0x1b00] ss:$72 sps:$4 sm:$0xff]  }
  0x57   :  { %4784 = vmatpush2.bf16.msra.mxu0 %v20740_v46  ;;  %v20816_v46 = vld [vmem:[#allocation5 + $0x1a74] ss:$72 sps:$4 sm:$0xff]  }
  0x58   :  { %4827 = vmatpush2.bf16.msra.mxu1 %v20741_v47  ;;  %4785 = vmatprep.subr.bf16.mxu0 %v20742_v52  ;;  %v20819_v47 = vld [vmem:[#allocation5 + $0x2374] ss:$72 sps:$4 sm:$0xff]   ;;  %v20820_v52 = vld [vmem:[#allocation5 + $0x19e0] ss:$72 sps:$4 sm:$0xff]  }
  0x59   :  { %4828 = vmatprep.subr.bf16.mxu1 %v20744_v55  ;;  %v20823_v55 = vld [vmem:[#allocation5 + $0x22e0] ss:$72 sps:$4 sm:$0xff]  }
  0x5b   :  { %4786 = vmatpush2.bf16.msra.mxu0 %v20746_v56  ;;  %v20828_v56 = vld [vmem:[#allocation5 + $0x1954] ss:$72 sps:$4 sm:$0xff]  }
  0x5c   :  { %4829 = vmatpush2.bf16.msra.mxu1 %v20747_v57  ;;  %4787 = vmatprep.subr.bf16.mxu0 %v20748_v58  ;;  %v20831_v57 = vld [vmem:[#allocation5 + $0x2254] ss:$72 sps:$4 sm:$0xff]   ;;  %v20826_v58 = vld [vmem:[#allocation5 + $0x1950] ss:$72 sps:$4 sm:$0xff]  }
  0x5d   :  { %4830 = vmatprep.subr.bf16.mxu1 %v20750_v59  ;;  %v20829_v59 = vld [vmem:[#allocation5 + $0x2250] ss:$72 sps:$4 sm:$0xff]  }
  0x5f   :  { %4788 = vmatpush2.bf16.msra.mxu0 %v20752_v60  ;;  %v20834_v60 = vld [vmem:[#allocation5 + $0x18c4] ss:$72 sps:$4 sm:$0xff]  }
  0x60   :  { %4831 = vmatpush2.bf16.msra.mxu1 %v20753_v61  ;;  %4789 = vmatprep.subr.bf16.mxu0 %v20754_v62  ;;  %v20837_v61 = vld [vmem:[#allocation5 + $0x21c4] ss:$72 sps:$4 sm:$0xff]   ;;  %v20832_v62 = vld [vmem:[#allocation5 + $0x18c0] ss:$72 sps:$4 sm:$0xff]  }
  0x61   :  { %4832 = vmatprep.subr.bf16.mxu1 %v20756_v63  ;;  %v20835_v63 = vld [vmem:[#allocation5 + $0x21c0] ss:$72 sps:$4 sm:$0xff]  }
  0x63   :  { %4790 = vmatpush2.bf16.msra.mxu0 %v20758_v0  ;;  %v20840_v0 = vld [vmem:[#allocation5 + $0x1834] ss:$72 sps:$4 sm:$0xff]  }
  0x64   :  { %4833 = vmatpush2.bf16.msra.mxu1 %v20759_v1  ;;  %4791 = vmatprep.subr.bf16.mxu0 %v20760_v2  ;;  %v20843_v1 = vld [vmem:[#allocation5 + $0x2134] ss:$72 sps:$4 sm:$0xff]   ;;  %v20838_v2 = vld [vmem:[#allocation5 + $0x1830] ss:$72 sps:$4 sm:$0xff]  }
  0x65   :  { %4834 = vmatprep.subr.bf16.mxu1 %v20762_v3  ;;  %v20841_v3 = vld [vmem:[#allocation5 + $0x2130] ss:$72 sps:$4 sm:$0xff]  }
  0x67   :  { %4792 = vmatpush2.bf16.msra.mxu0 %v20764_v4  ;;  %v20846_v4 = vld [vmem:[#allocation5 + $0x17a4] ss:$72 sps:$4 sm:$0xff]  }
  0x68   :  { %4835 = vmatpush2.bf16.msra.mxu1 %v20765_v5  ;;  %4847 = vmatprep.subr.bf16.mxu0 %v20768_v6  ;;  %v20849_v5 = vld [vmem:[#allocation5 + $0x20a4] ss:$72 sps:$4 sm:$0xff]   ;;  %v20844_v6 = vld [vmem:[#allocation5 + $0x17a0] ss:$72 sps:$4 sm:$0xff]  }
  0x69   :  { %4890 = vmatprep.subr.bf16.mxu1 %v20771_v7  ;;  %v20847_v7 = vld [vmem:[#allocation5 + $0x20a0] ss:$72 sps:$4 sm:$0xff]  }
  0x6a   :  { %4794 = vmatmul.mubr.bf16.vlgmr.msra.gmra.mxu0 %v24372_v8 }
  0x6b   :  { %4837 = vmatmul.mubr.bf16.vlgmr.msra.gmra.mxu1 %v24374_v9  ;;  %4848 = vmatpush1.bf16.msra.mxu0 %v20766_v10  ;;  %v20852_v10 = vld [vmem:[#allocation5 + $0x1714] ss:$72 sps:$4 sm:$0xff]  }
  0x6c   :  { %4891 = vmatpush1.bf16.msra.mxu1 %v20769_v11  ;;  %4849 = vmatprep.subr.bf16.mxu0 %v20774_v12  ;;  %v20855_v11 = vld [vmem:[#allocation5 + $0x2014] ss:$72 sps:$4 sm:$0xff]   ;;  %v20850_v12 = vld [vmem:[#allocation5 + $0x1710] ss:$72 sps:$4 sm:$0xff]  }
  0x6d   :  { %4892 = vmatprep.subr.bf16.mxu1 %v20777_v13  ;;  %4879 = vmatprep.mubr.bf16.mxu0 %v24388_v41  ;;  %v20853_v13 = vld [vmem:[#allocation5 + $0x2010] ss:$72 sps:$4 sm:$0xff]  }
  0x6e   :  { %4922 = vmatprep.mubr.bf16.mxu1 %v24392_v42 }
  0x6f   :  { %4850 = vmatpush1.bf16.msra.mxu0 %v20772_v14  ;;  %v20858_v14 = vld [vmem:[#allocation5 + $0x1684] ss:$72 sps:$4 sm:$0xff]  }
  0x70   :  { %4893 = vmatpush1.bf16.msra.mxu1 %v20775_v15  ;;  %4851 = vmatprep.subr.bf16.mxu0 %v20780_v16  ;;  %v20861_v15 = vld [vmem:[#allocation5 + $0x1f84] ss:$72 sps:$4 sm:$0xff]   ;;  %v20856_v16 = vld [vmem:[#allocation5 + $0x1680] ss:$72 sps:$4 sm:$0xff]  }
  0x71   :  { %4894 = vmatprep.subr.bf16.mxu1 %v20783_v17  ;;  %v20859_v17 = vld [vmem:[#allocation5 + $0x1f80] ss:$72 sps:$4 sm:$0xff]  }
  0x73   :  { %4852 = vmatpush1.bf16.msra.mxu0 %v20778_v18  ;;  %v20864_v18 = vld [vmem:[#allocation5 + $0x27f4] ss:$72 sps:$4 sm:$0xff]  }
  0x74   :  { %4895 = vmatpush1.bf16.msra.mxu1 %v20781_v19  ;;  %4853 = vmatprep.subr.bf16.mxu0 %v20786_v20  ;;  %v20867_v19 = vld [vmem:[#allocation5 + $0x30f4] ss:$72 sps:$4 sm:$0xff]   ;;  %v24398_v20 = vcombine.low %v24378_v36, %v24380_v37  ;;  %v20874_v36 = vld [vmem:[#allocation5 + $0x26d0] ss:$72 sps:$4 sm:$0xff]  }
  0x75   :  { %4896 = vmatprep.subr.bf16.mxu1 %v20789_v21  ;;  %v24402_v21 = vcombine.low %v24382_v38, %v24384_v39  ;;  %v20877_v37 = vld [vmem:[#allocation5 + $0x2fd0] ss:$72 sps:$4 sm:$0xff]   ;;  %v20882_v38 = vld [vmem:[#allocation5 + $0x2644] ss:$72 sps:$4 sm:$0xff]  }
  0x76   :  { %25132 = vst [vmem:[#allocation13_spill] sm:$0xff] %v24398_v20  ;;  %v20885_v39 = vld [vmem:[#allocation5 + $0x2f44] ss:$72 sps:$4 sm:$0xff]  }
  0x77   :  { %4854 = vmatpush1.bf16.msra.mxu0 %v20784_v22  ;;  %25133 = vst [vmem:[#allocation14_spill] sm:$0xff] %v24402_v21  ;;  %v20862_v22 = vld [vmem:[#allocation5 + $0x27f0] ss:$72 sps:$4 sm:$0xff]  }
  0x78   :  { %4897 = vmatpush1.bf16.msra.mxu1 %v20787_v23  ;;  %4855 = vmatprep.subr.bf16.mxu0 %v20792_v24  ;;  %v20865_v23 = vld [vmem:[#allocation5 + $0x30f0] ss:$72 sps:$4 sm:$0xff]   ;;  %v20870_v24 = vld [vmem:[#allocation5 + $0x2764] ss:$72 sps:$4 sm:$0xff]  }
  0x79   :  { %4898 = vmatprep.subr.bf16.mxu1 %v20795_v25  ;;  %v20873_v25 = vld [vmem:[#allocation5 + $0x3064] ss:$72 sps:$4 sm:$0xff]  }
  0x7b   :  { %4856 = vmatpush1.bf16.msra.mxu0 %v20790_v26  ;;  %v20868_v26 = vld [vmem:[#allocation5 + $0x2760] ss:$72 sps:$4 sm:$0xff]  }
  0x7c   :  { %4899 = vmatpush1.bf16.msra.mxu1 %v20793_v27  ;;  %4857 = vmatprep.subr.bf16.mxu0 %v20798_v28  ;;  %v20871_v27 = vld [vmem:[#allocation5 + $0x3060] ss:$72 sps:$4 sm:$0xff]  }
  0x7d   :  { %4900 = vmatprep.subr.bf16.mxu1 %v20801_v29  ;;  %v24404_v28 = vld [vmem:[#allocation2 + $0x20] sm:$0xff] }
  0x7e   :  { %v24408_v29 = vld [vmem:[#allocation2 + $0x60] sm:$0xff] }
  0x7f   :  { %4858 = vmatpush1.bf16.msra.mxu0 %v20796_v30  ;;  %v24410_v30 = vld [vmem:[#allocation2 + $0x28] sm:$0xff] }
  0x80   :  { %4901 = vmatpush1.bf16.msra.mxu1 %v20799_v31  ;;  %4859 = vmatprep.subr.bf16.mxu0 %v20804_v32  ;;  %v24412_v31 = vld [vmem:[#allocation2 + $0x68] sm:$0xff]  ;;  %v20876_v32 = vld [vmem:[#allocation5 + $0x26d4] ss:$72 sps:$4 sm:$0xff]  }
  0x81   :  { %4902 = vmatprep.subr.bf16.mxu1 %v20807_v33  ;;  %v24416_v33 = vcombine.high %v24404_v28, %v24408_v29 }
  0x83   :  { %4860 = vmatpush1.bf16.msra.mxu0 %v20802_v34  ;;  %25134 = vst [vmem:[#allocation15_spill] sm:$0xff] %v24416_v33  ;;  %v24420_v34 = vcombine.high %v24410_v30, %v24412_v31 }
  0x84   :  { %4903 = vmatpush1.bf16.msra.mxu1 %v20805_v35  ;;  %4861 = vmatprep.subr.bf16.mxu0 %v20810_v40  ;;  %v20879_v35 = vld [vmem:[#allocation5 + $0x2fd4] ss:$72 sps:$4 sm:$0xff]   ;;  %v20880_v40 = vld [vmem:[#allocation5 + $0x2640] ss:$72 sps:$4 sm:$0xff]  }
  0x85   :  { %4904 = vmatprep.subr.bf16.mxu1 %v20813_v43  ;;  %25135 = vst [vmem:[#allocation16_spill] sm:$0xff] %v24420_v34  ;;  %v20883_v43 = vld [vmem:[#allocation5 + $0x2f40] ss:$72 sps:$4 sm:$0xff]  }
  0x87   :  { %4862 = vmatpush1.bf16.msra.mxu0 %v20808_v44  ;;  %v20888_v44 = vld [vmem:[#allocation5 + $0x25b4] ss:$72 sps:$4 sm:$0xff]  }
  0x88   :  { %4905 = vmatpush1.bf16.msra.mxu1 %v20811_v45  ;;  %4863 = vmatprep.subr.bf16.mxu0 %v20816_v46  ;;  %v20891_v45 = vld [vmem:[#allocation5 + $0x2eb4] ss:$72 sps:$4 sm:$0xff]   ;;  %v20886_v46 = vld [vmem:[#allocation5 + $0x25b0] ss:$72 sps:$4 sm:$0xff]  }
  0x89   :  { %4906 = vmatprep.subr.bf16.mxu1 %v20819_v47  ;;  %v20889_v47 = vld [vmem:[#allocation5 + $0x2eb0] ss:$72 sps:$4 sm:$0xff]  }
  0x8b   :  { %4864 = vmatpush2.bf16.msra.mxu0 %v20814_v48  ;;  %v20894_v48 = vld [vmem:[#allocation5 + $0x2524] ss:$72 sps:$4 sm:$0xff]  }
  0x8c   :  { %4907 = vmatpush2.bf16.msra.mxu1 %v20817_v49  ;;  %4865 = vmatprep.subr.bf16.mxu0 %v20822_v50  ;;  %v20897_v49 = vld [vmem:[#allocation5 + $0x2e24] ss:$72 sps:$4 sm:$0xff]   ;;  %v20892_v50 = vld [vmem:[#allocation5 + $0x2520] ss:$72 sps:$4 sm:$0xff]  }
  0x8d   :  { %4908 = vmatprep.subr.bf16.mxu1 %v20825_v51  ;;  %v20895_v51 = vld [vmem:[#allocation5 + $0x2e20] ss:$72 sps:$4 sm:$0xff]  }
  0x8f   :  { %4866 = vmatpush2.bf16.msra.mxu0 %v20820_v52  ;;  %v20900_v52 = vld [vmem:[#allocation5 + $0x2494] ss:$72 sps:$4 sm:$0xff]  }
  0x90   :  { %4909 = vmatpush2.bf16.msra.mxu1 %v20823_v55  ;;  %4867 = vmatprep.subr.bf16.mxu0 %v20828_v56  ;;  %v20903_v55 = vld [vmem:[#allocation5 + $0x2d94] ss:$72 sps:$4 sm:$0xff]   ;;  %v20898_v56 = vld [vmem:[#allocation5 + $0x2490] ss:$72 sps:$4 sm:$0xff]  }
  0x91   :  { %4910 = vmatprep.subr.bf16.mxu1 %v20831_v57  ;;  %v20901_v57 = vld [vmem:[#allocation5 + $0x2d90] ss:$72 sps:$4 sm:$0xff]  }
  0x93   :  { %4868 = vmatpush2.bf16.msra.mxu0 %v20826_v58  ;;  %v20906_v58 = vld [vmem:[#allocation5 + $0x2404] ss:$72 sps:$4 sm:$0xff]  }
  0x94   :  { %4911 = vmatpush2.bf16.msra.mxu1 %v20829_v59  ;;  %4869 = vmatprep.subr.bf16.mxu0 %v20834_v60  ;;  %v20909_v59 = vld [vmem:[#allocation5 + $0x2d04] ss:$72 sps:$4 sm:$0xff]   ;;  %v20904_v60 = vld [vmem:[#allocation5 + $0x2400] ss:$72 sps:$4 sm:$0xff]  }
  0x95   :  { %4912 = vmatprep.subr.bf16.mxu1 %v20837_v61  ;;  %v20907_v61 = vld [vmem:[#allocation5 + $0x2d00] ss:$72 sps:$4 sm:$0xff]  }
  0x97   :  { %4870 = vmatpush2.bf16.msra.mxu0 %v20832_v62  ;;  %v20912_v62 = vld [vmem:[#allocation5 + $0x2c74] ss:$72 sps:$4 sm:$0xff]  }
  0x98   :  { %4913 = vmatpush2.bf16.msra.mxu1 %v20835_v63  ;;  %4871 = vmatprep.subr.bf16.mxu0 %v20840_v0  ;;  %v20915_v63 = vld [vmem:[#allocation5 + $0x3574] ss:$72 sps:$4 sm:$0xff]   ;;  %v20910_v0 = vld [vmem:[#allocation5 + $0x2c70] ss:$72 sps:$4 sm:$0xff]  }
  0x99   :  { %4914 = vmatprep.subr.bf16.mxu1 %v20843_v1  ;;  %v20913_v1 = vld [vmem:[#allocation5 + $0x3570] ss:$72 sps:$4 sm:$0xff]  }
  0x9b   :  { %4872 = vmatpush2.bf16.msra.mxu0 %v20838_v2  ;;  %v20918_v2 = vld [vmem:[#allocation5 + $0x2be4] ss:$72 sps:$4 sm:$0xff]  }
  0x9c   :  { %4915 = vmatpush2.bf16.msra.mxu1 %v20841_v3  ;;  %4873 = vmatprep.subr.bf16.mxu0 %v20846_v4  ;;  %v20921_v3 = vld [vmem:[#allocation5 + $0x34e4] ss:$72 sps:$4 sm:$0xff]   ;;  %v20916_v4 = vld [vmem:[#allocation5 + $0x2be0] ss:$72 sps:$4 sm:$0xff]  }
  0x9d   :  { %4916 = vmatprep.subr.bf16.mxu1 %v20849_v5  ;;  %v20919_v5 = vld [vmem:[#allocation5 + $0x34e0] ss:$72 sps:$4 sm:$0xff]  }
  0x9f   :  { %4874 = vmatpush2.bf16.msra.mxu0 %v20844_v6  ;;  %v20924_v6 = vld [vmem:[#allocation5 + $0x2b54] ss:$72 sps:$4 sm:$0xff]  }
  0xa0   :  { %4917 = vmatpush2.bf16.msra.mxu1 %v20847_v7  ;;  %4875 = vmatprep.subr.bf16.mxu0 %v20852_v10  ;;  %v20927_v7 = vld [vmem:[#allocation5 + $0x3454] ss:$72 sps:$4 sm:$0xff]   ;;  %v20922_v10 = vld [vmem:[#allocation5 + $0x2b50] ss:$72 sps:$4 sm:$0xff]  }
  0xa1   :  { %4918 = vmatprep.subr.bf16.mxu1 %v20855_v11  ;;  %v20925_v11 = vld [vmem:[#allocation5 + $0x3450] ss:$72 sps:$4 sm:$0xff]  }
  0xa3   :  { %4876 = vmatpush2.bf16.msra.mxu0 %v20850_v12  ;;  %v20930_v12 = vld [vmem:[#allocation5 + $0x2ac4] ss:$72 sps:$4 sm:$0xff]  }
  0xa4   :  { %4919 = vmatpush2.bf16.msra.mxu1 %v20853_v13  ;;  %4877 = vmatprep.subr.bf16.mxu0 %v20858_v14  ;;  %v20933_v13 = vld [vmem:[#allocation5 + $0x33c4] ss:$72 sps:$4 sm:$0xff]   ;;  %v20928_v14 = vld [vmem:[#allocation5 + $0x2ac0] ss:$72 sps:$4 sm:$0xff]  }
  0xa5   :  { %4920 = vmatprep.subr.bf16.mxu1 %v20861_v15  ;;  %v20931_v15 = vld [vmem:[#allocation5 + $0x33c0] ss:$72 sps:$4 sm:$0xff]  }
  0xa7   :  { %4878 = vmatpush2.bf16.msra.mxu0 %v20856_v16  ;;  %v20936_v16 = vld [vmem:[#allocation5 + $0x2a34] ss:$72 sps:$4 sm:$0xff]  }
  0xa8   :  { %4921 = vmatpush2.bf16.msra.mxu1 %v20859_v17  ;;  %4933 = vmatprep.subr.bf16.mxu0 %v20864_v18  ;;  %v20939_v17 = vld [vmem:[#allocation5 + $0x3334] ss:$72 sps:$4 sm:$0xff]   ;;  %v20934_v18 = vld [vmem:[#allocation5 + $0x2a30] ss:$72 sps:$4 sm:$0xff]  }
  0xa9   :  { %4976 = vmatprep.subr.bf16.mxu1 %v20867_v19  ;;  %v20937_v19 = vld [vmem:[#allocation5 + $0x3330] ss:$72 sps:$4 sm:$0xff]  }
  0xaa   :  { %4880 = vmatmul.mubr.bf16.vlgmr.msra.gmra.mxu0 %v24398_v20 }
  0xab   :  { %4923 = vmatmul.mubr.bf16.vlgmr.msra.gmra.mxu1 %v24402_v21  ;;  %4934 = vmatpush1.bf16.msra.mxu0 %v20862_v22  ;;  %v20942_v22 = vld [vmem:[#allocation5 + $0x29a4] ss:$72 sps:$4 sm:$0xff]  }
  0xac   :  { %4977 = vmatpush1.bf16.msra.mxu1 %v20865_v23  ;;  %4935 = vmatprep.subr.bf16.mxu0 %v20870_v24  ;;  %v20945_v23 = vld [vmem:[#allocation5 + $0x32a4] ss:$72 sps:$4 sm:$0xff]   ;;  %v20940_v24 = vld [vmem:[#allocation5 + $0x29a0] ss:$72 sps:$4 sm:$0xff]  }
  0xad   :  { %4978 = vmatprep.subr.bf16.mxu1 %v20873_v25  ;;  %4965 = vmatprep.mubr.bf16.mxu0 %v24416_v33  ;;  %v20943_v25 = vld [vmem:[#allocation5 + $0x32a0] ss:$72 sps:$4 sm:$0xff]  }
  0xae   :  { %5008 = vmatprep.mubr.bf16.mxu1 %v24420_v34 }
  0xaf   :  { %4936 = vmatpush1.bf16.msra.mxu0 %v20868_v26  ;;  %v20948_v26 = vld [vmem:[#allocation5 + $0x2914] ss:$72 sps:$4 sm:$0xff]  }
  0xb0   :  { %4979 = vmatpush1.bf16.msra.mxu1 %v20871_v27  ;;  %4937 = vmatprep.subr.bf16.mxu0 %v20876_v32  ;;  %v20951_v27 = vld [vmem:[#allocation5 + $0x3214] ss:$72 sps:$4 sm:$0xff]   ;;  %v20946_v32 = vld [vmem:[#allocation5 + $0x2910] ss:$72 sps:$4 sm:$0xff]  }
  0xb1   :  { %4980 = vmatprep.subr.bf16.mxu1 %v20879_v35  ;;  %v20949_v35 = vld [vmem:[#allocation5 + $0x3210] ss:$72 sps:$4 sm:$0xff]  }
  0xb3   :  { %4938 = vmatpush1.bf16.msra.mxu0 %v20874_v36  ;;  %v20954_v36 = vld [vmem:[#allocation5 + $0x2884] ss:$72 sps:$4 sm:$0xff]  }
  0xb4   :  { %4981 = vmatpush1.bf16.msra.mxu1 %v20877_v37  ;;  %4939 = vmatprep.subr.bf16.mxu0 %v20882_v38  ;;  %v20957_v37 = vld [vmem:[#allocation5 + $0x3184] ss:$72 sps:$4 sm:$0xff]   ;;  %v20952_v38 = vld [vmem:[#allocation5 + $0x2880] ss:$72 sps:$4 sm:$0xff]  }
  0xb5   :  { %4982 = vmatprep.subr.bf16.mxu1 %v20885_v39  ;;  %v20955_v39 = vld [vmem:[#allocation5 + $0x3180] ss:$72 sps:$4 sm:$0xff]  }
  0xb7   :  { %4940 = vmatpush1.bf16.msra.mxu0 %v20880_v40  ;;  %v20960_v40 = vld [vmem:[#allocation5 + $0x39f4] ss:$72 sps:$4 sm:$0xff]  }
  0xb8   :  { %4983 = vmatpush1.bf16.msra.mxu1 %v20883_v43  ;;  %4941 = vmatprep.subr.bf16.mxu0 %v20888_v44  ;;  %v20963_v43 = vld [vmem:[#allocation5 + $0x42f4] ss:$72 sps:$4 sm:$0xff]   ;;  %v20958_v44 = vld [vmem:[#allocation5 + $0x39f0] ss:$72 sps:$4 sm:$0xff]  }
  0xb9   :  { %4984 = vmatprep.subr.bf16.mxu1 %v20891_v45  ;;  %v20961_v45 = vld [vmem:[#allocation5 + $0x42f0] ss:$72 sps:$4 sm:$0xff]  }
  0xbb   :  { %4942 = vmatpush1.bf16.msra.mxu0 %v20886_v46  ;;  %v24424_v46 = vld [vmem:[#allocation2 + $0x30] sm:$0xff] }
  0xbc   :  { %4985 = vmatpush1.bf16.msra.mxu1 %v20889_v47  ;;  %4943 = vmatprep.subr.bf16.mxu0 %v20894_v48  ;;  %v24426_v47 = vld [vmem:[#allocation2 + $0x70] sm:$0xff]  ;;  %v24430_v48 = vcombine.low %v24404_v28, %v24408_v29  ;;  %v20964_v29 = vld [vmem:[#allocation5 + $0x3960] ss:$72 sps:$4 sm:$0xff]  }
  0xbd   :  { %4986 = vmatprep.subr.bf16.mxu1 %v20897_v49  ;;  %v24434_v49 = vcombine.low %v24410_v30, %v24412_v31  ;;  %v20967_v30 = vld [vmem:[#allocation5 + $0x4260] ss:$72 sps:$4 sm:$0xff]   ;;  %v20972_v31 = vld [vmem:[#allocation5 + $0x38d4] ss:$72 sps:$4 sm:$0xff]  }
  0xbe   :  { %25136 = vst [vmem:[#allocation17_spill] sm:$0xff] %v24430_v48 }
  0xbf   :  { %4944 = vmatpush1.bf16.msra.mxu0 %v20892_v50  ;;  %25137 = vst [vmem:[#allocation18_spill] sm:$0xff] %v24434_v49  ;;  %v24436_v50 = vld [vmem:[#allocation2 + $0x38] sm:$0xff] }
  0xc0   :  { %4987 = vmatpush1.bf16.msra.mxu1 %v20895_v51  ;;  %4945 = vmatprep.subr.bf16.mxu0 %v20900_v52  ;;  %v24438_v51 = vld [vmem:[#allocation2 + $0x78] sm:$0xff]  ;;  %v20966_v52 = vld [vmem:[#allocation5 + $0x3964] ss:$72 sps:$4 sm:$0xff]  }
  0xc1   :  { %4988 = vmatprep.subr.bf16.mxu1 %v20903_v55  ;;  %v20969_v55 = vld [vmem:[#allocation5 + $0x4264] ss:$72 sps:$4 sm:$0xff]   ;;  %v24446_v28 = vcombine.high %v24436_v50, %v24438_v51 }
  0xc3   :  { %4946 = vmatpush1.bf16.msra.mxu0 %v20898_v56  ;;  %v24442_v56 = vcombine.high %v24424_v46, %v24426_v47  ;;  %25139 = vst [vmem:[#allocation20_spill] sm:$0xff] %v24446_v28 }
  0xc4   :  { %4989 = vmatpush1.bf16.msra.mxu1 %v20901_v57  ;;  %4947 = vmatprep.subr.bf16.mxu0 %v20906_v58  ;;  %v20975_v57 = vld [vmem:[#allocation5 + $0x41d4] ss:$72 sps:$4 sm:$0xff]   ;;  %v20970_v58 = vld [vmem:[#allocation5 + $0x38d0] ss:$72 sps:$4 sm:$0xff]  }
  0xc5   :  { %4990 = vmatprep.subr.bf16.mxu1 %v20909_v59  ;;  %25138 = vst [vmem:[#allocation19_spill] sm:$0xff] %v24442_v56  ;;  %v20973_v59 = vld [vmem:[#allocation5 + $0x41d0] ss:$72 sps:$4 sm:$0xff]  }
  0xc7   :  { %4948 = vmatpush1.bf16.msra.mxu0 %v20904_v60  ;;  %v20978_v60 = vld [vmem:[#allocation5 + $0x3844] ss:$72 sps:$4 sm:$0xff]  }
  0xc8   :  { %4991 = vmatpush1.bf16.msra.mxu1 %v20907_v61  ;;  %4949 = vmatprep.subr.bf16.mxu0 %v20912_v62  ;;  %v20981_v61 = vld [vmem:[#allocation5 + $0x4144] ss:$72 sps:$4 sm:$0xff]   ;;  %v20976_v62 = vld [vmem:[#allocation5 + $0x3840] ss:$72 sps:$4 sm:$0xff]  }
  0xc9   :  { %4992 = vmatprep.subr.bf16.mxu1 %v20915_v63  ;;  %v20979_v63 = vld [vmem:[#allocation5 + $0x4140] ss:$72 sps:$4 sm:$0xff]  }
  0xcb   :  { %4950 = vmatpush2.bf16.msra.mxu0 %v20910_v0  ;;  %v20984_v0 = vld [vmem:[#allocation5 + $0x37b4] ss:$72 sps:$4 sm:$0xff]  }
  0xcc   :  { %4993 = vmatpush2.bf16.msra.mxu1 %v20913_v1  ;;  %4951 = vmatprep.subr.bf16.mxu0 %v20918_v2  ;;  %v20987_v1 = vld [vmem:[#allocation5 + $0x40b4] ss:$72 sps:$4 sm:$0xff]   ;;  %v20982_v2 = vld [vmem:[#allocation5 + $0x37b0] ss:$72 sps:$4 sm:$0xff]  }
  0xcd   :  { %4994 = vmatprep.subr.bf16.mxu1 %v20921_v3  ;;  %v20985_v3 = vld [vmem:[#allocation5 + $0x40b0] ss:$72 sps:$4 sm:$0xff]  }
  0xcf   :  { %4952 = vmatpush2.bf16.msra.mxu0 %v20916_v4  ;;  %v20990_v4 = vld [vmem:[#allocation5 + $0x3724] ss:$72 sps:$4 sm:$0xff]  }
  0xd0   :  { %4995 = vmatpush2.bf16.msra.mxu1 %v20919_v5  ;;  %4953 = vmatprep.subr.bf16.mxu0 %v20924_v6  ;;  %v20993_v5 = vld [vmem:[#allocation5 + $0x4024] ss:$72 sps:$4 sm:$0xff]   ;;  %v20988_v6 = vld [vmem:[#allocation5 + $0x3720] ss:$72 sps:$4 sm:$0xff]  }
  0xd1   :  { %4996 = vmatprep.subr.bf16.mxu1 %v20927_v7  ;;  %v20991_v7 = vld [vmem:[#allocation5 + $0x4020] ss:$72 sps:$4 sm:$0xff]  }
  0xd3   :  { %4954 = vmatpush2.bf16.msra.mxu0 %v20922_v10  ;;  %v20996_v10 = vld [vmem:[#allocation5 + $0x3694] ss:$72 sps:$4 sm:$0xff]  }
  0xd4   :  { %4997 = vmatpush2.bf16.msra.mxu1 %v20925_v11  ;;  %4955 = vmatprep.subr.bf16.mxu0 %v20930_v12  ;;  %v20999_v11 = vld [vmem:[#allocation5 + $0x3f94] ss:$72 sps:$4 sm:$0xff]   ;;  %v20994_v12 = vld [vmem:[#allocation5 + $0x3690] ss:$72 sps:$4 sm:$0xff]  }
  0xd5   :  { %4998 = vmatprep.subr.bf16.mxu1 %v20933_v13  ;;  %v20997_v13 = vld [vmem:[#allocation5 + $0x3f90] ss:$72 sps:$4 sm:$0xff]  }
  0xd7   :  { %4956 = vmatpush2.bf16.msra.mxu0 %v20928_v14  ;;  %v21002_v14 = vld [vmem:[#allocation5 + $0x3604] ss:$72 sps:$4 sm:$0xff]  }
  0xd8   :  { %4999 = vmatpush2.bf16.msra.mxu1 %v20931_v15  ;;  %4957 = vmatprep.subr.bf16.mxu0 %v20936_v16  ;;  %v21005_v15 = vld [vmem:[#allocation5 + $0x3f04] ss:$72 sps:$4 sm:$0xff]   ;;  %v21000_v16 = vld [vmem:[#allocation5 + $0x3600] ss:$72 sps:$4 sm:$0xff]  }
  0xd9   :  { %5000 = vmatprep.subr.bf16.mxu1 %v20939_v17  ;;  %v21003_v17 = vld [vmem:[#allocation5 + $0x3f00] ss:$72 sps:$4 sm:$0xff]  }
  0xdb   :  { %4958 = vmatpush2.bf16.msra.mxu0 %v20934_v18  ;;  %v21008_v18 = vld [vmem:[#allocation5 + $0x3e74] ss:$72 sps:$4 sm:$0xff]  }
  0xdc   :  { %5001 = vmatpush2.bf16.msra.mxu1 %v20937_v19  ;;  %4959 = vmatprep.subr.bf16.mxu0 %v20942_v22  ;;  %v21011_v19 = vld [vmem:[#allocation5 + $0x4774] ss:$72 sps:$4 sm:$0xff]   ;;  %v21006_v22 = vld [vmem:[#allocation5 + $0x3e70] ss:$72 sps:$4 sm:$0xff]  }
  0xdd   :  { %5002 = vmatprep.subr.bf16.mxu1 %v20945_v23  ;;  %v21009_v23 = vld [vmem:[#allocation5 + $0x4770] ss:$72 sps:$4 sm:$0xff]  }
  0xdf   :  { %4960 = vmatpush2.bf16.msra.mxu0 %v20940_v24  ;;  %v21014_v24 = vld [vmem:[#allocation5 + $0x3de4] ss:$72 sps:$4 sm:$0xff]  }
  0xe0   :  { %5003 = vmatpush2.bf16.msra.mxu1 %v20943_v25  ;;  %4961 = vmatprep.subr.bf16.mxu0 %v20948_v26  ;;  %v21017_v25 = vld [vmem:[#allocation5 + $0x46e4] ss:$72 sps:$4 sm:$0xff]   ;;  %v21012_v26 = vld [vmem:[#allocation5 + $0x3de0] ss:$72 sps:$4 sm:$0xff]  }
  0xe1   :  { %5004 = vmatprep.subr.bf16.mxu1 %v20951_v27  ;;  %v21015_v27 = vld [vmem:[#allocation5 + $0x46e0] ss:$72 sps:$4 sm:$0xff]  }
  0xe3   :  { %4962 = vmatpush2.bf16.msra.mxu0 %v20946_v32  ;;  %v21020_v32 = vld [vmem:[#allocation5 + $0x3d54] ss:$72 sps:$4 sm:$0xff]  }
  0xe4   :  { %5005 = vmatpush2.bf16.msra.mxu1 %v20949_v35  ;;  %4963 = vmatprep.subr.bf16.mxu0 %v20954_v36  ;;  %v21023_v35 = vld [vmem:[#allocation5 + $0x4654] ss:$72 sps:$4 sm:$0xff]   ;;  %v21018_v36 = vld [vmem:[#allocation5 + $0x3d50] ss:$72 sps:$4 sm:$0xff]  }
  0xe5   :  { %5006 = vmatprep.subr.bf16.mxu1 %v20957_v37  ;;  %v21021_v37 = vld [vmem:[#allocation5 + $0x4650] ss:$72 sps:$4 sm:$0xff]  }
  0xe7   :  { %4964 = vmatpush2.bf16.msra.mxu0 %v20952_v38  ;;  %v21026_v38 = vld [vmem:[#allocation5 + $0x3cc4] ss:$72 sps:$4 sm:$0xff]  }
  0xe8   :  { %5007 = vmatpush2.bf16.msra.mxu1 %v20955_v39  ;;  %5019 = vmatprep.subr.bf16.mxu0 %v20960_v40  ;;  %v21029_v39 = vld [vmem:[#allocation5 + $0x45c4] ss:$72 sps:$4 sm:$0xff]   ;;  %v21024_v40 = vld [vmem:[#allocation5 + $0x3cc0] ss:$72 sps:$4 sm:$0xff]  }
  0xe9   :  { %5062 = vmatprep.subr.bf16.mxu1 %v20963_v43  ;;  %v21027_v43 = vld [vmem:[#allocation5 + $0x45c0] ss:$72 sps:$4 sm:$0xff]  }
  0xea   :  { %4966 = vmatmul.mubr.bf16.vlgmr.msra.gmra.mxu0 %v24430_v48 }
  0xeb   :  { %5009 = vmatmul.mubr.bf16.vlgmr.msra.gmra.mxu1 %v24434_v49  ;;  %5020 = vmatpush1.bf16.msra.mxu0 %v20958_v44  ;;  %v21032_v44 = vld [vmem:[#allocation5 + $0x3c34] ss:$72 sps:$4 sm:$0xff]  }
  0xec   :  { %5063 = vmatpush1.bf16.msra.mxu1 %v20961_v45  ;;  %5021 = vmatprep.subr.bf16.mxu0 %v20966_v52  ;;  %v21035_v45 = vld [vmem:[#allocation5 + $0x4534] ss:$72 sps:$4 sm:$0xff]   ;;  %v21030_v52 = vld [vmem:[#allocation5 + $0x3c30] ss:$72 sps:$4 sm:$0xff]  }
  0xed   :  { %5064 = vmatprep.subr.bf16.mxu1 %v20969_v55  ;;  %5051 = vmatprep.mubr.bf16.mxu0 %v24442_v56  ;;  %v21033_v55 = vld [vmem:[#allocation5 + $0x4530] ss:$72 sps:$4 sm:$0xff]  }
  0xee   :  { %5094 = vmatprep.mubr.bf16.mxu1 %v24446_v28 }
  0xef   :  { %5022 = vmatpush1.bf16.msra.mxu0 %v20964_v29  ;;  %v21038_v29 = vld [vmem:[#allocation5 + $0x3ba4] ss:$72 sps:$4 sm:$0xff]  }
  0xf0   :  { %5065 = vmatpush1.bf16.msra.mxu1 %v20967_v30  ;;  %5023 = vmatprep.subr.bf16.mxu0 %v20972_v31  ;;  %v21041_v30 = vld [vmem:[#allocation5 + $0x44a4] ss:$72 sps:$4 sm:$0xff]   ;;  %v21036_v31 = vld [vmem:[#allocation5 + $0x3ba0] ss:$72 sps:$4 sm:$0xff]  }
  0xf1   :  { %5066 = vmatprep.subr.bf16.mxu1 %v20975_v57  ;;  %v21039_v57 = vld [vmem:[#allocation5 + $0x44a0] ss:$72 sps:$4 sm:$0xff]  }
  0xf3   :  { %5024 = vmatpush1.bf16.msra.mxu0 %v20970_v58  ;;  %v21044_v58 = vld [vmem:[#allocation5 + $0x3b14] ss:$72 sps:$4 sm:$0xff]  }
  0xf4   :  { %5067 = vmatpush1.bf16.msra.mxu1 %v20973_v59  ;;  %5025 = vmatprep.subr.bf16.mxu0 %v20978_v60  ;;  %v21047_v59 = vld [vmem:[#allocation5 + $0x4414] ss:$72 sps:$4 sm:$0xff]   ;;  %v21042_v60 = vld [vmem:[#allocation5 + $0x3b10] ss:$72 sps:$4 sm:$0xff]  }
  0xf5   :  { %5068 = vmatprep.subr.bf16.mxu1 %v20981_v61  ;;  %v21045_v61 = vld [vmem:[#allocation5 + $0x4410] ss:$72 sps:$4 sm:$0xff]  }
  0xf7   :  { %5026 = vmatpush1.bf16.msra.mxu0 %v20976_v62  ;;  %v21050_v62 = vld [vmem:[#allocation5 + $0x3a84] ss:$72 sps:$4 sm:$0xff]  }
  0xf8   :  { %5069 = vmatpush1.bf16.msra.mxu1 %v20979_v63  ;;  %5027 = vmatprep.subr.bf16.mxu0 %v20984_v0  ;;  %v21053_v63 = vld [vmem:[#allocation5 + $0x4384] ss:$72 sps:$4 sm:$0xff]   ;;  %v21048_v0 = vld [vmem:[#allocation5 + $0x3a80] ss:$72 sps:$4 sm:$0xff]  }
  0xf9   :  { %5070 = vmatprep.subr.bf16.mxu1 %v20987_v1  ;;  %v21051_v1 = vld [vmem:[#allocation5 + $0x4380] ss:$72 sps:$4 sm:$0xff]  }
  0xfb   :  { %5028 = vmatpush1.bf16.msra.mxu0 %v20982_v2  ;;  %v21056_v2 = vld [vmem:[#allocation5 + $0x3fc] ss:$72 sps:$4 sm:$0xff]  }
  0xfc   :  { %5071 = vmatpush1.bf16.msra.mxu1 %v20985_v3  ;;  %5029 = vmatprep.subr.bf16.mxu0 %v20990_v4  ;;  %v21059_v3 = vld [vmem:[#allocation5 + $0xcfc] ss:$72 sps:$4 sm:$0xff]   ;;  %v24454_v4 = vcombine.low %v24424_v46, %v24426_v47  ;;  %v21060_v46 = vld [vmem:[#allocation5 + $0x368] ss:$72 sps:$4 sm:$0xff]  }
  0xfd   :  { %5072 = vmatprep.subr.bf16.mxu1 %v20993_v5  ;;  %v24458_v5 = vcombine.low %v24436_v50, %v24438_v51  ;;  %v21063_v47 = vld [vmem:[#allocation5 + $0xc68] ss:$72 sps:$4 sm:$0xff]   ;;  %v21068_v50 = vld [vmem:[#allocation5 + $0x2dc] ss:$72 sps:$4 sm:$0xff]  }
  0xfe   :  { %25140 = vst [vmem:[#allocation21_spill] sm:$0xff] %v24454_v4 }
  0xff   :  { %5030 = vmatpush1.bf16.msra.mxu0 %v20988_v6  ;;  %25141 = vst [vmem:[#allocation22_spill] sm:$0xff] %v24458_v5  ;;  %v21054_v6 = vld [vmem:[#allocation5 + $0x3f8] ss:$72 sps:$4 sm:$0xff]  }
 0x100   :  { %5073 = vmatpush1.bf16.msra.mxu1 %v20991_v7  ;;  %5031 = vmatprep.subr.bf16.mxu0 %v20996_v10  ;;  %v21057_v7 = vld [vmem:[#allocation5 + $0xcf8] ss:$72 sps:$4 sm:$0xff]   ;;  %v21062_v10 = vld [vmem:[#allocation5 + $0x36c] ss:$72 sps:$4 sm:$0xff]  }
 0x101   :  { %5074 = vmatprep.subr.bf16.mxu1 %v20999_v11  ;;  %v21065_v11 = vld [vmem:[#allocation5 + $0xc6c] ss:$72 sps:$4 sm:$0xff]  }
 0x103   :  { %5032 = vmatpush1.bf16.msra.mxu0 %v20994_v12 }
 0x104   :  { %5075 = vmatpush1.bf16.msra.mxu1 %v20997_v13  ;;  %5033 = vmatprep.subr.bf16.mxu0 %v21002_v14 }
 0x105   :  { %5076 = vmatprep.subr.bf16.mxu1 %v21005_v15 }
 0x107   :  { %5034 = vmatpush1.bf16.msra.mxu0 %v21000_v16  ;;  %v21071_v16 = vld [vmem:[#allocation5 + $0xbdc] ss:$72 sps:$4 sm:$0xff]  }
 0x108   :  { %5077 = vmatpush1.bf16.msra.mxu1 %v21003_v17  ;;  %5035 = vmatprep.subr.bf16.mxu0 %v21008_v18 }
 0x109   :  { %5078 = vmatprep.subr.bf16.mxu1 %v21011_v19 }
 0x10b   :  { %5036 = vmatpush2.bf16.msra.mxu0 %v21006_v22  ;;  %v21066_v22 = vld [vmem:[#allocation5 + $0x2d8] ss:$72 sps:$4 sm:$0xff]  }
 0x10c   :  { %5079 = vmatpush2.bf16.msra.mxu1 %v21009_v23  ;;  %5037 = vmatprep.subr.bf16.mxu0 %v21014_v24  ;;  %v21069_v23 = vld [vmem:[#allocation5 + $0xbd8] ss:$72 sps:$4 sm:$0xff]  }
 0x10d   :  { %5080 = vmatprep.subr.bf16.mxu1 %v21017_v25  ;;  %v21074_v25 = vld [vmem:[#allocation5 + $0x24c] ss:$72 sps:$4 sm:$0xff]  }
 0x10f   :  { %5038 = vmatpush2.bf16.msra.mxu0 %v21012_v26  ;;  %v21077_v26 = vld [vmem:[#allocation5 + $0xb4c] ss:$72 sps:$4 sm:$0xff]  }
 0x110   :  { %5081 = vmatpush2.bf16.msra.mxu1 %v21015_v27  ;;  %5039 = vmatprep.subr.bf16.mxu0 %v21020_v32  ;;  %v21072_v27 = vld [vmem:[#allocation5 + $0x248] ss:$72 sps:$4 sm:$0xff]  }
 0x111   :  { %5082 = vmatprep.subr.bf16.mxu1 %v21023_v35  ;;  %v21075_v32 = vld [vmem:[#allocation5 + $0xb48] ss:$72 sps:$4 sm:$0xff]   ;;  %v21080_v35 = vld [vmem:[#allocation5 + $0x1bc] ss:$72 sps:$4 sm:$0xff]  }
 0x113   :  { %5040 = vmatpush2.bf16.msra.mxu0 %v21018_v36  ;;  %v21083_v36 = vld [vmem:[#allocation5 + $0xabc] ss:$72 sps:$4 sm:$0xff]  }
 0x114   :  { %5083 = vmatpush2.bf16.msra.mxu1 %v21021_v37  ;;  %5041 = vmatprep.subr.bf16.mxu0 %v21026_v38  ;;  %v21078_v37 = vld [vmem:[#allocation5 + $0x1b8] ss:$72 sps:$4 sm:$0xff]  }
 0x115   :  { %5084 = vmatprep.subr.bf16.mxu1 %v21029_v39  ;;  %v21081_v38 = vld [vmem:[#allocation5 + $0xab8] ss:$72 sps:$4 sm:$0xff]   ;;  %v21086_v39 = vld [vmem:[#allocation5 + $0x12c] ss:$72 sps:$4 sm:$0xff]  }
 0x117   :  { %5042 = vmatpush2.bf16.msra.mxu0 %v21024_v40  ;;  %v21089_v40 = vld [vmem:[#allocation5 + $0xa2c] ss:$72 sps:$4 sm:$0xff]  }
 0x118   :  { %5085 = vmatpush2.bf16.msra.mxu1 %v21027_v43  ;;  %5043 = vmatprep.subr.bf16.mxu0 %v21032_v44  ;;  %v21084_v43 = vld [vmem:[#allocation5 + $0x128] ss:$72 sps:$4 sm:$0xff]  }
 0x119   :  { %5086 = vmatprep.subr.bf16.mxu1 %v21035_v45  ;;  %v21087_v44 = vld [vmem:[#allocation5 + $0xa28] ss:$72 sps:$4 sm:$0xff]   ;;  %v21092_v45 = vld [vmem:[#allocation5 + $0x9c] ss:$72 sps:$4 sm:$0xff]  }
 0x11b   :  { %5044 = vmatpush2.bf16.msra.mxu0 %v21030_v52  ;;  %v21095_v52 = vld [vmem:[#allocation5 + $0x99c] ss:$72 sps:$4 sm:$0xff]  }
 0x11c   :  { %5087 = vmatpush2.bf16.msra.mxu1 %v21033_v55  ;;  %5045 = vmatprep.subr.bf16.mxu0 %v21038_v29  ;;  %v21090_v55 = vld [vmem:[#allocation5 + $0x98] ss:$72 sps:$4 sm:$0xff]  }
 0x11d   :  { %5088 = vmatprep.subr.bf16.mxu1 %v21041_v30  ;;  %v21093_v29 = vld [vmem:[#allocation5 + $0x998] ss:$72 sps:$4 sm:$0xff]   ;;  %v21098_v30 = vld [vmem:[#allocation5 + $0xc] ss:$72 sps:$4 sm:$0xff]  }
 0x11f   :  { %5046 = vmatpush2.bf16.msra.mxu0 %v21036_v31  ;;  %v21101_v31 = vld [vmem:[#allocation5 + $0x90c] ss:$72 sps:$4 sm:$0xff]  }
 0x120   :  { %5089 = vmatpush2.bf16.msra.mxu1 %v21039_v57  ;;  %5047 = vmatprep.subr.bf16.mxu0 %v21044_v58  ;;  %v21096_v57 = vld [vmem:[#allocation5 + $0x8] ss:$72 sps:$4 sm:$0xff]  }
 0x121   :  { %5090 = vmatprep.subr.bf16.mxu1 %v21047_v59  ;;  %v21099_v58 = vld [vmem:[#allocation5 + $0x908] ss:$72 sps:$4 sm:$0xff]   ;;  %v21104_v59 = vld [vmem:[#allocation5 + $0x87c] ss:$72 sps:$4 sm:$0xff]  }
 0x123   :  { %5048 = vmatpush2.bf16.msra.mxu0 %v21042_v60  ;;  %v21107_v60 = vld [vmem:[#allocation5 + $0x117c] ss:$72 sps:$4 sm:$0xff]  }
 0x124   :  { %5091 = vmatpush2.bf16.msra.mxu1 %v21045_v61  ;;  %5049 = vmatprep.subr.bf16.mxu0 %v21050_v62  ;;  %v21102_v61 = vld [vmem:[#allocation5 + $0x878] ss:$72 sps:$4 sm:$0xff]  }
 0x125   :  { %5092 = vmatprep.subr.bf16.mxu1 %v21053_v63  ;;  %v21105_v62 = vld [vmem:[#allocation5 + $0x1178] ss:$72 sps:$4 sm:$0xff]   ;;  %v21110_v63 = vld [vmem:[#allocation5 + $0x7ec] ss:$72 sps:$4 sm:$0xff]  }
 0x127   :  { %5050 = vmatpush2.bf16.msra.mxu0 %v21048_v0  ;;  %v21113_v0 = vld [vmem:[#allocation5 + $0x10ec] ss:$72 sps:$4 sm:$0xff]  }
 0x128   :  { %5093 = vmatpush2.bf16.msra.mxu1 %v21051_v1  ;;  %5105 = vmatprep.subr.bf16.mxu0 %v21056_v2  ;;  %v21108_v1 = vld [vmem:[#allocation5 + $0x7e8] ss:$72 sps:$4 sm:$0xff]  }
 0x129   :  { %5148 = vmatprep.subr.bf16.mxu1 %v21059_v3  ;;  %v21111_v2 = vld [vmem:[#allocation5 + $0x10e8] ss:$72 sps:$4 sm:$0xff]   ;;  %v21116_v3 = vld [vmem:[#allocation5 + $0x75c] ss:$72 sps:$4 sm:$0xff]  }
 0x12a   :  { %v4795_v12 = vpop.f32.mrf.mxu0  ;;  %5052 = vmatmul.mubr.bf16.vlgmr.msra.gmra.mxu0 %v24454_v4 }
 0x12b   :  { %v4838_v13 = vpop.f32.mrf.mxu1  ;;  %5095 = vmatmul.mubr.bf16.vlgmr.msra.gmra.mxu1 %v24458_v5  ;;  %5106 = vmatpush1.bf16.msra.mxu0 %v21054_v6  ;;  %v21119_v6 = vld [vmem:[#allocation5 + $0x105c] ss:$72 sps:$4 sm:$0xff]  }
 0x12c   :  { %v24462_v14 = vadd.f32 %v4838_v13, %v4795_v12  ;;  %5149 = vmatpush1.bf16.msra.mxu1 %v21057_v7  ;;  %v4797_v51 = vpop.f32.mrf.mxu0  ;;  %5107 = vmatprep.subr.bf16.mxu0 %v21062_v10  ;;  %v21114_v7 = vld [vmem:[#allocation5 + $0x758] ss:$72 sps:$4 sm:$0xff]   ;;  %v21125_v12 = vld [vmem:[#allocation5 + $0xfcc] ss:$72 sps:$4 sm:$0xff]   ;;  %v21120_v13 = vld [vmem:[#allocation5 + $0x6c8] ss:$72 sps:$4 sm:$0xff]  }
 0x12d   :  { %v4840_v15 = vpop.f32.mrf.mxu1  ;;  %5150 = vmatprep.subr.bf16.mxu1 %v21065_v11  ;;  %5137 = vmatprep.mubr.bf16.mxu0 %v24366_v53  ;;  %v21117_v10 = vld [vmem:[#allocation5 + $0x1058] ss:$72 sps:$4 sm:$0xff]   ;;  %v21122_v11 = vld [vmem:[#allocation5 + $0x6cc] ss:$72 sps:$4 sm:$0xff]  }
 0x12e   :  { %v24464_v17 = vadd.f32 %v4840_v15, %v4797_v51  ;;  %5180 = vmatprep.mubr.bf16.mxu1 %v24368_v54  ;;  %v4799_v18 = vpop.f32.mrf.mxu0  ;;  %v21126_v51 = vld [vmem:[#allocation5 + $0x638] ss:$72 sps:$4 sm:$0xff]  }
 0x12f   :  { %v4842_v19 = vpop.f32.mrf.mxu1  ;;  %5108 = vmatpush1.bf16.msra.mxu0 %v21060_v46  ;;  %v21123_v46 = vld [vmem:[#allocation5 + $0xfc8] ss:$72 sps:$4 sm:$0xff]   ;;  %v21129_v15 = vld [vmem:[#allocation5 + $0xf38] ss:$72 sps:$4 sm:$0xff]  }
 0x130   :  { %v24468_v24 = vadd.f32 %v4842_v19, %v4799_v18  ;;  %5151 = vmatpush1.bf16.msra.mxu1 %v21063_v47  ;;  %5109 = vmatprep.subr.bf16.mxu0 %v21068_v50  ;;  %v21128_v47 = vld [vmem:[#allocation5 + $0x63c] ss:$72 sps:$4 sm:$0xff]   ;;  %v21137_v18 = vld [vmem:[#allocation5 + $0xeac] ss:$72 sps:$4 sm:$0xff]   ;;  %v21132_v19 = vld [vmem:[#allocation5 + $0x5a8] ss:$72 sps:$4 sm:$0xff]  }
 0x131   :  { %5152 = vmatprep.subr.bf16.mxu1 %v21071_v16  ;;  %v21131_v50 = vld [vmem:[#allocation5 + $0xf3c] ss:$72 sps:$4 sm:$0xff]   ;;  %v21134_v16 = vld [vmem:[#allocation5 + $0x5ac] ss:$72 sps:$4 sm:$0xff]  }
 0x133   :  { %5110 = vmatpush1.bf16.msra.mxu0 %v21066_v22  ;;  %v21135_v22 = vld [vmem:[#allocation5 + $0xea8] ss:$72 sps:$4 sm:$0xff]  }
 0x134   :  { %5153 = vmatpush1.bf16.msra.mxu1 %v21069_v23  ;;  %5111 = vmatprep.subr.bf16.mxu0 %v21074_v25  ;;  %v21140_v23 = vld [vmem:[#allocation5 + $0x51c] ss:$72 sps:$4 sm:$0xff]  }
 0x135   :  { %5154 = vmatprep.subr.bf16.mxu1 %v21077_v26  ;;  %v21143_v25 = vld [vmem:[#allocation5 + $0xe1c] ss:$72 sps:$4 sm:$0xff]   ;;  %v21138_v26 = vld [vmem:[#allocation5 + $0x518] ss:$72 sps:$4 sm:$0xff]  }
 0x137   :  { %5112 = vmatpush1.bf16.msra.mxu0 %v21072_v27  ;;  %v21141_v27 = vld [vmem:[#allocation5 + $0xe18] ss:$72 sps:$4 sm:$0xff]  }
 0x138   :  { %5155 = vmatpush1.bf16.msra.mxu1 %v21075_v32  ;;  %5113 = vmatprep.subr.bf16.mxu0 %v21080_v35  ;;  %v21146_v32 = vld [vmem:[#allocation5 + $0x48c] ss:$72 sps:$4 sm:$0xff]  }
 0x139   :  { %5156 = vmatprep.subr.bf16.mxu1 %v21083_v36  ;;  %v21149_v35 = vld [vmem:[#allocation5 + $0xd8c] ss:$72 sps:$4 sm:$0xff]   ;;  %v21144_v36 = vld [vmem:[#allocation5 + $0x488] ss:$72 sps:$4 sm:$0xff]  }
 0x13b   :  { %5114 = vmatpush1.bf16.msra.mxu0 %v21078_v37  ;;  %v21147_v37 = vld [vmem:[#allocation5 + $0xd88] ss:$72 sps:$4 sm:$0xff]  }
 0x13c   :  { %5157 = vmatpush1.bf16.msra.mxu1 %v21081_v38  ;;  %5115 = vmatprep.subr.bf16.mxu0 %v21086_v39  ;;  %v21152_v38 = vld [vmem:[#allocation5 + $0x15fc] ss:$72 sps:$4 sm:$0xff]  }
 0x13d   :  { %5158 = vmatprep.subr.bf16.mxu1 %v21089_v40  ;;  %v21155_v39 = vld [vmem:[#allocation5 + $0x1efc] ss:$72 sps:$4 sm:$0xff]   ;;  %v21150_v40 = vld [vmem:[#allocation5 + $0x15f8] ss:$72 sps:$4 sm:$0xff]  }
 0x13f   :  { %5116 = vmatpush1.bf16.msra.mxu0 %v21084_v43  ;;  %v21153_v43 = vld [vmem:[#allocation5 + $0x1ef8] ss:$72 sps:$4 sm:$0xff]  }
 0x140   :  { %5159 = vmatpush1.bf16.msra.mxu1 %v21087_v44  ;;  %5117 = vmatprep.subr.bf16.mxu0 %v21092_v45  ;;  %v24470_v44 = vpop.f32.mrf.mxu0  ;;  %v24472_v45 = vpop.f32.mrf.mxu1 }
 0x141   :  { %5160 = vmatprep.subr.bf16.mxu1 %v21095_v52  ;;  %v21158_v52 = vld [vmem:[#allocation5 + $0x156c] ss:$72 sps:$4 sm:$0xff]  }
 0x143   :  { %5118 = vmatpush1.bf16.msra.mxu0 %v21090_v55  ;;  %v21161_v55 = vld [vmem:[#allocation5 + $0x1e6c] ss:$72 sps:$4 sm:$0xff]  }
 0x144   :  { %5161 = vmatpush1.bf16.msra.mxu1 %v21093_v29  ;;  %5119 = vmatprep.subr.bf16.mxu0 %v21098_v30  ;;  %v21156_v29 = vld [vmem:[#allocation5 + $0x1568] ss:$72 sps:$4 sm:$0xff]  }
 0x145   :  { %5162 = vmatprep.subr.bf16.mxu1 %v21101_v31  ;;  %v21159_v30 = vld [vmem:[#allocation5 + $0x1e68] ss:$72 sps:$4 sm:$0xff]  }
 0x147   :  { %5120 = vmatpush1.bf16.msra.mxu0 %v21096_v57 }
 0x148   :  { %5163 = vmatpush1.bf16.msra.mxu1 %v21099_v58  ;;  %5121 = vmatprep.subr.bf16.mxu0 %v21104_v59 }
 0x149   :  { %5164 = vmatprep.subr.bf16.mxu1 %v21107_v60 }
 0x14b   :  { %5122 = vmatpush2.bf16.msra.mxu0 %v21102_v61  ;;  %v21164_v61 = vld [vmem:[#allocation5 + $0x14dc] ss:$72 sps:$4 sm:$0xff]  }
 0x14c   :  { %5165 = vmatpush2.bf16.msra.mxu1 %v21105_v62  ;;  %5123 = vmatprep.subr.bf16.mxu0 %v21110_v63  ;;  %v21167_v62 = vld [vmem:[#allocation5 + $0x1ddc] ss:$72 sps:$4 sm:$0xff]  }
 0x14d   :  { %5166 = vmatprep.subr.bf16.mxu1 %v21113_v0 }
 0x14f   :  { %5124 = vmatpush2.bf16.msra.mxu0 %v21108_v1  ;;  %v21162_v1 = vld [vmem:[#allocation5 + $0x14d8] ss:$72 sps:$4 sm:$0xff]  }
 0x150   :  { %5167 = vmatpush2.bf16.msra.mxu1 %v21111_v2  ;;  %5125 = vmatprep.subr.bf16.mxu0 %v21116_v3  ;;  %v21165_v2 = vld [vmem:[#allocation5 + $0x1dd8] ss:$72 sps:$4 sm:$0xff]  }
 0x151   :  { %5168 = vmatprep.subr.bf16.mxu1 %v21119_v6 }
 0x153   :  { %5126 = vmatpush2.bf16.msra.mxu0 %v21114_v7 }
 0x154   :  { %5169 = vmatpush2.bf16.msra.mxu1 %v21117_v10  ;;  %5127 = vmatprep.subr.bf16.mxu0 %v21122_v11  ;;  %v21170_v10 = vld [vmem:[#allocation5 + $0x144c] ss:$72 sps:$4 sm:$0xff]  }
 0x155   :  { %5170 = vmatprep.subr.bf16.mxu1 %v21125_v12  ;;  %v21173_v11 = vld [vmem:[#allocation5 + $0x1d4c] ss:$72 sps:$4 sm:$0xff]  }
 0x157   :  { %5128 = vmatpush2.bf16.msra.mxu0 %v21120_v13  ;;  %v21171_v13 = vld [vmem:[#allocation5 + $0x1d48] ss:$72 sps:$4 sm:$0xff]  }
 0x158   :  { %5171 = vmatpush2.bf16.msra.mxu1 %v21123_v46  ;;  %5129 = vmatprep.subr.bf16.mxu0 %v21128_v47  ;;  %v21176_v46 = vld [vmem:[#allocation5 + $0x13bc] ss:$72 sps:$4 sm:$0xff]  }
 0x159   :  { %5172 = vmatprep.subr.bf16.mxu1 %v21131_v50  ;;  %v21179_v47 = vld [vmem:[#allocation5 + $0x1cbc] ss:$72 sps:$4 sm:$0xff]   ;;  %v21177_v50 = vld [vmem:[#allocation5 + $0x1cb8] ss:$72 sps:$4 sm:$0xff]  }
 0x15b   :  { %5130 = vmatpush2.bf16.msra.mxu0 %v21126_v51  ;;  %v21182_v51 = vld [vmem:[#allocation5 + $0x132c] ss:$72 sps:$4 sm:$0xff]  }
 0x15c   :  { %5173 = vmatpush2.bf16.msra.mxu1 %v21129_v15  ;;  %5131 = vmatprep.subr.bf16.mxu0 %v21134_v16  ;;  %v21185_v15 = vld [vmem:[#allocation5 + $0x1c2c] ss:$72 sps:$4 sm:$0xff]   ;;  %v21180_v16 = vld [vmem:[#allocation5 + $0x1328] ss:$72 sps:$4 sm:$0xff]  }
 0x15d   :  { %5174 = vmatprep.subr.bf16.mxu1 %v21137_v18  ;;  %v21183_v18 = vld [vmem:[#allocation5 + $0x1c28] ss:$72 sps:$4 sm:$0xff]  }
 0x15f   :  { %5132 = vmatpush2.bf16.msra.mxu0 %v21132_v19  ;;  %v21188_v19 = vld [vmem:[#allocation5 + $0x129c] ss:$72 sps:$4 sm:$0xff]  }
 0x160   :  { %5175 = vmatpush2.bf16.msra.mxu1 %v21135_v22  ;;  %5133 = vmatprep.subr.bf16.mxu0 %v21140_v23  ;;  %v21191_v22 = vld [vmem:[#allocation5 + $0x1b9c] ss:$72 sps:$4 sm:$0xff]   ;;  %v21186_v23 = vld [vmem:[#allocation5 + $0x1298] ss:$72 sps:$4 sm:$0xff]  }
 0x161   :  { %5176 = vmatprep.subr.bf16.mxu1 %v21143_v25  ;;  %v21189_v25 = vld [vmem:[#allocation5 + $0x1b98] ss:$72 sps:$4 sm:$0xff]  }
 0x163   :  { %5134 = vmatpush2.bf16.msra.mxu0 %v21138_v26  ;;  %v21194_v26 = vld [vmem:[#allocation5 + $0x120c] ss:$72 sps:$4 sm:$0xff]  }
 0x164   :  { %5177 = vmatpush2.bf16.msra.mxu1 %v21141_v27  ;;  %5135 = vmatprep.subr.bf16.mxu0 %v21146_v32  ;;  %v21197_v27 = vld [vmem:[#allocation5 + $0x1b0c] ss:$72 sps:$4 sm:$0xff]   ;;  %v21192_v32 = vld [vmem:[#allocation5 + $0x1208] ss:$72 sps:$4 sm:$0xff]  }
 0x165   :  { %5178 = vmatprep.subr.bf16.mxu1 %v21149_v35  ;;  %v21195_v35 = vld [vmem:[#allocation5 + $0x1b08] ss:$72 sps:$4 sm:$0xff]  }
 0x167   :  { %5136 = vmatpush2.bf16.msra.mxu0 %v21144_v36  ;;  %v21200_v36 = vld [vmem:[#allocation5 + $0x1a7c] ss:$72 sps:$4 sm:$0xff]  }
 0x168   :  { %5179 = vmatpush2.bf16.msra.mxu1 %v21147_v37  ;;  %5191 = vmatprep.subr.bf16.mxu0 %v21152_v38  ;;  %v21203_v37 = vld [vmem:[#allocation5 + $0x237c] ss:$72 sps:$4 sm:$0xff]   ;;  %v21198_v38 = vld [vmem:[#allocation5 + $0x1a78] ss:$72 sps:$4 sm:$0xff]  }
 0x169   :  { %5234 = vmatprep.subr.bf16.mxu1 %v21155_v39  ;;  %v21201_v39 = vld [vmem:[#allocation5 + $0x2378] ss:$72 sps:$4 sm:$0xff]  }
 0x16a   :  { %v4881_v31 = vpop.f32.mrf.mxu0  ;;  %5138 = vmatmul.mubr.bf16.vlgmr.msra.gmra.mxu0 %v24372_v8 }
 0x16b   :  { %v4924_v57 = vpop.f32.mrf.mxu1  ;;  %5181 = vmatmul.mubr.bf16.vlgmr.msra.gmra.mxu1 %v24374_v9  ;;  %v4882_v58 = vadd.f32 %v4881_v31, %v24462_v14  ;;  %5192 = vmatpush1.bf16.msra.mxu0 %v21150_v40  ;;  %v21206_v40 = vld [vmem:[#allocation5 + $0x19ec] ss:$72 sps:$4 sm:$0xff]   ;;  %v21210_v31 = vld [vmem:[#allocation5 + $0x1958] ss:$72 sps:$4 sm:$0xff]  }
 0x16c   :  { %5235 = vmatpush1.bf16.msra.mxu1 %v21153_v43  ;;  %v4883_v59 = vpop.f32.mrf.mxu0  ;;  %5193 = vmatprep.subr.bf16.mxu0 %v21158_v52  ;;  %v21209_v43 = vld [vmem:[#allocation5 + $0x22ec] ss:$72 sps:$4 sm:$0xff]   ;;  %v21204_v52 = vld [vmem:[#allocation5 + $0x19e8] ss:$72 sps:$4 sm:$0xff]  }
 0x16d   :  { %v4926_v60 = vpop.f32.mrf.mxu1  ;;  %5236 = vmatprep.subr.bf16.mxu1 %v21161_v55  ;;  %v24477_v63 = vadd.f32 %v4924_v57, %v4882_v58  ;;  %v4884_v0 = vadd.f32 %v4883_v59, %v24464_v17  ;;  %5223 = vmatprep.mubr.bf16.mxu0 %v24388_v41  ;;  %v21168_v17 = vld [vmem:[#allocation5 + $0x1448] ss:$72 sps:$4 sm:$0xff]   ;;  %v21213_v57 = vld [vmem:[#allocation5 + $0x2258] ss:$72 sps:$4 sm:$0xff]   ;;  %v21218_v58 = vld [vmem:[#allocation5 + $0x18cc] ss:$72 sps:$4 sm:$0xff]  }
 0x16e   :  { %5266 = vmatprep.mubr.bf16.mxu1 %v24392_v42  ;;  %v4885_v3 = vpop.f32.mrf.mxu0  ;;  %v21207_v55 = vld [vmem:[#allocation5 + $0x22e8] ss:$72 sps:$4 sm:$0xff]   ;;  %v21221_v59 = vld [vmem:[#allocation5 + $0x21cc] ss:$72 sps:$4 sm:$0xff]  }
 0x16f   :  { %v24482_v14 = vadd.f32 %v4926_v60, %v4884_v0  ;;  %v4886_v6 = vadd.f32 %v4885_v3, %v24468_v24  ;;  %5194 = vmatpush1.bf16.msra.mxu0 %v21156_v29  ;;  %v4928_v7 = vpop.f32.mrf.mxu1  ;;  %v21174_v24 = vld [vmem:[#allocation5 + $0x13b8] ss:$72 sps:$4 sm:$0xff]   ;;  %v21212_v29 = vld [vmem:[#allocation5 + $0x195c] ss:$72 sps:$4 sm:$0xff]   ;;  %v21216_v60 = vld [vmem:[#allocation5 + $0x18c8] ss:$72 sps:$4 sm:$0xff]  }
 0x170   :  { %5237 = vmatpush1.bf16.msra.mxu1 %v21159_v30  ;;  %5195 = vmatprep.subr.bf16.mxu0 %v21164_v61  ;;  %v21215_v30 = vld [vmem:[#allocation5 + $0x225c] ss:$72 sps:$4 sm:$0xff]   ;;  %v21219_v61 = vld [vmem:[#allocation5 + $0x21c8] ss:$72 sps:$4 sm:$0xff]   ;;  %v21230_v3 = vld [vmem:[#allocation5 + $0x17ac] ss:$72 sps:$4 sm:$0xff]  }
 0x171   :  { %5238 = vmatprep.subr.bf16.mxu1 %v21167_v62  ;;  %v24485_v12 = vadd.f32 %v4928_v7, %v4886_v6  ;;  %v21224_v62 = vld [vmem:[#allocation5 + $0x183c] ss:$72 sps:$4 sm:$0xff]   ;;  %v21233_v6 = vld [vmem:[#allocation5 + $0x20ac] ss:$72 sps:$4 sm:$0xff]   ;;  %v21228_v7 = vld [vmem:[#allocation5 + $0x17a8] ss:$72 sps:$4 sm:$0xff]  }
 0x172   :  { %v21227_v0 = vld [vmem:[#allocation5 + $0x213c] ss:$72 sps:$4 sm:$0xff]  }
 0x173   :  { %5196 = vmatpush1.bf16.msra.mxu0 %v21162_v1  ;;  %v21222_v1 = vld [vmem:[#allocation5 + $0x1838] ss:$72 sps:$4 sm:$0xff]  }
 0x174   :  { %5239 = vmatpush1.bf16.msra.mxu1 %v21165_v2  ;;  %5197 = vmatprep.subr.bf16.mxu0 %v21170_v10  ;;  %v21225_v2 = vld [vmem:[#allocation5 + $0x2138] ss:$72 sps:$4 sm:$0xff]   ;;  %v21231_v10 = vld [vmem:[#allocation5 + $0x20a8] ss:$72 sps:$4 sm:$0xff]  }
 0x175   :  { %5240 = vmatprep.subr.bf16.mxu1 %v21173_v11  ;;  %v21236_v11 = vld [vmem:[#allocation5 + $0x171c] ss:$72 sps:$4 sm:$0xff]  }
 0x177   :  { %5198 = vmatpush1.bf16.msra.mxu0 %v21168_v17  ;;  %v21239_v17 = vld [vmem:[#allocation5 + $0x201c] ss:$72 sps:$4 sm:$0xff]  }
 0x178   :  { %5241 = vmatpush1.bf16.msra.mxu1 %v21171_v13  ;;  %5199 = vmatprep.subr.bf16.mxu0 %v21176_v46  ;;  %v21234_v13 = vld [vmem:[#allocation5 + $0x1718] ss:$72 sps:$4 sm:$0xff]  }
 0x179   :  { %5242 = vmatprep.subr.bf16.mxu1 %v21179_v47  ;;  %v21237_v46 = vld [vmem:[#allocation5 + $0x2018] ss:$72 sps:$4 sm:$0xff]   ;;  %v21242_v47 = vld [vmem:[#allocation5 + $0x168c] ss:$72 sps:$4 sm:$0xff]  }
 0x17b   :  { %5200 = vmatpush1.bf16.msra.mxu0 %v21174_v24  ;;  %v21245_v24 = vld [vmem:[#allocation5 + $0x1f8c] ss:$72 sps:$4 sm:$0xff]  }
 0x17c   :  { %5243 = vmatpush1.bf16.msra.mxu1 %v21177_v50  ;;  %5201 = vmatprep.subr.bf16.mxu0 %v21182_v51  ;;  %v21240_v50 = vld [vmem:[#allocation5 + $0x1688] ss:$72 sps:$4 sm:$0xff]  }
 0x17d   :  { %5244 = vmatprep.subr.bf16.mxu1 %v21185_v15  ;;  %v21243_v51 = vld [vmem:[#allocation5 + $0x1f88] ss:$72 sps:$4 sm:$0xff]   ;;  %v21248_v15 = vld [vmem:[#allocation5 + $0x27fc] ss:$72 sps:$4 sm:$0xff]  }
 0x17f   :  { %5202 = vmatpush1.bf16.msra.mxu0 %v21180_v16  ;;  %v21251_v16 = vld [vmem:[#allocation5 + $0x30fc] ss:$72 sps:$4 sm:$0xff]  }
 0x180   :  { %5245 = vmatpush1.bf16.msra.mxu1 %v21183_v18  ;;  %5203 = vmatprep.subr.bf16.mxu0 %v21188_v19  ;;  %v21246_v18 = vld [vmem:[#allocation5 + $0x27f8] ss:$72 sps:$4 sm:$0xff]  }
 0x181   :  { %5246 = vmatprep.subr.bf16.mxu1 %v21191_v22  ;;  %v21249_v19 = vld [vmem:[#allocation5 + $0x30f8] ss:$72 sps:$4 sm:$0xff]   ;;  %v24487_v22 = vpop.f32.mrf.mxu0 }
 0x183   :  { %5204 = vmatpush1.bf16.msra.mxu0 %v21186_v23  ;;  %v24489_v23 = vpop.f32.mrf.mxu1 }
 0x184   :  { %5247 = vmatpush1.bf16.msra.mxu1 %v21189_v25  ;;  %5205 = vmatprep.subr.bf16.mxu0 %v21194_v26  ;;  %v21254_v25 = vld [vmem:[#allocation5 + $0x276c] ss:$72 sps:$4 sm:$0xff]  }
 0x185   :  { %5248 = vmatprep.subr.bf16.mxu1 %v21197_v27  ;;  %v21257_v26 = vld [vmem:[#allocation5 + $0x306c] ss:$72 sps:$4 sm:$0xff]   ;;  %v21252_v27 = vld [vmem:[#allocation5 + $0x2768] ss:$72 sps:$4 sm:$0xff]  }
 0x187   :  { %5206 = vmatpush1.bf16.msra.mxu0 %v21192_v32  ;;  %v21255_v32 = vld [vmem:[#allocation5 + $0x3068] ss:$72 sps:$4 sm:$0xff]  }
 0x188   :  { %5249 = vmatpush1.bf16.msra.mxu1 %v21195_v35  ;;  %5207 = vmatprep.subr.bf16.mxu0 %v21200_v36 }
 0x189   :  { %5250 = vmatprep.subr.bf16.mxu1 %v21203_v37 }
 0x18b   :  { %5208 = vmatpush2.bf16.msra.mxu0 %v21198_v38 }
 0x18c   :  { %5251 = vmatpush2.bf16.msra.mxu1 %v21201_v39  ;;  %5209 = vmatprep.subr.bf16.mxu0 %v21206_v40  ;;  %v21260_v40 = vld [vmem:[#allocation5 + $0x26dc] ss:$72 sps:$4 sm:$0xff]  }
 0x18d   :  { %5252 = vmatprep.subr.bf16.mxu1 %v21209_v43  ;;  %v21263_v43 = vld [vmem:[#allocation5 + $0x2fdc] ss:$72 sps:$4 sm:$0xff]  }
 0x18f   :  { %5210 = vmatpush2.bf16.msra.mxu0 %v21204_v52 }
 0x190   :  { %5253 = vmatpush2.bf16.msra.mxu1 %v21207_v55  ;;  %5211 = vmatprep.subr.bf16.mxu0 %v21212_v29  ;;  %v21258_v29 = vld [vmem:[#allocation5 + $0x26d8] ss:$72 sps:$4 sm:$0xff]  }
 0x191   :  { %5254 = vmatprep.subr.bf16.mxu1 %v21215_v30  ;;  %v21261_v30 = vld [vmem:[#allocation5 + $0x2fd8] ss:$72 sps:$4 sm:$0xff]  }
 0x193   :  { %5212 = vmatpush2.bf16.msra.mxu0 %v21210_v31 }
 0x194   :  { %5255 = vmatpush2.bf16.msra.mxu1 %v21213_v57  ;;  %5213 = vmatprep.subr.bf16.mxu0 %v21218_v58 }
 0x195   :  { %5256 = vmatprep.subr.bf16.mxu1 %v21221_v59  ;;  %v21266_v59 = vld [vmem:[#allocation5 + $0x264c] ss:$72 sps:$4 sm:$0xff]  }
 0x197   :  { %5214 = vmatpush2.bf16.msra.mxu0 %v21216_v60  ;;  %v21269_v60 = vld [vmem:[#allocation5 + $0x2f4c] ss:$72 sps:$4 sm:$0xff]  }
 0x198   :  { %5257 = vmatpush2.bf16.msra.mxu1 %v21219_v61  ;;  %5215 = vmatprep.subr.bf16.mxu0 %v21224_v62  ;;  %v21267_v62 = vld [vmem:[#allocation5 + $0x2f48] ss:$72 sps:$4 sm:$0xff]  }
 0x199   :  { %5258 = vmatprep.subr.bf16.mxu1 %v21227_v0  ;;  %v21272_v0 = vld [vmem:[#allocation5 + $0x25bc] ss:$72 sps:$4 sm:$0xff]  }
 0x19b   :  { %5216 = vmatpush2.bf16.msra.mxu0 %v21222_v1  ;;  %v21275_v1 = vld [vmem:[#allocation5 + $0x2ebc] ss:$72 sps:$4 sm:$0xff]  }
 0x19c   :  { %5259 = vmatpush2.bf16.msra.mxu1 %v21225_v2  ;;  %5217 = vmatprep.subr.bf16.mxu0 %v21230_v3  ;;  %v21273_v2 = vld [vmem:[#allocation5 + $0x2eb8] ss:$72 sps:$4 sm:$0xff]   ;;  %v21278_v3 = vld [vmem:[#allocation5 + $0x252c] ss:$72 sps:$4 sm:$0xff]  }
 0x19d   :  { %5260 = vmatprep.subr.bf16.mxu1 %v21233_v6  ;;  %v21281_v6 = vld [vmem:[#allocation5 + $0x2e2c] ss:$72 sps:$4 sm:$0xff]  }
 0x19f   :  { %5218 = vmatpush2.bf16.msra.mxu0 %v21228_v7  ;;  %v21276_v7 = vld [vmem:[#allocation5 + $0x2528] ss:$72 sps:$4 sm:$0xff]  }
 0x1a0   :  { %5261 = vmatpush2.bf16.msra.mxu1 %v21231_v10  ;;  %5219 = vmatprep.subr.bf16.mxu0 %v21236_v11  ;;  %v21279_v10 = vld [vmem:[#allocation5 + $0x2e28] ss:$72 sps:$4 sm:$0xff]   ;;  %v21284_v11 = vld [vmem:[#allocation5 + $0x249c] ss:$72 sps:$4 sm:$0xff]  }
 0x1a1   :  { %5262 = vmatprep.subr.bf16.mxu1 %v21239_v17  ;;  %v21287_v17 = vld [vmem:[#allocation5 + $0x2d9c] ss:$72 sps:$4 sm:$0xff]  }
 0x1a3   :  { %5220 = vmatpush2.bf16.msra.mxu0 %v21234_v13  ;;  %v21282_v13 = vld [vmem:[#allocation5 + $0x2498] ss:$72 sps:$4 sm:$0xff]  }
 0x1a4   :  { %5263 = vmatpush2.bf16.msra.mxu1 %v21237_v46  ;;  %5221 = vmatprep.subr.bf16.mxu0 %v21242_v47  ;;  %v21285_v46 = vld [vmem:[#allocation5 + $0x2d98] ss:$72 sps:$4 sm:$0xff]   ;;  %v21290_v47 = vld [vmem:[#allocation5 + $0x240c] ss:$72 sps:$4 sm:$0xff]  }
 0x1a5   :  { %5264 = vmatprep.subr.bf16.mxu1 %v21245_v24  ;;  %v21293_v24 = vld [vmem:[#allocation5 + $0x2d0c] ss:$72 sps:$4 sm:$0xff]  }
 0x1a7   :  { %5222 = vmatpush2.bf16.msra.mxu0 %v21240_v50  ;;  %v21288_v50 = vld [vmem:[#allocation5 + $0x2408] ss:$72 sps:$4 sm:$0xff]  }
 0x1a8   :  { %5265 = vmatpush2.bf16.msra.mxu1 %v21243_v51  ;;  %5277 = vmatprep.subr.bf16.mxu0 %v21248_v15  ;;  %v21291_v51 = vld [vmem:[#allocation5 + $0x2d08] ss:$72 sps:$4 sm:$0xff]   ;;  %v21296_v15 = vld [vmem:[#allocation5 + $0x2c7c] ss:$72 sps:$4 sm:$0xff]  }
 0x1a9   :  { %5320 = vmatprep.subr.bf16.mxu1 %v21251_v16  ;;  %v21299_v16 = vld [vmem:[#allocation5 + $0x357c] ss:$72 sps:$4 sm:$0xff]  }
 0x1aa   :  { %v4967_v35 = vpop.f32.mrf.mxu0  ;;  %5224 = vmatmul.mubr.bf16.vlgmr.msra.gmra.mxu0 %v24398_v20 }
 0x1ab   :  { %v5010_v36 = vpop.f32.mrf.mxu1  ;;  %5267 = vmatmul.mubr.bf16.vlgmr.msra.gmra.mxu1 %v24402_v21  ;;  %v4968_v37 = vadd.f32 %v4967_v35, %v24477_v63  ;;  %5278 = vmatpush1.bf16.msra.mxu0 %v21246_v18  ;;  %v21294_v18 = vld [vmem:[#allocation5 + $0x2c78] ss:$72 sps:$4 sm:$0xff]   ;;  %v21308_v35 = vld [vmem:[#allocation5 + $0x2b5c] ss:$72 sps:$4 sm:$0xff]  }
 0x1ac   :  { %5321 = vmatpush1.bf16.msra.mxu1 %v21249_v19  ;;  %v4969_v38 = vpop.f32.mrf.mxu0  ;;  %5279 = vmatprep.subr.bf16.mxu0 %v21254_v25  ;;  %v21297_v19 = vld [vmem:[#allocation5 + $0x3578] ss:$72 sps:$4 sm:$0xff]   ;;  %v21302_v25 = vld [vmem:[#allocation5 + $0x2bec] ss:$72 sps:$4 sm:$0xff]  }
 0x1ad   :  { %v5012_v39 = vpop.f32.mrf.mxu1  ;;  %5322 = vmatprep.subr.bf16.mxu1 %v21257_v26  ;;  %v24494_v52 = vadd.f32 %v5010_v36, %v4968_v37  ;;  %v4970_v55 = vadd.f32 %v4969_v38, %v24482_v14  ;;  %5309 = vmatprep.mubr.bf16.mxu0 %v24416_v33  ;;  %v21264_v14 = vld [vmem:[#allocation5 + $0x2648] ss:$72 sps:$4 sm:$0xff]   ;;  %v21305_v26 = vld [vmem:[#allocation5 + $0x34ec] ss:$72 sps:$4 sm:$0xff]   ;;  %v21311_v36 = vld [vmem:[#allocation5 + $0x345c] ss:$72 sps:$4 sm:$0xff]  }
 0x1ae   :  { %5352 = vmatprep.mubr.bf16.mxu1 %v24420_v34  ;;  %v4971_v31 = vpop.f32.mrf.mxu0  ;;  %v21306_v37 = vld [vmem:[#allocation5 + $0x2b58] ss:$72 sps:$4 sm:$0xff]  }
 0x1af   :  { %v24499_v63 = vadd.f32 %v5012_v39, %v4970_v55  ;;  %v4972_v57 = vadd.f32 %v4971_v31, %v24485_v12  ;;  %5280 = vmatpush1.bf16.msra.mxu0 %v21252_v27  ;;  %v5014_v58 = vpop.f32.mrf.mxu1  ;;  %v21270_v12 = vld [vmem:[#allocation5 + $0x25b8] ss:$72 sps:$4 sm:$0xff]   ;;  %v21300_v27 = vld [vmem:[#allocation5 + $0x2be8] ss:$72 sps:$4 sm:$0xff]   ;;  %v21314_v39 = vld [vmem:[#allocation5 + $0x2acc] ss:$72 sps:$4 sm:$0xff]  }
 0x1b0   :  { %5323 = vmatpush1.bf16.msra.mxu1 %v21255_v32  ;;  %5281 = vmatprep.subr.bf16.mxu0 %v21260_v40  ;;  %v21303_v32 = vld [vmem:[#allocation5 + $0x34e8] ss:$72 sps:$4 sm:$0xff]   ;;  %v21309_v38 = vld [vmem:[#allocation5 + $0x3458] ss:$72 sps:$4 sm:$0xff]   ;;  %v21317_v40 = vld [vmem:[#allocation5 + $0x33cc] ss:$72 sps:$4 sm:$0xff]  }
 0x1b1   :  { %5324 = vmatprep.subr.bf16.mxu1 %v21263_v43  ;;  %v24502_v61 = vadd.f32 %v5014_v58, %v4972_v57  ;;  %v21312_v43 = vld [vmem:[#allocation5 + $0x2ac8] ss:$72 sps:$4 sm:$0xff]   ;;  %v21318_v31 = vld [vmem:[#allocation5 + $0x2a38] ss:$72 sps:$4 sm:$0xff]   ;;  %v21326_v58 = vld [vmem:[#allocation5 + $0x29ac] ss:$72 sps:$4 sm:$0xff]  }
 0x1b2   :  { %v21315_v55 = vld [vmem:[#allocation5 + $0x33c8] ss:$72 sps:$4 sm:$0xff]   ;;  %v21321_v57 = vld [vmem:[#allocation5 + $0x3338] ss:$72 sps:$4 sm:$0xff]  }
 0x1b3   :  { %5282 = vmatpush1.bf16.msra.mxu0 %v21258_v29  ;;  %v21320_v29 = vld [vmem:[#allocation5 + $0x2a3c] ss:$72 sps:$4 sm:$0xff]  }
 0x1b4   :  { %5325 = vmatpush1.bf16.msra.mxu1 %v21261_v30  ;;  %5283 = vmatprep.subr.bf16.mxu0 %v21266_v59  ;;  %v21323_v30 = vld [vmem:[#allocation5 + $0x333c] ss:$72 sps:$4 sm:$0xff]   ;;  %v21329_v59 = vld [vmem:[#allocation5 + $0x32ac] ss:$72 sps:$4 sm:$0xff]  }
 0x1b5   :  { %5326 = vmatprep.subr.bf16.mxu1 %v21269_v60  ;;  %v21324_v60 = vld [vmem:[#allocation5 + $0x29a8] ss:$72 sps:$4 sm:$0xff]  }
 0x1b7   :  { %5284 = vmatpush1.bf16.msra.mxu0 %v21264_v14  ;;  %v21327_v14 = vld [vmem:[#allocation5 + $0x32a8] ss:$72 sps:$4 sm:$0xff]  }
 0x1b8   :  { %5327 = vmatpush1.bf16.msra.mxu1 %v21267_v62  ;;  %5285 = vmatprep.subr.bf16.mxu0 %v21272_v0  ;;  %v21332_v62 = vld [vmem:[#allocation5 + $0x291c] ss:$72 sps:$4 sm:$0xff]  }
 0x1b9   :  { %5328 = vmatprep.subr.bf16.mxu1 %v21275_v1  ;;  %v21335_v0 = vld [vmem:[#allocation5 + $0x321c] ss:$72 sps:$4 sm:$0xff]   ;;  %v21330_v1 = vld [vmem:[#allocation5 + $0x2918] ss:$72 sps:$4 sm:$0xff]  }
 0x1bb   :  { %5286 = vmatpush1.bf16.msra.mxu0 %v21270_v12  ;;  %v21333_v12 = vld [vmem:[#allocation5 + $0x3218] ss:$72 sps:$4 sm:$0xff]  }
 0x1bc   :  { %5329 = vmatpush1.bf16.msra.mxu1 %v21273_v2  ;;  %5287 = vmatprep.subr.bf16.mxu0 %v21278_v3  ;;  %v21338_v2 = vld [vmem:[#allocation5 + $0x288c] ss:$72 sps:$4 sm:$0xff]  }
 0x1bd   :  { %5330 = vmatprep.subr.bf16.mxu1 %v21281_v6  ;;  %v21341_v3 = vld [vmem:[#allocation5 + $0x318c] ss:$72 sps:$4 sm:$0xff]   ;;  %v21336_v6 = vld [vmem:[#allocation5 + $0x2888] ss:$72 sps:$4 sm:$0xff]  }
 0x1bf   :  { %5288 = vmatpush1.bf16.msra.mxu0 %v21276_v7  ;;  %v21339_v7 = vld [vmem:[#allocation5 + $0x3188] ss:$72 sps:$4 sm:$0xff]  }
 0x1c0   :  { %5331 = vmatpush1.bf16.msra.mxu1 %v21279_v10  ;;  %5289 = vmatprep.subr.bf16.mxu0 %v21284_v11  ;;  %v21344_v10 = vld [vmem:[#allocation5 + $0x39fc] ss:$72 sps:$4 sm:$0xff]  }
 0x1c1   :  { %5332 = vmatprep.subr.bf16.mxu1 %v21287_v17  ;;  %v21347_v11 = vld [vmem:[#allocation5 + $0x42fc] ss:$72 sps:$4 sm:$0xff]   ;;  %v21342_v17 = vld [vmem:[#allocation5 + $0x39f8] ss:$72 sps:$4 sm:$0xff]  }
 0x1c3   :  { %5290 = vmatpush1.bf16.msra.mxu0 %v21282_v13  ;;  %v21345_v13 = vld [vmem:[#allocation5 + $0x42f8] ss:$72 sps:$4 sm:$0xff]  }
 0x1c4   :  { %5333 = vmatpush1.bf16.msra.mxu1 %v21285_v46  ;;  %5291 = vmatprep.subr.bf16.mxu0 %v21290_v47  ;;  %v24504_v46 = vpop.f32.mrf.mxu0  ;;  %v24506_v47 = vpop.f32.mrf.mxu1 }
 0x1c5   :  { %5334 = vmatprep.subr.bf16.mxu1 %v21293_v24  ;;  %v21350_v24 = vld [vmem:[#allocation5 + $0x396c] ss:$72 sps:$4 sm:$0xff]  }
 0x1c7   :  { %5292 = vmatpush1.bf16.msra.mxu0 %v21288_v50  ;;  %v21353_v50 = vld [vmem:[#allocation5 + $0x426c] ss:$72 sps:$4 sm:$0xff]  }
 0x1c8   :  { %5335 = vmatpush1.bf16.msra.mxu1 %v21291_v51  ;;  %5293 = vmatprep.subr.bf16.mxu0 %v21296_v15  ;;  %v21348_v51 = vld [vmem:[#allocation5 + $0x3968] ss:$72 sps:$4 sm:$0xff]  }
 0x1c9   :  { %5336 = vmatprep.subr.bf16.mxu1 %v21299_v16  ;;  %v21351_v15 = vld [vmem:[#allocation5 + $0x4268] ss:$72 sps:$4 sm:$0xff]  }
 0x1cb   :  { %5294 = vmatpush2.bf16.msra.mxu0 %v21294_v18 }
 0x1cc   :  { %5337 = vmatpush2.bf16.msra.mxu1 %v21297_v19  ;;  %5295 = vmatprep.subr.bf16.mxu0 %v21302_v25 }
 0x1cd   :  { %5338 = vmatprep.subr.bf16.mxu1 %v21305_v26 }
 0x1cf   :  { %5296 = vmatpush2.bf16.msra.mxu0 %v21300_v27  ;;  %v21356_v27 = vld [vmem:[#allocation5 + $0x38dc] ss:$72 sps:$4 sm:$0xff]  }
 0x1d0   :  { %5339 = vmatpush2.bf16.msra.mxu1 %v21303_v32  ;;  %5297 = vmatprep.subr.bf16.mxu0 %v21308_v35  ;;  %v21359_v32 = vld [vmem:[#allocation5 + $0x41dc] ss:$72 sps:$4 sm:$0xff]  }
 0x1d1   :  { %5340 = vmatprep.subr.bf16.mxu1 %v21311_v36 }
 0x1d3   :  { %5298 = vmatpush2.bf16.msra.mxu0 %v21306_v37  ;;  %v21354_v37 = vld [vmem:[#allocation5 + $0x38d8] ss:$72 sps:$4 sm:$0xff]  }
 0x1d4   :  { %5341 = vmatpush2.bf16.msra.mxu1 %v21309_v38  ;;  %5299 = vmatprep.subr.bf16.mxu0 %v21314_v39  ;;  %v21357_v38 = vld [vmem:[#allocation5 + $0x41d8] ss:$72 sps:$4 sm:$0xff]  }
 0x1d5   :  { %5342 = vmatprep.subr.bf16.mxu1 %v21317_v40 }
 0x1d7   :  { %5300 = vmatpush2.bf16.msra.mxu0 %v21312_v43 }
 0x1d8   :  { %5343 = vmatpush2.bf16.msra.mxu1 %v21315_v55  ;;  %5301 = vmatprep.subr.bf16.mxu0 %v21320_v29  ;;  %v21362_v55 = vld [vmem:[#allocation5 + $0x384c] ss:$72 sps:$4 sm:$0xff]  }
 0x1d9   :  { %5344 = vmatprep.subr.bf16.mxu1 %v21323_v30  ;;  %v21365_v29 = vld [vmem:[#allocation5 + $0x414c] ss:$72 sps:$4 sm:$0xff]  }
 0x1db   :  { %5302 = vmatpush2.bf16.msra.mxu0 %v21318_v31  ;;  %v21363_v31 = vld [vmem:[#allocation5 + $0x4148] ss:$72 sps:$4 sm:$0xff]  }
 0x1dc   :  { %5345 = vmatpush2.bf16.msra.mxu1 %v21321_v57  ;;  %5303 = vmatprep.subr.bf16.mxu0 %v21326_v58  ;;  %v21368_v57 = vld [vmem:[#allocation5 + $0x37bc] ss:$72 sps:$4 sm:$0xff]  }
 0x1dd   :  { %5346 = vmatprep.subr.bf16.mxu1 %v21329_v59  ;;  %v21371_v58 = vld [vmem:[#allocation5 + $0x40bc] ss:$72 sps:$4 sm:$0xff]   ;;  %v21369_v59 = vld [vmem:[#allocation5 + $0x40b8] ss:$72 sps:$4 sm:$0xff]  }
 0x1df   :  { %5304 = vmatpush2.bf16.msra.mxu0 %v21324_v60  ;;  %v21374_v60 = vld [vmem:[#allocation5 + $0x372c] ss:$72 sps:$4 sm:$0xff]  }
 0x1e0   :  { %5347 = vmatpush2.bf16.msra.mxu1 %v21327_v14  ;;  %5305 = vmatprep.subr.bf16.mxu0 %v21332_v62  ;;  %v21377_v14 = vld [vmem:[#allocation5 + $0x402c] ss:$72 sps:$4 sm:$0xff]   ;;  %v21372_v62 = vld [vmem:[#allocation5 + $0x3728] ss:$72 sps:$4 sm:$0xff]  }
 0x1e1   :  { %5348 = vmatprep.subr.bf16.mxu1 %v21335_v0  ;;  %v21375_v0 = vld [vmem:[#allocation5 + $0x4028] ss:$72 sps:$4 sm:$0xff]  }
 0x1e3   :  { %5306 = vmatpush2.bf16.msra.mxu0 %v21330_v1  ;;  %v21380_v1 = vld [vmem:[#allocation5 + $0x369c] ss:$72 sps:$4 sm:$0xff]  }
 0x1e4   :  { %5349 = vmatpush2.bf16.msra.mxu1 %v21333_v12  ;;  %5307 = vmatprep.subr.bf16.mxu0 %v21338_v2  ;;  %v21383_v12 = vld [vmem:[#allocation5 + $0x3f9c] ss:$72 sps:$4 sm:$0xff]   ;;  %v21378_v2 = vld [vmem:[#allocation5 + $0x3698] ss:$72 sps:$4 sm:$0xff]  }
 0x1e5   :  { %5350 = vmatprep.subr.bf16.mxu1 %v21341_v3  ;;  %v21381_v3 = vld [vmem:[#allocation5 + $0x3f98] ss:$72 sps:$4 sm:$0xff]  }
 0x1e7   :  { %5308 = vmatpush2.bf16.msra.mxu0 %v21336_v6  ;;  %v21386_v6 = vld [vmem:[#allocation5 + $0x360c] ss:$72 sps:$4 sm:$0xff]  }
 0x1e8   :  { %5351 = vmatpush2.bf16.msra.mxu1 %v21339_v7  ;;  %5363 = vmatprep.subr.bf16.mxu0 %v21344_v10  ;;  %v21389_v7 = vld [vmem:[#allocation5 + $0x3f0c] ss:$72 sps:$4 sm:$0xff]   ;;  %v21384_v10 = vld [vmem:[#allocation5 + $0x3608] ss:$72 sps:$4 sm:$0xff]  }
 0x1e9   :  { %5406 = vmatprep.subr.bf16.mxu1 %v21347_v11  ;;  %v21387_v11 = vld [vmem:[#allocation5 + $0x3f08] ss:$72 sps:$4 sm:$0xff]  }
 0x1ea   :  { %v5053_v16 = vpop.f32.mrf.mxu0  ;;  %5310 = vmatmul.mubr.bf16.vlgmr.msra.gmra.mxu0 %v24430_v48 }
 0x1eb   :  { %v5096_v18 = vpop.f32.mrf.mxu1  ;;  %5353 = vmatmul.mubr.bf16.vlgmr.msra.gmra.mxu1 %v24434_v49  ;;  %v5054_v19 = vadd.f32 %v5053_v16, %v24494_v52  ;;  %5364 = vmatpush1.bf16.msra.mxu0 %v21342_v17  ;;  %v21392_v17 = vld [vmem:[#allocation5 + $0x3e7c] ss:$72 sps:$4 sm:$0xff]   ;;  %v21396_v16 = vld [vmem:[#allocation5 + $0x3de8] ss:$72 sps:$4 sm:$0xff]  }
 0x1ec   :  { %5407 = vmatpush1.bf16.msra.mxu1 %v21345_v13  ;;  %v5055_v25 = vpop.f32.mrf.mxu0  ;;  %5365 = vmatprep.subr.bf16.mxu0 %v21350_v24  ;;  %v21395_v13 = vld [vmem:[#allocation5 + $0x477c] ss:$72 sps:$4 sm:$0xff]   ;;  %v21390_v24 = vld [vmem:[#allocation5 + $0x3e78] ss:$72 sps:$4 sm:$0xff]  }
 0x1ed   :  { %v5098_v26 = vpop.f32.mrf.mxu1  ;;  %5408 = vmatprep.subr.bf16.mxu1 %v21353_v50  ;;  %v24511_v35 = vadd.f32 %v5096_v18, %v5054_v19  ;;  %v5056_v36 = vadd.f32 %v5055_v25, %v24499_v63  ;;  %5395 = vmatprep.mubr.bf16.mxu0 %v24442_v56  ;;  %v21360_v63 = vld [vmem:[#allocation5 + $0x3848] ss:$72 sps:$4 sm:$0xff]   ;;  %v21393_v50 = vld [vmem:[#allocation5 + $0x4778] ss:$72 sps:$4 sm:$0xff]   ;;  %v21404_v19 = vld [vmem:[#allocation5 + $0x3d5c] ss:$72 sps:$4 sm:$0xff]  }
 0x1ee   :  { %5438 = vmatprep.mubr.bf16.mxu1 %v24446_v28  ;;  %v5057_v39 = vpop.f32.mrf.mxu0  ;;  %v21399_v18 = vld [vmem:[#allocation5 + $0x46e8] ss:$72 sps:$4 sm:$0xff]   ;;  %v21407_v25 = vld [vmem:[#allocation5 + $0x465c] ss:$72 sps:$4 sm:$0xff]  }
 0x1ef   :  { %v24516_v52 = vadd.f32 %v5098_v26, %v5056_v36  ;;  %v5058_v40 = vadd.f32 %v5057_v39, %v24502_v61  ;;  %5366 = vmatpush1.bf16.msra.mxu0 %v21348_v51  ;;  %v5100_v43 = vpop.f32.mrf.mxu1  ;;  %v21366_v61 = vld [vmem:[#allocation5 + $0x37b8] ss:$72 sps:$4 sm:$0xff]   ;;  %v21398_v51 = vld [vmem:[#allocation5 + $0x3dec] ss:$72 sps:$4 sm:$0xff]   ;;  %v21416_v39 = vld [vmem:[#allocation5 + $0x3c3c] ss:$72 sps:$4 sm:$0xff]  }
 0x1f0   :  { %5409 = vmatpush1.bf16.msra.mxu1 %v21351_v15  ;;  %5367 = vmatprep.subr.bf16.mxu0 %v21356_v27  ;;  %v21401_v15 = vld [vmem:[#allocation5 + $0x46ec] ss:$72 sps:$4 sm:$0xff]   ;;  %v21402_v26 = vld [vmem:[#allocation5 + $0x3d58] ss:$72 sps:$4 sm:$0xff]  }
 0x1f1   :  { %5410 = vmatprep.subr.bf16.mxu1 %v21359_v32  ;;  %v24519_v30 = vadd.f32 %v5100_v43, %v5058_v40  ;;  %v21405_v27 = vld [vmem:[#allocation5 + $0x4658] ss:$72 sps:$4 sm:$0xff]   ;;  %v21410_v32 = vld [vmem:[#allocation5 + $0x3ccc] ss:$72 sps:$4 sm:$0xff]   ;;  %v21419_v40 = vld [vmem:[#allocation5 + $0x453c] ss:$72 sps:$4 sm:$0xff]  }
 0x1f2   :  { %v21413_v36 = vld [vmem:[#allocation5 + $0x45cc] ss:$72 sps:$4 sm:$0xff]   ;;  %v21414_v43 = vld [vmem:[#allocation5 + $0x3c38] ss:$72 sps:$4 sm:$0xff]  }
 0x1f3   :  { %5368 = vmatpush1.bf16.msra.mxu0 %v21354_v37  ;;  %v21408_v37 = vld [vmem:[#allocation5 + $0x3cc8] ss:$72 sps:$4 sm:$0xff]  }
 0x1f4   :  { %5411 = vmatpush1.bf16.msra.mxu1 %v21357_v38  ;;  %5369 = vmatprep.subr.bf16.mxu0 %v21362_v55  ;;  %v21411_v38 = vld [vmem:[#allocation5 + $0x45c8] ss:$72 sps:$4 sm:$0xff]   ;;  %v21417_v55 = vld [vmem:[#allocation5 + $0x4538] ss:$72 sps:$4 sm:$0xff]  }
 0x1f5   :  { %5412 = vmatprep.subr.bf16.mxu1 %v21365_v29  ;;  %v21422_v29 = vld [vmem:[#allocation5 + $0x3bac] ss:$72 sps:$4 sm:$0xff]  }
 0x1f7   :  { %5370 = vmatpush1.bf16.msra.mxu0 %v21360_v63  ;;  %v21425_v63 = vld [vmem:[#allocation5 + $0x44ac] ss:$72 sps:$4 sm:$0xff]  }
 0x1f8   :  { %5413 = vmatpush1.bf16.msra.mxu1 %v21363_v31  ;;  %5371 = vmatprep.subr.bf16.mxu0 %v21368_v57  ;;  %v21420_v31 = vld [vmem:[#allocation5 + $0x3ba8] ss:$72 sps:$4 sm:$0xff]  }
 0x1f9   :  { %5414 = vmatprep.subr.bf16.mxu1 %v21371_v58  ;;  %v21423_v57 = vld [vmem:[#allocation5 + $0x44a8] ss:$72 sps:$4 sm:$0xff]   ;;  %v21428_v58 = vld [vmem:[#allocation5 + $0x3b1c] ss:$72 sps:$4 sm:$0xff]  }
 0x1fb   :  { %5372 = vmatpush1.bf16.msra.mxu0 %v21366_v61  ;;  %v21431_v61 = vld [vmem:[#allocation5 + $0x441c] ss:$72 sps:$4 sm:$0xff]  }
 0x1fc   :  { %5415 = vmatpush1.bf16.msra.mxu1 %v21369_v59  ;;  %5373 = vmatprep.subr.bf16.mxu0 %v21374_v60  ;;  %v21426_v59 = vld [vmem:[#allocation5 + $0x3b18] ss:$72 sps:$4 sm:$0xff]  }
 0x1fd   :  { %5416 = vmatprep.subr.bf16.mxu1 %v21377_v14  ;;  %v21429_v60 = vld [vmem:[#allocation5 + $0x4418] ss:$72 sps:$4 sm:$0xff]   ;;  %v21434_v14 = vld [vmem:[#allocation5 + $0x3a8c] ss:$72 sps:$4 sm:$0xff]  }
 0x1ff   :  { %5374 = vmatpush1.bf16.msra.mxu0 %v21372_v62  ;;  %v21437_v62 = vld [vmem:[#allocation5 + $0x438c] ss:$72 sps:$4 sm:$0xff]  }
 0x200   :  { %5417 = vmatpush1.bf16.msra.mxu1 %v21375_v0  ;;  %5375 = vmatprep.subr.bf16.mxu0 %v21380_v1  ;;  %v21432_v0 = vld [vmem:[#allocation5 + $0x3a88] ss:$72 sps:$4 sm:$0xff]  }
 0x201   :  { %5418 = vmatprep.subr.bf16.mxu1 %v21383_v12  ;;  %v21435_v1 = vld [vmem:[#allocation5 + $0x4388] ss:$72 sps:$4 sm:$0xff]   ;;  %v21440_v12 = vld [vmem:[#allocation5 + $0x404] ss:$72 sps:$4 sm:$0xff]  }
 0x203   :  { %5376 = vmatpush1.bf16.msra.mxu0 %v21378_v2  ;;  %v21443_v2 = vld [vmem:[#allocation5 + $0xd04] ss:$72 sps:$4 sm:$0xff]  }
 0x204   :  { %5419 = vmatpush1.bf16.msra.mxu1 %v21381_v3  ;;  %5377 = vmatprep.subr.bf16.mxu0 %v21386_v6  ;;  %v21438_v3 = vld [vmem:[#allocation5 + $0x400] ss:$72 sps:$4 sm:$0xff]  }
 0x205   :  { %5420 = vmatprep.subr.bf16.mxu1 %v21389_v7  ;;  %v21441_v6 = vld [vmem:[#allocation5 + $0xd00] ss:$72 sps:$4 sm:$0xff]   ;;  %v24521_v7 = vpop.f32.mrf.mxu0 }
 0x207   :  { %5378 = vmatpush1.bf16.msra.mxu0 %v21384_v10  ;;  %v24523_v10 = vpop.f32.mrf.mxu1 }
 0x208   :  { %5421 = vmatpush1.bf16.msra.mxu1 %v21387_v11  ;;  %5379 = vmatprep.subr.bf16.mxu0 %v21392_v17  ;;  %v21446_v11 = vld [vmem:[#allocation5 + $0x374] ss:$72 sps:$4 sm:$0xff]  }
 0x209   :  { %5422 = vmatprep.subr.bf16.mxu1 %v21395_v13  ;;  %v21449_v17 = vld [vmem:[#allocation5 + $0xc74] ss:$72 sps:$4 sm:$0xff]   ;;  %v21444_v13 = vld [vmem:[#allocation5 + $0x370] ss:$72 sps:$4 sm:$0xff]  }
 0x20b   :  { %5380 = vmatpush2.bf16.msra.mxu0 %v21390_v24  ;;  %v21447_v24 = vld [vmem:[#allocation5 + $0xc70] ss:$72 sps:$4 sm:$0xff]  }
 0x20c   :  { %5423 = vmatpush2.bf16.msra.mxu1 %v21393_v50  ;;  %5381 = vmatprep.subr.bf16.mxu0 %v21398_v51 }
 0x20d   :  { %5424 = vmatprep.subr.bf16.mxu1 %v21401_v15 }
 0x20f   :  { %5382 = vmatpush2.bf16.msra.mxu0 %v21396_v16 }
 0x210   :  { %5425 = vmatpush2.bf16.msra.mxu1 %v21399_v18  ;;  %5383 = vmatprep.subr.bf16.mxu0 %v21404_v19  ;;  %v21452_v19 = vld [vmem:[#allocation5 + $0x2e4] ss:$72 sps:$4 sm:$0xff]  }
 0x211   :  { %5426 = vmatprep.subr.bf16.mxu1 %v21407_v25  ;;  %v21455_v25 = vld [vmem:[#allocation5 + $0xbe4] ss:$72 sps:$4 sm:$0xff]  }
 0x213   :  { %5384 = vmatpush2.bf16.msra.mxu0 %v21402_v26 }
 0x214   :  { %5427 = vmatpush2.bf16.msra.mxu1 %v21405_v27  ;;  %5385 = vmatprep.subr.bf16.mxu0 %v21410_v32  ;;  %v21450_v27 = vld [vmem:[#allocation5 + $0x2e0] ss:$72 sps:$4 sm:$0xff]  }
 0x215   :  { %5428 = vmatprep.subr.bf16.mxu1 %v21413_v36  ;;  %v21453_v32 = vld [vmem:[#allocation5 + $0xbe0] ss:$72 sps:$4 sm:$0xff]  }
 0x217   :  { %5386 = vmatpush2.bf16.msra.mxu0 %v21408_v37 }
 0x218   :  { %5429 = vmatpush2.bf16.msra.mxu1 %v21411_v38  ;;  %5387 = vmatprep.subr.bf16.mxu0 %v21416_v39  ;;  %v21458_v39 = vld [vmem:[#allocation5 + $0x254] ss:$72 sps:$4 sm:$0xff]  }
 0x219   :  { %5430 = vmatprep.subr.bf16.mxu1 %v21419_v40  ;;  %v21461_v40 = vld [vmem:[#allocation5 + $0xb54] ss:$72 sps:$4 sm:$0xff]  }
 0x21b   :  { %5388 = vmatpush2.bf16.msra.mxu0 %v21414_v43  ;;  %v21456_v43 = vld [vmem:[#allocation5 + $0x250] ss:$72 sps:$4 sm:$0xff]  }
 0x21c   :  { %5431 = vmatpush2.bf16.msra.mxu1 %v21417_v55  ;;  %5389 = vmatprep.subr.bf16.mxu0 %v21422_v29  ;;  %v21459_v55 = vld [vmem:[#allocation5 + $0xb50] ss:$72 sps:$4 sm:$0xff]   ;;  %v21464_v29 = vld [vmem:[#allocation5 + $0x1c4] ss:$72 sps:$4 sm:$0xff]  }
 0x21d   :  { %5432 = vmatprep.subr.bf16.mxu1 %v21425_v63  ;;  %v21467_v63 = vld [vmem:[#allocation5 + $0xac4] ss:$72 sps:$4 sm:$0xff]  }
 0x21f   :  { %5390 = vmatpush2.bf16.msra.mxu0 %v21420_v31  ;;  %v21462_v31 = vld [vmem:[#allocation5 + $0x1c0] ss:$72 sps:$4 sm:$0xff]  }
 0x220   :  { %5433 = vmatpush2.bf16.msra.mxu1 %v21423_v57  ;;  %5391 = vmatprep.subr.bf16.mxu0 %v21428_v58  ;;  %v21465_v57 = vld [vmem:[#allocation5 + $0xac0] ss:$72 sps:$4 sm:$0xff]   ;;  %v21470_v58 = vld [vmem:[#allocation5 + $0x134] ss:$72 sps:$4 sm:$0xff]  }
 0x221   :  { %5434 = vmatprep.subr.bf16.mxu1 %v21431_v61  ;;  %v21473_v61 = vld [vmem:[#allocation5 + $0xa34] ss:$72 sps:$4 sm:$0xff]  }
 0x223   :  { %5392 = vmatpush2.bf16.msra.mxu0 %v21426_v59  ;;  %v21468_v59 = vld [vmem:[#allocation5 + $0x130] ss:$72 sps:$4 sm:$0xff]  }
 0x224   :  { %5435 = vmatpush2.bf16.msra.mxu1 %v21429_v60  ;;  %5393 = vmatprep.subr.bf16.mxu0 %v21434_v14  ;;  %v21471_v60 = vld [vmem:[#allocation5 + $0xa30] ss:$72 sps:$4 sm:$0xff]   ;;  %v21476_v14 = vld [vmem:[#allocation5 + $0xa4] ss:$72 sps:$4 sm:$0xff]  }
 0x225   :  { %5436 = vmatprep.subr.bf16.mxu1 %v21437_v62  ;;  %v21479_v62 = vld [vmem:[#allocation5 + $0x9a4] ss:$72 sps:$4 sm:$0xff]  }
 0x227   :  { %5394 = vmatpush2.bf16.msra.mxu0 %v21432_v0  ;;  %v21474_v0 = vld [vmem:[#allocation5 + $0xa0] ss:$72 sps:$4 sm:$0xff]  }
 0x228   :  { %5437 = vmatpush2.bf16.msra.mxu1 %v21435_v1  ;;  %5449 = vmatprep.subr.bf16.mxu0 %v21440_v12  ;;  %v21477_v1 = vld [vmem:[#allocation5 + $0x9a0] ss:$72 sps:$4 sm:$0xff]   ;;  %v21482_v12 = vld [vmem:[#allocation5 + $0x14] ss:$72 sps:$4 sm:$0xff]  }
 0x229   :  { %5492 = vmatprep.subr.bf16.mxu1 %v21443_v2  ;;  %v21485_v2 = vld [vmem:[#allocation5 + $0x914] ss:$72 sps:$4 sm:$0xff]  }
 0x22a   :  { %v5139_v50 = vpop.f32.mrf.mxu0  ;;  %5396 = vmatmul.mubr.bf16.vlgmr.msra.gmra.mxu0 %v24454_v4 }
 0x22b   :  { %v5182_v51 = vpop.f32.mrf.mxu1  ;;  %5439 = vmatmul.mubr.bf16.vlgmr.msra.gmra.mxu1 %v24458_v5  ;;  %5450 = vmatpush1.bf16.msra.mxu0 %v21438_v3  ;;  %v21480_v3 = vld [vmem:[#allocation5 + $0x10] ss:$72 sps:$4 sm:$0xff]  }
 0x22c   :  { %v24527_v15 = vadd.f32 %v5182_v51, %v5139_v50  ;;  %5493 = vmatpush1.bf16.msra.mxu1 %v21441_v6  ;;  %v5141_v16 = vpop.f32.mrf.mxu0  ;;  %5451 = vmatprep.subr.bf16.mxu0 %v21446_v11  ;;  %v21483_v6 = vld [vmem:[#allocation5 + $0x910] ss:$72 sps:$4 sm:$0xff]   ;;  %v21488_v11 = vld [vmem:[#allocation5 + $0x884] ss:$72 sps:$4 sm:$0xff]   ;;  %v21494_v50 = vld [vmem:[#allocation5 + $0x7f4] ss:$72 sps:$4 sm:$0xff]  }
 0x22d   :  { %v5184_v18 = vpop.f32.mrf.mxu1  ;;  %5494 = vmatprep.subr.bf16.mxu1 %v21449_v17  ;;  %5481 = vmatprep.mubr.bf16.mxu0 %v24366_v53  ;;  %v21491_v17 = vld [vmem:[#allocation5 + $0x1184] ss:$72 sps:$4 sm:$0xff]   ;;  %v21497_v51 = vld [vmem:[#allocation5 + $0x10f4] ss:$72 sps:$4 sm:$0xff]  }
 0x22e   :  { %v24529_v26 = vadd.f32 %v5184_v18, %v5141_v16  ;;  %5524 = vmatprep.mubr.bf16.mxu1 %v24368_v54  ;;  %v5143_v36 = vpop.f32.mrf.mxu0  ;;  %v21492_v16 = vld [vmem:[#allocation5 + $0x7f0] ss:$72 sps:$4 sm:$0xff]  }
 0x22f   :  { %v5186_v37 = vpop.f32.mrf.mxu1  ;;  %5452 = vmatpush1.bf16.msra.mxu0 %v21444_v13  ;;  %v21486_v13 = vld [vmem:[#allocation5 + $0x880] ss:$72 sps:$4 sm:$0xff]   ;;  %v21495_v18 = vld [vmem:[#allocation5 + $0x10f0] ss:$72 sps:$4 sm:$0xff]  }
 0x230   :  { %v24533_v38 = vadd.f32 %v5186_v37, %v5143_v36  ;;  %5495 = vmatpush1.bf16.msra.mxu1 %v21447_v24  ;;  %5453 = vmatprep.subr.bf16.mxu0 %v21452_v19  ;;  %v21489_v24 = vld [vmem:[#allocation5 + $0x1180] ss:$72 sps:$4 sm:$0xff]   ;;  %v21500_v19 = vld [vmem:[#allocation5 + $0x764] ss:$72 sps:$4 sm:$0xff]   ;;  %v21506_v36 = vld [vmem:[#allocation5 + $0x6d4] ss:$72 sps:$4 sm:$0xff]  }
 0x231   :  { %5496 = vmatprep.subr.bf16.mxu1 %v21455_v25  ;;  %v21503_v25 = vld [vmem:[#allocation5 + $0x1064] ss:$72 sps:$4 sm:$0xff]   ;;  %v21509_v37 = vld [vmem:[#allocation5 + $0xfd4] ss:$72 sps:$4 sm:$0xff]  }
 0x233   :  { %5454 = vmatpush1.bf16.msra.mxu0 %v21450_v27  ;;  %v21498_v27 = vld [vmem:[#allocation5 + $0x760] ss:$72 sps:$4 sm:$0xff]  }
 0x234   :  { %5497 = vmatpush1.bf16.msra.mxu1 %v21453_v32  ;;  %5455 = vmatprep.subr.bf16.mxu0 %v21458_v39  ;;  %v21501_v32 = vld [vmem:[#allocation5 + $0x1060] ss:$72 sps:$4 sm:$0xff]   ;;  %v21504_v39 = vld [vmem:[#allocation5 + $0x6d0] ss:$72 sps:$4 sm:$0xff]  }
 0x235   :  { %5498 = vmatprep.subr.bf16.mxu1 %v21461_v40  ;;  %v21507_v40 = vld [vmem:[#allocation5 + $0xfd0] ss:$72 sps:$4 sm:$0xff]  }
 0x237   :  { %5456 = vmatpush1.bf16.msra.mxu0 %v21456_v43  ;;  %v21512_v43 = vld [vmem:[#allocation5 + $0x644] ss:$72 sps:$4 sm:$0xff]  }
 0x238   :  { %5499 = vmatpush1.bf16.msra.mxu1 %v21459_v55  ;;  %5457 = vmatprep.subr.bf16.mxu0 %v21464_v29  ;;  %v21515_v55 = vld [vmem:[#allocation5 + $0xf44] ss:$72 sps:$4 sm:$0xff]   ;;  %v21510_v29 = vld [vmem:[#allocation5 + $0x640] ss:$72 sps:$4 sm:$0xff]  }
 0x239   :  { %5500 = vmatprep.subr.bf16.mxu1 %v21467_v63  ;;  %v21513_v63 = vld [vmem:[#allocation5 + $0xf40] ss:$72 sps:$4 sm:$0xff]  }
 0x23b   :  { %5458 = vmatpush1.bf16.msra.mxu0 %v21462_v31  ;;  %v21518_v31 = vld [vmem:[#allocation5 + $0x5b4] ss:$72 sps:$4 sm:$0xff]  }
 0x23c   :  { %5501 = vmatpush1.bf16.msra.mxu1 %v21465_v57  ;;  %5459 = vmatprep.subr.bf16.mxu0 %v21470_v58  ;;  %v21521_v57 = vld [vmem:[#allocation5 + $0xeb4] ss:$72 sps:$4 sm:$0xff]   ;;  %v21516_v58 = vld [vmem:[#allocation5 + $0x5b0] ss:$72 sps:$4 sm:$0xff]  }
 0x23d   :  { %5502 = vmatprep.subr.bf16.mxu1 %v21473_v61  ;;  %v21519_v61 = vld [vmem:[#allocation5 + $0xeb0] ss:$72 sps:$4 sm:$0xff]  }
 0x23f   :  { %5460 = vmatpush1.bf16.msra.mxu0 %v21468_v59  ;;  %v21524_v59 = vld [vmem:[#allocation5 + $0x524] ss:$72 sps:$4 sm:$0xff]  }
 0x240   :  { %5503 = vmatpush1.bf16.msra.mxu1 %v21471_v60  ;;  %5461 = vmatprep.subr.bf16.mxu0 %v21476_v14  ;;  %v21527_v60 = vld [vmem:[#allocation5 + $0xe24] ss:$72 sps:$4 sm:$0xff]   ;;  %v21522_v14 = vld [vmem:[#allocation5 + $0x520] ss:$72 sps:$4 sm:$0xff]  }
 0x241   :  { %5504 = vmatprep.subr.bf16.mxu1 %v21479_v62  ;;  %v21525_v62 = vld [vmem:[#allocation5 + $0xe20] ss:$72 sps:$4 sm:$0xff]  }
 0x243   :  { %5462 = vmatpush1.bf16.msra.mxu0 %v21474_v0  ;;  %v21530_v0 = vld [vmem:[#allocation5 + $0x494] ss:$72 sps:$4 sm:$0xff]  }
 0x244   :  { %5505 = vmatpush1.bf16.msra.mxu1 %v21477_v1  ;;  %5463 = vmatprep.subr.bf16.mxu0 %v21482_v12  ;;  %v21533_v1 = vld [vmem:[#allocation5 + $0xd94] ss:$72 sps:$4 sm:$0xff]   ;;  %v21528_v12 = vld [vmem:[#allocation5 + $0x490] ss:$72 sps:$4 sm:$0xff]  }
 0x245   :  { %5506 = vmatprep.subr.bf16.mxu1 %v21485_v2  ;;  %v21531_v2 = vld [vmem:[#allocation5 + $0xd90] ss:$72 sps:$4 sm:$0xff]  }
 0x247   :  { %5464 = vmatpush1.bf16.msra.mxu0 %v21480_v3  ;;  %v21536_v3 = vld [vmem:[#allocation5 + $0x1604] ss:$72 sps:$4 sm:$0xff]  }
 0x248   :  { %5507 = vmatpush1.bf16.msra.mxu1 %v21483_v6  ;;  %5465 = vmatprep.subr.bf16.mxu0 %v21488_v11  ;;  %v21539_v6 = vld [vmem:[#allocation5 + $0x1f04] ss:$72 sps:$4 sm:$0xff]   ;;  %v21534_v11 = vld [vmem:[#allocation5 + $0x1600] ss:$72 sps:$4 sm:$0xff]  }
 0x249   :  { %5508 = vmatprep.subr.bf16.mxu1 %v21491_v17  ;;  %v21537_v17 = vld [vmem:[#allocation5 + $0x1f00] ss:$72 sps:$4 sm:$0xff]  }
 0x24b   :  { %5466 = vmatpush2.bf16.msra.mxu0 %v21486_v13  ;;  %v24535_v13 = vpop.f32.mrf.mxu0 }
 0x24c   :  { %5509 = vmatpush2.bf16.msra.mxu1 %v21489_v24  ;;  %5467 = vmatprep.subr.bf16.mxu0 %v21494_v50  ;;  %v24537_v24 = vpop.f32.mrf.mxu1  ;;  %v21542_v50 = vld [vmem:[#allocation5 + $0x1574] ss:$72 sps:$4 sm:$0xff]  }
 0x24d   :  { %5510 = vmatprep.subr.bf16.mxu1 %v21497_v51  ;;  %v21545_v51 = vld [vmem:[#allocation5 + $0x1e74] ss:$72 sps:$4 sm:$0xff]  }
 0x24f   :  { %5468 = vmatpush2.bf16.msra.mxu0 %v21492_v16  ;;  %v21540_v16 = vld [vmem:[#allocation5 + $0x1570] ss:$72 sps:$4 sm:$0xff]  }
 0x250   :  { %5511 = vmatpush2.bf16.msra.mxu1 %v21495_v18  ;;  %5469 = vmatprep.subr.bf16.mxu0 %v21500_v19  ;;  %v21543_v18 = vld [vmem:[#allocation5 + $0x1e70] ss:$72 sps:$4 sm:$0xff]  }
 0x251   :  { %5512 = vmatprep.subr.bf16.mxu1 %v21503_v25 }
 0x253   :  { %5470 = vmatpush2.bf16.msra.mxu0 %v21498_v27 }
 0x254   :  { %5513 = vmatpush2.bf16.msra.mxu1 %v21501_v32  ;;  %5471 = vmatprep.subr.bf16.mxu0 %v21506_v36 }
 0x255   :  { %5514 = vmatprep.subr.bf16.mxu1 %v21509_v37  ;;  %v21548_v37 = vld [vmem:[#allocation5 + $0x14e4] ss:$72 sps:$4 sm:$0xff]  }
 0x257   :  { %5472 = vmatpush2.bf16.msra.mxu0 %v21504_v39  ;;  %v21551_v39 = vld [vmem:[#allocation5 + $0x1de4] ss:$72 sps:$4 sm:$0xff]  }
 0x258   :  { %5515 = vmatpush2.bf16.msra.mxu1 %v21507_v40  ;;  %5473 = vmatprep.subr.bf16.mxu0 %v21512_v43 }
 0x259   :  { %5516 = vmatprep.subr.bf16.mxu1 %v21515_v55  ;;  %v21546_v55 = vld [vmem:[#allocation5 + $0x14e0] ss:$72 sps:$4 sm:$0xff]  }
 0x25b   :  { %5474 = vmatpush2.bf16.msra.mxu0 %v21510_v29  ;;  %v21549_v29 = vld [vmem:[#allocation5 + $0x1de0] ss:$72 sps:$4 sm:$0xff]  }
 0x25c   :  { %5517 = vmatpush2.bf16.msra.mxu1 %v21513_v63  ;;  %5475 = vmatprep.subr.bf16.mxu0 %v21518_v31 }
 0x25d   :  { %5518 = vmatprep.subr.bf16.mxu1 %v21521_v57 }
 0x25f   :  { %5476 = vmatpush2.bf16.msra.mxu0 %v21516_v58  ;;  %v21554_v58 = vld [vmem:[#allocation5 + $0x1454] ss:$72 sps:$4 sm:$0xff]  }
 0x260   :  { %5519 = vmatpush2.bf16.msra.mxu1 %v21519_v61  ;;  %5477 = vmatprep.subr.bf16.mxu0 %v21524_v59  ;;  %v21557_v61 = vld [vmem:[#allocation5 + $0x1d54] ss:$72 sps:$4 sm:$0xff]  }
 0x261   :  { %5520 = vmatprep.subr.bf16.mxu1 %v21527_v60  ;;  %v21555_v60 = vld [vmem:[#allocation5 + $0x1d50] ss:$72 sps:$4 sm:$0xff]  }
 0x263   :  { %5478 = vmatpush2.bf16.msra.mxu0 %v21522_v14  ;;  %v21560_v14 = vld [vmem:[#allocation5 + $0x13c4] ss:$72 sps:$4 sm:$0xff]  }
 0x264   :  { %5521 = vmatpush2.bf16.msra.mxu1 %v21525_v62  ;;  %5479 = vmatprep.subr.bf16.mxu0 %v21530_v0  ;;  %v21563_v62 = vld [vmem:[#allocation5 + $0x1cc4] ss:$72 sps:$4 sm:$0xff]   ;;  %v21558_v0 = vld [vmem:[#allocation5 + $0x13c0] ss:$72 sps:$4 sm:$0xff]  }
 0x265   :  { %5522 = vmatprep.subr.bf16.mxu1 %v21533_v1  ;;  %v21561_v1 = vld [vmem:[#allocation5 + $0x1cc0] ss:$72 sps:$4 sm:$0xff]  }
 0x267   :  { %5480 = vmatpush2.bf16.msra.mxu0 %v21528_v12  ;;  %v21569_v12 = vld [vmem:[#allocation5 + $0x1c34] ss:$72 sps:$4 sm:$0xff]  }
 0x268   :  { %5523 = vmatpush2.bf16.msra.mxu1 %v21531_v2  ;;  %5535 = vmatprep.subr.bf16.mxu0 %v21536_v3  ;;  %v21564_v2 = vld [vmem:[#allocation5 + $0x1330] ss:$72 sps:$4 sm:$0xff]  }
 0x269   :  { %5578 = vmatprep.subr.bf16.mxu1 %v21539_v6  ;;  %v21567_v3 = vld [vmem:[#allocation5 + $0x1c30] ss:$72 sps:$4 sm:$0xff]   ;;  %v21572_v6 = vld [vmem:[#allocation5 + $0x12a4] ss:$72 sps:$4 sm:$0xff]  }
 0x26a   :  { %v5225_v19 = vpop.f32.mrf.mxu0  ;;  %5482 = vmatmul.mubr.bf16.vlgmr.msra.gmra.mxu0 %v24372_v8 }
 0x26b   :  { %v5268_v25 = vpop.f32.mrf.mxu1  ;;  %5525 = vmatmul.mubr.bf16.vlgmr.msra.gmra.mxu1 %v24374_v9  ;;  %v5226_v27 = vadd.f32 %v5225_v19, %v24527_v15  ;;  %5536 = vmatpush1.bf16.msra.mxu0 %v21534_v11  ;;  %v21575_v11 = vld [vmem:[#allocation5 + $0x1ba4] ss:$72 sps:$4 sm:$0xff]   ;;  %v21579_v19 = vld [vmem:[#allocation5 + $0x1b10] ss:$72 sps:$4 sm:$0xff]  }
 0x26c   :  { %5579 = vmatpush1.bf16.msra.mxu1 %v21537_v17  ;;  %v5227_v32 = vpop.f32.mrf.mxu0  ;;  %5537 = vmatprep.subr.bf16.mxu0 %v21542_v50  ;;  %v21570_v17 = vld [vmem:[#allocation5 + $0x12a0] ss:$72 sps:$4 sm:$0xff]  }
 0x26d   :  { %v5270_v36 = vpop.f32.mrf.mxu1  ;;  %5580 = vmatprep.subr.bf16.mxu1 %v21545_v51  ;;  %v24542_v40 = vadd.f32 %v5268_v25, %v5226_v27  ;;  %v5228_v43 = vadd.f32 %v5227_v32, %v24529_v26  ;;  %5567 = vmatprep.mubr.bf16.mxu0 %v24388_v41  ;;  %v21552_v26 = vld [vmem:[#allocation5 + $0x1450] ss:$72 sps:$4 sm:$0xff]   ;;  %v21573_v50 = vld [vmem:[#allocation5 + $0x1ba0] ss:$72 sps:$4 sm:$0xff]   ;;  %v21578_v51 = vld [vmem:[#allocation5 + $0x1214] ss:$72 sps:$4 sm:$0xff]  }
 0x26e   :  { %5610 = vmatprep.mubr.bf16.mxu1 %v24392_v42  ;;  %v5229_v63 = vpop.f32.mrf.mxu0  ;;  %v21584_v25 = vld [vmem:[#allocation5 + $0x1a84] ss:$72 sps:$4 sm:$0xff]   ;;  %v21582_v32 = vld [vmem:[#allocation5 + $0x1a80] ss:$72 sps:$4 sm:$0xff]  }
 0x26f   :  { %v24547_v15 = vadd.f32 %v5270_v36, %v5228_v43  ;;  %v5230_v31 = vadd.f32 %v5229_v63, %v24533_v38  ;;  %5538 = vmatpush1.bf16.msra.mxu0 %v21540_v16  ;;  %v5272_v57 = vpop.f32.mrf.mxu1  ;;  %v21566_v38 = vld [vmem:[#allocation5 + $0x1334] ss:$72 sps:$4 sm:$0xff]   ;;  %v21587_v27 = vld [vmem:[#allocation5 + $0x2384] ss:$72 sps:$4 sm:$0xff]   ;;  %v21585_v36 = vld [vmem:[#allocation5 + $0x2380] ss:$72 sps:$4 sm:$0xff]  }
 0x270   :  { %5581 = vmatpush1.bf16.msra.mxu1 %v21543_v18  ;;  %5539 = vmatprep.subr.bf16.mxu0 %v21548_v37  ;;  %v21581_v16 = vld [vmem:[#allocation5 + $0x1b14] ss:$72 sps:$4 sm:$0xff]   ;;  %v21576_v18 = vld [vmem:[#allocation5 + $0x1210] ss:$72 sps:$4 sm:$0xff]   ;;  %v21599_v63 = vld [vmem:[#allocation5 + $0x2264] ss:$72 sps:$4 sm:$0xff]  }
 0x271   :  { %5582 = vmatprep.subr.bf16.mxu1 %v21551_v39  ;;  %v24550_v59 = vadd.f32 %v5272_v57, %v5230_v31  ;;  %v21590_v37 = vld [vmem:[#allocation5 + $0x19f4] ss:$72 sps:$4 sm:$0xff]   ;;  %v21588_v43 = vld [vmem:[#allocation5 + $0x19f0] ss:$72 sps:$4 sm:$0xff]   ;;  %v21594_v31 = vld [vmem:[#allocation5 + $0x1960] ss:$72 sps:$4 sm:$0xff]  }
 0x272   :  { %v21593_v39 = vld [vmem:[#allocation5 + $0x22f4] ss:$72 sps:$4 sm:$0xff]   ;;  %v21597_v57 = vld [vmem:[#allocation5 + $0x2260] ss:$72 sps:$4 sm:$0xff]  }
 0x273   :  { %5540 = vmatpush1.bf16.msra.mxu0 %v21546_v55  ;;  %v21591_v55 = vld [vmem:[#allocation5 + $0x22f0] ss:$72 sps:$4 sm:$0xff]  }
 0x274   :  { %5583 = vmatpush1.bf16.msra.mxu1 %v21549_v29  ;;  %5541 = vmatprep.subr.bf16.mxu0 %v21554_v58  ;;  %v21596_v29 = vld [vmem:[#allocation5 + $0x1964] ss:$72 sps:$4 sm:$0xff]   ;;  %v21602_v58 = vld [vmem:[#allocation5 + $0x18d4] ss:$72 sps:$4 sm:$0xff]  }
 0x275   :  { %5584 = vmatprep.subr.bf16.mxu1 %v21557_v61  ;;  %v21605_v61 = vld [vmem:[#allocation5 + $0x21d4] ss:$72 sps:$4 sm:$0xff]  }
 0x277   :  { %5542 = vmatpush1.bf16.msra.mxu0 %v21552_v26  ;;  %v21600_v26 = vld [vmem:[#allocation5 + $0x18d0] ss:$72 sps:$4 sm:$0xff]  }
 0x278   :  { %5585 = vmatpush1.bf16.msra.mxu1 %v21555_v60  ;;  %5543 = vmatprep.subr.bf16.mxu0 %v21560_v14  ;;  %v21603_v60 = vld [vmem:[#allocation5 + $0x21d0] ss:$72 sps:$4 sm:$0xff]   ;;  %v21608_v14 = vld [vmem:[#allocation5 + $0x1844] ss:$72 sps:$4 sm:$0xff]  }
 0x279   :  { %5586 = vmatprep.subr.bf16.mxu1 %v21563_v62  ;;  %v21611_v62 = vld [vmem:[#allocation5 + $0x2144] ss:$72 sps:$4 sm:$0xff]  }
 0x27b   :  { %5544 = vmatpush1.bf16.msra.mxu0 %v21558_v0  ;;  %v21606_v0 = vld [vmem:[#allocation5 + $0x1840] ss:$72 sps:$4 sm:$0xff]  }
 0x27c   :  { %5587 = vmatpush1.bf16.msra.mxu1 %v21561_v1  ;;  %5545 = vmatprep.subr.bf16.mxu0 %v21566_v38  ;;  %v21609_v1 = vld [vmem:[#allocation5 + $0x2140] ss:$72 sps:$4 sm:$0xff]   ;;  %v21614_v38 = vld [vmem:[#allocation5 + $0x17b4] ss:$72 sps:$4 sm:$0xff]  }
 0x27d   :  { %5588 = vmatprep.subr.bf16.mxu1 %v21569_v12  ;;  %v21617_v12 = vld [vmem:[#allocation5 + $0x20b4] ss:$72 sps:$4 sm:$0xff]  }
 0x27f   :  { %5546 = vmatpush1.bf16.msra.mxu0 %v21564_v2  ;;  %v21612_v2 = vld [vmem:[#allocation5 + $0x17b0] ss:$72 sps:$4 sm:$0xff]  }
 0x280   :  { %5589 = vmatpush1.bf16.msra.mxu1 %v21567_v3  ;;  %5547 = vmatprep.subr.bf16.mxu0 %v21572_v6  ;;  %v21615_v3 = vld [vmem:[#allocation5 + $0x20b0] ss:$72 sps:$4 sm:$0xff]   ;;  %v21620_v6 = vld [vmem:[#allocation5 + $0x1724] ss:$72 sps:$4 sm:$0xff]  }
 0x281   :  { %5590 = vmatprep.subr.bf16.mxu1 %v21575_v11  ;;  %v21623_v11 = vld [vmem:[#allocation5 + $0x2024] ss:$72 sps:$4 sm:$0xff]  }
 0x283   :  { %5548 = vmatpush1.bf16.msra.mxu0 %v21570_v17  ;;  %v21618_v17 = vld [vmem:[#allocation5 + $0x1720] ss:$72 sps:$4 sm:$0xff]  }
 0x284   :  { %5591 = vmatpush1.bf16.msra.mxu1 %v21573_v50  ;;  %5549 = vmatprep.subr.bf16.mxu0 %v21578_v51  ;;  %v21621_v50 = vld [vmem:[#allocation5 + $0x2020] ss:$72 sps:$4 sm:$0xff]   ;;  %v21626_v51 = vld [vmem:[#allocation5 + $0x1694] ss:$72 sps:$4 sm:$0xff]  }
 0x285   :  { %5592 = vmatprep.subr.bf16.mxu1 %v21581_v16  ;;  %v21629_v16 = vld [vmem:[#allocation5 + $0x1f94] ss:$72 sps:$4 sm:$0xff]  }
 0x287   :  { %5550 = vmatpush1.bf16.msra.mxu0 %v21576_v18  ;;  %v21624_v18 = vld [vmem:[#allocation5 + $0x1690] ss:$72 sps:$4 sm:$0xff]  }
 0x288   :  { %5593 = vmatpush1.bf16.msra.mxu1 %v21579_v19  ;;  %5551 = vmatprep.subr.bf16.mxu0 %v21584_v25  ;;  %v21627_v19 = vld [vmem:[#allocation5 + $0x1f90] ss:$72 sps:$4 sm:$0xff]   ;;  %v21632_v25 = vld [vmem:[#allocation5 + $0x2804] ss:$72 sps:$4 sm:$0xff]  }
 0x289   :  { %5594 = vmatprep.subr.bf16.mxu1 %v21587_v27  ;;  %v21635_v27 = vld [vmem:[#allocation5 + $0x3104] ss:$72 sps:$4 sm:$0xff]  }
 0x28b   :  { %5552 = vmatpush2.bf16.msra.mxu0 %v21582_v32  ;;  %v21630_v32 = vld [vmem:[#allocation5 + $0x2800] ss:$72 sps:$4 sm:$0xff]  }
 0x28c   :  { %5595 = vmatpush2.bf16.msra.mxu1 %v21585_v36  ;;  %5553 = vmatprep.subr.bf16.mxu0 %v21590_v37  ;;  %v21633_v36 = vld [vmem:[#allocation5 + $0x3100] ss:$72 sps:$4 sm:$0xff]   ;;  %v24552_v37 = vpop.f32.mrf.mxu0 }
 0x28d   :  { %5596 = vmatprep.subr.bf16.mxu1 %v21593_v39  ;;  %v24554_v39 = vpop.f32.mrf.mxu1 }
 0x28f   :  { %5554 = vmatpush2.bf16.msra.mxu0 %v21588_v43  ;;  %v21638_v43 = vld [vmem:[#allocation5 + $0x2774] ss:$72 sps:$4 sm:$0xff]  }
 0x290   :  { %5597 = vmatpush2.bf16.msra.mxu1 %v21591_v55  ;;  %5555 = vmatprep.subr.bf16.mxu0 %v21596_v29  ;;  %v21641_v55 = vld [vmem:[#allocation5 + $0x3074] ss:$72 sps:$4 sm:$0xff]   ;;  %v21636_v29 = vld [vmem:[#allocation5 + $0x2770] ss:$72 sps:$4 sm:$0xff]  }
 0x291   :  { %5598 = vmatprep.subr.bf16.mxu1 %v21599_v63  ;;  %v21639_v63 = vld [vmem:[#allocation5 + $0x3070] ss:$72 sps:$4 sm:$0xff]  }
 0x293   :  { %5556 = vmatpush2.bf16.msra.mxu0 %v21594_v31 }
 0x294   :  { %5599 = vmatpush2.bf16.msra.mxu1 %v21597_v57  ;;  %5557 = vmatprep.subr.bf16.mxu0 %v21602_v58 }
 0x295   :  { %5600 = vmatprep.subr.bf16.mxu1 %v21605_v61 }
 0x297   :  { %5558 = vmatpush2.bf16.msra.mxu0 %v21600_v26 }
 0x298   :  { %5601 = vmatpush2.bf16.msra.mxu1 %v21603_v60  ;;  %5559 = vmatprep.subr.bf16.mxu0 %v21608_v14  ;;  %v21644_v60 = vld [vmem:[#allocation5 + $0x26e4] ss:$72 sps:$4 sm:$0xff]  }
 0x299   :  { %5602 = vmatprep.subr.bf16.mxu1 %v21611_v62  ;;  %v21647_v14 = vld [vmem:[#allocation5 + $0x2fe4] ss:$72 sps:$4 sm:$0xff]  }
 0x29b   :  { %5560 = vmatpush2.bf16.msra.mxu0 %v21606_v0 }
 0x29c   :  { %5603 = vmatpush2.bf16.msra.mxu1 %v21609_v1  ;;  %5561 = vmatprep.subr.bf16.mxu0 %v21614_v38  ;;  %v21642_v1 = vld [vmem:[#allocation5 + $0x26e0] ss:$72 sps:$4 sm:$0xff]  }
 0x29d   :  { %5604 = vmatprep.subr.bf16.mxu1 %v21617_v12  ;;  %v21645_v38 = vld [vmem:[#allocation5 + $0x2fe0] ss:$72 sps:$4 sm:$0xff]  }
 0x29f   :  { %5562 = vmatpush2.bf16.msra.mxu0 %v21612_v2 }
 0x2a0   :  { %5605 = vmatpush2.bf16.msra.mxu1 %v21615_v3  ;;  %5563 = vmatprep.subr.bf16.mxu0 %v21620_v6  ;;  %v21650_v6 = vld [vmem:[#allocation5 + $0x2654] ss:$72 sps:$4 sm:$0xff]  }
 0x2a1   :  { %5606 = vmatprep.subr.bf16.mxu1 %v21623_v11  ;;  %v21653_v11 = vld [vmem:[#allocation5 + $0x2f54] ss:$72 sps:$4 sm:$0xff]  }
 0x2a3   :  { %5564 = vmatpush2.bf16.msra.mxu0 %v21618_v17 }
 0x2a4   :  { %5607 = vmatpush2.bf16.msra.mxu1 %v21621_v50  ;;  %5565 = vmatprep.subr.bf16.mxu0 %v21626_v51  ;;  %v21651_v50 = vld [vmem:[#allocation5 + $0x2f50] ss:$72 sps:$4 sm:$0xff]   ;;  %v21656_v51 = vld [vmem:[#allocation5 + $0x25c4] ss:$72 sps:$4 sm:$0xff]  }
 0x2a5   :  { %5608 = vmatprep.subr.bf16.mxu1 %v21629_v16  ;;  %v21659_v16 = vld [vmem:[#allocation5 + $0x2ec4] ss:$72 sps:$4 sm:$0xff]  }
 0x2a7   :  { %5566 = vmatpush2.bf16.msra.mxu0 %v21624_v18  ;;  %v21657_v18 = vld [vmem:[#allocation5 + $0x2ec0] ss:$72 sps:$4 sm:$0xff]  }
 0x2a8   :  { %5609 = vmatpush2.bf16.msra.mxu1 %v21627_v19  ;;  %5621 = vmatprep.subr.bf16.mxu0 %v21632_v25  ;;  %v21662_v19 = vld [vmem:[#allocation5 + $0x2534] ss:$72 sps:$4 sm:$0xff]  }
 0x2a9   :  { %5664 = vmatprep.subr.bf16.mxu1 %v21635_v27  ;;  %v21665_v25 = vld [vmem:[#allocation5 + $0x2e34] ss:$72 sps:$4 sm:$0xff]   ;;  %v21660_v27 = vld [vmem:[#allocation5 + $0x2530] ss:$72 sps:$4 sm:$0xff]  }
 0x2aa   :  { %v5311_v31 = vpop.f32.mrf.mxu0  ;;  %5568 = vmatmul.mubr.bf16.vlgmr.msra.gmra.mxu0 %v24398_v20 }
 0x2ab   :  { %v5354_v57 = vpop.f32.mrf.mxu1  ;;  %5611 = vmatmul.mubr.bf16.vlgmr.msra.gmra.mxu1 %v24402_v21  ;;  %v5312_v58 = vadd.f32 %v5311_v31, %v24542_v40  ;;  %5622 = vmatpush1.bf16.msra.mxu0 %v21630_v32  ;;  %v21663_v32 = vld [vmem:[#allocation5 + $0x2e30] ss:$72 sps:$4 sm:$0xff]   ;;  %v21677_v31 = vld [vmem:[#allocation5 + $0x2d14] ss:$72 sps:$4 sm:$0xff]  }
 0x2ac   :  { %5665 = vmatpush1.bf16.msra.mxu1 %v21633_v36  ;;  %v5313_v61 = vpop.f32.mrf.mxu0  ;;  %5623 = vmatprep.subr.bf16.mxu0 %v21638_v43  ;;  %v21668_v36 = vld [vmem:[#allocation5 + $0x24a4] ss:$72 sps:$4 sm:$0xff]  }
 0x2ad   :  { %v5356_v26 = vpop.f32.mrf.mxu1  ;;  %5666 = vmatprep.subr.bf16.mxu1 %v21641_v55  ;;  %v24559_v62 = vadd.f32 %v5354_v57, %v5312_v58  ;;  %v5314_v0 = vadd.f32 %v5313_v61, %v24547_v15  ;;  %5653 = vmatprep.mubr.bf16.mxu0 %v24416_v33  ;;  %v21648_v15 = vld [vmem:[#allocation5 + $0x2650] ss:$72 sps:$4 sm:$0xff]   ;;  %v21671_v43 = vld [vmem:[#allocation5 + $0x2da4] ss:$72 sps:$4 sm:$0xff]   ;;  %v21666_v55 = vld [vmem:[#allocation5 + $0x24a0] ss:$72 sps:$4 sm:$0xff]  }
 0x2ae   :  { %5696 = vmatprep.mubr.bf16.mxu1 %v24420_v34  ;;  %v5315_v12 = vpop.f32.mrf.mxu0  ;;  %v21672_v57 = vld [vmem:[#allocation5 + $0x2410] ss:$72 sps:$4 sm:$0xff]   ;;  %v21680_v61 = vld [vmem:[#allocation5 + $0x2c84] ss:$72 sps:$4 sm:$0xff]  }
 0x2af   :  { %v24564_v40 = vadd.f32 %v5356_v26, %v5314_v0  ;;  %v5316_v2 = vadd.f32 %v5315_v12, %v24550_v59  ;;  %5624 = vmatpush1.bf16.msra.mxu0 %v21636_v29  ;;  %v5358_v3 = vpop.f32.mrf.mxu1  ;;  %v21654_v59 = vld [vmem:[#allocation5 + $0x25c0] ss:$72 sps:$4 sm:$0xff]   ;;  %v21675_v58 = vld [vmem:[#allocation5 + $0x2d10] ss:$72 sps:$4 sm:$0xff]   ;;  %v21683_v26 = vld [vmem:[#allocation5 + $0x3584] ss:$72 sps:$4 sm:$0xff]  }
 0x2b0   :  { %5667 = vmatpush1.bf16.msra.mxu1 %v21639_v63  ;;  %5625 = vmatprep.subr.bf16.mxu0 %v21644_v60  ;;  %v21669_v29 = vld [vmem:[#allocation5 + $0x2da0] ss:$72 sps:$4 sm:$0xff]   ;;  %v21674_v63 = vld [vmem:[#allocation5 + $0x2414] ss:$72 sps:$4 sm:$0xff]   ;;  %v21687_v12 = vld [vmem:[#allocation5 + $0x34f0] ss:$72 sps:$4 sm:$0xff]  }
 0x2b1   :  { %5668 = vmatprep.subr.bf16.mxu1 %v21647_v14  ;;  %v24567_v17 = vadd.f32 %v5358_v3, %v5316_v2  ;;  %v21678_v60 = vld [vmem:[#allocation5 + $0x2c80] ss:$72 sps:$4 sm:$0xff]   ;;  %v21686_v0 = vld [vmem:[#allocation5 + $0x2bf4] ss:$72 sps:$4 sm:$0xff]   ;;  %v21692_v2 = vld [vmem:[#allocation5 + $0x2b64] ss:$72 sps:$4 sm:$0xff]  }
 0x2b2   :  { %v21681_v14 = vld [vmem:[#allocation5 + $0x3580] ss:$72 sps:$4 sm:$0xff]   ;;  %v21695_v3 = vld [vmem:[#allocation5 + $0x3464] ss:$72 sps:$4 sm:$0xff]  }
 0x2b3   :  { %5626 = vmatpush1.bf16.msra.mxu0 %v21642_v1  ;;  %v21689_v1 = vld [vmem:[#allocation5 + $0x34f4] ss:$72 sps:$4 sm:$0xff]  }
 0x2b4   :  { %5669 = vmatpush1.bf16.msra.mxu1 %v21645_v38  ;;  %5627 = vmatprep.subr.bf16.mxu0 %v21650_v6  ;;  %v21684_v38 = vld [vmem:[#allocation5 + $0x2bf0] ss:$72 sps:$4 sm:$0xff]   ;;  %v21690_v6 = vld [vmem:[#allocation5 + $0x2b60] ss:$72 sps:$4 sm:$0xff]  }
 0x2b5   :  { %5670 = vmatprep.subr.bf16.mxu1 %v21653_v11  ;;  %v21693_v11 = vld [vmem:[#allocation5 + $0x3460] ss:$72 sps:$4 sm:$0xff]  }
 0x2b7   :  { %5628 = vmatpush1.bf16.msra.mxu0 %v21648_v15  ;;  %v21698_v15 = vld [vmem:[#allocation5 + $0x2ad4] ss:$72 sps:$4 sm:$0xff]  }
 0x2b8   :  { %5671 = vmatpush1.bf16.msra.mxu1 %v21651_v50  ;;  %5629 = vmatprep.subr.bf16.mxu0 %v21656_v51  ;;  %v21701_v50 = vld [vmem:[#allocation5 + $0x33d4] ss:$72 sps:$4 sm:$0xff]   ;;  %v21696_v51 = vld [vmem:[#allocation5 + $0x2ad0] ss:$72 sps:$4 sm:$0xff]  }
 0x2b9   :  { %5672 = vmatprep.subr.bf16.mxu1 %v21659_v16  ;;  %v21699_v16 = vld [vmem:[#allocation5 + $0x33d0] ss:$72 sps:$4 sm:$0xff]  }
 0x2bb   :  { %5630 = vmatpush1.bf16.msra.mxu0 %v21654_v59  ;;  %v21704_v59 = vld [vmem:[#allocation5 + $0x2a44] ss:$72 sps:$4 sm:$0xff]  }
 0x2bc   :  { %5673 = vmatpush1.bf16.msra.mxu1 %v21657_v18  ;;  %5631 = vmatprep.subr.bf16.mxu0 %v21662_v19  ;;  %v21707_v18 = vld [vmem:[#allocation5 + $0x3344] ss:$72 sps:$4 sm:$0xff]   ;;  %v21702_v19 = vld [vmem:[#allocation5 + $0x2a40] ss:$72 sps:$4 sm:$0xff]  }
 0x2bd   :  { %5674 = vmatprep.subr.bf16.mxu1 %v21665_v25  ;;  %v21705_v25 = vld [vmem:[#allocation5 + $0x3340] ss:$72 sps:$4 sm:$0xff]  }
 0x2bf   :  { %5632 = vmatpush1.bf16.msra.mxu0 %v21660_v27  ;;  %v21710_v27 = vld [vmem:[#allocation5 + $0x29b4] ss:$72 sps:$4 sm:$0xff]  }
 0x2c0   :  { %5675 = vmatpush1.bf16.msra.mxu1 %v21663_v32  ;;  %5633 = vmatprep.subr.bf16.mxu0 %v21668_v36  ;;  %v21713_v32 = vld [vmem:[#allocation5 + $0x32b4] ss:$72 sps:$4 sm:$0xff]   ;;  %v21708_v36 = vld [vmem:[#allocation5 + $0x29b0] ss:$72 sps:$4 sm:$0xff]  }
 0x2c1   :  { %5676 = vmatprep.subr.bf16.mxu1 %v21671_v43  ;;  %v21711_v43 = vld [vmem:[#allocation5 + $0x32b0] ss:$72 sps:$4 sm:$0xff]  }
 0x2c3   :  { %5634 = vmatpush1.bf16.msra.mxu0 %v21666_v55  ;;  %v21716_v55 = vld [vmem:[#allocation5 + $0x2924] ss:$72 sps:$4 sm:$0xff]  }
 0x2c4   :  { %5677 = vmatpush1.bf16.msra.mxu1 %v21669_v29  ;;  %5635 = vmatprep.subr.bf16.mxu0 %v21674_v63  ;;  %v21719_v29 = vld [vmem:[#allocation5 + $0x3224] ss:$72 sps:$4 sm:$0xff]   ;;  %v21714_v63 = vld [vmem:[#allocation5 + $0x2920] ss:$72 sps:$4 sm:$0xff]  }
 0x2c5   :  { %5678 = vmatprep.subr.bf16.mxu1 %v21677_v31  ;;  %v21717_v31 = vld [vmem:[#allocation5 + $0x3220] ss:$72 sps:$4 sm:$0xff]  }
 0x2c7   :  { %5636 = vmatpush1.bf16.msra.mxu0 %v21672_v57  ;;  %v21722_v57 = vld [vmem:[#allocation5 + $0x2894] ss:$72 sps:$4 sm:$0xff]  }
 0x2c8   :  { %5679 = vmatpush1.bf16.msra.mxu1 %v21675_v58  ;;  %5637 = vmatprep.subr.bf16.mxu0 %v21680_v61  ;;  %v21725_v58 = vld [vmem:[#allocation5 + $0x3194] ss:$72 sps:$4 sm:$0xff]   ;;  %v5189_v61 = vadd.f32 %v24537_v24, %v24535_v13 }
 0x2c9   :  { %5680 = vmatprep.subr.bf16.mxu1 %v21683_v26  ;;  %v21720_v26 = vld [vmem:[#allocation5 + $0x2890] ss:$72 sps:$4 sm:$0xff]   ;;  %v21737_v13 = vld [vmem:[#allocation5 + $0x4274] ss:$72 sps:$4 sm:$0xff]  }
 0x2cb   :  { %5638 = vmatpush2.bf16.msra.mxu0 %v21678_v60  ;;  %v21723_v60 = vld [vmem:[#allocation5 + $0x3190] ss:$72 sps:$4 sm:$0xff]  }
 0x2cc   :  { %5681 = vmatpush2.bf16.msra.mxu1 %v21681_v14  ;;  %5639 = vmatprep.subr.bf16.mxu0 %v21686_v0  ;;  %v21728_v14 = vld [vmem:[#allocation5 + $0x3a04] ss:$72 sps:$4 sm:$0xff]  }
 0x2cd   :  { %5682 = vmatprep.subr.bf16.mxu1 %v21689_v1  ;;  %v21731_v0 = vld [vmem:[#allocation5 + $0x4304] ss:$72 sps:$4 sm:$0xff]   ;;  %v5232_v1 = vadd.f32 %v24552_v37, %v5189_v61 }
 0x2cf   :  { %5640 = vmatpush2.bf16.msra.mxu0 %v21684_v38  ;;  %v21726_v38 = vld [vmem:[#allocation5 + $0x3a00] ss:$72 sps:$4 sm:$0xff]   ;;  %v5275_v24 = vadd.f32 %v24554_v39, %v5232_v1 }
 0x2d0   :  { %5683 = vmatpush2.bf16.msra.mxu1 %v21687_v12  ;;  %5641 = vmatprep.subr.bf16.mxu0 %v21692_v2  ;;  %v21729_v12 = vld [vmem:[#allocation5 + $0x4300] ss:$72 sps:$4 sm:$0xff]   ;;  %v5317_v2 = vpop.f32.mrf.mxu0 }
 0x2d1   :  { %5684 = vmatprep.subr.bf16.mxu1 %v21695_v3  ;;  %v5360_v3 = vpop.f32.mrf.mxu1  ;;  %v5318_v37 = vadd.f32 %v5317_v2, %v5275_v24  ;;  %v21755_v2 = vld [vmem:[#allocation5 + $0x40c4] ss:$72 sps:$4 sm:$0xff]   ;;  %v21753_v24 = vld [vmem:[#allocation5 + $0x40c0] ss:$72 sps:$4 sm:$0xff]  }
 0x2d3   :  { %5642 = vmatpush2.bf16.msra.mxu0 %v21690_v6  ;;  %v21734_v6 = vld [vmem:[#allocation5 + $0x3974] ss:$72 sps:$4 sm:$0xff]  }
 0x2d4   :  { %5685 = vmatpush2.bf16.msra.mxu1 %v21693_v11  ;;  %5643 = vmatprep.subr.bf16.mxu0 %v21698_v15  ;;  %v21732_v11 = vld [vmem:[#allocation5 + $0x3970] ss:$72 sps:$4 sm:$0xff]  }
 0x2d5   :  { %5686 = vmatprep.subr.bf16.mxu1 %v21701_v50  ;;  %v21735_v15 = vld [vmem:[#allocation5 + $0x4270] ss:$72 sps:$4 sm:$0xff]  }
 0x2d7   :  { %5644 = vmatpush2.bf16.msra.mxu0 %v21696_v51 }
 0x2d8   :  { %5687 = vmatpush2.bf16.msra.mxu1 %v21699_v16  ;;  %5645 = vmatprep.subr.bf16.mxu0 %v21704_v59 }
 0x2d9   :  { %5688 = vmatprep.subr.bf16.mxu1 %v21707_v18 }
 0x2db   :  { %5646 = vmatpush2.bf16.msra.mxu0 %v21702_v19  ;;  %v21740_v19 = vld [vmem:[#allocation5 + $0x38e4] ss:$72 sps:$4 sm:$0xff]  }
 0x2dc   :  { %5689 = vmatpush2.bf16.msra.mxu1 %v21705_v25  ;;  %5647 = vmatprep.subr.bf16.mxu0 %v21710_v27  ;;  %v21743_v25 = vld [vmem:[#allocation5 + $0x41e4] ss:$72 sps:$4 sm:$0xff]  }
 0x2dd   :  { %5690 = vmatprep.subr.bf16.mxu1 %v21713_v32  ;;  %v21738_v32 = vld [vmem:[#allocation5 + $0x38e0] ss:$72 sps:$4 sm:$0xff]  }
 0x2df   :  { %5648 = vmatpush2.bf16.msra.mxu0 %v21708_v36  ;;  %v21741_v36 = vld [vmem:[#allocation5 + $0x41e0] ss:$72 sps:$4 sm:$0xff]  }
 0x2e0   :  { %5691 = vmatpush2.bf16.msra.mxu1 %v21711_v43  ;;  %5649 = vmatprep.subr.bf16.mxu0 %v21716_v55  ;;  %v5361_v55 = vadd.f32 %v5360_v3, %v5318_v37  ;;  %v5796_v3 = vmul.f32 %v24519_v30, %v24519_v30  ;;  %v21764_v30 = vld [vmem:[#allocation5 + $0x36a4] ss:$72 sps:$4 sm:$0xff]  }
 0x2e1   :  { %5692 = vmatprep.subr.bf16.mxu1 %v21719_v29  ;;  %v21767_v37 = vld [vmem:[#allocation5 + $0x3fa4] ss:$72 sps:$4 sm:$0xff]  }
 0x2e3   :  { %5650 = vmatpush2.bf16.msra.mxu0 %v21714_v63 }
 0x2e4   :  { %5693 = vmatpush2.bf16.msra.mxu1 %v21717_v31  ;;  %5651 = vmatprep.subr.bf16.mxu0 %v21722_v57  ;;  %v21746_v57 = vld [vmem:[#allocation5 + $0x3854] ss:$72 sps:$4 sm:$0xff]  }
 0x2e5   :  { %5694 = vmatprep.subr.bf16.mxu1 %v21725_v58  ;;  %v21749_v58 = vld [vmem:[#allocation5 + $0x4154] ss:$72 sps:$4 sm:$0xff]  }
 0x2e7   :  { %5652 = vmatpush2.bf16.msra.mxu0 %v21720_v26 }
 0x2e8   :  { %5695 = vmatpush2.bf16.msra.mxu1 %v21723_v60  ;;  %5707 = vmatprep.subr.bf16.mxu0 %v21728_v14 }
 0x2e9   :  { %5750 = vmatprep.subr.bf16.mxu1 %v21731_v0 }
 0x2ea   :  { %v5397_v50 = vpop.f32.mrf.mxu0  ;;  %5654 = vmatmul.mubr.bf16.vlgmr.msra.gmra.mxu0 %v24430_v48 }
 0x2eb   :  { %v5440_v51 = vpop.f32.mrf.mxu1  ;;  %5697 = vmatmul.mubr.bf16.vlgmr.msra.gmra.mxu1 %v24434_v49  ;;  %v5398_v16 = vadd.f32 %v5397_v50, %v24559_v62  ;;  %5708 = vmatpush1.bf16.msra.mxu0 %v21726_v38  ;;  %v21747_v38 = vld [vmem:[#allocation5 + $0x4150] ss:$72 sps:$4 sm:$0xff]  }
 0x2ec   :  { %5751 = vmatpush1.bf16.msra.mxu1 %v21729_v12  ;;  %v5399_v59 = vpop.f32.mrf.mxu0  ;;  %5709 = vmatprep.subr.bf16.mxu0 %v21734_v6  ;;  %v21752_v12 = vld [vmem:[#allocation5 + $0x37c4] ss:$72 sps:$4 sm:$0xff]   ;;  %v21756_v50 = vld [vmem:[#allocation5 + $0x3730] ss:$72 sps:$4 sm:$0xff]  }
 0x2ed   :  { %v5442_v18 = vpop.f32.mrf.mxu1  ;;  %5752 = vmatprep.subr.bf16.mxu1 %v21737_v13  ;;  %v24576_v39 = vadd.f32 %v5440_v51, %v5398_v16  ;;  %v5400_v27 = vadd.f32 %v5399_v59, %v24564_v40  ;;  %5739 = vmatprep.mubr.bf16.mxu0 %v24442_v56  ;;  %v5793_v40 = vmul.f32 %v24511_v35, %v24511_v35  ;;  %v21750_v13 = vld [vmem:[#allocation5 + $0x37c0] ss:$72 sps:$4 sm:$0xff]   ;;  %v21759_v51 = vld [vmem:[#allocation5 + $0x4030] ss:$72 sps:$4 sm:$0xff]  }
 0x2ee   :  { %5782 = vmatprep.mubr.bf16.mxu1 %v24446_v28  ;;  %v5401_v43 = vpop.f32.mrf.mxu0  ;;  %v21762_v16 = vld [vmem:[#allocation5 + $0x36a0] ss:$72 sps:$4 sm:$0xff]  }
 0x2ef   :  { %v5444_v62 = vpop.f32.mrf.mxu1  ;;  %v5443_v29 = vadd.f32 %v5442_v18, %v5400_v27  ;;  %v5402_v63 = vadd.f32 %v5401_v43, %v24567_v17  ;;  %5710 = vmatpush1.bf16.msra.mxu0 %v21732_v11  ;;  %v21744_v17 = vld [vmem:[#allocation5 + $0x3850] ss:$72 sps:$4 sm:$0xff]   ;;  %v21758_v11 = vld [vmem:[#allocation5 + $0x3734] ss:$72 sps:$4 sm:$0xff]   ;;  %v21765_v59 = vld [vmem:[#allocation5 + $0x3fa0] ss:$72 sps:$4 sm:$0xff]  }
 0x2f0   :  { %5753 = vmatpush1.bf16.msra.mxu1 %v21735_v15  ;;  %v5403_v31 = vpop.f32.mrf.mxu0  ;;  %5711 = vmatprep.subr.bf16.mxu0 %v21740_v19  ;;  %v21761_v15 = vld [vmem:[#allocation5 + $0x4034] ss:$72 sps:$4 sm:$0xff]   ;;  %v21768_v27 = vld [vmem:[#allocation5 + $0x3610] ss:$72 sps:$4 sm:$0xff]   ;;  %v21776_v43 = vld [vmem:[#allocation5 + $0x3e84] ss:$72 sps:$4 sm:$0xff]  }
 0x2f1   :  { %5754 = vmatprep.subr.bf16.mxu1 %v21743_v25  ;;  %v5799_v61 = vmul.f32 %v5443_v29, %v5443_v29  ;;  %v24584_v26 = vadd.f32 %v5444_v62, %v5402_v63  ;;  %v5404_v60 = vadd.f32 %v5403_v31, %v5361_v55  ;;  %v5446_v14 = vpop.f32.mrf.mxu1  ;;  %v21770_v18 = vld [vmem:[#allocation5 + $0x3614] ss:$72 sps:$4 sm:$0xff]   ;;  %v21779_v62 = vld [vmem:[#allocation5 + $0x4784] ss:$72 sps:$4 sm:$0xff]   ;;  %v21774_v55 = vld [vmem:[#allocation5 + $0x3e80] ss:$72 sps:$4 sm:$0xff]  }
 0x2f2   :  { %v21773_v19 = vld [vmem:[#allocation5 + $0x3f14] ss:$72 sps:$4 sm:$0xff]   ;;  %v21777_v63 = vld [vmem:[#allocation5 + $0x4780] ss:$72 sps:$4 sm:$0xff]  }
 0x2f3   :  { %v24586_v0 = vadd.f32 %v5799_v61, %v5793_v40  ;;  %v5447_v1 = vadd.f32 %v5446_v14, %v5404_v60  ;;  %5712 = vmatpush1.bf16.msra.mxu0 %v21738_v32  ;;  %v21771_v32 = vld [vmem:[#allocation5 + $0x3f10] ss:$72 sps:$4 sm:$0xff]   ;;  %v21782_v31 = vld [vmem:[#allocation5 + $0x3df4] ss:$72 sps:$4 sm:$0xff]  }
 0x2f4   :  { %5755 = vmatpush1.bf16.msra.mxu1 %v21741_v36  ;;  %5713 = vmatprep.subr.bf16.mxu0 %v21746_v57  ;;  %v21785_v40 = vld [vmem:[#allocation5 + $0x46f4] ss:$72 sps:$4 sm:$0xff]  }
 0x2f5   :  { %5756 = vmatprep.subr.bf16.mxu1 %v21749_v58  ;;  %24198 = vrsqrt.f32 %v24586_v0  ;;  %v5802_v35 = vmul.f32 %v5447_v1, %v5447_v1  ;;  %vm5813_vm0 = vcmp.eq.f32.partialorder %v24586_v0, inf  ;;  %v5816_v61 = vand.u32 2147483648, %v24586_v0 }
 0x2f6   :  { %vm5815_vm2 = vcmp.eq.f32.partialorder %v24586_v0, 0.0 }
 0x2f7   :  { %v5808_v6 = vadd.f32 %v5802_v35, %v5796_v3  ;;  %5714 = vmatpush1.bf16.msra.mxu0 %v21744_v17  ;;  %v21788_v3 = vld [vmem:[#allocation5 + $0x3d64] ss:$72 sps:$4 sm:$0xff]  }
 0x2f8   :  { %5757 = vmatpush1.bf16.msra.mxu1 %v21747_v38  ;;  %5715 = vmatprep.subr.bf16.mxu0 %v21752_v12  ;;  %v21780_v38 = vld [vmem:[#allocation5 + $0x3df0] ss:$72 sps:$4 sm:$0xff]   ;;  %v21791_v35 = vld [vmem:[#allocation5 + $0x4664] ss:$72 sps:$4 sm:$0xff]  }
 0x2f9   :  { %5758 = vmatprep.subr.bf16.mxu1 %v21755_v2  ;;  %24200 = vrsqrt.f32 %v5808_v6  ;;  %vm5834_vm1 = vcmp.eq.f32.partialorder %v5808_v6, inf  ;;  %v5837_v60 = vand.u32 2147483648, %v5808_v6  ;;  %vm5836_vm3 = vcmp.eq.f32.partialorder %v5808_v6, 0.0  ;;  %v21783_v12 = vld [vmem:[#allocation5 + $0x46f0] ss:$72 sps:$4 sm:$0xff]  }
 0x2fb   :  { %5716 = vmatpush1.bf16.msra.mxu0 %v21750_v13  ;;  %v21789_v13 = vld [vmem:[#allocation5 + $0x4660] ss:$72 sps:$4 sm:$0xff]  }
 0x2fc   :  { %5759 = vmatpush1.bf16.msra.mxu1 %v21753_v24  ;;  %5717 = vmatprep.subr.bf16.mxu0 %v21758_v11  ;;  %v21797_v24 = vld [vmem:[#allocation5 + $0x45d4] ss:$72 sps:$4 sm:$0xff]   ;;  %v21792_v11 = vld [vmem:[#allocation5 + $0x3cd0] ss:$72 sps:$4 sm:$0xff]  }
 0x2fd   :  { %5760 = vmatprep.subr.bf16.mxu1 %v21761_v15  ;;  %v21795_v15 = vld [vmem:[#allocation5 + $0x45d0] ss:$72 sps:$4 sm:$0xff]  }
 0x2ff   :  { %5718 = vmatpush1.bf16.msra.mxu0 %v21756_v50  ;;  %v21800_v50 = vld [vmem:[#allocation5 + $0x3c44] ss:$72 sps:$4 sm:$0xff]  }
 0x300   :  { %5761 = vmatpush1.bf16.msra.mxu1 %v21759_v51  ;;  %5719 = vmatprep.subr.bf16.mxu0 %v21764_v30  ;;  %v21803_v51 = vld [vmem:[#allocation5 + $0x4544] ss:$72 sps:$4 sm:$0xff]   ;;  %v21798_v30 = vld [vmem:[#allocation5 + $0x3c40] ss:$72 sps:$4 sm:$0xff]  }
 0x301   :  { %5762 = vmatprep.subr.bf16.mxu1 %v21767_v37  ;;  %v21801_v37 = vld [vmem:[#allocation5 + $0x4540] ss:$72 sps:$4 sm:$0xff]  }
 0x302   :  { %v24199_v25 = vpop.eup %24198 }
 0x303   :  { %5720 = vmatpush1.bf16.msra.mxu0 %v21762_v16  ;;  %v5812_v36 = vmul.f32 %v24199_v25, %v24586_v0  ;;  %v21806_v16 = vld [vmem:[#allocation5 + $0x3bb4] ss:$72 sps:$4 sm:$0xff]   ;;  %v21812_v25 = vld [vmem:[#allocation5 + $0x3b24] ss:$72 sps:$4 sm:$0xff]  }
 0x304   :  { %5763 = vmatpush1.bf16.msra.mxu1 %v21765_v59  ;;  %5721 = vmatprep.subr.bf16.mxu0 %v21770_v18  ;;  %v21809_v59 = vld [vmem:[#allocation5 + $0x44b4] ss:$72 sps:$4 sm:$0xff]   ;;  %v21804_v18 = vld [vmem:[#allocation5 + $0x3bb0] ss:$72 sps:$4 sm:$0xff]  }
 0x305   :  { %5764 = vmatprep.subr.bf16.mxu1 %v21773_v19  ;;  %v5814_v57 = vsel %vm5813_vm0, %v24586_v0, %v5812_v36  ;;  %v21786_v0 = vld [vmem:[#allocation5 + $0x3d60] ss:$72 sps:$4 sm:$0xff]   ;;  %v21807_v19 = vld [vmem:[#allocation5 + $0x44b0] ss:$72 sps:$4 sm:$0xff]   ;;  %vm24333_vm0 = vmmov 0  }
 0x306   :  { %v24201_v29 = vpop.eup %24200  ;;  %v24596_v1 = vsel %vm5815_vm2, %v5816_v61, %v5814_v57  ;;  %v21813_v36 = vld [vmem:[#allocation5 + $0x4420] ss:$72 sps:$4 sm:$0xff]   ;;  %v21833_v61 = vld [vmem:[#allocation5 + $0xc7c] ss:$72 sps:$4 sm:$0xff]  }
 0x307   :  { %5722 = vmatpush1.bf16.msra.mxu0 %v21768_v27  ;;  %v5833_v58 = vmul.f32 %v24201_v29, %v5808_v6  ;;  %v21815_v27 = vld [vmem:[#allocation5 + $0x4424] ss:$72 sps:$4 sm:$0xff]   ;;  %v21819_v29 = vld [vmem:[#allocation5 + $0x4390] ss:$72 sps:$4 sm:$0xff]  }
 0x308   :  { %5765 = vmatpush1.bf16.msra.mxu1 %v21771_v32  ;;  %5723 = vmatprep.subr.bf16.mxu0 %v21776_v43  ;;  %v21810_v32 = vld [vmem:[#allocation5 + $0x3b20] ss:$72 sps:$4 sm:$0xff]   ;;  %v21818_v43 = vld [vmem:[#allocation5 + $0x3a94] ss:$72 sps:$4 sm:$0xff]  }
 0x309   :  { %5766 = vmatprep.subr.bf16.mxu1 %v21779_v62  ;;  %v5835_v14 = vsel %vm5834_vm1, %v5808_v6, %v5833_v58  ;;  %v21794_v6 = vld [vmem:[#allocation5 + $0x3cd4] ss:$72 sps:$4 sm:$0xff]   ;;  %v21822_v57 = vld [vmem:[#allocation5 + $0x408] ss:$72 sps:$4 sm:$0xff]  }
 0x30a   :  { %v24598_v17 = vsel %vm5836_vm3, %v5837_v60, %v5835_v14  ;;  %v21821_v62 = vld [vmem:[#allocation5 + $0x4394] ss:$72 sps:$4 sm:$0xff]   ;;  %v21825_v58 = vld [vmem:[#allocation5 + $0xd08] ss:$72 sps:$4 sm:$0xff]   ;;  %v21828_v60 = vld [vmem:[#allocation5 + $0x378] ss:$72 sps:$4 sm:$0xff]  }
 0x30b   :  { %5724 = vmatpush2.bf16.msra.mxu0 %v21774_v55  ;;  %v21816_v55 = vld [vmem:[#allocation5 + $0x3a90] ss:$72 sps:$4 sm:$0xff]  }
 0x30c   :  { %5767 = vmatpush2.bf16.msra.mxu1 %v21777_v63  ;;  %5725 = vmatprep.subr.bf16.mxu0 %v21782_v31  ;;  %v21824_v63 = vld [vmem:[#allocation5 + $0x40c] ss:$72 sps:$4 sm:$0xff]   ;;  %v21831_v14 = vld [vmem:[#allocation5 + $0xc78] ss:$72 sps:$4 sm:$0xff]  }
 0x30d   :  { %5768 = vmatprep.subr.bf16.mxu1 %v21785_v40  ;;  %v21827_v31 = vld [vmem:[#allocation5 + $0xd0c] ss:$72 sps:$4 sm:$0xff]   ;;  %v21830_v40 = vld [vmem:[#allocation5 + $0x37c] ss:$72 sps:$4 sm:$0xff]  }
 0x30f   :  { %5726 = vmatpush2.bf16.msra.mxu0 %v21780_v38 }
 0x310   :  { %5769 = vmatpush2.bf16.msra.mxu1 %v21783_v12  ;;  %5727 = vmatprep.subr.bf16.mxu0 %v21788_v3 }
 0x311   :  { %5770 = vmatprep.subr.bf16.mxu1 %v21791_v35 }
 0x313   :  { %5728 = vmatpush2.bf16.msra.mxu0 %v21786_v0 }
 0x314   :  { %5771 = vmatpush2.bf16.msra.mxu1 %v21789_v13  ;;  %5729 = vmatprep.subr.bf16.mxu0 %v21794_v6  ;;  %v21836_v13 = vld [vmem:[#allocation5 + $0x2ec] ss:$72 sps:$4 sm:$0xff]  }
 0x315   :  { %5772 = vmatprep.subr.bf16.mxu1 %v21797_v24  ;;  %v21839_v6 = vld [vmem:[#allocation5 + $0xbec] ss:$72 sps:$4 sm:$0xff]  }
 0x317   :  { %5730 = vmatpush2.bf16.msra.mxu0 %v21792_v11  ;;  %v21834_v11 = vld [vmem:[#allocation5 + $0x2e8] ss:$72 sps:$4 sm:$0xff]  }
 0x318   :  { %5773 = vmatpush2.bf16.msra.mxu1 %v21795_v15  ;;  %5731 = vmatprep.subr.bf16.mxu0 %v21800_v50  ;;  %v21837_v15 = vld [vmem:[#allocation5 + $0xbe8] ss:$72 sps:$4 sm:$0xff]  }
 0x319   :  { %5774 = vmatprep.subr.bf16.mxu1 %v21803_v51 }
 0x31b   :  { %5732 = vmatpush2.bf16.msra.mxu0 %v21798_v30 }
 0x31c   :  { %5775 = vmatpush2.bf16.msra.mxu1 %v21801_v37  ;;  %5733 = vmatprep.subr.bf16.mxu0 %v21806_v16  ;;  %v21842_v37 = vld [vmem:[#allocation5 + $0x25c] ss:$72 sps:$4 sm:$0xff]  }
 0x31d   :  { %5776 = vmatprep.subr.bf16.mxu1 %v21809_v59  ;;  %v21845_v16 = vld [vmem:[#allocation5 + $0xb5c] ss:$72 sps:$4 sm:$0xff]   ;;  %v21840_v59 = vld [vmem:[#allocation5 + $0x258] ss:$72 sps:$4 sm:$0xff]  }
 0x31f   :  { %5734 = vmatpush2.bf16.msra.mxu0 %v21804_v18  ;;  %v21843_v18 = vld [vmem:[#allocation5 + $0xb58] ss:$72 sps:$4 sm:$0xff]  }
 0x320   :  { %5777 = vmatpush2.bf16.msra.mxu1 %v21807_v19  ;;  %5735 = vmatprep.subr.bf16.mxu0 %v21812_v25  ;;  %v21848_v19 = vld [vmem:[#allocation5 + $0x1cc] ss:$72 sps:$4 sm:$0xff]  }
 0x321   :  { %5778 = vmatprep.subr.bf16.mxu1 %v21815_v27  ;;  %v21851_v25 = vld [vmem:[#allocation5 + $0xacc] ss:$72 sps:$4 sm:$0xff]   ;;  %v21846_v27 = vld [vmem:[#allocation5 + $0x1c8] ss:$72 sps:$4 sm:$0xff]  }
 0x323   :  { %5736 = vmatpush2.bf16.msra.mxu0 %v21810_v32  ;;  %v21849_v32 = vld [vmem:[#allocation5 + $0xac8] ss:$72 sps:$4 sm:$0xff]  }
 0x324   :  { %5779 = vmatpush2.bf16.msra.mxu1 %v21813_v36  ;;  %5737 = vmatprep.subr.bf16.mxu0 %v21818_v43  ;;  %v21854_v36 = vld [vmem:[#allocation5 + $0x13c] ss:$72 sps:$4 sm:$0xff]  }
 0x325   :  { %5780 = vmatprep.subr.bf16.mxu1 %v21821_v62  ;;  %v21857_v43 = vld [vmem:[#allocation5 + $0xa3c] ss:$72 sps:$4 sm:$0xff]   ;;  %v21852_v62 = vld [vmem:[#allocation5 + $0x138] ss:$72 sps:$4 sm:$0xff]  }
 0x327   :  { %5738 = vmatpush2.bf16.msra.mxu0 %v21816_v55  ;;  %v21855_v55 = vld [vmem:[#allocation5 + $0xa38] ss:$72 sps:$4 sm:$0xff]  }
 0x328   :  { %5781 = vmatpush2.bf16.msra.mxu1 %v21819_v29  ;;  %10512 = vmatprep.subr.bf16.mxu0 %v21824_v63  ;;  %v21860_v29 = vld [vmem:[#allocation5 + $0xac] ss:$72 sps:$4 sm:$0xff]  }
 0x329   :  { %10555 = vmatprep.subr.bf16.mxu1 %v21827_v31  ;;  %v21863_v63 = vld [vmem:[#allocation5 + $0x9ac] ss:$72 sps:$4 sm:$0xff]   ;;  %v21858_v31 = vld [vmem:[#allocation5 + $0xa8] ss:$72 sps:$4 sm:$0xff]  }
 0x32a   :  { %v5483_v38 = vpop.f32.mrf.mxu0  ;;  %5740 = vmatmul.mubr.bf16.vlgmr.msra.gmra.mxu0 %v24454_v4 }
 0x32b   :  { %v5526_v12 = vpop.f32.mrf.mxu1  ;;  %5783 = vmatmul.mubr.bf16.vlgmr.msra.gmra.mxu1 %v24458_v5  ;;  %10513 = vmatpush1.bf16.msra.mxu0 %v21822_v57  ;;  %v21861_v57 = vld [vmem:[#allocation5 + $0x9a8] ss:$72 sps:$4 sm:$0xff]  }
 0x32c   :  { %v24604_v3 = vadd.f32 %v5526_v12, %v5483_v38  ;;  %10556 = vmatpush1.bf16.msra.mxu1 %v21825_v58  ;;  %v5485_v35 = vpop.f32.mrf.mxu0  ;;  %10514 = vmatprep.subr.bf16.mxu0 %v21830_v40  ;;  %v21866_v58 = vld [vmem:[#allocation5 + $0x1c] ss:$72 sps:$4 sm:$0xff]   ;;  %v21875_v38 = vld [vmem:[#allocation5 + $0x118c] ss:$72 sps:$4 sm:$0xff]   ;;  %v21870_v12 = vld [vmem:[#allocation5 + $0x888] ss:$72 sps:$4 sm:$0xff]  }
 0x32d   :  { %v5528_v0 = vpop.f32.mrf.mxu1  ;;  %10557 = vmatprep.subr.bf16.mxu1 %v21833_v61  ;;  %10544 = vmatprep.mubr.bf16.mxu0 %v24366_v53  ;;  %v21869_v40 = vld [vmem:[#allocation5 + $0x91c] ss:$72 sps:$4 sm:$0xff]   ;;  %v21864_v61 = vld [vmem:[#allocation5 + $0x18] ss:$72 sps:$4 sm:$0xff]  }
 0x32e   :  { %v24606_v24 = vadd.f32 %v5528_v0, %v5485_v35  ;;  %10587 = vmatprep.mubr.bf16.mxu1 %v24368_v54  ;;  %v5487_v50 = vpop.f32.mrf.mxu0  ;;  %v21873_v35 = vld [vmem:[#allocation5 + $0x1188] ss:$72 sps:$4 sm:$0xff]   ;;  %v21878_v0 = vld [vmem:[#allocation5 + $0x7fc] ss:$72 sps:$4 sm:$0xff]  }
 0x32f   :  { %v5530_v51 = vpop.f32.mrf.mxu1  ;;  %10515 = vmatpush1.bf16.msra.mxu0 %v21828_v60  ;;  %v21867_v60 = vld [vmem:[#allocation5 + $0x918] ss:$72 sps:$4 sm:$0xff]  }
 0x330   :  { %v24610_v30 = vadd.f32 %v5530_v51, %v5487_v50  ;;  %10558 = vmatpush1.bf16.msra.mxu1 %v21831_v14  ;;  %10516 = vmatprep.subr.bf16.mxu0 %v21836_v13  ;;  %v21872_v14 = vld [vmem:[#allocation5 + $0x88c] ss:$72 sps:$4 sm:$0xff]   ;;  %v21881_v13 = vld [vmem:[#allocation5 + $0x10fc] ss:$72 sps:$4 sm:$0xff]   ;;  %v21882_v51 = vld [vmem:[#allocation5 + $0x768] ss:$72 sps:$4 sm:$0xff]  }
 0x331   :  { %10559 = vmatprep.subr.bf16.mxu1 %v21839_v6  ;;  %v21876_v6 = vld [vmem:[#allocation5 + $0x7f8] ss:$72 sps:$4 sm:$0xff]   ;;  %v21887_v50 = vld [vmem:[#allocation5 + $0x106c] ss:$72 sps:$4 sm:$0xff]  }
 0x333   :  { %10517 = vmatpush1.bf16.msra.mxu0 %v21834_v11  ;;  %v21879_v11 = vld [vmem:[#allocation5 + $0x10f8] ss:$72 sps:$4 sm:$0xff]  }
 0x334   :  { %10560 = vmatpush1.bf16.msra.mxu1 %v21837_v15  ;;  %10518 = vmatprep.subr.bf16.mxu0 %v21842_v37  ;;  %v21884_v15 = vld [vmem:[#allocation5 + $0x76c] ss:$72 sps:$4 sm:$0xff]   ;;  %v21885_v37 = vld [vmem:[#allocation5 + $0x1068] ss:$72 sps:$4 sm:$0xff]  }
 0x335   :  { %10561 = vmatprep.subr.bf16.mxu1 %v21845_v16  ;;  %v21890_v16 = vld [vmem:[#allocation5 + $0x6dc] ss:$72 sps:$4 sm:$0xff]  }
 0x337   :  { %10519 = vmatpush1.bf16.msra.mxu0 %v21840_v59  ;;  %v21893_v59 = vld [vmem:[#allocation5 + $0xfdc] ss:$72 sps:$4 sm:$0xff]  }
 0x338   :  { %10562 = vmatpush1.bf16.msra.mxu1 %v21843_v18  ;;  %10520 = vmatprep.subr.bf16.mxu0 %v21848_v19  ;;  %v21888_v18 = vld [vmem:[#allocation5 + $0x6d8] ss:$72 sps:$4 sm:$0xff]  }
 0x339   :  { %10563 = vmatprep.subr.bf16.mxu1 %v21851_v25  ;;  %v21891_v19 = vld [vmem:[#allocation5 + $0xfd8] ss:$72 sps:$4 sm:$0xff]   ;;  %v21896_v25 = vld [vmem:[#allocation5 + $0x64c] ss:$72 sps:$4 sm:$0xff]  }
 0x33b   :  { %10521 = vmatpush1.bf16.msra.mxu0 %v21846_v27  ;;  %v21899_v27 = vld [vmem:[#allocation5 + $0xf4c] ss:$72 sps:$4 sm:$0xff]  }
 0x33c   :  { %10564 = vmatpush1.bf16.msra.mxu1 %v21849_v32  ;;  %10522 = vmatprep.subr.bf16.mxu0 %v21854_v36  ;;  %v21894_v32 = vld [vmem:[#allocation5 + $0x648] ss:$72 sps:$4 sm:$0xff]  }
 0x33d   :  { %10565 = vmatprep.subr.bf16.mxu1 %v21857_v43  ;;  %v21897_v36 = vld [vmem:[#allocation5 + $0xf48] ss:$72 sps:$4 sm:$0xff]   ;;  %v21902_v43 = vld [vmem:[#allocation5 + $0x5bc] ss:$72 sps:$4 sm:$0xff]  }
 0x33f   :  { %10523 = vmatpush1.bf16.msra.mxu0 %v21852_v62  ;;  %v21905_v62 = vld [vmem:[#allocation5 + $0xebc] ss:$72 sps:$4 sm:$0xff]  }
 0x340   :  { %10566 = vmatpush1.bf16.msra.mxu1 %v21855_v55  ;;  %10524 = vmatprep.subr.bf16.mxu0 %v21860_v29  ;;  %v21900_v55 = vld [vmem:[#allocation5 + $0x5b8] ss:$72 sps:$4 sm:$0xff]  }
 0x341   :  { %10567 = vmatprep.subr.bf16.mxu1 %v21863_v63  ;;  %v21903_v29 = vld [vmem:[#allocation5 + $0xeb8] ss:$72 sps:$4 sm:$0xff]   ;;  %v21908_v63 = vld [vmem:[#allocation5 + $0x52c] ss:$72 sps:$4 sm:$0xff]  }
 0x343   :  { %10525 = vmatpush1.bf16.msra.mxu0 %v21858_v31  ;;  %v21911_v31 = vld [vmem:[#allocation5 + $0xe2c] ss:$72 sps:$4 sm:$0xff]  }
 0x344   :  { %10568 = vmatpush1.bf16.msra.mxu1 %v21861_v57  ;;  %10526 = vmatprep.subr.bf16.mxu0 %v21866_v58  ;;  %v21906_v57 = vld [vmem:[#allocation5 + $0x528] ss:$72 sps:$4 sm:$0xff]  }
 0x345   :  { %10569 = vmatprep.subr.bf16.mxu1 %v21869_v40  ;;  %v21909_v58 = vld [vmem:[#allocation5 + $0xe28] ss:$72 sps:$4 sm:$0xff]   ;;  %v21914_v40 = vld [vmem:[#allocation5 + $0x49c] ss:$72 sps:$4 sm:$0xff]  }
 0x347   :  { %10527 = vmatpush1.bf16.msra.mxu0 %v21864_v61  ;;  %v21917_v61 = vld [vmem:[#allocation5 + $0xd9c] ss:$72 sps:$4 sm:$0xff]  }
 0x348   :  { %10570 = vmatpush1.bf16.msra.mxu1 %v21867_v60  ;;  %10528 = vmatprep.subr.bf16.mxu0 %v21872_v14  ;;  %v21912_v60 = vld [vmem:[#allocation5 + $0x498] ss:$72 sps:$4 sm:$0xff]  }
 0x349   :  { %10571 = vmatprep.subr.bf16.mxu1 %v21875_v38  ;;  %v21915_v14 = vld [vmem:[#allocation5 + $0xd98] ss:$72 sps:$4 sm:$0xff]   ;;  %v21920_v38 = vld [vmem:[#allocation5 + $0x160c] ss:$72 sps:$4 sm:$0xff]  }
 0x34b   :  { %10529 = vmatpush2.bf16.msra.mxu0 %v21870_v12  ;;  %v21923_v12 = vld [vmem:[#allocation5 + $0x1f0c] ss:$72 sps:$4 sm:$0xff]  }
 0x34c   :  { %10572 = vmatpush2.bf16.msra.mxu1 %v21873_v35  ;;  %10530 = vmatprep.subr.bf16.mxu0 %v21878_v0  ;;  %v21918_v35 = vld [vmem:[#allocation5 + $0x1608] ss:$72 sps:$4 sm:$0xff]  }
 0x34d   :  { %10573 = vmatprep.subr.bf16.mxu1 %v21881_v13  ;;  %v21921_v0 = vld [vmem:[#allocation5 + $0x1f08] ss:$72 sps:$4 sm:$0xff]   ;;  %v24612_v13 = vpop.f32.mrf.mxu0 }
 0x34f   :  { %10531 = vmatpush2.bf16.msra.mxu0 %v21876_v6  ;;  %v24614_v6 = vpop.f32.mrf.mxu1 }
 0x350   :  { %10574 = vmatpush2.bf16.msra.mxu1 %v21879_v11  ;;  %10532 = vmatprep.subr.bf16.mxu0 %v21884_v15  ;;  %v21926_v11 = vld [vmem:[#allocation5 + $0x157c] ss:$72 sps:$4 sm:$0xff]  }
 0x351   :  { %10575 = vmatprep.subr.bf16.mxu1 %v21887_v50  ;;  %v21929_v15 = vld [vmem:[#allocation5 + $0x1e7c] ss:$72 sps:$4 sm:$0xff]   ;;  %v21924_v50 = vld [vmem:[#allocation5 + $0x1578] ss:$72 sps:$4 sm:$0xff]  }
 0x353   :  { %10533 = vmatpush2.bf16.msra.mxu0 %v21882_v51  ;;  %v21927_v51 = vld [vmem:[#allocation5 + $0x1e78] ss:$72 sps:$4 sm:$0xff]  }
 0x354   :  { %10576 = vmatpush2.bf16.msra.mxu1 %v21885_v37  ;;  %10534 = vmatprep.subr.bf16.mxu0 %v21890_v16 }
 0x355   :  { %10577 = vmatprep.subr.bf16.mxu1 %v21893_v59 }
 0x357   :  { %10535 = vmatpush2.bf16.msra.mxu0 %v21888_v18 }
 0x358   :  { %10578 = vmatpush2.bf16.msra.mxu1 %v21891_v19  ;;  %10536 = vmatprep.subr.bf16.mxu0 %v21896_v25  ;;  %v21932_v25 = vld [vmem:[#allocation5 + $0x14ec] ss:$72 sps:$4 sm:$0xff]  }
 0x359   :  { %10579 = vmatprep.subr.bf16.mxu1 %v21899_v27  ;;  %v21935_v27 = vld [vmem:[#allocation5 + $0x1dec] ss:$72 sps:$4 sm:$0xff]  }
 0x35b   :  { %10537 = vmatpush2.bf16.msra.mxu0 %v21894_v32 }
 0x35c   :  { %10580 = vmatpush2.bf16.msra.mxu1 %v21897_v36  ;;  %10538 = vmatprep.subr.bf16.mxu0 %v21902_v43  ;;  %v21930_v43 = vld [vmem:[#allocation5 + $0x14e8] ss:$72 sps:$4 sm:$0xff]  }
 0x35d   :  { %10581 = vmatprep.subr.bf16.mxu1 %v21905_v62  ;;  %v21933_v62 = vld [vmem:[#allocation5 + $0x1de8] ss:$72 sps:$4 sm:$0xff]  }
 0x35f   :  { %10539 = vmatpush2.bf16.msra.mxu0 %v21900_v55 }
 0x360   :  { %10582 = vmatpush2.bf16.msra.mxu1 %v21903_v29  ;;  %10540 = vmatprep.subr.bf16.mxu0 %v21908_v63 }
 0x361   :  { %10583 = vmatprep.subr.bf16.mxu1 %v21911_v31  ;;  %v21938_v31 = vld [vmem:[#allocation5 + $0x145c] ss:$72 sps:$4 sm:$0xff]  }
 0x363   :  { %10541 = vmatpush2.bf16.msra.mxu0 %v21906_v57  ;;  %v21941_v57 = vld [vmem:[#allocation5 + $0x1d5c] ss:$72 sps:$4 sm:$0xff]  }
 0x364   :  { %10584 = vmatpush2.bf16.msra.mxu1 %v21909_v58  ;;  %10542 = vmatprep.subr.bf16.mxu0 %v21914_v40  ;;  %v21939_v40 = vld [vmem:[#allocation5 + $0x1d58] ss:$72 sps:$4 sm:$0xff]  }
 0x365   :  { %10585 = vmatprep.subr.bf16.mxu1 %v21917_v61  ;;  %v21944_v61 = vld [vmem:[#allocation5 + $0x13cc] ss:$72 sps:$4 sm:$0xff]  }
 0x367   :  { %10543 = vmatpush2.bf16.msra.mxu0 %v21912_v60  ;;  %v21947_v60 = vld [vmem:[#allocation5 + $0x1ccc] ss:$72 sps:$4 sm:$0xff]  }
 0x368   :  { %10586 = vmatpush2.bf16.msra.mxu1 %v21915_v14  ;;  %10598 = vmatprep.subr.bf16.mxu0 %v21920_v38  ;;  %v21942_v14 = vld [vmem:[#allocation5 + $0x13c8] ss:$72 sps:$4 sm:$0xff]  }
 0x369   :  { %10641 = vmatprep.subr.bf16.mxu1 %v21923_v12  ;;  %v21945_v38 = vld [vmem:[#allocation5 + $0x1cc8] ss:$72 sps:$4 sm:$0xff]   ;;  %v21953_v12 = vld [vmem:[#allocation5 + $0x1c3c] ss:$72 sps:$4 sm:$0xff]  }
 0x36a   :  { %v5569_v37 = vpop.f32.mrf.mxu0  ;;  %10545 = vmatmul.mubr.bf16.vlgmr.msra.gmra.mxu0 %v24372_v8 }
 0x36b   :  { %v5612_v16 = vpop.f32.mrf.mxu1  ;;  %10588 = vmatmul.mubr.bf16.vlgmr.msra.gmra.mxu1 %v24374_v9  ;;  %v5570_v59 = vadd.f32 %v5569_v37, %v24604_v3  ;;  %10599 = vmatpush1.bf16.msra.mxu0 %v21918_v35  ;;  %v21948_v35 = vld [vmem:[#allocation5 + $0x1338] ss:$72 sps:$4 sm:$0xff]   ;;  %v21962_v37 = vld [vmem:[#allocation5 + $0x121c] ss:$72 sps:$4 sm:$0xff]  }
 0x36c   :  { %10642 = vmatpush1.bf16.msra.mxu1 %v21921_v0  ;;  %v5571_v18 = vpop.f32.mrf.mxu0  ;;  %10600 = vmatprep.subr.bf16.mxu0 %v21926_v11  ;;  %v21951_v0 = vld [vmem:[#allocation5 + $0x1c38] ss:$72 sps:$4 sm:$0xff]   ;;  %v21956_v11 = vld [vmem:[#allocation5 + $0x12ac] ss:$72 sps:$4 sm:$0xff]  }
 0x36d   :  { %v5614_v19 = vpop.f32.mrf.mxu1  ;;  %10643 = vmatprep.subr.bf16.mxu1 %v21929_v15  ;;  %v24619_v32 = vadd.f32 %v5612_v16, %v5570_v59  ;;  %v5572_v36 = vadd.f32 %v5571_v18, %v24606_v24  ;;  %10630 = vmatprep.mubr.bf16.mxu0 %v24388_v41  ;;  %v21936_v24 = vld [vmem:[#allocation5 + $0x1458] ss:$72 sps:$4 sm:$0xff]   ;;  %v21959_v15 = vld [vmem:[#allocation5 + $0x1bac] ss:$72 sps:$4 sm:$0xff]   ;;  %v21965_v16 = vld [vmem:[#allocation5 + $0x1b1c] ss:$72 sps:$4 sm:$0xff]  }
 0x36e   :  { %10673 = vmatprep.mubr.bf16.mxu1 %v24392_v42  ;;  %v5573_v55 = vpop.f32.mrf.mxu0  ;;  %v21960_v59 = vld [vmem:[#allocation5 + $0x1218] ss:$72 sps:$4 sm:$0xff]  }
 0x36f   :  { %v24624_v3 = vadd.f32 %v5614_v19, %v5572_v36  ;;  %v5574_v29 = vadd.f32 %v5573_v55, %v24610_v30  ;;  %10601 = vmatpush1.bf16.msra.mxu0 %v21924_v50  ;;  %v5616_v63 = vpop.f32.mrf.mxu1  ;;  %v21950_v30 = vld [vmem:[#allocation5 + $0x133c] ss:$72 sps:$4 sm:$0xff]   ;;  %v21954_v50 = vld [vmem:[#allocation5 + $0x12a8] ss:$72 sps:$4 sm:$0xff]   ;;  %v21963_v18 = vld [vmem:[#allocation5 + $0x1b18] ss:$72 sps:$4 sm:$0xff]  }
 0x370   :  { %10644 = vmatpush1.bf16.msra.mxu1 %v21927_v51  ;;  %10602 = vmatprep.subr.bf16.mxu0 %v21932_v25  ;;  %v21957_v51 = vld [vmem:[#allocation5 + $0x1ba8] ss:$72 sps:$4 sm:$0xff]   ;;  %v21968_v19 = vld [vmem:[#allocation5 + $0x1a8c] ss:$72 sps:$4 sm:$0xff]   ;;  %v21972_v55 = vld [vmem:[#allocation5 + $0x19f8] ss:$72 sps:$4 sm:$0xff]  }
 0x371   :  { %10645 = vmatprep.subr.bf16.mxu1 %v21935_v27  ;;  %v24627_v58 = vadd.f32 %v5616_v63, %v5574_v29  ;;  %v21971_v25 = vld [vmem:[#allocation5 + $0x238c] ss:$72 sps:$4 sm:$0xff]   ;;  %v21966_v27 = vld [vmem:[#allocation5 + $0x1a88] ss:$72 sps:$4 sm:$0xff]   ;;  %v21975_v29 = vld [vmem:[#allocation5 + $0x22f8] ss:$72 sps:$4 sm:$0xff]  }
 0x372   :  { %v21969_v36 = vld [vmem:[#allocation5 + $0x2388] ss:$72 sps:$4 sm:$0xff]   ;;  %v21980_v63 = vld [vmem:[#allocation5 + $0x196c] ss:$72 sps:$4 sm:$0xff]  }
 0x373   :  { %10603 = vmatpush1.bf16.msra.mxu0 %v21930_v43  ;;  %v21974_v43 = vld [vmem:[#allocation5 + $0x19fc] ss:$72 sps:$4 sm:$0xff]  }
 0x374   :  { %10646 = vmatpush1.bf16.msra.mxu1 %v21933_v62  ;;  %10604 = vmatprep.subr.bf16.mxu0 %v21938_v31  ;;  %v21977_v62 = vld [vmem:[#allocation5 + $0x22fc] ss:$72 sps:$4 sm:$0xff]   ;;  %v21983_v31 = vld [vmem:[#allocation5 + $0x226c] ss:$72 sps:$4 sm:$0xff]  }
 0x375   :  { %10647 = vmatprep.subr.bf16.mxu1 %v21941_v57  ;;  %v21978_v57 = vld [vmem:[#allocation5 + $0x1968] ss:$72 sps:$4 sm:$0xff]  }
 0x377   :  { %10605 = vmatpush1.bf16.msra.mxu0 %v21936_v24  ;;  %v21981_v24 = vld [vmem:[#allocation5 + $0x2268] ss:$72 sps:$4 sm:$0xff]  }
 0x378   :  { %10648 = vmatpush1.bf16.msra.mxu1 %v21939_v40  ;;  %10606 = vmatprep.subr.bf16.mxu0 %v21944_v61  ;;  %v21986_v40 = vld [vmem:[#allocation5 + $0x18dc] ss:$72 sps:$4 sm:$0xff]  }
 0x379   :  { %10649 = vmatprep.subr.bf16.mxu1 %v21947_v60  ;;  %v21989_v61 = vld [vmem:[#allocation5 + $0x21dc] ss:$72 sps:$4 sm:$0xff]   ;;  %v21984_v60 = vld [vmem:[#allocation5 + $0x18d8] ss:$72 sps:$4 sm:$0xff]  }
 0x37b   :  { %10607 = vmatpush1.bf16.msra.mxu0 %v21942_v14  ;;  %v21987_v14 = vld [vmem:[#allocation5 + $0x21d8] ss:$72 sps:$4 sm:$0xff]  }
 0x37c   :  { %10650 = vmatpush1.bf16.msra.mxu1 %v21945_v38  ;;  %10608 = vmatprep.subr.bf16.mxu0 %v21950_v30  ;;  %v21992_v38 = vld [vmem:[#allocation5 + $0x184c] ss:$72 sps:$4 sm:$0xff]  }
 0x37d   :  { %10651 = vmatprep.subr.bf16.mxu1 %v21953_v12  ;;  %v21995_v30 = vld [vmem:[#allocation5 + $0x214c] ss:$72 sps:$4 sm:$0xff]   ;;  %v21990_v12 = vld [vmem:[#allocation5 + $0x1848] ss:$72 sps:$4 sm:$0xff]  }
 0x37f   :  { %10609 = vmatpush1.bf16.msra.mxu0 %v21948_v35  ;;  %v21993_v35 = vld [vmem:[#allocation5 + $0x2148] ss:$72 sps:$4 sm:$0xff]  }
 0x380   :  { %10652 = vmatpush1.bf16.msra.mxu1 %v21951_v0  ;;  %10610 = vmatprep.subr.bf16.mxu0 %v21956_v11  ;;  %v21998_v0 = vld [vmem:[#allocation5 + $0x17bc] ss:$72 sps:$4 sm:$0xff]  }
 0x381   :  { %10653 = vmatprep.subr.bf16.mxu1 %v21959_v15  ;;  %v22001_v11 = vld [vmem:[#allocation5 + $0x20bc] ss:$72 sps:$4 sm:$0xff]   ;;  %v21996_v15 = vld [vmem:[#allocation5 + $0x17b8] ss:$72 sps:$4 sm:$0xff]  }
 0x383   :  { %10611 = vmatpush1.bf16.msra.mxu0 %v21954_v50  ;;  %v21999_v50 = vld [vmem:[#allocation5 + $0x20b8] ss:$72 sps:$4 sm:$0xff]  }
 0x384   :  { %10654 = vmatpush1.bf16.msra.mxu1 %v21957_v51  ;;  %10612 = vmatprep.subr.bf16.mxu0 %v21962_v37  ;;  %v22004_v51 = vld [vmem:[#allocation5 + $0x172c] ss:$72 sps:$4 sm:$0xff]  }
 0x385   :  { %10655 = vmatprep.subr.bf16.mxu1 %v21965_v16  ;;  %v22007_v37 = vld [vmem:[#allocation5 + $0x202c] ss:$72 sps:$4 sm:$0xff]   ;;  %v22002_v16 = vld [vmem:[#allocation5 + $0x1728] ss:$72 sps:$4 sm:$0xff]  }
 0x387   :  { %10613 = vmatpush1.bf16.msra.mxu0 %v21960_v59  ;;  %v22005_v59 = vld [vmem:[#allocation5 + $0x2028] ss:$72 sps:$4 sm:$0xff]  }
 0x388   :  { %10656 = vmatpush1.bf16.msra.mxu1 %v21963_v18  ;;  %10614 = vmatprep.subr.bf16.mxu0 %v21968_v19  ;;  %v22010_v18 = vld [vmem:[#allocation5 + $0x169c] ss:$72 sps:$4 sm:$0xff]  }
 0x389   :  { %10657 = vmatprep.subr.bf16.mxu1 %v21971_v25  ;;  %v22013_v19 = vld [vmem:[#allocation5 + $0x1f9c] ss:$72 sps:$4 sm:$0xff]   ;;  %v22008_v25 = vld [vmem:[#allocation5 + $0x1698] ss:$72 sps:$4 sm:$0xff]  }
 0x38b   :  { %10615 = vmatpush2.bf16.msra.mxu0 %v21966_v27  ;;  %v22011_v27 = vld [vmem:[#allocation5 + $0x1f98] ss:$72 sps:$4 sm:$0xff]  }
 0x38c   :  { %10658 = vmatpush2.bf16.msra.mxu1 %v21969_v36  ;;  %10616 = vmatprep.subr.bf16.mxu0 %v21974_v43  ;;  %v22016_v36 = vld [vmem:[#allocation5 + $0x280c] ss:$72 sps:$4 sm:$0xff]  }
 0x38d   :  { %10659 = vmatprep.subr.bf16.mxu1 %v21977_v62  ;;  %v22019_v43 = vld [vmem:[#allocation5 + $0x310c] ss:$72 sps:$4 sm:$0xff]   ;;  %v22014_v62 = vld [vmem:[#allocation5 + $0x2808] ss:$72 sps:$4 sm:$0xff]  }
 0x38f   :  { %10617 = vmatpush2.bf16.msra.mxu0 %v21972_v55  ;;  %v22017_v55 = vld [vmem:[#allocation5 + $0x3108] ss:$72 sps:$4 sm:$0xff]  }
 0x390   :  { %10660 = vmatpush2.bf16.msra.mxu1 %v21975_v29  ;;  %10618 = vmatprep.subr.bf16.mxu0 %v21980_v63  ;;  %v24629_v29 = vpop.f32.mrf.mxu0  ;;  %v24631_v63 = vpop.f32.mrf.mxu1 }
 0x391   :  { %10661 = vmatprep.subr.bf16.mxu1 %v21983_v31  ;;  %v22022_v31 = vld [vmem:[#allocation5 + $0x277c] ss:$72 sps:$4 sm:$0xff]  }
 0x393   :  { %10619 = vmatpush2.bf16.msra.mxu0 %v21978_v57  ;;  %v22025_v57 = vld [vmem:[#allocation5 + $0x307c] ss:$72 sps:$4 sm:$0xff]  }
 0x394   :  { %10662 = vmatpush2.bf16.msra.mxu1 %v21981_v24  ;;  %10620 = vmatprep.subr.bf16.mxu0 %v21986_v40  ;;  %v22020_v24 = vld [vmem:[#allocation5 + $0x2778] ss:$72 sps:$4 sm:$0xff]  }
 0x395   :  { %10663 = vmatprep.subr.bf16.mxu1 %v21989_v61  ;;  %v22023_v40 = vld [vmem:[#allocation5 + $0x3078] ss:$72 sps:$4 sm:$0xff]  }
 0x397   :  { %10621 = vmatpush2.bf16.msra.mxu0 %v21984_v60 }
 0x398   :  { %10664 = vmatpush2.bf16.msra.mxu1 %v21987_v14  ;;  %10622 = vmatprep.subr.bf16.mxu0 %v21992_v38 }
 0x399   :  { %10665 = vmatprep.subr.bf16.mxu1 %v21995_v30 }
 0x39b   :  { %10623 = vmatpush2.bf16.msra.mxu0 %v21990_v12  ;;  %v22028_v12 = vld [vmem:[#allocation5 + $0x26ec] ss:$72 sps:$4 sm:$0xff]  }
 0x39c   :  { %10666 = vmatpush2.bf16.msra.mxu1 %v21993_v35  ;;  %10624 = vmatprep.subr.bf16.mxu0 %v21998_v0  ;;  %v22031_v35 = vld [vmem:[#allocation5 + $0x2fec] ss:$72 sps:$4 sm:$0xff]  }
 0x39d   :  { %10667 = vmatprep.subr.bf16.mxu1 %v22001_v11 }
 0x39f   :  { %10625 = vmatpush2.bf16.msra.mxu0 %v21996_v15  ;;  %v22026_v15 = vld [vmem:[#allocation5 + $0x26e8] ss:$72 sps:$4 sm:$0xff]  }
 0x3a0   :  { %10668 = vmatpush2.bf16.msra.mxu1 %v21999_v50  ;;  %10626 = vmatprep.subr.bf16.mxu0 %v22004_v51  ;;  %v22029_v50 = vld [vmem:[#allocation5 + $0x2fe8] ss:$72 sps:$4 sm:$0xff]  }
 0x3a1   :  { %10669 = vmatprep.subr.bf16.mxu1 %v22007_v37 }
 0x3a3   :  { %10627 = vmatpush2.bf16.msra.mxu0 %v22002_v16 }
 0x3a4   :  { %10670 = vmatpush2.bf16.msra.mxu1 %v22005_v59  ;;  %10628 = vmatprep.subr.bf16.mxu0 %v22010_v18  ;;  %v22034_v59 = vld [vmem:[#allocation5 + $0x265c] ss:$72 sps:$4 sm:$0xff]  }
 0x3a5   :  { %10671 = vmatprep.subr.bf16.mxu1 %v22013_v19  ;;  %v22037_v18 = vld [vmem:[#allocation5 + $0x2f5c] ss:$72 sps:$4 sm:$0xff]  }
 0x3a7   :  { %10629 = vmatpush2.bf16.msra.mxu0 %v22008_v25  ;;  %v22035_v25 = vld [vmem:[#allocation5 + $0x2f58] ss:$72 sps:$4 sm:$0xff]  }
 0x3a8   :  { %10672 = vmatpush2.bf16.msra.mxu1 %v22011_v27  ;;  %10684 = vmatprep.subr.bf16.mxu0 %v22016_v36  ;;  %v22040_v27 = vld [vmem:[#allocation5 + $0x25cc] ss:$72 sps:$4 sm:$0xff]  }
 0x3a9   :  { %10727 = vmatprep.subr.bf16.mxu1 %v22019_v43  ;;  %v22043_v36 = vld [vmem:[#allocation5 + $0x2ecc] ss:$72 sps:$4 sm:$0xff]   ;;  %v22041_v43 = vld [vmem:[#allocation5 + $0x2ec8] ss:$72 sps:$4 sm:$0xff]  }
 0x3aa   :  { %v5655_v61 = vpop.f32.mrf.mxu0  ;;  %10631 = vmatmul.mubr.bf16.vlgmr.msra.gmra.mxu0 %v24398_v20 }
 0x3ab   :  { %v5698_v60 = vpop.f32.mrf.mxu1  ;;  %10674 = vmatmul.mubr.bf16.vlgmr.msra.gmra.mxu1 %v24402_v21  ;;  %v5656_v14 = vadd.f32 %v5655_v61, %v24619_v32  ;;  %10685 = vmatpush1.bf16.msra.mxu0 %v22014_v62  ;;  %v22046_v62 = vld [vmem:[#allocation5 + $0x253c] ss:$72 sps:$4 sm:$0xff]   ;;  %v22050_v61 = vld [vmem:[#allocation5 + $0x24a8] ss:$72 sps:$4 sm:$0xff]  }
 0x3ac   :  { %10728 = vmatpush1.bf16.msra.mxu1 %v22017_v55  ;;  %v5657_v38 = vpop.f32.mrf.mxu0  ;;  %10686 = vmatprep.subr.bf16.mxu0 %v22022_v31  ;;  %v22049_v55 = vld [vmem:[#allocation5 + $0x2e3c] ss:$72 sps:$4 sm:$0xff]   ;;  %v22044_v31 = vld [vmem:[#allocation5 + $0x2538] ss:$72 sps:$4 sm:$0xff]  }
 0x3ad   :  { %v5700_v30 = vpop.f32.mrf.mxu1  ;;  %10729 = vmatprep.subr.bf16.mxu1 %v22025_v57  ;;  %v24636_v0 = vadd.f32 %v5698_v60, %v5656_v14  ;;  %v5658_v11 = vadd.f32 %v5657_v38, %v24624_v3  ;;  %10716 = vmatprep.mubr.bf16.mxu0 %v24416_v33  ;;  %v22032_v3 = vld [vmem:[#allocation5 + $0x2658] ss:$72 sps:$4 sm:$0xff]   ;;  %v22053_v60 = vld [vmem:[#allocation5 + $0x2da8] ss:$72 sps:$4 sm:$0xff]   ;;  %v22058_v14 = vld [vmem:[#allocation5 + $0x241c] ss:$72 sps:$4 sm:$0xff]  }
 0x3ae   :  { %10759 = vmatprep.mubr.bf16.mxu1 %v24420_v34  ;;  %v5659_v51 = vpop.f32.mrf.mxu0  ;;  %v22047_v57 = vld [vmem:[#allocation5 + $0x2e38] ss:$72 sps:$4 sm:$0xff]   ;;  %v22061_v38 = vld [vmem:[#allocation5 + $0x2d1c] ss:$72 sps:$4 sm:$0xff]  }
 0x3af   :  { %v24641_v32 = vadd.f32 %v5700_v30, %v5658_v11  ;;  %v5660_v37 = vadd.f32 %v5659_v51, %v24627_v58  ;;  %10687 = vmatpush1.bf16.msra.mxu0 %v22020_v24  ;;  %v5702_v16 = vpop.f32.mrf.mxu1  ;;  %v22038_v58 = vld [vmem:[#allocation5 + $0x25c8] ss:$72 sps:$4 sm:$0xff]   ;;  %v22052_v24 = vld [vmem:[#allocation5 + $0x24ac] ss:$72 sps:$4 sm:$0xff]   ;;  %v22056_v30 = vld [vmem:[#allocation5 + $0x2418] ss:$72 sps:$4 sm:$0xff]  }
 0x3b0   :  { %10730 = vmatpush1.bf16.msra.mxu1 %v22023_v40  ;;  %10688 = vmatprep.subr.bf16.mxu0 %v22028_v12  ;;  %v22055_v40 = vld [vmem:[#allocation5 + $0x2dac] ss:$72 sps:$4 sm:$0xff]   ;;  %v22059_v12 = vld [vmem:[#allocation5 + $0x2d18] ss:$72 sps:$4 sm:$0xff]   ;;  %v22070_v51 = vld [vmem:[#allocation5 + $0x2bfc] ss:$72 sps:$4 sm:$0xff]  }
 0x3b1   :  { %10731 = vmatprep.subr.bf16.mxu1 %v22031_v35  ;;  %v24644_v19 = vadd.f32 %v5702_v16, %v5660_v37  ;;  %v22064_v35 = vld [vmem:[#allocation5 + $0x2c8c] ss:$72 sps:$4 sm:$0xff]   ;;  %v22073_v37 = vld [vmem:[#allocation5 + $0x34fc] ss:$72 sps:$4 sm:$0xff]   ;;  %v22068_v16 = vld [vmem:[#allocation5 + $0x2bf8] ss:$72 sps:$4 sm:$0xff]  }
 0x3b2   :  { %v22067_v11 = vld [vmem:[#allocation5 + $0x358c] ss:$72 sps:$4 sm:$0xff]  }
 0x3b3   :  { %10689 = vmatpush1.bf16.msra.mxu0 %v22026_v15  ;;  %v22062_v15 = vld [vmem:[#allocation5 + $0x2c88] ss:$72 sps:$4 sm:$0xff]  }
 0x3b4   :  { %10732 = vmatpush1.bf16.msra.mxu1 %v22029_v50  ;;  %10690 = vmatprep.subr.bf16.mxu0 %v22034_v59  ;;  %v22065_v50 = vld [vmem:[#allocation5 + $0x3588] ss:$72 sps:$4 sm:$0xff]   ;;  %v22071_v59 = vld [vmem:[#allocation5 + $0x34f8] ss:$72 sps:$4 sm:$0xff]  }
 0x3b5   :  { %10733 = vmatprep.subr.bf16.mxu1 %v22037_v18  ;;  %v22076_v18 = vld [vmem:[#allocation5 + $0x2b6c] ss:$72 sps:$4 sm:$0xff]  }
 0x3b7   :  { %10691 = vmatpush1.bf16.msra.mxu0 %v22032_v3  ;;  %v22079_v3 = vld [vmem:[#allocation5 + $0x346c] ss:$72 sps:$4 sm:$0xff]  }
 0x3b8   :  { %10734 = vmatpush1.bf16.msra.mxu1 %v22035_v25  ;;  %10692 = vmatprep.subr.bf16.mxu0 %v22040_v27  ;;  %v22074_v25 = vld [vmem:[#allocation5 + $0x2b68] ss:$72 sps:$4 sm:$0xff]  }
 0x3b9   :  { %10735 = vmatprep.subr.bf16.mxu1 %v22043_v36  ;;  %v22077_v27 = vld [vmem:[#allocation5 + $0x3468] ss:$72 sps:$4 sm:$0xff]   ;;  %v22082_v36 = vld [vmem:[#allocation5 + $0x2adc] ss:$72 sps:$4 sm:$0xff]  }
 0x3bb   :  { %10693 = vmatpush1.bf16.msra.mxu0 %v22038_v58  ;;  %v22085_v58 = vld [vmem:[#allocation5 + $0x33dc] ss:$72 sps:$4 sm:$0xff]  }
 0x3bc   :  { %10736 = vmatpush1.bf16.msra.mxu1 %v22041_v43  ;;  %10694 = vmatprep.subr.bf16.mxu0 %v22046_v62  ;;  %v22080_v43 = vld [vmem:[#allocation5 + $0x2ad8] ss:$72 sps:$4 sm:$0xff]  }
 0x3bd   :  { %10737 = vmatprep.subr.bf16.mxu1 %v22049_v55  ;;  %v22083_v62 = vld [vmem:[#allocation5 + $0x33d8] ss:$72 sps:$4 sm:$0xff]   ;;  %v22088_v55 = vld [vmem:[#allocation5 + $0x2a4c] ss:$72 sps:$4 sm:$0xff]  }
 0x3bf   :  { %10695 = vmatpush1.bf16.msra.mxu0 %v22044_v31  ;;  %v22091_v31 = vld [vmem:[#allocation5 + $0x334c] ss:$72 sps:$4 sm:$0xff]  }
 0x3c0   :  { %10738 = vmatpush1.bf16.msra.mxu1 %v22047_v57  ;;  %10696 = vmatprep.subr.bf16.mxu0 %v22052_v24  ;;  %v22086_v57 = vld [vmem:[#allocation5 + $0x2a48] ss:$72 sps:$4 sm:$0xff]  }
 0x3c1   :  { %10739 = vmatprep.subr.bf16.mxu1 %v22055_v40  ;;  %v22089_v24 = vld [vmem:[#allocation5 + $0x3348] ss:$72 sps:$4 sm:$0xff]   ;;  %v22094_v40 = vld [vmem:[#allocation5 + $0x29bc] ss:$72 sps:$4 sm:$0xff]  }
 0x3c3   :  { %10697 = vmatpush1.bf16.msra.mxu0 %v22050_v61  ;;  %v22097_v61 = vld [vmem:[#allocation5 + $0x32bc] ss:$72 sps:$4 sm:$0xff]  }
 0x3c4   :  { %10740 = vmatpush1.bf16.msra.mxu1 %v22053_v60  ;;  %10698 = vmatprep.subr.bf16.mxu0 %v22058_v14  ;;  %v22092_v60 = vld [vmem:[#allocation5 + $0x29b8] ss:$72 sps:$4 sm:$0xff]  }
 0x3c5   :  { %10741 = vmatprep.subr.bf16.mxu1 %v22061_v38  ;;  %v22095_v14 = vld [vmem:[#allocation5 + $0x32b8] ss:$72 sps:$4 sm:$0xff]   ;;  %v4845_v38 = vadd.f32 %v24472_v45, %v24470_v44 }
 0x3c6   :  { %v22104_v44 = vld [vmem:[#allocation5 + $0x2898] ss:$72 sps:$4 sm:$0xff]  }
 0x3c7   :  { %10699 = vmatpush1.bf16.msra.mxu0 %v22056_v30  ;;  %v22100_v30 = vld [vmem:[#allocation5 + $0x292c] ss:$72 sps:$4 sm:$0xff]   ;;  %v22107_v45 = vld [vmem:[#allocation5 + $0x3198] ss:$72 sps:$4 sm:$0xff]  }
 0x3c8   :  { %10742 = vmatpush1.bf16.msra.mxu1 %v22059_v12  ;;  %10700 = vmatprep.subr.bf16.mxu0 %v22064_v35  ;;  %v22103_v12 = vld [vmem:[#allocation5 + $0x322c] ss:$72 sps:$4 sm:$0xff]   ;;  %v4888_v35 = vadd.f32 %v24487_v22, %v4845_v38  ;;  %v22125_v38 = vld [vmem:[#allocation5 + $0x41e8] ss:$72 sps:$4 sm:$0xff]  }
 0x3c9   :  { %10743 = vmatprep.subr.bf16.mxu1 %v22067_v11  ;;  %v22098_v11 = vld [vmem:[#allocation5 + $0x2928] ss:$72 sps:$4 sm:$0xff]  }
 0x3cb   :  { %10701 = vmatpush2.bf16.msra.mxu0 %v22062_v15  ;;  %v22101_v15 = vld [vmem:[#allocation5 + $0x3228] ss:$72 sps:$4 sm:$0xff]  }
 0x3cc   :  { %10744 = vmatpush2.bf16.msra.mxu1 %v22065_v50  ;;  %10702 = vmatprep.subr.bf16.mxu0 %v22070_v51  ;;  %v22106_v50 = vld [vmem:[#allocation5 + $0x289c] ss:$72 sps:$4 sm:$0xff]  }
 0x3cd   :  { %10745 = vmatprep.subr.bf16.mxu1 %v22073_v37  ;;  %v22109_v51 = vld [vmem:[#allocation5 + $0x319c] ss:$72 sps:$4 sm:$0xff]   ;;  %v4931_v37 = vadd.f32 %v24489_v23, %v4888_v35 }
 0x3cf   :  { %10703 = vmatpush2.bf16.msra.mxu0 %v22068_v16  ;;  %v5533_v16 = vadd.f32 %v24614_v6, %v24612_v13  ;;  %v5704_v6 = vpop.f32.mrf.mxu1 }
 0x3d0   :  { %10746 = vmatpush2.bf16.msra.mxu1 %v22071_v59  ;;  %10704 = vmatprep.subr.bf16.mxu0 %v22076_v18  ;;  %v4974_v59 = vadd.f32 %v24504_v46, %v4931_v37  ;;  %v22112_v18 = vld [vmem:[#allocation5 + $0x3a0c] ss:$72 sps:$4 sm:$0xff]   ;;  %v22121_v46 = vld [vmem:[#allocation5 + $0x427c] ss:$72 sps:$4 sm:$0xff]  }
 0x3d1   :  { %10747 = vmatprep.subr.bf16.mxu1 %v22079_v3  ;;  %v5576_v22 = vadd.f32 %v24629_v29, %v5533_v16  ;;  %v22115_v3 = vld [vmem:[#allocation5 + $0x430c] ss:$72 sps:$4 sm:$0xff]   ;;  %v22119_v29 = vld [vmem:[#allocation5 + $0x4278] ss:$72 sps:$4 sm:$0xff]   ;;  %v22130_v16 = vld [vmem:[#allocation5 + $0x385c] ss:$72 sps:$4 sm:$0xff]  }
 0x3d2   :  { %v5017_v23 = vadd.f32 %v24506_v47, %v4974_v59 }
 0x3d3   :  { %10705 = vmatpush2.bf16.msra.mxu0 %v22074_v25  ;;  %v22110_v25 = vld [vmem:[#allocation5 + $0x3a08] ss:$72 sps:$4 sm:$0xff]   ;;  %v5619_v13 = vadd.f32 %v24631_v63, %v5576_v22 }
 0x3d4   :  { %10748 = vmatpush2.bf16.msra.mxu1 %v22077_v27  ;;  %10706 = vmatprep.subr.bf16.mxu0 %v22082_v36  ;;  %v22113_v27 = vld [vmem:[#allocation5 + $0x4308] ss:$72 sps:$4 sm:$0xff]   ;;  %v5661_v36 = vpop.f32.mrf.mxu0 }
 0x3d5   :  { %10749 = vmatprep.subr.bf16.mxu1 %v22085_v58  ;;  %v22118_v58 = vld [vmem:[#allocation5 + $0x397c] ss:$72 sps:$4 sm:$0xff]  }
 0x3d7   :  { %10707 = vmatpush2.bf16.msra.mxu0 %v22080_v43  ;;  %v22116_v43 = vld [vmem:[#allocation5 + $0x3978] ss:$72 sps:$4 sm:$0xff]  }
 0x3d8   :  { %10750 = vmatpush2.bf16.msra.mxu1 %v22083_v62  ;;  %10708 = vmatprep.subr.bf16.mxu0 %v22088_v55  ;;  %v5060_v62 = vadd.f32 %v24521_v7, %v5017_v23  ;;  %v5662_v55 = vadd.f32 %v5661_v36, %v5619_v13  ;;  %v22136_v36 = vld [vmem:[#allocation5 + $0x37cc] ss:$72 sps:$4 sm:$0xff]   ;;  %v5798_v13 = vmul.f32 %v24584_v26, %v24584_v26  ;;  %v22140_v26 = vld [vmem:[#allocation5 + $0x3738] ss:$72 sps:$4 sm:$0xff]  }
 0x3d9   :  { %10751 = vmatprep.subr.bf16.mxu1 %v22091_v31  ;;  %v22139_v23 = vld [vmem:[#allocation5 + $0x40cc] ss:$72 sps:$4 sm:$0xff]  }
 0x3db   :  { %10709 = vmatpush2.bf16.msra.mxu0 %v22086_v57 }
 0x3dc   :  { %10752 = vmatpush2.bf16.msra.mxu1 %v22089_v24  ;;  %10710 = vmatprep.subr.bf16.mxu0 %v22094_v40  ;;  %v22124_v40 = vld [vmem:[#allocation5 + $0x38ec] ss:$72 sps:$4 sm:$0xff]  }
 0x3dd   :  { %10753 = vmatprep.subr.bf16.mxu1 %v22097_v61  ;;  %v22127_v61 = vld [vmem:[#allocation5 + $0x41ec] ss:$72 sps:$4 sm:$0xff]  }
 0x3df   :  { %10711 = vmatpush2.bf16.msra.mxu0 %v22092_v60 }
 0x3e0   :  { %10754 = vmatpush2.bf16.msra.mxu1 %v22095_v14  ;;  %10712 = vmatprep.subr.bf16.mxu0 %v22100_v30  ;;  %v22122_v14 = vld [vmem:[#allocation5 + $0x38e8] ss:$72 sps:$4 sm:$0xff]   ;;  %v5103_v30 = vadd.f32 %v24523_v10, %v5060_v62  ;;  %v22142_v62 = vld [vmem:[#allocation5 + $0x373c] ss:$72 sps:$4 sm:$0xff]  }
 0x3e1   :  { %10755 = vmatprep.subr.bf16.mxu1 %v22103_v12  ;;  %v5705_v12 = vadd.f32 %v5704_v6, %v5662_v55  ;;  %v22145_v55 = vld [vmem:[#allocation5 + $0x403c] ss:$72 sps:$4 sm:$0xff]  }
 0x3e2   :  { %v5797_v22 = vmul.f32 %v5103_v30, %v5103_v30  ;;  %v22160_v30 = vld [vmem:[#allocation5 + $0x3e8c] ss:$72 sps:$4 sm:$0xff]  }
 0x3e3   :  { %10713 = vmatpush2.bf16.msra.mxu0 %v22098_v11 }
 0x3e4   :  { %10756 = vmatpush2.bf16.msra.mxu1 %v22101_v15  ;;  %10714 = vmatprep.subr.bf16.mxu0 %v22106_v50 }
 0x3e5   :  { %10757 = vmatprep.subr.bf16.mxu1 %v22109_v51 }
 0x3e7   :  { %10715 = vmatpush2.bf16.msra.mxu0 %v22104_v44  ;;  %v22133_v44 = vld [vmem:[#allocation5 + $0x415c] ss:$72 sps:$4 sm:$0xff]  }
 0x3e8   :  { %10758 = vmatpush2.bf16.msra.mxu1 %v22107_v45  ;;  %10770 = vmatprep.subr.bf16.mxu0 %v22112_v18 }
 0x3e9   :  { %10813 = vmatprep.subr.bf16.mxu1 %v22115_v3 }
 0x3ea   :  { %v5741_v31 = vpop.f32.mrf.mxu0  ;;  %10717 = vmatmul.mubr.bf16.vlgmr.msra.gmra.mxu0 %v24430_v48 }
 0x3eb   :  { %v5784_v57 = vpop.f32.mrf.mxu1  ;;  %10760 = vmatmul.mubr.bf16.vlgmr.msra.gmra.mxu1 %v24434_v49  ;;  %v5742_v47 = vadd.f32 %v5741_v31, %v24636_v0  ;;  %10771 = vmatpush1.bf16.msra.mxu0 %v22110_v25  ;;  %v5794_v0 = vmul.f32 %v24516_v52, %v24516_v52  ;;  %v22143_v31 = vld [vmem:[#allocation5 + $0x4038] ss:$72 sps:$4 sm:$0xff]  }
 0x3ec   :  { %10814 = vmatpush1.bf16.msra.mxu1 %v22113_v27  ;;  %v5743_v63 = vpop.f32.mrf.mxu0  ;;  %10772 = vmatprep.subr.bf16.mxu0 %v22118_v58  ;;  %v22131_v27 = vld [vmem:[#allocation5 + $0x4158] ss:$72 sps:$4 sm:$0xff]  }
 0x3ed   :  { %v5786_v24 = vpop.f32.mrf.mxu1  ;;  %10815 = vmatprep.subr.bf16.mxu1 %v22121_v46  ;;  %v5785_v60 = vadd.f32 %v5784_v57, %v5742_v47  ;;  %v5744_v7 = vadd.f32 %v5743_v63, %v24641_v32  ;;  %10802 = vmatprep.mubr.bf16.mxu0 %v24442_v56  ;;  %v5795_v32 = vmul.f32 %v24576_v39, %v24576_v39  ;;  %v22128_v39 = vld [vmem:[#allocation5 + $0x3858] ss:$72 sps:$4 sm:$0xff]   ;;  %v22148_v57 = vld [vmem:[#allocation5 + $0x36ac] ss:$72 sps:$4 sm:$0xff]   ;;  %v22146_v63 = vld [vmem:[#allocation5 + $0x36a8] ss:$72 sps:$4 sm:$0xff]  }
 0x3ee   :  { %10845 = vmatprep.mubr.bf16.mxu1 %v24446_v28  ;;  %v5745_v35 = vpop.f32.mrf.mxu0  ;;  %v22151_v47 = vld [vmem:[#allocation5 + $0x3fac] ss:$72 sps:$4 sm:$0xff]  }
 0x3ef   :  { %v5788_v11 = vpop.f32.mrf.mxu1  ;;  %v5800_v15 = vmul.f32 %v5785_v60, %v5785_v60  ;;  %v5787_v50 = vadd.f32 %v5786_v24, %v5744_v7  ;;  %v5746_v51 = vadd.f32 %v5745_v35, %v24644_v19  ;;  %10773 = vmatpush1.bf16.msra.mxu0 %v22116_v43  ;;  %v22134_v43 = vld [vmem:[#allocation5 + $0x37c8] ss:$72 sps:$4 sm:$0xff]   ;;  %v22157_v60 = vld [vmem:[#allocation5 + $0x3f1c] ss:$72 sps:$4 sm:$0xff]   ;;  %v22152_v7 = vld [vmem:[#allocation5 + $0x3618] ss:$72 sps:$4 sm:$0xff]  }
 0x3f0   :  { %10816 = vmatpush1.bf16.msra.mxu1 %v22119_v29  ;;  %v5747_v37 = vpop.f32.mrf.mxu0  ;;  %10774 = vmatprep.subr.bf16.mxu0 %v22124_v40  ;;  %v22137_v29 = vld [vmem:[#allocation5 + $0x40c8] ss:$72 sps:$4 sm:$0xff]  }
 0x3f1   :  { %10817 = vmatprep.subr.bf16.mxu1 %v22127_v61  ;;  %v24669_v52 = vadd.f32 %v5800_v15, %v5794_v0  ;;  %v5801_v10 = vmul.f32 %v5787_v50, %v5787_v50  ;;  %v5789_v45 = vadd.f32 %v5788_v11, %v5746_v51  ;;  %v5748_v59 = vadd.f32 %v5747_v37, %v5705_v12  ;;  %v5790_v18 = vpop.f32.mrf.mxu1  ;;  %v22149_v24 = vld [vmem:[#allocation5 + $0x3fa8] ss:$72 sps:$4 sm:$0xff]   ;;  %v22154_v61 = vld [vmem:[#allocation5 + $0x361c] ss:$72 sps:$4 sm:$0xff]   ;;  %v22155_v0 = vld [vmem:[#allocation5 + $0x3f18] ss:$72 sps:$4 sm:$0xff]  }
 0x3f2   :  { %v22163_v11 = vld [vmem:[#allocation5 + $0x478c] ss:$72 sps:$4 sm:$0xff]   ;;  %v22158_v15 = vld [vmem:[#allocation5 + $0x3e88] ss:$72 sps:$4 sm:$0xff]  }
 0x3f3   :  { %24202 = vrsqrt.f32 %v24669_v52  ;;  %v24672_v19 = vadd.f32 %v5801_v10, %v5795_v32  ;;  %v5803_v3 = vmul.f32 %v5789_v45, %v5789_v45  ;;  %v5791_v25 = vadd.f32 %v5790_v18, %v5748_v59  ;;  %10775 = vmatpush1.bf16.msra.mxu0 %v22122_v14  ;;  %v22161_v10 = vld [vmem:[#allocation5 + $0x4788] ss:$72 sps:$4 sm:$0xff]   ;;  %v22166_v45 = vld [vmem:[#allocation5 + $0x3dfc] ss:$72 sps:$4 sm:$0xff]  }
 0x3f4   :  { %10818 = vmatpush1.bf16.msra.mxu1 %v22125_v38  ;;  %10776 = vmatprep.subr.bf16.mxu0 %v22130_v16  ;;  %vm5820_vm4 = vcmp.eq.f32.partialorder %v24669_v52, inf  ;;  %vm5822_vm5 = vcmp.eq.f32.partialorder %v24669_v52, 0.0  ;;  %v5823_v51 = vand.u32 2147483648, %v24669_v52 }
 0x3f5   :  { %10819 = vmatprep.subr.bf16.mxu1 %v22133_v44  ;;  %24204 = vrsqrt.f32 %v24672_v19  ;;  %v24677_v6 = vadd.f32 %v5803_v3, %v5797_v22  ;;  %v5804_v58 = vmul.f32 %v5791_v25, %v5791_v25  ;;  %vm5827_vm6 = vcmp.eq.f32.partialorder %v24672_v19, inf  ;;  %v22169_v3 = vld [vmem:[#allocation5 + $0x46fc] ss:$72 sps:$4 sm:$0xff]  }
 0x3f6   :  { %v5830_v44 = vand.u32 2147483648, %v24672_v19  ;;  %vm5829_vm10 = vcmp.eq.f32.partialorder %v24672_v19, 0.0 }
 0x3f7   :  { %24206 = vrsqrt.f32 %v24677_v6  ;;  %v24680_v46 = vadd.f32 %v5804_v58, %v5798_v13  ;;  %10777 = vmatpush1.bf16.msra.mxu0 %v22128_v39  ;;  %vm5841_vm7 = vcmp.eq.f32.partialorder %v24677_v6, inf  ;;  %v5844_v16 = vand.u32 2147483648, %v24677_v6  ;;  %v22167_v58 = vld [vmem:[#allocation5 + $0x46f8] ss:$72 sps:$4 sm:$0xff]  }
 0x3f8   :  { %10820 = vmatpush1.bf16.msra.mxu1 %v22131_v27  ;;  %10778 = vmatprep.subr.bf16.mxu0 %v22136_v36  ;;  %vm5843_vm8 = vcmp.eq.f32.partialorder %v24677_v6, 0.0 }
 0x3f9   :  { %10821 = vmatprep.subr.bf16.mxu1 %v22139_v23  ;;  %24208 = vrsqrt.f32 %v24680_v46  ;;  %vm5848_vm9 = vcmp.eq.f32.partialorder %v24680_v46, inf  ;;  %v5851_v27 = vand.u32 2147483648, %v24680_v46  ;;  %vm5850_vm11 = vcmp.eq.f32.partialorder %v24680_v46, 0.0 }
 0x3fb   :  { %10779 = vmatpush1.bf16.msra.mxu0 %v22134_v43 }
 0x3fc   :  { %10822 = vmatpush1.bf16.msra.mxu1 %v22137_v29  ;;  %10780 = vmatprep.subr.bf16.mxu0 %v22142_v62  ;;  %v22172_v29 = vld [vmem:[#allocation5 + $0x3d6c] ss:$72 sps:$4 sm:$0xff]  }
 0x3fd   :  { %10823 = vmatprep.subr.bf16.mxu1 %v22145_v55  ;;  %v22175_v62 = vld [vmem:[#allocation5 + $0x466c] ss:$72 sps:$4 sm:$0xff]   ;;  %v22173_v55 = vld [vmem:[#allocation5 + $0x4668] ss:$72 sps:$4 sm:$0xff]  }
 0x3ff   :  { %10781 = vmatpush1.bf16.msra.mxu0 %v22140_v26  ;;  %v22181_v26 = vld [vmem:[#allocation5 + $0x45dc] ss:$72 sps:$4 sm:$0xff]  }
 0x400   :  { %10824 = vmatpush1.bf16.msra.mxu1 %v22143_v31  ;;  %v24203_v40 = vpop.eup %24202  ;;  %10782 = vmatprep.subr.bf16.mxu0 %v22148_v57  ;;  %v22176_v31 = vld [vmem:[#allocation5 + $0x3cd8] ss:$72 sps:$4 sm:$0xff]  }
 0x401   :  { %10825 = vmatprep.subr.bf16.mxu1 %v22151_v47  ;;  %v5819_v14 = vmul.f32 %v24203_v40, %v24669_v52  ;;  %v22179_v57 = vld [vmem:[#allocation5 + $0x45d8] ss:$72 sps:$4 sm:$0xff]   ;;  %v22184_v47 = vld [vmem:[#allocation5 + $0x3c4c] ss:$72 sps:$4 sm:$0xff]   ;;  %v22185_v40 = vld [vmem:[#allocation5 + $0x4548] ss:$72 sps:$4 sm:$0xff]  }
 0x402   :  { %v24205_v38 = vpop.eup %24204 }
 0x403   :  { %10783 = vmatpush1.bf16.msra.mxu0 %v22146_v63  ;;  %v5826_v12 = vmul.f32 %v24205_v38, %v24672_v19  ;;  %v5821_v50 = vsel %vm5820_vm4, %v24669_v52, %v5819_v14  ;;  %v22187_v63 = vld [vmem:[#allocation5 + $0x454c] ss:$72 sps:$4 sm:$0xff]   ;;  %v22191_v14 = vld [vmem:[#allocation5 + $0x44b8] ss:$72 sps:$4 sm:$0xff]  }
 0x404   :  { %10826 = vmatpush1.bf16.msra.mxu1 %v22149_v24  ;;  %v24207_v35 = vpop.eup %24206  ;;  %10784 = vmatprep.subr.bf16.mxu0 %v22154_v61  ;;  %v24700_v25 = vsel %vm5822_vm5, %v5823_v51, %v5821_v50  ;;  %v22182_v24 = vld [vmem:[#allocation5 + $0x3c48] ss:$72 sps:$4 sm:$0xff]   ;;  %v22190_v61 = vld [vmem:[#allocation5 + $0x3bbc] ss:$72 sps:$4 sm:$0xff]   ;;  %v22196_v38 = vld [vmem:[#allocation5 + $0x3b2c] ss:$72 sps:$4 sm:$0xff]  }
 0x405   :  { %10827 = vmatprep.subr.bf16.mxu1 %v22157_v60  ;;  %v5840_v32 = vmul.f32 %v24207_v35, %v24677_v6  ;;  %v5828_v22 = vsel %vm5827_vm6, %v24672_v19, %v5826_v12  ;;  %v22170_v19 = vld [vmem:[#allocation5 + $0x3d68] ss:$72 sps:$4 sm:$0xff]   ;;  %v22193_v60 = vld [vmem:[#allocation5 + $0x44bc] ss:$72 sps:$4 sm:$0xff]   ;;  %v22203_v50 = vld [vmem:[#allocation5 + $0x4398] ss:$72 sps:$4 sm:$0xff]  }
 0x406   :  { %v24209_v37 = vpop.eup %24208  ;;  %v24711_v13 = vsel %vm5829_vm10, %v5830_v44, %v5828_v22  ;;  %v22197_v12 = vld [vmem:[#allocation5 + $0x4428] ss:$72 sps:$4 sm:$0xff]   ;;  %v22202_v35 = vld [vmem:[#allocation5 + $0x3a9c] ss:$72 sps:$4 sm:$0xff]  }
 0x407   :  { %10785 = vmatpush1.bf16.msra.mxu0 %v22152_v7  ;;  %v5842_v59 = vsel %vm5841_vm7, %v24677_v6, %v5840_v32  ;;  %v5847_v18 = vmul.f32 %v24209_v37, %v24680_v46  ;;  %v22164_v6 = vld [vmem:[#allocation5 + $0x3df8] ss:$72 sps:$4 sm:$0xff]   ;;  %v22208_v51 = vld [vmem:[#allocation5 + $0x414] ss:$72 sps:$4 sm:$0xff]   ;;  %v22214_v44 = vld [vmem:[#allocation5 + $0x384] ss:$72 sps:$4 sm:$0xff]  }
 0x408   :  { %10828 = vmatpush1.bf16.msra.mxu1 %v22155_v0  ;;  %10786 = vmatprep.subr.bf16.mxu0 %v22160_v30  ;;  %v24702_v39 = vsel %vm5843_vm8, %v5844_v16, %v5842_v59  ;;  %v22188_v7 = vld [vmem:[#allocation5 + $0x3bb8] ss:$72 sps:$4 sm:$0xff]   ;;  %v22199_v0 = vld [vmem:[#allocation5 + $0x442c] ss:$72 sps:$4 sm:$0xff]   ;;  %v22194_v30 = vld [vmem:[#allocation5 + $0x3b28] ss:$72 sps:$4 sm:$0xff]  }
 0x409   :  { %10829 = vmatprep.subr.bf16.mxu1 %v22163_v11  ;;  %v5849_v23 = vsel %vm5848_vm9, %v24680_v46, %v5847_v18  ;;  %v22178_v46 = vld [vmem:[#allocation5 + $0x3cdc] ss:$72 sps:$4 sm:$0xff]   ;;  %v22206_v37 = vld [vmem:[#allocation5 + $0x410] ss:$72 sps:$4 sm:$0xff]   ;;  %v22215_v59 = vld [vmem:[#allocation5 + $0xc80] ss:$72 sps:$4 sm:$0xff]  }
 0x40a   :  { %v24713_v52 = vsel %vm5850_vm11, %v5851_v27, %v5849_v23  ;;  %v22205_v11 = vld [vmem:[#allocation5 + $0x439c] ss:$72 sps:$4 sm:$0xff]   ;;  %v22209_v16 = vld [vmem:[#allocation5 + $0xd10] ss:$72 sps:$4 sm:$0xff]  }
 0x40b   :  { %10787 = vmatpush2.bf16.msra.mxu0 %v22158_v15  ;;  %v22200_v15 = vld [vmem:[#allocation5 + $0x3a98] ss:$72 sps:$4 sm:$0xff]   ;;  %v22211_v32 = vld [vmem:[#allocation5 + $0xd14] ss:$72 sps:$4 sm:$0xff]  }
 0x40c   :  { %10830 = vmatpush2.bf16.msra.mxu1 %v22161_v10  ;;  %10788 = vmatprep.subr.bf16.mxu0 %v22166_v45  ;;  %v22217_v10 = vld [vmem:[#allocation5 + $0xc84] ss:$72 sps:$4 sm:$0xff]   ;;  %v22212_v45 = vld [vmem:[#allocation5 + $0x380] ss:$72 sps:$4 sm:$0xff]  }
 0x40d   :  { %10831 = vmatprep.subr.bf16.mxu1 %v22169_v3 }
 0x40f   :  { %10789 = vmatpush2.bf16.msra.mxu0 %v22164_v6  ;;  %v22220_v6 = vld [vmem:[#allocation5 + $0x2f4] ss:$72 sps:$4 sm:$0xff]  }
 0x410   :  { %10832 = vmatpush2.bf16.msra.mxu1 %v22167_v58  ;;  %10790 = vmatprep.subr.bf16.mxu0 %v22172_v29  ;;  %v22223_v58 = vld [vmem:[#allocation5 + $0xbf4] ss:$72 sps:$4 sm:$0xff]  }
 0x411   :  { %10833 = vmatprep.subr.bf16.mxu1 %v22175_v62  ;;  %v22218_v62 = vld [vmem:[#allocation5 + $0x2f0] ss:$72 sps:$4 sm:$0xff]  }
 0x413   :  { %10791 = vmatpush2.bf16.msra.mxu0 %v22170_v19  ;;  %v22221_v19 = vld [vmem:[#allocation5 + $0xbf0] ss:$72 sps:$4 sm:$0xff]  }
 0x414   :  { %10834 = vmatpush2.bf16.msra.mxu1 %v22173_v55  ;;  %10792 = vmatprep.subr.bf16.mxu0 %v22178_v46 }
 0x415   :  { %10835 = vmatprep.subr.bf16.mxu1 %v22181_v26 }
 0x417   :  { %10793 = vmatpush2.bf16.msra.mxu0 %v22176_v31 }
 0x418   :  { %10836 = vmatpush2.bf16.msra.mxu1 %v22179_v57  ;;  %10794 = vmatprep.subr.bf16.mxu0 %v22184_v47  ;;  %v22226_v47 = vld [vmem:[#allocation5 + $0x264] ss:$72 sps:$4 sm:$0xff]  }
 0x419   :  { %10837 = vmatprep.subr.bf16.mxu1 %v22187_v63  ;;  %v22229_v63 = vld [vmem:[#allocation5 + $0xb64] ss:$72 sps:$4 sm:$0xff]  }
 0x41b   :  { %10795 = vmatpush2.bf16.msra.mxu0 %v22182_v24 }
 0x41c   :  { %10838 = vmatpush2.bf16.msra.mxu1 %v22185_v40  ;;  %10796 = vmatprep.subr.bf16.mxu0 %v22190_v61  ;;  %v22224_v40 = vld [vmem:[#allocation5 + $0x260] ss:$72 sps:$4 sm:$0xff]  }
 0x41d   :  { %10839 = vmatprep.subr.bf16.mxu1 %v22193_v60  ;;  %v22227_v61 = vld [vmem:[#allocation5 + $0xb60] ss:$72 sps:$4 sm:$0xff]   ;;  %v22232_v60 = vld [vmem:[#allocation5 + $0x1d4] ss:$72 sps:$4 sm:$0xff]  }
 0x41f   :  { %10797 = vmatpush2.bf16.msra.mxu0 %v22188_v7  ;;  %v22235_v7 = vld [vmem:[#allocation5 + $0xad4] ss:$72 sps:$4 sm:$0xff]  }
 0x420   :  { %10840 = vmatpush2.bf16.msra.mxu1 %v22191_v14  ;;  %10798 = vmatprep.subr.bf16.mxu0 %v22196_v38  ;;  %v22230_v14 = vld [vmem:[#allocation5 + $0x1d0] ss:$72 sps:$4 sm:$0xff]  }
 0x421   :  { %10841 = vmatprep.subr.bf16.mxu1 %v22199_v0  ;;  %v22233_v38 = vld [vmem:[#allocation5 + $0xad0] ss:$72 sps:$4 sm:$0xff]   ;;  %v22238_v0 = vld [vmem:[#allocation5 + $0x144] ss:$72 sps:$4 sm:$0xff]  }
 0x423   :  { %10799 = vmatpush2.bf16.msra.mxu0 %v22194_v30  ;;  %v22241_v30 = vld [vmem:[#allocation5 + $0xa44] ss:$72 sps:$4 sm:$0xff]  }
 0x424   :  { %10842 = vmatpush2.bf16.msra.mxu1 %v22197_v12  ;;  %10800 = vmatprep.subr.bf16.mxu0 %v22202_v35  ;;  %v22236_v12 = vld [vmem:[#allocation5 + $0x140] ss:$72 sps:$4 sm:$0xff]  }
 0x425   :  { %10843 = vmatprep.subr.bf16.mxu1 %v22205_v11  ;;  %v22239_v35 = vld [vmem:[#allocation5 + $0xa40] ss:$72 sps:$4 sm:$0xff]   ;;  %v22244_v11 = vld [vmem:[#allocation5 + $0xb4] ss:$72 sps:$4 sm:$0xff]  }
 0x427   :  { %10801 = vmatpush2.bf16.msra.mxu0 %v22200_v15  ;;  %v22247_v15 = vld [vmem:[#allocation5 + $0x9b4] ss:$72 sps:$4 sm:$0xff]  }
 0x428   :  { %10844 = vmatpush2.bf16.msra.mxu1 %v22203_v50  ;;  %10856 = vmatprep.subr.bf16.mxu0 %v22208_v51  ;;  %v22242_v50 = vld [vmem:[#allocation5 + $0xb0] ss:$72 sps:$4 sm:$0xff]  }
 0x429   :  { %10899 = vmatprep.subr.bf16.mxu1 %v22211_v32  ;;  %v22245_v51 = vld [vmem:[#allocation5 + $0x9b0] ss:$72 sps:$4 sm:$0xff]   ;;  %v22250_v32 = vld [vmem:[#allocation5 + $0x24] ss:$72 sps:$4 sm:$0xff]  }
 0x42a   :  { %v10546_v22 = vpop.f32.mrf.mxu0  ;;  %10803 = vmatmul.mubr.bf16.vlgmr.msra.gmra.mxu0 %v24454_v4 }
 0x42b   :  { %v10589_v18 = vpop.f32.mrf.mxu1  ;;  %10846 = vmatmul.mubr.bf16.vlgmr.msra.gmra.mxu1 %v24458_v5  ;;  %10857 = vmatpush1.bf16.msra.mxu0 %v22206_v37  ;;  %v22253_v37 = vld [vmem:[#allocation5 + $0x924] ss:$72 sps:$4 sm:$0xff]  }
 0x42c   :  { %v24719_v3 = vadd.f32 %v10589_v18, %v10546_v22  ;;  %10900 = vmatpush1.bf16.msra.mxu1 %v22209_v16  ;;  %v10548_v27 = vpop.f32.mrf.mxu0  ;;  %10858 = vmatprep.subr.bf16.mxu0 %v22214_v44  ;;  %v22248_v16 = vld [vmem:[#allocation5 + $0x20] ss:$72 sps:$4 sm:$0xff]   ;;  %v22257_v22 = vld [vmem:[#allocation5 + $0x1190] ss:$72 sps:$4 sm:$0xff]   ;;  %v22262_v18 = vld [vmem:[#allocation5 + $0x804] ss:$72 sps:$4 sm:$0xff]  }
 0x42d   :  { %v10591_v23 = vpop.f32.mrf.mxu1  ;;  %10901 = vmatprep.subr.bf16.mxu1 %v22217_v10  ;;  %10888 = vmatprep.mubr.bf16.mxu0 %v24366_v53  ;;  %v22251_v44 = vld [vmem:[#allocation5 + $0x920] ss:$72 sps:$4 sm:$0xff]   ;;  %v22256_v10 = vld [vmem:[#allocation5 + $0x894] ss:$72 sps:$4 sm:$0xff]  }
 0x42e   :  { %v24721_v29 = vadd.f32 %v10591_v23, %v10548_v27  ;;  %10931 = vmatprep.mubr.bf16.mxu1 %v24368_v54  ;;  %v10550_v55 = vpop.f32.mrf.mxu0  ;;  %v22265_v27 = vld [vmem:[#allocation5 + $0x1104] ss:$72 sps:$4 sm:$0xff]   ;;  %v22260_v23 = vld [vmem:[#allocation5 + $0x800] ss:$72 sps:$4 sm:$0xff]  }
 0x42f   :  { %v10593_v46 = vpop.f32.mrf.mxu1  ;;  %10859 = vmatpush1.bf16.msra.mxu0 %v22212_v45  ;;  %v22259_v45 = vld [vmem:[#allocation5 + $0x1194] ss:$72 sps:$4 sm:$0xff]  }
 0x430   :  { %v24725_v26 = vadd.f32 %v10593_v46, %v10550_v55  ;;  %10902 = vmatpush1.bf16.msra.mxu1 %v22215_v59  ;;  %v10552_v31 = vpop.f32.mrf.mxu0  ;;  %10860 = vmatprep.subr.bf16.mxu0 %v22220_v6  ;;  %v22254_v59 = vld [vmem:[#allocation5 + $0x890] ss:$72 sps:$4 sm:$0xff]   ;;  %v22263_v6 = vld [vmem:[#allocation5 + $0x1100] ss:$72 sps:$4 sm:$0xff]   ;;  %v22274_v46 = vld [vmem:[#allocation5 + $0x6e4] ss:$72 sps:$4 sm:$0xff]  }
 0x431   :  { %v10595_v57 = vpop.f32.mrf.mxu1  ;;  %10903 = vmatprep.subr.bf16.mxu1 %v22223_v58  ;;  %v22268_v58 = vld [vmem:[#allocation5 + $0x774] ss:$72 sps:$4 sm:$0xff]   ;;  %v22269_v55 = vld [vmem:[#allocation5 + $0x1070] ss:$72 sps:$4 sm:$0xff]  }
 0x432   :  { %v24727_v24 = vadd.f32 %v10595_v57, %v10552_v31  ;;  %v22277_v31 = vld [vmem:[#allocation5 + $0xfe4] ss:$72 sps:$4 sm:$0xff]   ;;  %v22272_v57 = vld [vmem:[#allocation5 + $0x6e0] ss:$72 sps:$4 sm:$0xff]  }
 0x433   :  { %10861 = vmatpush1.bf16.msra.mxu0 %v22218_v62  ;;  %v22271_v62 = vld [vmem:[#allocation5 + $0x1074] ss:$72 sps:$4 sm:$0xff]  }
 0x434   :  { %10904 = vmatpush1.bf16.msra.mxu1 %v22221_v19  ;;  %10862 = vmatprep.subr.bf16.mxu0 %v22226_v47  ;;  %v22266_v19 = vld [vmem:[#allocation5 + $0x770] ss:$72 sps:$4 sm:$0xff]   ;;  %v22275_v47 = vld [vmem:[#allocation5 + $0xfe0] ss:$72 sps:$4 sm:$0xff]  }
 0x435   :  { %10905 = vmatprep.subr.bf16.mxu1 %v22229_v63  ;;  %v22280_v63 = vld [vmem:[#allocation5 + $0x654] ss:$72 sps:$4 sm:$0xff]  }
 0x437   :  { %10863 = vmatpush1.bf16.msra.mxu0 %v22224_v40  ;;  %v22283_v40 = vld [vmem:[#allocation5 + $0xf54] ss:$72 sps:$4 sm:$0xff]  }
 0x438   :  { %10906 = vmatpush1.bf16.msra.mxu1 %v22227_v61  ;;  %10864 = vmatprep.subr.bf16.mxu0 %v22232_v60  ;;  %v22278_v61 = vld [vmem:[#allocation5 + $0x650] ss:$72 sps:$4 sm:$0xff]  }
 0x439   :  { %10907 = vmatprep.subr.bf16.mxu1 %v22235_v7  ;;  %v22281_v60 = vld [vmem:[#allocation5 + $0xf50] ss:$72 sps:$4 sm:$0xff]   ;;  %v22286_v7 = vld [vmem:[#allocation5 + $0x5c4] ss:$72 sps:$4 sm:$0xff]  }
 0x43b   :  { %10865 = vmatpush1.bf16.msra.mxu0 %v22230_v14  ;;  %v22289_v14 = vld [vmem:[#allocation5 + $0xec4] ss:$72 sps:$4 sm:$0xff]  }
 0x43c   :  { %10908 = vmatpush1.bf16.msra.mxu1 %v22233_v38  ;;  %10866 = vmatprep.subr.bf16.mxu0 %v22238_v0  ;;  %v22284_v38 = vld [vmem:[#allocation5 + $0x5c0] ss:$72 sps:$4 sm:$0xff]  }
 0x43d   :  { %10909 = vmatprep.subr.bf16.mxu1 %v22241_v30  ;;  %v22287_v0 = vld [vmem:[#allocation5 + $0xec0] ss:$72 sps:$4 sm:$0xff]   ;;  %v22292_v30 = vld [vmem:[#allocation5 + $0x534] ss:$72 sps:$4 sm:$0xff]  }
 0x43f   :  { %10867 = vmatpush1.bf16.msra.mxu0 %v22236_v12  ;;  %v22295_v12 = vld [vmem:[#allocation5 + $0xe34] ss:$72 sps:$4 sm:$0xff]  }
 0x440   :  { %10910 = vmatpush1.bf16.msra.mxu1 %v22239_v35  ;;  %10868 = vmatprep.subr.bf16.mxu0 %v22244_v11  ;;  %v22290_v35 = vld [vmem:[#allocation5 + $0x530] ss:$72 sps:$4 sm:$0xff]  }
 0x441   :  { %10911 = vmatprep.subr.bf16.mxu1 %v22247_v15  ;;  %v22293_v11 = vld [vmem:[#allocation5 + $0xe30] ss:$72 sps:$4 sm:$0xff]   ;;  %v22298_v15 = vld [vmem:[#allocation5 + $0x4a4] ss:$72 sps:$4 sm:$0xff]  }
 0x443   :  { %10869 = vmatpush1.bf16.msra.mxu0 %v22242_v50  ;;  %v22301_v50 = vld [vmem:[#allocation5 + $0xda4] ss:$72 sps:$4 sm:$0xff]  }
 0x444   :  { %10912 = vmatpush1.bf16.msra.mxu1 %v22245_v51  ;;  %10870 = vmatprep.subr.bf16.mxu0 %v22250_v32  ;;  %v22296_v51 = vld [vmem:[#allocation5 + $0x4a0] ss:$72 sps:$4 sm:$0xff]  }
 0x445   :  { %10913 = vmatprep.subr.bf16.mxu1 %v22253_v37  ;;  %v22299_v32 = vld [vmem:[#allocation5 + $0xda0] ss:$72 sps:$4 sm:$0xff]   ;;  %v22304_v37 = vld [vmem:[#allocation5 + $0x1614] ss:$72 sps:$4 sm:$0xff]  }
 0x447   :  { %10871 = vmatpush1.bf16.msra.mxu0 %v22248_v16  ;;  %v22307_v16 = vld [vmem:[#allocation5 + $0x1f14] ss:$72 sps:$4 sm:$0xff]  }
 0x448   :  { %10914 = vmatpush1.bf16.msra.mxu1 %v22251_v44  ;;  %10872 = vmatprep.subr.bf16.mxu0 %v22256_v10  ;;  %v22302_v44 = vld [vmem:[#allocation5 + $0x1610] ss:$72 sps:$4 sm:$0xff]  }
 0x449   :  { %10915 = vmatprep.subr.bf16.mxu1 %v22259_v45  ;;  %v22305_v10 = vld [vmem:[#allocation5 + $0x1f10] ss:$72 sps:$4 sm:$0xff]   ;;  %v22310_v45 = vld [vmem:[#allocation5 + $0x1584] ss:$72 sps:$4 sm:$0xff]  }
 0x44b   :  { %10873 = vmatpush2.bf16.msra.mxu0 %v22254_v59  ;;  %v22313_v59 = vld [vmem:[#allocation5 + $0x1e84] ss:$72 sps:$4 sm:$0xff]  }
 0x44c   :  { %10916 = vmatpush2.bf16.msra.mxu1 %v22257_v22  ;;  %10874 = vmatprep.subr.bf16.mxu0 %v22262_v18  ;;  %v22308_v22 = vld [vmem:[#allocation5 + $0x1580] ss:$72 sps:$4 sm:$0xff]  }
 0x44d   :  { %10917 = vmatprep.subr.bf16.mxu1 %v22265_v27  ;;  %v22311_v18 = vld [vmem:[#allocation5 + $0x1e80] ss:$72 sps:$4 sm:$0xff]  }
 0x44f   :  { %10875 = vmatpush2.bf16.msra.mxu0 %v22260_v23 }
 0x450   :  { %10918 = vmatpush2.bf16.msra.mxu1 %v22263_v6  ;;  %10876 = vmatprep.subr.bf16.mxu0 %v22268_v58 }
 0x451   :  { %10919 = vmatprep.subr.bf16.mxu1 %v22271_v62 }
 0x453   :  { %10877 = vmatpush2.bf16.msra.mxu0 %v22266_v19  ;;  %v22316_v19 = vld [vmem:[#allocation5 + $0x14f4] ss:$72 sps:$4 sm:$0xff]  }
 0x454   :  { %10920 = vmatpush2.bf16.msra.mxu1 %v22269_v55  ;;  %10878 = vmatprep.subr.bf16.mxu0 %v22274_v46  ;;  %v22319_v55 = vld [vmem:[#allocation5 + $0x1df4] ss:$72 sps:$4 sm:$0xff]  }
 0x455   :  { %10921 = vmatprep.subr.bf16.mxu1 %v22277_v31 }
 0x457   :  { %10879 = vmatpush2.bf16.msra.mxu0 %v22272_v57  ;;  %v22314_v57 = vld [vmem:[#allocation5 + $0x14f0] ss:$72 sps:$4 sm:$0xff]  }
 0x458   :  { %10922 = vmatpush2.bf16.msra.mxu1 %v22275_v47  ;;  %10880 = vmatprep.subr.bf16.mxu0 %v22280_v63  ;;  %v22317_v47 = vld [vmem:[#allocation5 + $0x1df0] ss:$72 sps:$4 sm:$0xff]  }
 0x459   :  { %10923 = vmatprep.subr.bf16.mxu1 %v22283_v40 }
 0x45b   :  { %10881 = vmatpush2.bf16.msra.mxu0 %v22278_v61 }
 0x45c   :  { %10924 = vmatpush2.bf16.msra.mxu1 %v22281_v60  ;;  %10882 = vmatprep.subr.bf16.mxu0 %v22286_v7  ;;  %v22322_v7 = vld [vmem:[#allocation5 + $0x1464] ss:$72 sps:$4 sm:$0xff]  }
 0x45d   :  { %10925 = vmatprep.subr.bf16.mxu1 %v22289_v14  ;;  %v22325_v14 = vld [vmem:[#allocation5 + $0x1d64] ss:$72 sps:$4 sm:$0xff]  }
 0x45f   :  { %10883 = vmatpush2.bf16.msra.mxu0 %v22284_v38 }
 0x460   :  { %10926 = vmatpush2.bf16.msra.mxu1 %v22287_v0  ;;  %10884 = vmatprep.subr.bf16.mxu0 %v22292_v30  ;;  %v22320_v0 = vld [vmem:[#allocation5 + $0x1460] ss:$72 sps:$4 sm:$0xff]  }
 0x461   :  { %10927 = vmatprep.subr.bf16.mxu1 %v22295_v12  ;;  %v22323_v30 = vld [vmem:[#allocation5 + $0x1d60] ss:$72 sps:$4 sm:$0xff]  }
 0x463   :  { %10885 = vmatpush2.bf16.msra.mxu0 %v22290_v35 }
 0x464   :  { %10928 = vmatpush2.bf16.msra.mxu1 %v22293_v11  ;;  %10886 = vmatprep.subr.bf16.mxu0 %v22298_v15  ;;  %v22331_v11 = vld [vmem:[#allocation5 + $0x1cd4] ss:$72 sps:$4 sm:$0xff]   ;;  %v22326_v15 = vld [vmem:[#allocation5 + $0x13d0] ss:$72 sps:$4 sm:$0xff]  }
 0x465   :  { %10929 = vmatprep.subr.bf16.mxu1 %v22301_v50  ;;  %v22329_v50 = vld [vmem:[#allocation5 + $0x1cd0] ss:$72 sps:$4 sm:$0xff]  }
 0x467   :  { %10887 = vmatpush2.bf16.msra.mxu0 %v22296_v51  ;;  %v22334_v51 = vld [vmem:[#allocation5 + $0x1344] ss:$72 sps:$4 sm:$0xff]  }
 0x468   :  { %10930 = vmatpush2.bf16.msra.mxu1 %v22299_v32  ;;  %10942 = vmatprep.subr.bf16.mxu0 %v22304_v37  ;;  %v22337_v32 = vld [vmem:[#allocation5 + $0x1c44] ss:$72 sps:$4 sm:$0xff]   ;;  %v22335_v37 = vld [vmem:[#allocation5 + $0x1c40] ss:$72 sps:$4 sm:$0xff]  }
 0x469   :  { %10985 = vmatprep.subr.bf16.mxu1 %v22307_v16  ;;  %v22340_v16 = vld [vmem:[#allocation5 + $0x12b4] ss:$72 sps:$4 sm:$0xff]  }
 0x46a   :  { %v10632_v27 = vpop.f32.mrf.mxu0  ;;  %10889 = vmatmul.mubr.bf16.vlgmr.msra.gmra.mxu0 %v24372_v8 }
 0x46b   :  { %v10675_v23 = vpop.f32.mrf.mxu1  ;;  %10932 = vmatmul.mubr.bf16.vlgmr.msra.gmra.mxu1 %v24374_v9  ;;  %v10633_v6 = vadd.f32 %v10632_v27, %v24719_v3  ;;  %10943 = vmatpush1.bf16.msra.mxu0 %v22302_v44  ;;  %v22343_v44 = vld [vmem:[#allocation5 + $0x1bb4] ss:$72 sps:$4 sm:$0xff]   ;;  %v22347_v27 = vld [vmem:[#allocation5 + $0x1b20] ss:$72 sps:$4 sm:$0xff]  }
 0x46c   :  { %10986 = vmatpush1.bf16.msra.mxu1 %v22305_v10  ;;  %v10634_v58 = vpop.f32.mrf.mxu0  ;;  %10944 = vmatprep.subr.bf16.mxu0 %v22310_v45  ;;  %v22338_v10 = vld [vmem:[#allocation5 + $0x12b0] ss:$72 sps:$4 sm:$0xff]  }
 0x46d   :  { %v10677_v62 = vpop.f32.mrf.mxu1  ;;  %10987 = vmatprep.subr.bf16.mxu1 %v22313_v59  ;;  %v24732_v46 = vadd.f32 %v10675_v23, %v10633_v6  ;;  %v10635_v31 = vadd.f32 %v10634_v58, %v24721_v29  ;;  %10974 = vmatprep.mubr.bf16.mxu0 %v24388_v41  ;;  %v22341_v45 = vld [vmem:[#allocation5 + $0x1bb0] ss:$72 sps:$4 sm:$0xff]   ;;  %v22346_v59 = vld [vmem:[#allocation5 + $0x1224] ss:$72 sps:$4 sm:$0xff]   ;;  %v22352_v23 = vld [vmem:[#allocation5 + $0x1a94] ss:$72 sps:$4 sm:$0xff]  }
 0x46e   :  { %11017 = vmatprep.mubr.bf16.mxu1 %v24392_v42  ;;  %v10636_v63 = vpop.f32.mrf.mxu0  ;;  %v22355_v6 = vld [vmem:[#allocation5 + $0x2394] ss:$72 sps:$4 sm:$0xff]   ;;  %v22350_v58 = vld [vmem:[#allocation5 + $0x1a90] ss:$72 sps:$4 sm:$0xff]  }
 0x46f   :  { %v10679_v3 = vpop.f32.mrf.mxu1  ;;  %v24737_v40 = vadd.f32 %v10677_v62, %v10635_v31  ;;  %v10637_v61 = vadd.f32 %v10636_v63, %v24725_v26  ;;  %10945 = vmatpush1.bf16.msra.mxu0 %v22308_v22  ;;  %v22328_v26 = vld [vmem:[#allocation5 + $0x13d4] ss:$72 sps:$4 sm:$0xff]   ;;  %v22349_v22 = vld [vmem:[#allocation5 + $0x1b24] ss:$72 sps:$4 sm:$0xff]   ;;  %v22353_v62 = vld [vmem:[#allocation5 + $0x2390] ss:$72 sps:$4 sm:$0xff]  }
 0x470   :  { %10988 = vmatpush1.bf16.msra.mxu1 %v22311_v18  ;;  %v10638_v60 = vpop.f32.mrf.mxu0  ;;  %10946 = vmatprep.subr.bf16.mxu0 %v22316_v19  ;;  %v22344_v18 = vld [vmem:[#allocation5 + $0x1220] ss:$72 sps:$4 sm:$0xff]   ;;  %v22358_v19 = vld [vmem:[#allocation5 + $0x1a04] ss:$72 sps:$4 sm:$0xff]   ;;  %v22367_v63 = vld [vmem:[#allocation5 + $0x2274] ss:$72 sps:$4 sm:$0xff]  }
 0x471   :  { %10989 = vmatprep.subr.bf16.mxu1 %v22319_v55  ;;  %v24740_v29 = vadd.f32 %v10679_v3, %v10637_v61  ;;  %v10639_v38 = vadd.f32 %v10638_v60, %v24727_v24  ;;  %v10681_v12 = vpop.f32.mrf.mxu1  ;;  %v22332_v24 = vld [vmem:[#allocation5 + $0x1340] ss:$72 sps:$4 sm:$0xff]   ;;  %v22361_v55 = vld [vmem:[#allocation5 + $0x2304] ss:$72 sps:$4 sm:$0xff]   ;;  %v22362_v3 = vld [vmem:[#allocation5 + $0x1970] ss:$72 sps:$4 sm:$0xff]  }
 0x472   :  { %v22356_v31 = vld [vmem:[#allocation5 + $0x1a00] ss:$72 sps:$4 sm:$0xff]   ;;  %v22365_v61 = vld [vmem:[#allocation5 + $0x2270] ss:$72 sps:$4 sm:$0xff]   ;;  %v22370_v60 = vld [vmem:[#allocation5 + $0x18e4] ss:$72 sps:$4 sm:$0xff]  }
 0x473   :  { %v24743_v35 = vadd.f32 %v10681_v12, %v10639_v38  ;;  %10947 = vmatpush1.bf16.msra.mxu0 %v22314_v57  ;;  %v22359_v57 = vld [vmem:[#allocation5 + $0x2300] ss:$72 sps:$4 sm:$0xff]   ;;  %v22374_v12 = vld [vmem:[#allocation5 + $0x1850] ss:$72 sps:$4 sm:$0xff]  }
 0x474   :  { %10990 = vmatpush1.bf16.msra.mxu1 %v22317_v47  ;;  %10948 = vmatprep.subr.bf16.mxu0 %v22322_v7  ;;  %v22364_v47 = vld [vmem:[#allocation5 + $0x1974] ss:$72 sps:$4 sm:$0xff]   ;;  %v22373_v7 = vld [vmem:[#allocation5 + $0x21e4] ss:$72 sps:$4 sm:$0xff]   ;;  %v22371_v38 = vld [vmem:[#allocation5 + $0x21e0] ss:$72 sps:$4 sm:$0xff]  }
 0x475   :  { %10991 = vmatprep.subr.bf16.mxu1 %v22325_v14  ;;  %v22368_v14 = vld [vmem:[#allocation5 + $0x18e0] ss:$72 sps:$4 sm:$0xff]  }
 0x477   :  { %10949 = vmatpush1.bf16.msra.mxu0 %v22320_v0  ;;  %v22376_v0 = vld [vmem:[#allocation5 + $0x1854] ss:$72 sps:$4 sm:$0xff]  }
 0x478   :  { %10992 = vmatpush1.bf16.msra.mxu1 %v22323_v30  ;;  %10950 = vmatprep.subr.bf16.mxu0 %v22328_v26  ;;  %v22379_v30 = vld [vmem:[#allocation5 + $0x2154] ss:$72 sps:$4 sm:$0xff]   ;;  %v22377_v26 = vld [vmem:[#allocation5 + $0x2150] ss:$72 sps:$4 sm:$0xff]  }
 0x479   :  { %10993 = vmatprep.subr.bf16.mxu1 %v22331_v11  ;;  %v22382_v11 = vld [vmem:[#allocation5 + $0x17c4] ss:$72 sps:$4 sm:$0xff]  }
 0x47b   :  { %10951 = vmatpush1.bf16.msra.mxu0 %v22326_v15  ;;  %v22385_v15 = vld [vmem:[#allocation5 + $0x20c4] ss:$72 sps:$4 sm:$0xff]  }
 0x47c   :  { %10994 = vmatpush1.bf16.msra.mxu1 %v22329_v50  ;;  %10952 = vmatprep.subr.bf16.mxu0 %v22334_v51  ;;  %v22380_v50 = vld [vmem:[#allocation5 + $0x17c0] ss:$72 sps:$4 sm:$0xff]  }
 0x47d   :  { %10995 = vmatprep.subr.bf16.mxu1 %v22337_v32  ;;  %v22383_v51 = vld [vmem:[#allocation5 + $0x20c0] ss:$72 sps:$4 sm:$0xff]   ;;  %v22388_v32 = vld [vmem:[#allocation5 + $0x1734] ss:$72 sps:$4 sm:$0xff]  }
 0x47f   :  { %10953 = vmatpush1.bf16.msra.mxu0 %v22332_v24  ;;  %v22391_v24 = vld [vmem:[#allocation5 + $0x2034] ss:$72 sps:$4 sm:$0xff]  }
 0x480   :  { %10996 = vmatpush1.bf16.msra.mxu1 %v22335_v37  ;;  %10954 = vmatprep.subr.bf16.mxu0 %v22340_v16  ;;  %v22386_v37 = vld [vmem:[#allocation5 + $0x1730] ss:$72 sps:$4 sm:$0xff]  }
 0x481   :  { %10997 = vmatprep.subr.bf16.mxu1 %v22343_v44  ;;  %v22389_v16 = vld [vmem:[#allocation5 + $0x2030] ss:$72 sps:$4 sm:$0xff]   ;;  %v22394_v44 = vld [vmem:[#allocation5 + $0x16a4] ss:$72 sps:$4 sm:$0xff]  }
 0x483   :  { %10955 = vmatpush1.bf16.msra.mxu0 %v22338_v10  ;;  %v22397_v10 = vld [vmem:[#allocation5 + $0x1fa4] ss:$72 sps:$4 sm:$0xff]  }
 0x484   :  { %10998 = vmatpush1.bf16.msra.mxu1 %v22341_v45  ;;  %10956 = vmatprep.subr.bf16.mxu0 %v22346_v59  ;;  %v22392_v45 = vld [vmem:[#allocation5 + $0x16a0] ss:$72 sps:$4 sm:$0xff]  }
 0x485   :  { %10999 = vmatprep.subr.bf16.mxu1 %v22349_v22  ;;  %v22395_v59 = vld [vmem:[#allocation5 + $0x1fa0] ss:$72 sps:$4 sm:$0xff]   ;;  %v22400_v22 = vld [vmem:[#allocation5 + $0x2814] ss:$72 sps:$4 sm:$0xff]  }
 0x487   :  { %10957 = vmatpush1.bf16.msra.mxu0 %v22344_v18  ;;  %v22403_v18 = vld [vmem:[#allocation5 + $0x3114] ss:$72 sps:$4 sm:$0xff]  }
 0x488   :  { %11000 = vmatpush1.bf16.msra.mxu1 %v22347_v27  ;;  %10958 = vmatprep.subr.bf16.mxu0 %v22352_v23  ;;  %v22398_v27 = vld [vmem:[#allocation5 + $0x2810] ss:$72 sps:$4 sm:$0xff]  }
 0x489   :  { %11001 = vmatprep.subr.bf16.mxu1 %v22355_v6  ;;  %v22401_v23 = vld [vmem:[#allocation5 + $0x3110] ss:$72 sps:$4 sm:$0xff]   ;;  %v22406_v6 = vld [vmem:[#allocation5 + $0x2784] ss:$72 sps:$4 sm:$0xff]  }
 0x48b   :  { %10959 = vmatpush2.bf16.msra.mxu0 %v22350_v58  ;;  %v22409_v58 = vld [vmem:[#allocation5 + $0x3084] ss:$72 sps:$4 sm:$0xff]  }
 0x48c   :  { %11002 = vmatpush2.bf16.msra.mxu1 %v22353_v62  ;;  %10960 = vmatprep.subr.bf16.mxu0 %v22358_v19  ;;  %v22404_v62 = vld [vmem:[#allocation5 + $0x2780] ss:$72 sps:$4 sm:$0xff]  }
 0x48d   :  { %11003 = vmatprep.subr.bf16.mxu1 %v22361_v55  ;;  %v22407_v19 = vld [vmem:[#allocation5 + $0x3080] ss:$72 sps:$4 sm:$0xff]  }
 0x48f   :  { %10961 = vmatpush2.bf16.msra.mxu0 %v22356_v31 }
 0x490   :  { %11004 = vmatpush2.bf16.msra.mxu1 %v22359_v57  ;;  %10962 = vmatprep.subr.bf16.mxu0 %v22364_v47 }
 0x491   :  { %11005 = vmatprep.subr.bf16.mxu1 %v22367_v63 }
 0x493   :  { %10963 = vmatpush2.bf16.msra.mxu0 %v22362_v3  ;;  %v22412_v3 = vld [vmem:[#allocation5 + $0x26f4] ss:$72 sps:$4 sm:$0xff]  }
 0x494   :  { %11006 = vmatpush2.bf16.msra.mxu1 %v22365_v61  ;;  %10964 = vmatprep.subr.bf16.mxu0 %v22370_v60  ;;  %v22415_v61 = vld [vmem:[#allocation5 + $0x2ff4] ss:$72 sps:$4 sm:$0xff]  }
 0x495   :  { %11007 = vmatprep.subr.bf16.mxu1 %v22373_v7 }
 0x497   :  { %10965 = vmatpush2.bf16.msra.mxu0 %v22368_v14  ;;  %v22410_v14 = vld [vmem:[#allocation5 + $0x26f0] ss:$72 sps:$4 sm:$0xff]  }
 0x498   :  { %11008 = vmatpush2.bf16.msra.mxu1 %v22371_v38  ;;  %10966 = vmatprep.subr.bf16.mxu0 %v22376_v0  ;;  %v22413_v38 = vld [vmem:[#allocation5 + $0x2ff0] ss:$72 sps:$4 sm:$0xff]  }
 0x499   :  { %11009 = vmatprep.subr.bf16.mxu1 %v22379_v30 }
 0x49b   :  { %10967 = vmatpush2.bf16.msra.mxu0 %v22374_v12 }
 0x49c   :  { %11010 = vmatpush2.bf16.msra.mxu1 %v22377_v26  ;;  %10968 = vmatprep.subr.bf16.mxu0 %v22382_v11  ;;  %v22418_v11 = vld [vmem:[#allocation5 + $0x2664] ss:$72 sps:$4 sm:$0xff]  }
 0x49d   :  { %11011 = vmatprep.subr.bf16.mxu1 %v22385_v15  ;;  %v22421_v15 = vld [vmem:[#allocation5 + $0x2f64] ss:$72 sps:$4 sm:$0xff]  }
 0x49f   :  { %10969 = vmatpush2.bf16.msra.mxu0 %v22380_v50 }
 0x4a0   :  { %11012 = vmatpush2.bf16.msra.mxu1 %v22383_v51  ;;  %10970 = vmatprep.subr.bf16.mxu0 %v22388_v32 }
 0x4a1   :  { %11013 = vmatprep.subr.bf16.mxu1 %v22391_v24  ;;  %v22416_v24 = vld [vmem:[#allocation5 + $0x2660] ss:$72 sps:$4 sm:$0xff]  }
 0x4a3   :  { %10971 = vmatpush2.bf16.msra.mxu0 %v22386_v37  ;;  %v22419_v37 = vld [vmem:[#allocation5 + $0x2f60] ss:$72 sps:$4 sm:$0xff]  }
 0x4a4   :  { %11014 = vmatpush2.bf16.msra.mxu1 %v22389_v16  ;;  %10972 = vmatprep.subr.bf16.mxu0 %v22394_v44  ;;  %v22427_v16 = vld [vmem:[#allocation5 + $0x2ed4] ss:$72 sps:$4 sm:$0xff]   ;;  %v22422_v44 = vld [vmem:[#allocation5 + $0x25d0] ss:$72 sps:$4 sm:$0xff]  }
 0x4a5   :  { %11015 = vmatprep.subr.bf16.mxu1 %v22397_v10  ;;  %v22425_v10 = vld [vmem:[#allocation5 + $0x2ed0] ss:$72 sps:$4 sm:$0xff]  }
 0x4a7   :  { %10973 = vmatpush2.bf16.msra.mxu0 %v22392_v45  ;;  %v22430_v45 = vld [vmem:[#allocation5 + $0x2544] ss:$72 sps:$4 sm:$0xff]  }
 0x4a8   :  { %11016 = vmatpush2.bf16.msra.mxu1 %v22395_v59  ;;  %11028 = vmatprep.subr.bf16.mxu0 %v22400_v22  ;;  %v22433_v59 = vld [vmem:[#allocation5 + $0x2e44] ss:$72 sps:$4 sm:$0xff]   ;;  %v22431_v22 = vld [vmem:[#allocation5 + $0x2e40] ss:$72 sps:$4 sm:$0xff]  }
 0x4a9   :  { %11071 = vmatprep.subr.bf16.mxu1 %v22403_v18  ;;  %v22436_v18 = vld [vmem:[#allocation5 + $0x24b4] ss:$72 sps:$4 sm:$0xff]  }
 0x4aa   :  { %v10718_v55 = vpop.f32.mrf.mxu0  ;;  %10975 = vmatmul.mubr.bf16.vlgmr.msra.gmra.mxu0 %v24398_v20 }
 0x4ab   :  { %v10761_v31 = vpop.f32.mrf.mxu1  ;;  %11018 = vmatmul.mubr.bf16.vlgmr.msra.gmra.mxu1 %v24402_v21  ;;  %v10719_v57 = vadd.f32 %v10718_v55, %v24732_v46  ;;  %11029 = vmatpush1.bf16.msra.mxu0 %v22398_v27  ;;  %v22439_v27 = vld [vmem:[#allocation5 + $0x2db4] ss:$72 sps:$4 sm:$0xff]   ;;  %v22443_v55 = vld [vmem:[#allocation5 + $0x2d20] ss:$72 sps:$4 sm:$0xff]  }
 0x4ac   :  { %11072 = vmatpush1.bf16.msra.mxu1 %v22401_v23  ;;  %v10720_v47 = vpop.f32.mrf.mxu0  ;;  %11030 = vmatprep.subr.bf16.mxu0 %v22406_v6  ;;  %v22434_v23 = vld [vmem:[#allocation5 + $0x24b0] ss:$72 sps:$4 sm:$0xff]  }
 0x4ad   :  { %v10763_v63 = vpop.f32.mrf.mxu1  ;;  %11073 = vmatprep.subr.bf16.mxu1 %v22409_v58  ;;  %v24748_v60 = vadd.f32 %v10761_v31, %v10719_v57  ;;  %v10721_v7 = vadd.f32 %v10720_v47, %v24737_v40  ;;  %11060 = vmatprep.mubr.bf16.mxu0 %v24416_v33  ;;  %v22437_v6 = vld [vmem:[#allocation5 + $0x2db0] ss:$72 sps:$4 sm:$0xff]   ;;  %v22442_v58 = vld [vmem:[#allocation5 + $0x2424] ss:$72 sps:$4 sm:$0xff]   ;;  %v22448_v31 = vld [vmem:[#allocation5 + $0x2c94] ss:$72 sps:$4 sm:$0xff]  }
 0x4ae   :  { %11103 = vmatprep.mubr.bf16.mxu1 %v24420_v34  ;;  %v10722_v0 = vpop.f32.mrf.mxu0  ;;  %v22451_v57 = vld [vmem:[#allocation5 + $0x3594] ss:$72 sps:$4 sm:$0xff]   ;;  %v22446_v47 = vld [vmem:[#allocation5 + $0x2c90] ss:$72 sps:$4 sm:$0xff]  }
 0x4af   :  { %v10765_v46 = vpop.f32.mrf.mxu1  ;;  %v24753_v30 = vadd.f32 %v10763_v63, %v10721_v7  ;;  %v10723_v12 = vadd.f32 %v10722_v0, %v24740_v29  ;;  %11031 = vmatpush1.bf16.msra.mxu0 %v22404_v62  ;;  %v22424_v29 = vld [vmem:[#allocation5 + $0x25d4] ss:$72 sps:$4 sm:$0xff]   ;;  %v22445_v62 = vld [vmem:[#allocation5 + $0x2d24] ss:$72 sps:$4 sm:$0xff]   ;;  %v22449_v63 = vld [vmem:[#allocation5 + $0x3590] ss:$72 sps:$4 sm:$0xff]  }
 0x4b0   :  { %11074 = vmatpush1.bf16.msra.mxu1 %v22407_v19  ;;  %v10724_v26 = vpop.f32.mrf.mxu0  ;;  %11032 = vmatprep.subr.bf16.mxu0 %v22412_v3  ;;  %v22440_v19 = vld [vmem:[#allocation5 + $0x2420] ss:$72 sps:$4 sm:$0xff]   ;;  %v22454_v3 = vld [vmem:[#allocation5 + $0x2c04] ss:$72 sps:$4 sm:$0xff]   ;;  %v22463_v0 = vld [vmem:[#allocation5 + $0x3474] ss:$72 sps:$4 sm:$0xff]  }
 0x4b1   :  { %11075 = vmatprep.subr.bf16.mxu1 %v22415_v61  ;;  %v24756_v40 = vadd.f32 %v10765_v46, %v10723_v12  ;;  %v10725_v50 = vadd.f32 %v10724_v26, %v24743_v35  ;;  %v10767_v51 = vpop.f32.mrf.mxu1  ;;  %v22428_v35 = vld [vmem:[#allocation5 + $0x2540] ss:$72 sps:$4 sm:$0xff]   ;;  %v22457_v61 = vld [vmem:[#allocation5 + $0x3504] ss:$72 sps:$4 sm:$0xff]   ;;  %v22458_v46 = vld [vmem:[#allocation5 + $0x2b70] ss:$72 sps:$4 sm:$0xff]  }
 0x4b2   :  { %v22452_v7 = vld [vmem:[#allocation5 + $0x2c00] ss:$72 sps:$4 sm:$0xff]   ;;  %v22461_v12 = vld [vmem:[#allocation5 + $0x3470] ss:$72 sps:$4 sm:$0xff]   ;;  %v22466_v26 = vld [vmem:[#allocation5 + $0x2ae4] ss:$72 sps:$4 sm:$0xff]  }
 0x4b3   :  { %v24759_v32 = vadd.f32 %v10767_v51, %v10725_v50  ;;  %11033 = vmatpush1.bf16.msra.mxu0 %v22410_v14  ;;  %v22455_v14 = vld [vmem:[#allocation5 + $0x3500] ss:$72 sps:$4 sm:$0xff]   ;;  %v22472_v51 = vld [vmem:[#allocation5 + $0x2a54] ss:$72 sps:$4 sm:$0xff]  }
 0x4b4   :  { %11076 = vmatpush1.bf16.msra.mxu1 %v22413_v38  ;;  %11034 = vmatprep.subr.bf16.mxu0 %v22418_v11  ;;  %v22460_v38 = vld [vmem:[#allocation5 + $0x2b74] ss:$72 sps:$4 sm:$0xff]   ;;  %v22469_v11 = vld [vmem:[#allocation5 + $0x33e4] ss:$72 sps:$4 sm:$0xff]   ;;  %v22467_v50 = vld [vmem:[#allocation5 + $0x33e0] ss:$72 sps:$4 sm:$0xff]  }
 0x4b5   :  { %11077 = vmatprep.subr.bf16.mxu1 %v22421_v15  ;;  %v22464_v15 = vld [vmem:[#allocation5 + $0x2ae0] ss:$72 sps:$4 sm:$0xff]  }
 0x4b7   :  { %11035 = vmatpush1.bf16.msra.mxu0 %v22416_v24  ;;  %v22475_v24 = vld [vmem:[#allocation5 + $0x3354] ss:$72 sps:$4 sm:$0xff]  }
 0x4b8   :  { %11078 = vmatpush1.bf16.msra.mxu1 %v22419_v37  ;;  %11036 = vmatprep.subr.bf16.mxu0 %v22424_v29  ;;  %v22470_v37 = vld [vmem:[#allocation5 + $0x2a50] ss:$72 sps:$4 sm:$0xff]  }
 0x4b9   :  { %11079 = vmatprep.subr.bf16.mxu1 %v22427_v16  ;;  %v22473_v29 = vld [vmem:[#allocation5 + $0x3350] ss:$72 sps:$4 sm:$0xff]   ;;  %v22478_v16 = vld [vmem:[#allocation5 + $0x29c4] ss:$72 sps:$4 sm:$0xff]  }
 0x4bb   :  { %11037 = vmatpush1.bf16.msra.mxu0 %v22422_v44  ;;  %v22481_v44 = vld [vmem:[#allocation5 + $0x32c4] ss:$72 sps:$4 sm:$0xff]  }
 0x4bc   :  { %11080 = vmatpush1.bf16.msra.mxu1 %v22425_v10  ;;  %11038 = vmatprep.subr.bf16.mxu0 %v22430_v45  ;;  %v22476_v10 = vld [vmem:[#allocation5 + $0x29c0] ss:$72 sps:$4 sm:$0xff]  }
 0x4bd   :  { %11081 = vmatprep.subr.bf16.mxu1 %v22433_v59  ;;  %v22479_v45 = vld [vmem:[#allocation5 + $0x32c0] ss:$72 sps:$4 sm:$0xff]   ;;  %v22484_v59 = vld [vmem:[#allocation5 + $0x2934] ss:$72 sps:$4 sm:$0xff]  }
 0x4bf   :  { %11039 = vmatpush1.bf16.msra.mxu0 %v22428_v35  ;;  %v22487_v35 = vld [vmem:[#allocation5 + $0x3234] ss:$72 sps:$4 sm:$0xff]  }
 0x4c0   :  { %11082 = vmatpush1.bf16.msra.mxu1 %v22431_v22  ;;  %11040 = vmatprep.subr.bf16.mxu0 %v22436_v18  ;;  %v22482_v22 = vld [vmem:[#allocation5 + $0x2930] ss:$72 sps:$4 sm:$0xff]  }
 0x4c1   :  { %11083 = vmatprep.subr.bf16.mxu1 %v22439_v27  ;;  %v22485_v18 = vld [vmem:[#allocation5 + $0x3230] ss:$72 sps:$4 sm:$0xff]   ;;  %v22490_v27 = vld [vmem:[#allocation5 + $0x28a4] ss:$72 sps:$4 sm:$0xff]  }
 0x4c3   :  { %11041 = vmatpush1.bf16.msra.mxu0 %v22434_v23  ;;  %v22493_v23 = vld [vmem:[#allocation5 + $0x31a4] ss:$72 sps:$4 sm:$0xff]  }
 0x4c4   :  { %11084 = vmatpush1.bf16.msra.mxu1 %v22437_v6  ;;  %11042 = vmatprep.subr.bf16.mxu0 %v22442_v58  ;;  %v22488_v6 = vld [vmem:[#allocation5 + $0x28a0] ss:$72 sps:$4 sm:$0xff]  }
 0x4c5   :  { %11085 = vmatprep.subr.bf16.mxu1 %v22445_v62  ;;  %v22491_v58 = vld [vmem:[#allocation5 + $0x31a0] ss:$72 sps:$4 sm:$0xff]   ;;  %v22496_v62 = vld [vmem:[#allocation5 + $0x3a14] ss:$72 sps:$4 sm:$0xff]  }
 0x4c7   :  { %11043 = vmatpush1.bf16.msra.mxu0 %v22440_v19  ;;  %v22499_v19 = vld [vmem:[#allocation5 + $0x4314] ss:$72 sps:$4 sm:$0xff]  }
 0x4c8   :  { %11086 = vmatpush1.bf16.msra.mxu1 %v22443_v55  ;;  %11044 = vmatprep.subr.bf16.mxu0 %v22448_v31  ;;  %v22494_v55 = vld [vmem:[#allocation5 + $0x3a10] ss:$72 sps:$4 sm:$0xff]  }
 0x4c9   :  { %11087 = vmatprep.subr.bf16.mxu1 %v22451_v57  ;;  %v22497_v31 = vld [vmem:[#allocation5 + $0x4310] ss:$72 sps:$4 sm:$0xff]   ;;  %v22502_v57 = vld [vmem:[#allocation5 + $0x3984] ss:$72 sps:$4 sm:$0xff]  }
 0x4cb   :  { %11045 = vmatpush2.bf16.msra.mxu0 %v22446_v47  ;;  %v22505_v47 = vld [vmem:[#allocation5 + $0x4284] ss:$72 sps:$4 sm:$0xff]  }
 0x4cc   :  { %11088 = vmatpush2.bf16.msra.mxu1 %v22449_v63  ;;  %11046 = vmatprep.subr.bf16.mxu0 %v22454_v3  ;;  %v22500_v63 = vld [vmem:[#allocation5 + $0x3980] ss:$72 sps:$4 sm:$0xff]  }
 0x4cd   :  { %11089 = vmatprep.subr.bf16.mxu1 %v22457_v61  ;;  %v22503_v3 = vld [vmem:[#allocation5 + $0x4280] ss:$72 sps:$4 sm:$0xff]  }
 0x4cf   :  { %11047 = vmatpush2.bf16.msra.mxu0 %v22452_v7 }
 0x4d0   :  { %11090 = vmatpush2.bf16.msra.mxu1 %v22455_v14  ;;  %11048 = vmatprep.subr.bf16.mxu0 %v22460_v38 }
 0x4d1   :  { %11091 = vmatprep.subr.bf16.mxu1 %v22463_v0 }
 0x4d3   :  { %11049 = vmatpush2.bf16.msra.mxu0 %v22458_v46  ;;  %v22508_v46 = vld [vmem:[#allocation5 + $0x38f4] ss:$72 sps:$4 sm:$0xff]  }
 0x4d4   :  { %11092 = vmatpush2.bf16.msra.mxu1 %v22461_v12  ;;  %11050 = vmatprep.subr.bf16.mxu0 %v22466_v26  ;;  %v22511_v12 = vld [vmem:[#allocation5 + $0x41f4] ss:$72 sps:$4 sm:$0xff]  }
 0x4d5   :  { %11093 = vmatprep.subr.bf16.mxu1 %v22469_v11 }
 0x4d7   :  { %11051 = vmatpush2.bf16.msra.mxu0 %v22464_v15  ;;  %v22506_v15 = vld [vmem:[#allocation5 + $0x38f0] ss:$72 sps:$4 sm:$0xff]  }
 0x4d8   :  { %11094 = vmatpush2.bf16.msra.mxu1 %v22467_v50  ;;  %11052 = vmatprep.subr.bf16.mxu0 %v22472_v51  ;;  %v22509_v50 = vld [vmem:[#allocation5 + $0x41f0] ss:$72 sps:$4 sm:$0xff]  }
 0x4d9   :  { %11095 = vmatprep.subr.bf16.mxu1 %v22475_v24 }
 0x4db   :  { %11053 = vmatpush2.bf16.msra.mxu0 %v22470_v37 }
 0x4dc   :  { %11096 = vmatpush2.bf16.msra.mxu1 %v22473_v29  ;;  %11054 = vmatprep.subr.bf16.mxu0 %v22478_v16  ;;  %v22514_v29 = vld [vmem:[#allocation5 + $0x3864] ss:$72 sps:$4 sm:$0xff]  }
 0x4dd   :  { %11097 = vmatprep.subr.bf16.mxu1 %v22481_v44  ;;  %v22517_v16 = vld [vmem:[#allocation5 + $0x4164] ss:$72 sps:$4 sm:$0xff]  }
 0x4df   :  { %11055 = vmatpush2.bf16.msra.mxu0 %v22476_v10  ;;  %v22515_v10 = vld [vmem:[#allocation5 + $0x4160] ss:$72 sps:$4 sm:$0xff]  }
 0x4e0   :  { %11098 = vmatpush2.bf16.msra.mxu1 %v22479_v45  ;;  %11056 = vmatprep.subr.bf16.mxu0 %v22484_v59  ;;  %v22520_v45 = vld [vmem:[#allocation5 + $0x37d4] ss:$72 sps:$4 sm:$0xff]  }
 0x4e1   :  { %11099 = vmatprep.subr.bf16.mxu1 %v22487_v35  ;;  %v22523_v59 = vld [vmem:[#allocation5 + $0x40d4] ss:$72 sps:$4 sm:$0xff]   ;;  %v22521_v35 = vld [vmem:[#allocation5 + $0x40d0] ss:$72 sps:$4 sm:$0xff]  }
 0x4e3   :  { %11057 = vmatpush2.bf16.msra.mxu0 %v22482_v22  ;;  %v22526_v22 = vld [vmem:[#allocation5 + $0x3744] ss:$72 sps:$4 sm:$0xff]  }
 0x4e4   :  { %11100 = vmatpush2.bf16.msra.mxu1 %v22485_v18  ;;  %11058 = vmatprep.subr.bf16.mxu0 %v22490_v27  ;;  %v22529_v18 = vld [vmem:[#allocation5 + $0x4044] ss:$72 sps:$4 sm:$0xff]   ;;  %v22524_v27 = vld [vmem:[#allocation5 + $0x3740] ss:$72 sps:$4 sm:$0xff]  }
 0x4e5   :  { %11101 = vmatprep.subr.bf16.mxu1 %v22493_v23  ;;  %v22527_v23 = vld [vmem:[#allocation5 + $0x4040] ss:$72 sps:$4 sm:$0xff]  }
 0x4e7   :  { %11059 = vmatpush2.bf16.msra.mxu0 %v22488_v6  ;;  %v22532_v6 = vld [vmem:[#allocation5 + $0x36b4] ss:$72 sps:$4 sm:$0xff]  }
 0x4e8   :  { %11102 = vmatpush2.bf16.msra.mxu1 %v22491_v58  ;;  %11114 = vmatprep.subr.bf16.mxu0 %v22496_v62  ;;  %v22535_v58 = vld [vmem:[#allocation5 + $0x3fb4] ss:$72 sps:$4 sm:$0xff]   ;;  %v22530_v62 = vld [vmem:[#allocation5 + $0x36b0] ss:$72 sps:$4 sm:$0xff]  }
 0x4e9   :  { %11157 = vmatprep.subr.bf16.mxu1 %v22499_v19  ;;  %v22533_v19 = vld [vmem:[#allocation5 + $0x3fb0] ss:$72 sps:$4 sm:$0xff]  }
 0x4ea   :  { %v10804_v61 = vpop.f32.mrf.mxu0  ;;  %11061 = vmatmul.mubr.bf16.vlgmr.msra.gmra.mxu0 %v24430_v48 }
 0x4eb   :  { %v10847_v7 = vpop.f32.mrf.mxu1  ;;  %11104 = vmatmul.mubr.bf16.vlgmr.msra.gmra.mxu1 %v24434_v49  ;;  %v10805_v14 = vadd.f32 %v10804_v61, %v24748_v60  ;;  %11115 = vmatpush1.bf16.msra.mxu0 %v22494_v55  ;;  %v22538_v55 = vld [vmem:[#allocation5 + $0x3624] ss:$72 sps:$4 sm:$0xff]   ;;  %v22542_v61 = vld [vmem:[#allocation5 + $0x3e90] ss:$72 sps:$4 sm:$0xff]  }
 0x4ec   :  { %11158 = vmatpush1.bf16.msra.mxu1 %v22497_v31  ;;  %v10806_v38 = vpop.f32.mrf.mxu0  ;;  %11116 = vmatprep.subr.bf16.mxu0 %v22502_v57  ;;  %v22541_v31 = vld [vmem:[#allocation5 + $0x3f24] ss:$72 sps:$4 sm:$0xff]   ;;  %v22536_v57 = vld [vmem:[#allocation5 + $0x3620] ss:$72 sps:$4 sm:$0xff]  }
 0x4ed   :  { %v10849_v0 = vpop.f32.mrf.mxu1  ;;  %11159 = vmatprep.subr.bf16.mxu1 %v22505_v47  ;;  %v24764_v26 = vadd.f32 %v10847_v7, %v10805_v14  ;;  %v10807_v11 = vadd.f32 %v10806_v38, %v24753_v30  ;;  %11146 = vmatprep.mubr.bf16.mxu0 %v24442_v56  ;;  %v22512_v30 = vld [vmem:[#allocation5 + $0x3860] ss:$72 sps:$4 sm:$0xff]   ;;  %v22545_v7 = vld [vmem:[#allocation5 + $0x4790] ss:$72 sps:$4 sm:$0xff]   ;;  %v22550_v14 = vld [vmem:[#allocation5 + $0x3e04] ss:$72 sps:$4 sm:$0xff]  }
 0x4ee   :  { %11189 = vmatprep.mubr.bf16.mxu1 %v24446_v28  ;;  %v10808_v51 = vpop.f32.mrf.mxu0  ;;  %v22539_v47 = vld [vmem:[#allocation5 + $0x3f20] ss:$72 sps:$4 sm:$0xff]   ;;  %v22553_v38 = vld [vmem:[#allocation5 + $0x4704] ss:$72 sps:$4 sm:$0xff]  }
 0x4ef   :  { %v24769_v60 = vadd.f32 %v10849_v0, %v10807_v11  ;;  %v10809_v24 = vadd.f32 %v10808_v51, %v24756_v40  ;;  %11117 = vmatpush1.bf16.msra.mxu0 %v22500_v63  ;;  %v10851_v37 = vpop.f32.mrf.mxu1  ;;  %v22518_v40 = vld [vmem:[#allocation5 + $0x37d0] ss:$72 sps:$4 sm:$0xff]   ;;  %v22544_v63 = vld [vmem:[#allocation5 + $0x3e94] ss:$72 sps:$4 sm:$0xff]   ;;  %v22548_v0 = vld [vmem:[#allocation5 + $0x3e00] ss:$72 sps:$4 sm:$0xff]  }
 0x4f0   :  { %11160 = vmatpush1.bf16.msra.mxu1 %v22503_v3  ;;  %11118 = vmatprep.subr.bf16.mxu0 %v22508_v46  ;;  %v22547_v3 = vld [vmem:[#allocation5 + $0x4794] ss:$72 sps:$4 sm:$0xff]   ;;  %v22551_v46 = vld [vmem:[#allocation5 + $0x4700] ss:$72 sps:$4 sm:$0xff]   ;;  %v22562_v51 = vld [vmem:[#allocation5 + $0x3ce4] ss:$72 sps:$4 sm:$0xff]  }
 0x4f1   :  { %11161 = vmatprep.subr.bf16.mxu1 %v22511_v12  ;;  %v24772_v44 = vadd.f32 %v10851_v37, %v10809_v24  ;;  %v22556_v12 = vld [vmem:[#allocation5 + $0x3d74] ss:$72 sps:$4 sm:$0xff]   ;;  %v22565_v24 = vld [vmem:[#allocation5 + $0x45e4] ss:$72 sps:$4 sm:$0xff]   ;;  %v22560_v37 = vld [vmem:[#allocation5 + $0x3ce0] ss:$72 sps:$4 sm:$0xff]  }
 0x4f2   :  { %v22559_v11 = vld [vmem:[#allocation5 + $0x4674] ss:$72 sps:$4 sm:$0xff]  }
 0x4f3   :  { %11119 = vmatpush1.bf16.msra.mxu0 %v22506_v15  ;;  %v22554_v15 = vld [vmem:[#allocation5 + $0x3d70] ss:$72 sps:$4 sm:$0xff]  }
 0x4f4   :  { %11162 = vmatpush1.bf16.msra.mxu1 %v22509_v50  ;;  %11120 = vmatprep.subr.bf16.mxu0 %v22514_v29  ;;  %v22557_v50 = vld [vmem:[#allocation5 + $0x4670] ss:$72 sps:$4 sm:$0xff]   ;;  %v22563_v29 = vld [vmem:[#allocation5 + $0x45e0] ss:$72 sps:$4 sm:$0xff]  }
 0x4f5   :  { %11163 = vmatprep.subr.bf16.mxu1 %v22517_v16  ;;  %v22568_v16 = vld [vmem:[#allocation5 + $0x3c54] ss:$72 sps:$4 sm:$0xff]  }
 0x4f7   :  { %11121 = vmatpush1.bf16.msra.mxu0 %v22512_v30  ;;  %v22571_v30 = vld [vmem:[#allocation5 + $0x4554] ss:$72 sps:$4 sm:$0xff]  }
 0x4f8   :  { %11164 = vmatpush1.bf16.msra.mxu1 %v22515_v10  ;;  %11122 = vmatprep.subr.bf16.mxu0 %v22520_v45  ;;  %v22566_v10 = vld [vmem:[#allocation5 + $0x3c50] ss:$72 sps:$4 sm:$0xff]  }
 0x4f9   :  { %11165 = vmatprep.subr.bf16.mxu1 %v22523_v59  ;;  %v22569_v45 = vld [vmem:[#allocation5 + $0x4550] ss:$72 sps:$4 sm:$0xff]   ;;  %v22574_v59 = vld [vmem:[#allocation5 + $0x3bc4] ss:$72 sps:$4 sm:$0xff]  }
 0x4fb   :  { %11123 = vmatpush1.bf16.msra.mxu0 %v22518_v40  ;;  %v22577_v40 = vld [vmem:[#allocation5 + $0x44c4] ss:$72 sps:$4 sm:$0xff]  }
 0x4fc   :  { %11166 = vmatpush1.bf16.msra.mxu1 %v22521_v35  ;;  %11124 = vmatprep.subr.bf16.mxu0 %v22526_v22  ;;  %v22572_v35 = vld [vmem:[#allocation5 + $0x3bc0] ss:$72 sps:$4 sm:$0xff]  }
 0x4fd   :  { %11167 = vmatprep.subr.bf16.mxu1 %v22529_v18  ;;  %v22575_v22 = vld [vmem:[#allocation5 + $0x44c0] ss:$72 sps:$4 sm:$0xff]   ;;  %v22580_v18 = vld [vmem:[#allocation5 + $0x3b34] ss:$72 sps:$4 sm:$0xff]  }
 0x4ff   :  { %11125 = vmatpush1.bf16.msra.mxu0 %v22524_v27  ;;  %v22583_v27 = vld [vmem:[#allocation5 + $0x4434] ss:$72 sps:$4 sm:$0xff]  }
 0x500   :  { %11168 = vmatpush1.bf16.msra.mxu1 %v22527_v23  ;;  %11126 = vmatprep.subr.bf16.mxu0 %v22532_v6  ;;  %v22578_v23 = vld [vmem:[#allocation5 + $0x3b30] ss:$72 sps:$4 sm:$0xff]  }
 0x501   :  { %11169 = vmatprep.subr.bf16.mxu1 %v22535_v58  ;;  %v22581_v6 = vld [vmem:[#allocation5 + $0x4430] ss:$72 sps:$4 sm:$0xff]   ;;  %v22586_v58 = vld [vmem:[#allocation5 + $0x3aa4] ss:$72 sps:$4 sm:$0xff]  }
 0x503   :  { %11127 = vmatpush1.bf16.msra.mxu0 %v22530_v62  ;;  %v22589_v62 = vld [vmem:[#allocation5 + $0x43a4] ss:$72 sps:$4 sm:$0xff]  }
 0x504   :  { %11170 = vmatpush1.bf16.msra.mxu1 %v22533_v19  ;;  %11128 = vmatprep.subr.bf16.mxu0 %v22538_v55  ;;  %v22584_v19 = vld [vmem:[#allocation5 + $0x3aa0] ss:$72 sps:$4 sm:$0xff]  }
 0x505   :  { %11171 = vmatprep.subr.bf16.mxu1 %v22541_v31  ;;  %v22587_v55 = vld [vmem:[#allocation5 + $0x43a0] ss:$72 sps:$4 sm:$0xff]   ;;  %v22592_v31 = vld [vmem:[#allocation5 + $0x41c] ss:$72 sps:$4 sm:$0xff]  }
 0x507   :  { %11129 = vmatpush1.bf16.msra.mxu0 %v22536_v57  ;;  %v22595_v57 = vld [vmem:[#allocation5 + $0xd1c] ss:$72 sps:$4 sm:$0xff]  }
 0x508   :  { %11172 = vmatpush1.bf16.msra.mxu1 %v22539_v47  ;;  %11130 = vmatprep.subr.bf16.mxu0 %v22544_v63  ;;  %v22590_v47 = vld [vmem:[#allocation5 + $0x418] ss:$72 sps:$4 sm:$0xff]  }
 0x509   :  { %11173 = vmatprep.subr.bf16.mxu1 %v22547_v3  ;;  %v22593_v63 = vld [vmem:[#allocation5 + $0xd18] ss:$72 sps:$4 sm:$0xff]   ;;  %v22598_v3 = vld [vmem:[#allocation5 + $0x38c] ss:$72 sps:$4 sm:$0xff]  }
 0x50b   :  { %11131 = vmatpush2.bf16.msra.mxu0 %v22542_v61  ;;  %v22601_v61 = vld [vmem:[#allocation5 + $0xc8c] ss:$72 sps:$4 sm:$0xff]  }
 0x50c   :  { %11174 = vmatpush2.bf16.msra.mxu1 %v22545_v7  ;;  %11132 = vmatprep.subr.bf16.mxu0 %v22550_v14  ;;  %v22596_v7 = vld [vmem:[#allocation5 + $0x388] ss:$72 sps:$4 sm:$0xff]  }
 0x50d   :  { %11175 = vmatprep.subr.bf16.mxu1 %v22553_v38  ;;  %v22599_v14 = vld [vmem:[#allocation5 + $0xc88] ss:$72 sps:$4 sm:$0xff]   ;;  %v22604_v38 = vld [vmem:[#allocation5 + $0x2fc] ss:$72 sps:$4 sm:$0xff]  }
 0x50f   :  { %11133 = vmatpush2.bf16.msra.mxu0 %v22548_v0  ;;  %v22607_v0 = vld [vmem:[#allocation5 + $0xbfc] ss:$72 sps:$4 sm:$0xff]  }
 0x510   :  { %11176 = vmatpush2.bf16.msra.mxu1 %v22551_v46  ;;  %11134 = vmatprep.subr.bf16.mxu0 %v22556_v12  ;;  %v22602_v46 = vld [vmem:[#allocation5 + $0x2f8] ss:$72 sps:$4 sm:$0xff]  }
 0x511   :  { %11177 = vmatprep.subr.bf16.mxu1 %v22559_v11  ;;  %v22605_v12 = vld [vmem:[#allocation5 + $0xbf8] ss:$72 sps:$4 sm:$0xff]   ;;  %v22610_v11 = vld [vmem:[#allocation5 + $0x26c] ss:$72 sps:$4 sm:$0xff]  }
 0x513   :  { %11135 = vmatpush2.bf16.msra.mxu0 %v22554_v15  ;;  %v22613_v15 = vld [vmem:[#allocation5 + $0xb6c] ss:$72 sps:$4 sm:$0xff]  }
 0x514   :  { %11178 = vmatpush2.bf16.msra.mxu1 %v22557_v50  ;;  %11136 = vmatprep.subr.bf16.mxu0 %v22562_v51  ;;  %v22608_v50 = vld [vmem:[#allocation5 + $0x268] ss:$72 sps:$4 sm:$0xff]  }
 0x515   :  { %11179 = vmatprep.subr.bf16.mxu1 %v22565_v24  ;;  %v22611_v51 = vld [vmem:[#allocation5 + $0xb68] ss:$72 sps:$4 sm:$0xff]   ;;  %v22616_v24 = vld [vmem:[#allocation5 + $0x1dc] ss:$72 sps:$4 sm:$0xff]  }
 0x517   :  { %11137 = vmatpush2.bf16.msra.mxu0 %v22560_v37  ;;  %v22619_v37 = vld [vmem:[#allocation5 + $0xadc] ss:$72 sps:$4 sm:$0xff]  }
 0x518   :  { %11180 = vmatpush2.bf16.msra.mxu1 %v22563_v29  ;;  %11138 = vmatprep.subr.bf16.mxu0 %v22568_v16  ;;  %v22614_v29 = vld [vmem:[#allocation5 + $0x1d8] ss:$72 sps:$4 sm:$0xff]  }
 0x519   :  { %11181 = vmatprep.subr.bf16.mxu1 %v22571_v30  ;;  %v22617_v16 = vld [vmem:[#allocation5 + $0xad8] ss:$72 sps:$4 sm:$0xff]   ;;  %v22622_v30 = vld [vmem:[#allocation5 + $0x14c] ss:$72 sps:$4 sm:$0xff]  }
 0x51b   :  { %11139 = vmatpush2.bf16.msra.mxu0 %v22566_v10  ;;  %v22625_v10 = vld [vmem:[#allocation5 + $0xa4c] ss:$72 sps:$4 sm:$0xff]  }
 0x51c   :  { %11182 = vmatpush2.bf16.msra.mxu1 %v22569_v45  ;;  %11140 = vmatprep.subr.bf16.mxu0 %v22574_v59  ;;  %v22620_v45 = vld [vmem:[#allocation5 + $0x148] ss:$72 sps:$4 sm:$0xff]  }
 0x51d   :  { %11183 = vmatprep.subr.bf16.mxu1 %v22577_v40  ;;  %v22623_v59 = vld [vmem:[#allocation5 + $0xa48] ss:$72 sps:$4 sm:$0xff]   ;;  %v22628_v40 = vld [vmem:[#allocation5 + $0xbc] ss:$72 sps:$4 sm:$0xff]  }
 0x51f   :  { %11141 = vmatpush2.bf16.msra.mxu0 %v22572_v35  ;;  %v22631_v35 = vld [vmem:[#allocation5 + $0x9bc] ss:$72 sps:$4 sm:$0xff]  }
 0x520   :  { %11184 = vmatpush2.bf16.msra.mxu1 %v22575_v22  ;;  %11142 = vmatprep.subr.bf16.mxu0 %v22580_v18  ;;  %v22626_v22 = vld [vmem:[#allocation5 + $0xb8] ss:$72 sps:$4 sm:$0xff]  }
 0x521   :  { %11185 = vmatprep.subr.bf16.mxu1 %v22583_v27  ;;  %v22629_v18 = vld [vmem:[#allocation5 + $0x9b8] ss:$72 sps:$4 sm:$0xff]   ;;  %v22634_v27 = vld [vmem:[#allocation5 + $0x2c] ss:$72 sps:$4 sm:$0xff]  }
 0x523   :  { %11143 = vmatpush2.bf16.msra.mxu0 %v22578_v23  ;;  %v22637_v23 = vld [vmem:[#allocation5 + $0x92c] ss:$72 sps:$4 sm:$0xff]  }
 0x524   :  { %11186 = vmatpush2.bf16.msra.mxu1 %v22581_v6  ;;  %11144 = vmatprep.subr.bf16.mxu0 %v22586_v58  ;;  %v22632_v6 = vld [vmem:[#allocation5 + $0x28] ss:$72 sps:$4 sm:$0xff]  }
 0x525   :  { %11187 = vmatprep.subr.bf16.mxu1 %v22589_v62  ;;  %v22635_v58 = vld [vmem:[#allocation5 + $0x928] ss:$72 sps:$4 sm:$0xff]   ;;  %v22640_v62 = vld [vmem:[#allocation5 + $0x89c] ss:$72 sps:$4 sm:$0xff]  }
 0x527   :  { %11145 = vmatpush2.bf16.msra.mxu0 %v22584_v19  ;;  %v22643_v19 = vld [vmem:[#allocation5 + $0x119c] ss:$72 sps:$4 sm:$0xff]  }
 0x528   :  { %11188 = vmatpush2.bf16.msra.mxu1 %v22587_v55  ;;  %11200 = vmatprep.subr.bf16.mxu0 %v22592_v31  ;;  %v22638_v55 = vld [vmem:[#allocation5 + $0x898] ss:$72 sps:$4 sm:$0xff]  }
 0x529   :  { %11243 = vmatprep.subr.bf16.mxu1 %v22595_v57  ;;  %v22641_v31 = vld [vmem:[#allocation5 + $0x1198] ss:$72 sps:$4 sm:$0xff]   ;;  %v22646_v57 = vld [vmem:[#allocation5 + $0x80c] ss:$72 sps:$4 sm:$0xff]  }
 0x52a   :  { %11147 = vmatmul.mubr.bf16.vlgmr.msra.gmra.mxu0 %v24454_v4 }
 0x52b   :  { %11190 = vmatmul.mubr.bf16.vlgmr.msra.gmra.mxu1 %v24458_v5  ;;  %11201 = vmatpush1.bf16.msra.mxu0 %v22590_v47  ;;  %v22649_v47 = vld [vmem:[#allocation5 + $0x110c] ss:$72 sps:$4 sm:$0xff]  }
 0x52c   :  { %11244 = vmatpush1.bf16.msra.mxu1 %v22593_v63  ;;  %11202 = vmatprep.subr.bf16.mxu0 %v22598_v3  ;;  %v22644_v63 = vld [vmem:[#allocation5 + $0x808] ss:$72 sps:$4 sm:$0xff]  }
 0x52d   :  { %11245 = vmatprep.subr.bf16.mxu1 %v22601_v61  ;;  %11232 = vmatprep.mubr.bf16.mxu0 %v24366_v53  ;;  %v22647_v3 = vld [vmem:[#allocation5 + $0x1108] ss:$72 sps:$4 sm:$0xff]   ;;  %v22652_v61 = vld [vmem:[#allocation5 + $0x77c] ss:$72 sps:$4 sm:$0xff]  }
 0x52e   :  { %11275 = vmatprep.mubr.bf16.mxu1 %v24368_v54 }
 0x52f   :  { %11203 = vmatpush1.bf16.msra.mxu0 %v22596_v7  ;;  %v22655_v7 = vld [vmem:[#allocation5 + $0x107c] ss:$72 sps:$4 sm:$0xff]  }
 0x530   :  { %11246 = vmatpush1.bf16.msra.mxu1 %v22599_v14  ;;  %11204 = vmatprep.subr.bf16.mxu0 %v22604_v38  ;;  %v22650_v14 = vld [vmem:[#allocation5 + $0x778] ss:$72 sps:$4 sm:$0xff]  }
 0x531   :  { %11247 = vmatprep.subr.bf16.mxu1 %v22607_v0  ;;  %v22653_v38 = vld [vmem:[#allocation5 + $0x1078] ss:$72 sps:$4 sm:$0xff]   ;;  %v22658_v0 = vld [vmem:[#allocation5 + $0x6ec] ss:$72 sps:$4 sm:$0xff]  }
 0x533   :  { %11205 = vmatpush1.bf16.msra.mxu0 %v22602_v46  ;;  %v22661_v46 = vld [vmem:[#allocation5 + $0xfec] ss:$72 sps:$4 sm:$0xff]  }
 0x534   :  { %11248 = vmatpush1.bf16.msra.mxu1 %v22605_v12  ;;  %11206 = vmatprep.subr.bf16.mxu0 %v22610_v11  ;;  %v22656_v12 = vld [vmem:[#allocation5 + $0x6e8] ss:$72 sps:$4 sm:$0xff]  }
 0x535   :  { %11249 = vmatprep.subr.bf16.mxu1 %v22613_v15  ;;  %v22659_v11 = vld [vmem:[#allocation5 + $0xfe8] ss:$72 sps:$4 sm:$0xff]   ;;  %v22664_v15 = vld [vmem:[#allocation5 + $0x65c] ss:$72 sps:$4 sm:$0xff]  }
 0x537   :  { %11207 = vmatpush1.bf16.msra.mxu0 %v22608_v50  ;;  %v22667_v50 = vld [vmem:[#allocation5 + $0xf5c] ss:$72 sps:$4 sm:$0xff]  }
 0x538   :  { %11250 = vmatpush1.bf16.msra.mxu1 %v22611_v51  ;;  %11208 = vmatprep.subr.bf16.mxu0 %v22616_v24  ;;  %v22662_v51 = vld [vmem:[#allocation5 + $0x658] ss:$72 sps:$4 sm:$0xff]  }
 0x539   :  { %11251 = vmatprep.subr.bf16.mxu1 %v22619_v37  ;;  %v22665_v24 = vld [vmem:[#allocation5 + $0xf58] ss:$72 sps:$4 sm:$0xff]   ;;  %v22670_v37 = vld [vmem:[#allocation5 + $0x5cc] ss:$72 sps:$4 sm:$0xff]  }
 0x53b   :  { %11209 = vmatpush1.bf16.msra.mxu0 %v22614_v29  ;;  %v22673_v29 = vld [vmem:[#allocation5 + $0xecc] ss:$72 sps:$4 sm:$0xff]  }
 0x53c   :  { %11252 = vmatpush1.bf16.msra.mxu1 %v22617_v16  ;;  %11210 = vmatprep.subr.bf16.mxu0 %v22622_v30  ;;  %v22668_v16 = vld [vmem:[#allocation5 + $0x5c8] ss:$72 sps:$4 sm:$0xff]  }
 0x53d   :  { %11253 = vmatprep.subr.bf16.mxu1 %v22625_v10  ;;  %v22671_v30 = vld [vmem:[#allocation5 + $0xec8] ss:$72 sps:$4 sm:$0xff]   ;;  %v22676_v10 = vld [vmem:[#allocation5 + $0x53c] ss:$72 sps:$4 sm:$0xff]  }
 0x53f   :  { %11211 = vmatpush1.bf16.msra.mxu0 %v22620_v45  ;;  %v22679_v45 = vld [vmem:[#allocation5 + $0xe3c] ss:$72 sps:$4 sm:$0xff]  }
 0x540   :  { %11254 = vmatpush1.bf16.msra.mxu1 %v22623_v59  ;;  %11212 = vmatprep.subr.bf16.mxu0 %v22628_v40  ;;  %v22674_v59 = vld [vmem:[#allocation5 + $0x538] ss:$72 sps:$4 sm:$0xff]  }
 0x541   :  { %11255 = vmatprep.subr.bf16.mxu1 %v22631_v35  ;;  %v22677_v40 = vld [vmem:[#allocation5 + $0xe38] ss:$72 sps:$4 sm:$0xff]   ;;  %v22682_v35 = vld [vmem:[#allocation5 + $0x4ac] ss:$72 sps:$4 sm:$0xff]  }
 0x543   :  { %11213 = vmatpush1.bf16.msra.mxu0 %v22626_v22  ;;  %v22685_v22 = vld [vmem:[#allocation5 + $0xdac] ss:$72 sps:$4 sm:$0xff]  }
 0x544   :  { %11256 = vmatpush1.bf16.msra.mxu1 %v22629_v18  ;;  %11214 = vmatprep.subr.bf16.mxu0 %v22634_v27  ;;  %v22680_v18 = vld [vmem:[#allocation5 + $0x4a8] ss:$72 sps:$4 sm:$0xff]  }
 0x545   :  { %11257 = vmatprep.subr.bf16.mxu1 %v22637_v23  ;;  %v22683_v27 = vld [vmem:[#allocation5 + $0xda8] ss:$72 sps:$4 sm:$0xff]   ;;  %v22688_v23 = vld [vmem:[#allocation5 + $0x161c] ss:$72 sps:$4 sm:$0xff]  }
 0x547   :  { %11215 = vmatpush1.bf16.msra.mxu0 %v22632_v6  ;;  %v22691_v6 = vld [vmem:[#allocation5 + $0x1f1c] ss:$72 sps:$4 sm:$0xff]  }
 0x548   :  { %11258 = vmatpush1.bf16.msra.mxu1 %v22635_v58  ;;  %11216 = vmatprep.subr.bf16.mxu0 %v22640_v62  ;;  %v22686_v58 = vld [vmem:[#allocation5 + $0x1618] ss:$72 sps:$4 sm:$0xff]  }
 0x549   :  { %11259 = vmatprep.subr.bf16.mxu1 %v22643_v19  ;;  %v22689_v62 = vld [vmem:[#allocation5 + $0x1f18] ss:$72 sps:$4 sm:$0xff]   ;;  %v22694_v19 = vld [vmem:[#allocation5 + $0x158c] ss:$72 sps:$4 sm:$0xff]  }
 0x54b   :  { %11217 = vmatpush2.bf16.msra.mxu0 %v22638_v55  ;;  %v22697_v55 = vld [vmem:[#allocation5 + $0x1e8c] ss:$72 sps:$4 sm:$0xff]  }
 0x54c   :  { %11260 = vmatpush2.bf16.msra.mxu1 %v22641_v31  ;;  %11218 = vmatprep.subr.bf16.mxu0 %v22646_v57  ;;  %v22692_v31 = vld [vmem:[#allocation5 + $0x1588] ss:$72 sps:$4 sm:$0xff]  }
 0x54d   :  { %11261 = vmatprep.subr.bf16.mxu1 %v22649_v47  ;;  %v22695_v57 = vld [vmem:[#allocation5 + $0x1e88] ss:$72 sps:$4 sm:$0xff]   ;;  %v22700_v47 = vld [vmem:[#allocation5 + $0x14fc] ss:$72 sps:$4 sm:$0xff]  }
 0x54f   :  { %11219 = vmatpush2.bf16.msra.mxu0 %v22644_v63  ;;  %v22703_v63 = vld [vmem:[#allocation5 + $0x1dfc] ss:$72 sps:$4 sm:$0xff]  }
 0x550   :  { %11262 = vmatpush2.bf16.msra.mxu1 %v22647_v3  ;;  %11220 = vmatprep.subr.bf16.mxu0 %v22652_v61  ;;  %v22698_v3 = vld [vmem:[#allocation5 + $0x14f8] ss:$72 sps:$4 sm:$0xff]  }
 0x551   :  { %11263 = vmatprep.subr.bf16.mxu1 %v22655_v7  ;;  %v22701_v61 = vld [vmem:[#allocation5 + $0x1df8] ss:$72 sps:$4 sm:$0xff]   ;;  %v22706_v7 = vld [vmem:[#allocation5 + $0x146c] ss:$72 sps:$4 sm:$0xff]  }
 0x553   :  { %11221 = vmatpush2.bf16.msra.mxu0 %v22650_v14  ;;  %v22709_v14 = vld [vmem:[#allocation5 + $0x1d6c] ss:$72 sps:$4 sm:$0xff]  }
 0x554   :  { %11264 = vmatpush2.bf16.msra.mxu1 %v22653_v38  ;;  %11222 = vmatprep.subr.bf16.mxu0 %v22658_v0  ;;  %v22704_v38 = vld [vmem:[#allocation5 + $0x1468] ss:$72 sps:$4 sm:$0xff]  }
 0x555   :  { %11265 = vmatprep.subr.bf16.mxu1 %v22661_v46  ;;  %v22707_v0 = vld [vmem:[#allocation5 + $0x1d68] ss:$72 sps:$4 sm:$0xff]   ;;  %v22712_v46 = vld [vmem:[#allocation5 + $0x13dc] ss:$72 sps:$4 sm:$0xff]  }
 0x557   :  { %11223 = vmatpush2.bf16.msra.mxu0 %v22656_v12  ;;  %v22715_v12 = vld [vmem:[#allocation5 + $0x1cdc] ss:$72 sps:$4 sm:$0xff]  }
 0x558   :  { %11266 = vmatpush2.bf16.msra.mxu1 %v22659_v11  ;;  %11224 = vmatprep.subr.bf16.mxu0 %v22664_v15  ;;  %v22710_v11 = vld [vmem:[#allocation5 + $0x13d8] ss:$72 sps:$4 sm:$0xff]  }
 0x559   :  { %11267 = vmatprep.subr.bf16.mxu1 %v22667_v50  ;;  %v22713_v15 = vld [vmem:[#allocation5 + $0x1cd8] ss:$72 sps:$4 sm:$0xff]   ;;  %v22718_v50 = vld [vmem:[#allocation5 + $0x134c] ss:$72 sps:$4 sm:$0xff]  }
 0x55b   :  { %11225 = vmatpush2.bf16.msra.mxu0 %v22662_v51  ;;  %v22721_v51 = vld [vmem:[#allocation5 + $0x1c4c] ss:$72 sps:$4 sm:$0xff]  }
 0x55c   :  { %11268 = vmatpush2.bf16.msra.mxu1 %v22665_v24  ;;  %11226 = vmatprep.subr.bf16.mxu0 %v22670_v37  ;;  %v22716_v24 = vld [vmem:[#allocation5 + $0x1348] ss:$72 sps:$4 sm:$0xff]  }
 0x55d   :  { %11269 = vmatprep.subr.bf16.mxu1 %v22673_v29  ;;  %v22719_v37 = vld [vmem:[#allocation5 + $0x1c48] ss:$72 sps:$4 sm:$0xff]   ;;  %v22724_v29 = vld [vmem:[#allocation5 + $0x12bc] ss:$72 sps:$4 sm:$0xff]  }
 0x55f   :  { %11227 = vmatpush2.bf16.msra.mxu0 %v22668_v16  ;;  %v22727_v16 = vld [vmem:[#allocation5 + $0x1bbc] ss:$72 sps:$4 sm:$0xff]  }
 0x560   :  { %11270 = vmatpush2.bf16.msra.mxu1 %v22671_v30  ;;  %11228 = vmatprep.subr.bf16.mxu0 %v22676_v10  ;;  %v22722_v30 = vld [vmem:[#allocation5 + $0x12b8] ss:$72 sps:$4 sm:$0xff]  }
 0x561   :  { %11271 = vmatprep.subr.bf16.mxu1 %v22679_v45  ;;  %v22725_v10 = vld [vmem:[#allocation5 + $0x1bb8] ss:$72 sps:$4 sm:$0xff]   ;;  %v22730_v45 = vld [vmem:[#allocation5 + $0x122c] ss:$72 sps:$4 sm:$0xff]  }
 0x563   :  { %11229 = vmatpush2.bf16.msra.mxu0 %v22674_v59  ;;  %v22733_v59 = vld [vmem:[#allocation5 + $0x1b2c] ss:$72 sps:$4 sm:$0xff]  }
 0x564   :  { %11272 = vmatpush2.bf16.msra.mxu1 %v22677_v40  ;;  %11230 = vmatprep.subr.bf16.mxu0 %v22682_v35  ;;  %v22728_v40 = vld [vmem:[#allocation5 + $0x1228] ss:$72 sps:$4 sm:$0xff]  }
 0x565   :  { %11273 = vmatprep.subr.bf16.mxu1 %v22685_v22  ;;  %v22731_v35 = vld [vmem:[#allocation5 + $0x1b28] ss:$72 sps:$4 sm:$0xff]   ;;  %v22736_v22 = vld [vmem:[#allocation5 + $0x1a9c] ss:$72 sps:$4 sm:$0xff]  }
 0x567   :  { %11231 = vmatpush2.bf16.msra.mxu0 %v22680_v18  ;;  %v22739_v18 = vld [vmem:[#allocation5 + $0x239c] ss:$72 sps:$4 sm:$0xff]  }
 0x568   :  { %11274 = vmatpush2.bf16.msra.mxu1 %v22683_v27  ;;  %11286 = vmatprep.subr.bf16.mxu0 %v22688_v23  ;;  %v22734_v27 = vld [vmem:[#allocation5 + $0x1a98] ss:$72 sps:$4 sm:$0xff]  }
 0x569   :  { %11329 = vmatprep.subr.bf16.mxu1 %v22691_v6  ;;  %v22737_v23 = vld [vmem:[#allocation5 + $0x2398] ss:$72 sps:$4 sm:$0xff]   ;;  %v22742_v6 = vld [vmem:[#allocation5 + $0x1a0c] ss:$72 sps:$4 sm:$0xff]  }
 0x56a   :  { %11233 = vmatmul.mubr.bf16.vlgmr.msra.gmra.mxu0 %v24372_v8 }
 0x56b   :  { %11276 = vmatmul.mubr.bf16.vlgmr.msra.gmra.mxu1 %v24374_v9  ;;  %11287 = vmatpush1.bf16.msra.mxu0 %v22686_v58  ;;  %v22745_v58 = vld [vmem:[#allocation5 + $0x230c] ss:$72 sps:$4 sm:$0xff]  }
 0x56c   :  { %11330 = vmatpush1.bf16.msra.mxu1 %v22689_v62  ;;  %11288 = vmatprep.subr.bf16.mxu0 %v22694_v19  ;;  %v22740_v62 = vld [vmem:[#allocation5 + $0x1a08] ss:$72 sps:$4 sm:$0xff]  }
 0x56d   :  { %11331 = vmatprep.subr.bf16.mxu1 %v22697_v55  ;;  %11318 = vmatprep.mubr.bf16.mxu0 %v24388_v41  ;;  %v22743_v19 = vld [vmem:[#allocation5 + $0x2308] ss:$72 sps:$4 sm:$0xff]   ;;  %v22748_v55 = vld [vmem:[#allocation5 + $0x197c] ss:$72 sps:$4 sm:$0xff]  }
 0x56e   :  { %11361 = vmatprep.mubr.bf16.mxu1 %v24392_v42 }
 0x56f   :  { %11289 = vmatpush1.bf16.msra.mxu0 %v22692_v31  ;;  %v22751_v31 = vld [vmem:[#allocation5 + $0x227c] ss:$72 sps:$4 sm:$0xff]  }
 0x570   :  { %11332 = vmatpush1.bf16.msra.mxu1 %v22695_v57  ;;  %11290 = vmatprep.subr.bf16.mxu0 %v22700_v47  ;;  %v22746_v57 = vld [vmem:[#allocation5 + $0x1978] ss:$72 sps:$4 sm:$0xff]  }
 0x571   :  { %11333 = vmatprep.subr.bf16.mxu1 %v22703_v63  ;;  %v22749_v47 = vld [vmem:[#allocation5 + $0x2278] ss:$72 sps:$4 sm:$0xff]   ;;  %v22754_v63 = vld [vmem:[#allocation5 + $0x18ec] ss:$72 sps:$4 sm:$0xff]  }
 0x573   :  { %11291 = vmatpush1.bf16.msra.mxu0 %v22698_v3  ;;  %v22757_v3 = vld [vmem:[#allocation5 + $0x21ec] ss:$72 sps:$4 sm:$0xff]  }
 0x574   :  { %11334 = vmatpush1.bf16.msra.mxu1 %v22701_v61  ;;  %11292 = vmatprep.subr.bf16.mxu0 %v22706_v7  ;;  %v22752_v61 = vld [vmem:[#allocation5 + $0x18e8] ss:$72 sps:$4 sm:$0xff]  }
 0x575   :  { %11335 = vmatprep.subr.bf16.mxu1 %v22709_v14  ;;  %v22755_v7 = vld [vmem:[#allocation5 + $0x21e8] ss:$72 sps:$4 sm:$0xff]   ;;  %v22760_v14 = vld [vmem:[#allocation5 + $0x185c] ss:$72 sps:$4 sm:$0xff]  }
 0x577   :  { %11293 = vmatpush1.bf16.msra.mxu0 %v22704_v38  ;;  %v22763_v38 = vld [vmem:[#allocation5 + $0x215c] ss:$72 sps:$4 sm:$0xff]  }
 0x578   :  { %11336 = vmatpush1.bf16.msra.mxu1 %v22707_v0  ;;  %11294 = vmatprep.subr.bf16.mxu0 %v22712_v46  ;;  %v22758_v0 = vld [vmem:[#allocation5 + $0x1858] ss:$72 sps:$4 sm:$0xff]  }
 0x579   :  { %11337 = vmatprep.subr.bf16.mxu1 %v22715_v12  ;;  %v22761_v46 = vld [vmem:[#allocation5 + $0x2158] ss:$72 sps:$4 sm:$0xff]   ;;  %v22766_v12 = vld [vmem:[#allocation5 + $0x17cc] ss:$72 sps:$4 sm:$0xff]  }
 0x57b   :  { %11295 = vmatpush1.bf16.msra.mxu0 %v22710_v11  ;;  %v22769_v11 = vld [vmem:[#allocation5 + $0x20cc] ss:$72 sps:$4 sm:$0xff]  }
 0x57c   :  { %11338 = vmatpush1.bf16.msra.mxu1 %v22713_v15  ;;  %11296 = vmatprep.subr.bf16.mxu0 %v22718_v50  ;;  %v22764_v15 = vld [vmem:[#allocation5 + $0x17c8] ss:$72 sps:$4 sm:$0xff]  }
 0x57d   :  { %11339 = vmatprep.subr.bf16.mxu1 %v22721_v51  ;;  %v22767_v50 = vld [vmem:[#allocation5 + $0x20c8] ss:$72 sps:$4 sm:$0xff]   ;;  %v22772_v51 = vld [vmem:[#allocation5 + $0x173c] ss:$72 sps:$4 sm:$0xff]  }
 0x57f   :  { %11297 = vmatpush1.bf16.msra.mxu0 %v22716_v24  ;;  %v22775_v24 = vld [vmem:[#allocation5 + $0x203c] ss:$72 sps:$4 sm:$0xff]  }
 0x580   :  { %11340 = vmatpush1.bf16.msra.mxu1 %v22719_v37  ;;  %11298 = vmatprep.subr.bf16.mxu0 %v22724_v29  ;;  %v22770_v37 = vld [vmem:[#allocation5 + $0x1738] ss:$72 sps:$4 sm:$0xff]  }
 0x581   :  { %11341 = vmatprep.subr.bf16.mxu1 %v22727_v16  ;;  %v22773_v29 = vld [vmem:[#allocation5 + $0x2038] ss:$72 sps:$4 sm:$0xff]   ;;  %v22778_v16 = vld [vmem:[#allocation5 + $0x16ac] ss:$72 sps:$4 sm:$0xff]  }
 0x583   :  { %11299 = vmatpush1.bf16.msra.mxu0 %v22722_v30  ;;  %v22781_v30 = vld [vmem:[#allocation5 + $0x1fac] ss:$72 sps:$4 sm:$0xff]  }
 0x584   :  { %11342 = vmatpush1.bf16.msra.mxu1 %v22725_v10  ;;  %11300 = vmatprep.subr.bf16.mxu0 %v22730_v45  ;;  %v22776_v10 = vld [vmem:[#allocation5 + $0x16a8] ss:$72 sps:$4 sm:$0xff]  }
 0x585   :  { %11343 = vmatprep.subr.bf16.mxu1 %v22733_v59  ;;  %v22779_v45 = vld [vmem:[#allocation5 + $0x1fa8] ss:$72 sps:$4 sm:$0xff]   ;;  %v22784_v59 = vld [vmem:[#allocation5 + $0x281c] ss:$72 sps:$4 sm:$0xff]  }
 0x587   :  { %11301 = vmatpush1.bf16.msra.mxu0 %v22728_v40  ;;  %v22787_v40 = vld [vmem:[#allocation5 + $0x311c] ss:$72 sps:$4 sm:$0xff]  }
 0x588   :  { %11344 = vmatpush1.bf16.msra.mxu1 %v22731_v35  ;;  %11302 = vmatprep.subr.bf16.mxu0 %v22736_v22  ;;  %v22782_v35 = vld [vmem:[#allocation5 + $0x2818] ss:$72 sps:$4 sm:$0xff]  }
 0x589   :  { %11345 = vmatprep.subr.bf16.mxu1 %v22739_v18  ;;  %v22785_v22 = vld [vmem:[#allocation5 + $0x3118] ss:$72 sps:$4 sm:$0xff]   ;;  %v22790_v18 = vld [vmem:[#allocation5 + $0x278c] ss:$72 sps:$4 sm:$0xff]  }
 0x58b   :  { %11303 = vmatpush2.bf16.msra.mxu0 %v22734_v27  ;;  %v22793_v27 = vld [vmem:[#allocation5 + $0x308c] ss:$72 sps:$4 sm:$0xff]  }
 0x58c   :  { %11346 = vmatpush2.bf16.msra.mxu1 %v22737_v23  ;;  %11304 = vmatprep.subr.bf16.mxu0 %v22742_v6  ;;  %v22788_v23 = vld [vmem:[#allocation5 + $0x2788] ss:$72 sps:$4 sm:$0xff]  }
 0x58d   :  { %11347 = vmatprep.subr.bf16.mxu1 %v22745_v58  ;;  %v22791_v6 = vld [vmem:[#allocation5 + $0x3088] ss:$72 sps:$4 sm:$0xff]   ;;  %v22796_v58 = vld [vmem:[#allocation5 + $0x26fc] ss:$72 sps:$4 sm:$0xff]  }
 0x58f   :  { %11305 = vmatpush2.bf16.msra.mxu0 %v22740_v62  ;;  %v22799_v62 = vld [vmem:[#allocation5 + $0x2ffc] ss:$72 sps:$4 sm:$0xff]  }
 0x590   :  { %11348 = vmatpush2.bf16.msra.mxu1 %v22743_v19  ;;  %11306 = vmatprep.subr.bf16.mxu0 %v22748_v55  ;;  %v22794_v19 = vld [vmem:[#allocation5 + $0x26f8] ss:$72 sps:$4 sm:$0xff]  }
 0x591   :  { %11349 = vmatprep.subr.bf16.mxu1 %v22751_v31  ;;  %v22797_v55 = vld [vmem:[#allocation5 + $0x2ff8] ss:$72 sps:$4 sm:$0xff]   ;;  %v22802_v31 = vld [vmem:[#allocation5 + $0x266c] ss:$72 sps:$4 sm:$0xff]  }
 0x593   :  { %11307 = vmatpush2.bf16.msra.mxu0 %v22746_v57  ;;  %v22805_v57 = vld [vmem:[#allocation5 + $0x2f6c] ss:$72 sps:$4 sm:$0xff]  }
 0x594   :  { %11350 = vmatpush2.bf16.msra.mxu1 %v22749_v47  ;;  %11308 = vmatprep.subr.bf16.mxu0 %v22754_v63  ;;  %v22800_v47 = vld [vmem:[#allocation5 + $0x2668] ss:$72 sps:$4 sm:$0xff]  }
 0x595   :  { %11351 = vmatprep.subr.bf16.mxu1 %v22757_v3  ;;  %v22803_v63 = vld [vmem:[#allocation5 + $0x2f68] ss:$72 sps:$4 sm:$0xff]   ;;  %v22808_v3 = vld [vmem:[#allocation5 + $0x25dc] ss:$72 sps:$4 sm:$0xff]  }
 0x597   :  { %11309 = vmatpush2.bf16.msra.mxu0 %v22752_v61  ;;  %v22811_v61 = vld [vmem:[#allocation5 + $0x2edc] ss:$72 sps:$4 sm:$0xff]  }
 0x598   :  { %11352 = vmatpush2.bf16.msra.mxu1 %v22755_v7  ;;  %11310 = vmatprep.subr.bf16.mxu0 %v22760_v14  ;;  %v22806_v7 = vld [vmem:[#allocation5 + $0x25d8] ss:$72 sps:$4 sm:$0xff]  }
 0x599   :  { %11353 = vmatprep.subr.bf16.mxu1 %v22763_v38  ;;  %v22809_v14 = vld [vmem:[#allocation5 + $0x2ed8] ss:$72 sps:$4 sm:$0xff]   ;;  %v22814_v38 = vld [vmem:[#allocation5 + $0x254c] ss:$72 sps:$4 sm:$0xff]  }
 0x59b   :  { %11311 = vmatpush2.bf16.msra.mxu0 %v22758_v0  ;;  %v22817_v0 = vld [vmem:[#allocation5 + $0x2e4c] ss:$72 sps:$4 sm:$0xff]  }
 0x59c   :  { %11354 = vmatpush2.bf16.msra.mxu1 %v22761_v46  ;;  %11312 = vmatprep.subr.bf16.mxu0 %v22766_v12  ;;  %v22812_v46 = vld [vmem:[#allocation5 + $0x2548] ss:$72 sps:$4 sm:$0xff]  }
 0x59d   :  { %11355 = vmatprep.subr.bf16.mxu1 %v22769_v11  ;;  %v22815_v12 = vld [vmem:[#allocation5 + $0x2e48] ss:$72 sps:$4 sm:$0xff]   ;;  %v22820_v11 = vld [vmem:[#allocation5 + $0x24bc] ss:$72 sps:$4 sm:$0xff]  }
 0x59f   :  { %11313 = vmatpush2.bf16.msra.mxu0 %v22764_v15  ;;  %v22823_v15 = vld [vmem:[#allocation5 + $0x2dbc] ss:$72 sps:$4 sm:$0xff]  }
 0x5a0   :  { %11356 = vmatpush2.bf16.msra.mxu1 %v22767_v50  ;;  %11314 = vmatprep.subr.bf16.mxu0 %v22772_v51  ;;  %v24786_v50 = vpop.f32.mrf.mxu0  ;;  %v24788_v51 = vpop.f32.mrf.mxu1 }
 0x5a1   :  { %11357 = vmatprep.subr.bf16.mxu1 %v22775_v24  ;;  %v22818_v24 = vld [vmem:[#allocation5 + $0x24b8] ss:$72 sps:$4 sm:$0xff]  }
 0x5a3   :  { %11315 = vmatpush2.bf16.msra.mxu0 %v22770_v37  ;;  %v22821_v37 = vld [vmem:[#allocation5 + $0x2db8] ss:$72 sps:$4 sm:$0xff]  }
 0x5a4   :  { %11358 = vmatpush2.bf16.msra.mxu1 %v22773_v29  ;;  %11316 = vmatprep.subr.bf16.mxu0 %v22778_v16  ;;  %v24790_v29 = vpop.f32.mrf.mxu0  ;;  %v24792_v16 = vpop.f32.mrf.mxu1 }
 0x5a5   :  { %11359 = vmatprep.subr.bf16.mxu1 %v22781_v30  ;;  %v22826_v30 = vld [vmem:[#allocation5 + $0x242c] ss:$72 sps:$4 sm:$0xff]  }
 0x5a7   :  { %11317 = vmatpush2.bf16.msra.mxu0 %v22776_v10  ;;  %v22829_v10 = vld [vmem:[#allocation5 + $0x2d2c] ss:$72 sps:$4 sm:$0xff]  }
 0x5a8   :  { %11360 = vmatpush2.bf16.msra.mxu1 %v22779_v45  ;;  %11372 = vmatprep.subr.bf16.mxu0 %v22784_v59  ;;  %v22824_v45 = vld [vmem:[#allocation5 + $0x2428] ss:$72 sps:$4 sm:$0xff]  }
 0x5a9   :  { %11415 = vmatprep.subr.bf16.mxu1 %v22787_v40  ;;  %v22827_v59 = vld [vmem:[#allocation5 + $0x2d28] ss:$72 sps:$4 sm:$0xff]   ;;  %v24794_v40 = vpop.f32.mrf.mxu0 }
 0x5aa   :  { %11319 = vmatmul.mubr.bf16.vlgmr.msra.gmra.mxu0 %v24398_v20 }
 0x5ab   :  { %11362 = vmatmul.mubr.bf16.vlgmr.msra.gmra.mxu1 %v24402_v21  ;;  %11373 = vmatpush1.bf16.msra.mxu0 %v22782_v35  ;;  %v24796_v35 = vpop.f32.mrf.mxu1 }
 0x5ac   :  { %11416 = vmatpush1.bf16.msra.mxu1 %v22785_v22  ;;  %11374 = vmatprep.subr.bf16.mxu0 %v22790_v18  ;;  %v22832_v22 = vld [vmem:[#allocation5 + $0x2c9c] ss:$72 sps:$4 sm:$0xff]  }
 0x5ad   :  { %11417 = vmatprep.subr.bf16.mxu1 %v22793_v27  ;;  %11404 = vmatprep.mubr.bf16.mxu0 %v24416_v33  ;;  %v22835_v18 = vld [vmem:[#allocation5 + $0x359c] ss:$72 sps:$4 sm:$0xff]   ;;  %v22830_v27 = vld [vmem:[#allocation5 + $0x2c98] ss:$72 sps:$4 sm:$0xff]  }
 0x5ae   :  { %11447 = vmatprep.mubr.bf16.mxu1 %v24420_v34 }
 0x5af   :  { %11375 = vmatpush1.bf16.msra.mxu0 %v22788_v23  ;;  %v22833_v23 = vld [vmem:[#allocation5 + $0x3598] ss:$72 sps:$4 sm:$0xff]  }
 0x5b0   :  { %11418 = vmatpush1.bf16.msra.mxu1 %v22791_v6  ;;  %11376 = vmatprep.subr.bf16.mxu0 %v22796_v58  ;;  %v24798_v6 = vpop.f32.mrf.mxu0  ;;  %v24800_v58 = vpop.f32.mrf.mxu1 }
 0x5b1   :  { %11419 = vmatprep.subr.bf16.mxu1 %v22799_v62  ;;  %v22838_v62 = vld [vmem:[#allocation5 + $0x2c0c] ss:$72 sps:$4 sm:$0xff]  }
 0x5b3   :  { %11377 = vmatpush1.bf16.msra.mxu0 %v22794_v19  ;;  %v22841_v19 = vld [vmem:[#allocation5 + $0x350c] ss:$72 sps:$4 sm:$0xff]  }
 0x5b4   :  { %11420 = vmatpush1.bf16.msra.mxu1 %v22797_v55  ;;  %11378 = vmatprep.subr.bf16.mxu0 %v22802_v31  ;;  %v22836_v55 = vld [vmem:[#allocation5 + $0x2c08] ss:$72 sps:$4 sm:$0xff]  }
 0x5b5   :  { %11421 = vmatprep.subr.bf16.mxu1 %v22805_v57  ;;  %v22839_v31 = vld [vmem:[#allocation5 + $0x3508] ss:$72 sps:$4 sm:$0xff]   ;;  %v10896_v57 = vpop.f32.mrf.mxu0 }
 0x5b7   :  { %11379 = vmatpush1.bf16.msra.mxu0 %v22800_v47  ;;  %v10939_v47 = vpop.f32.mrf.mxu1 }
 0x5b8   :  { %11422 = vmatpush1.bf16.msra.mxu1 %v22803_v63  ;;  %11380 = vmatprep.subr.bf16.mxu0 %v22808_v3  ;;  %v22844_v63 = vld [vmem:[#allocation5 + $0x2b7c] ss:$72 sps:$4 sm:$0xff]  }
 0x5b9   :  { %11423 = vmatprep.subr.bf16.mxu1 %v22811_v61  ;;  %v22847_v3 = vld [vmem:[#allocation5 + $0x347c] ss:$72 sps:$4 sm:$0xff]   ;;  %v24802_v61 = vpop.f32.mrf.mxu0 }
 0x5bb   :  { %11381 = vmatpush1.bf16.msra.mxu0 %v22806_v7  ;;  %v24804_v7 = vpop.f32.mrf.mxu1 }
 0x5bc   :  { %11424 = vmatpush1.bf16.msra.mxu1 %v22809_v14  ;;  %11382 = vmatprep.subr.bf16.mxu0 %v22814_v38  ;;  %v22842_v14 = vld [vmem:[#allocation5 + $0x2b78] ss:$72 sps:$4 sm:$0xff]  }
 0x5bd   :  { %11425 = vmatprep.subr.bf16.mxu1 %v22817_v0  ;;  %v22845_v38 = vld [vmem:[#allocation5 + $0x3478] ss:$72 sps:$4 sm:$0xff]   ;;  %v22850_v0 = vld [vmem:[#allocation5 + $0x2aec] ss:$72 sps:$4 sm:$0xff]  }
 0x5bf   :  { %11383 = vmatpush1.bf16.msra.mxu0 %v22812_v46  ;;  %v22853_v46 = vld [vmem:[#allocation5 + $0x33ec] ss:$72 sps:$4 sm:$0xff]  }
 0x5c0   :  { %11426 = vmatpush1.bf16.msra.mxu1 %v22815_v12  ;;  %11384 = vmatprep.subr.bf16.mxu0 %v22820_v11  ;;  %v10978_v12 = vpop.f32.mrf.mxu0  ;;  %v11021_v11 = vpop.f32.mrf.mxu1 }
 0x5c1   :  { %11427 = vmatprep.subr.bf16.mxu1 %v22823_v15  ;;  %v22848_v15 = vld [vmem:[#allocation5 + $0x2ae8] ss:$72 sps:$4 sm:$0xff]  }
 0x5c3   :  { %11385 = vmatpush1.bf16.msra.mxu0 %v22818_v24  ;;  %v22851_v24 = vld [vmem:[#allocation5 + $0x33e8] ss:$72 sps:$4 sm:$0xff]  }
 0x5c4   :  { %11428 = vmatpush1.bf16.msra.mxu1 %v22821_v37  ;;  %11386 = vmatprep.subr.bf16.mxu0 %v22826_v30  ;;  %v22856_v37 = vld [vmem:[#allocation5 + $0x2a5c] ss:$72 sps:$4 sm:$0xff]  }
 0x5c5   :  { %11429 = vmatprep.subr.bf16.mxu1 %v22829_v10  ;;  %v22859_v30 = vld [vmem:[#allocation5 + $0x335c] ss:$72 sps:$4 sm:$0xff]   ;;  %v24806_v10 = vpop.f32.mrf.mxu0 }
 0x5c7   :  { %11387 = vmatpush1.bf16.msra.mxu0 %v22824_v45  ;;  %v24808_v45 = vpop.f32.mrf.mxu1 }
 0x5c8   :  { %11430 = vmatpush1.bf16.msra.mxu1 %v22827_v59  ;;  %11388 = vmatprep.subr.bf16.mxu0 %v22832_v22  ;;  %v22854_v59 = vld [vmem:[#allocation5 + $0x2a58] ss:$72 sps:$4 sm:$0xff]  }
 0x5c9   :  { %11431 = vmatprep.subr.bf16.mxu1 %v22835_v18  ;;  %v22857_v22 = vld [vmem:[#allocation5 + $0x3358] ss:$72 sps:$4 sm:$0xff]   ;;  %v22862_v18 = vld [vmem:[#allocation5 + $0x29cc] ss:$72 sps:$4 sm:$0xff]  }
 0x5cb   :  { %11389 = vmatpush2.bf16.msra.mxu0 %v22830_v27  ;;  %v22865_v27 = vld [vmem:[#allocation5 + $0x32cc] ss:$72 sps:$4 sm:$0xff]  }
 0x5cc   :  { %11432 = vmatpush2.bf16.msra.mxu1 %v22833_v23  ;;  %11390 = vmatprep.subr.bf16.mxu0 %v22838_v62  ;;  %v10982_v23 = vpop.f32.mrf.mxu0  ;;  %v11025_v62 = vpop.f32.mrf.mxu1 }
 0x5cd   :  { %11433 = vmatprep.subr.bf16.mxu1 %v22841_v19  ;;  %v22860_v19 = vld [vmem:[#allocation5 + $0x29c8] ss:$72 sps:$4 sm:$0xff]  }
 0x5cf   :  { %11391 = vmatpush2.bf16.msra.mxu0 %v22836_v55  ;;  %v22863_v55 = vld [vmem:[#allocation5 + $0x32c8] ss:$72 sps:$4 sm:$0xff]  }
 0x5d0   :  { %11434 = vmatpush2.bf16.msra.mxu1 %v22839_v31  ;;  %11392 = vmatprep.subr.bf16.mxu0 %v22844_v63  ;;  %v24810_v31 = vpop.f32.mrf.mxu0  ;;  %v24812_v63 = vpop.f32.mrf.mxu1 }
 0x5d1   :  { %11435 = vmatprep.subr.bf16.mxu1 %v22847_v3  ;;  %v22868_v3 = vld [vmem:[#allocation5 + $0x293c] ss:$72 sps:$4 sm:$0xff]  }
 0x5d3   :  { %11393 = vmatpush2.bf16.msra.mxu0 %v22842_v14  ;;  %v22871_v14 = vld [vmem:[#allocation5 + $0x323c] ss:$72 sps:$4 sm:$0xff]  }
 0x5d4   :  { %11436 = vmatpush2.bf16.msra.mxu1 %v22845_v38  ;;  %11394 = vmatprep.subr.bf16.mxu0 %v22850_v0  ;;  %v10936_v38 = vadd.f32 %v24796_v35, %v24794_v40  ;;  %v22866_v0 = vld [vmem:[#allocation5 + $0x2938] ss:$72 sps:$4 sm:$0xff]   ;;  %v22880_v40 = vld [vmem:[#allocation5 + $0x3a1c] ss:$72 sps:$4 sm:$0xff]  }
 0x5d5   :  { %11437 = vmatprep.subr.bf16.mxu1 %v22853_v46  ;;  %v22869_v46 = vld [vmem:[#allocation5 + $0x3238] ss:$72 sps:$4 sm:$0xff]   ;;  %v22883_v35 = vld [vmem:[#allocation5 + $0x431c] ss:$72 sps:$4 sm:$0xff]  }
 0x5d7   :  { %11395 = vmatpush2.bf16.msra.mxu0 %v22848_v15  ;;  %v11064_v15 = vpop.f32.mrf.mxu0 }
 0x5d8   :  { %11438 = vmatpush2.bf16.msra.mxu1 %v22851_v24  ;;  %11396 = vmatprep.subr.bf16.mxu0 %v22856_v37  ;;  %v11107_v24 = vpop.f32.mrf.mxu1  ;;  %v22874_v37 = vld [vmem:[#allocation5 + $0x28ac] ss:$72 sps:$4 sm:$0xff]  }
 0x5d9   :  { %11439 = vmatprep.subr.bf16.mxu1 %v22859_v30  ;;  %v22877_v30 = vld [vmem:[#allocation5 + $0x31ac] ss:$72 sps:$4 sm:$0xff]   ;;  %v24816_v43 = vpop.f32.mrf.mxu0 }
 0x5da   :  { %v24818_v2 = vpop.f32.mrf.mxu1 }
 0x5db   :  { %11397 = vmatpush2.bf16.msra.mxu0 %v22854_v59  ;;  %v10979_v59 = vadd.f32 %v10978_v12, %v10936_v38  ;;  %v22881_v12 = vld [vmem:[#allocation5 + $0x4318] ss:$72 sps:$4 sm:$0xff]   ;;  %v22886_v38 = vld [vmem:[#allocation5 + $0x398c] ss:$72 sps:$4 sm:$0xff]  }
 0x5dc   :  { %11440 = vmatpush2.bf16.msra.mxu1 %v22857_v22  ;;  %11398 = vmatprep.subr.bf16.mxu0 %v22862_v18  ;;  %v10940_v22 = vadd.f32 %v10939_v47, %v10896_v57  ;;  %v22872_v18 = vld [vmem:[#allocation5 + $0x28a8] ss:$72 sps:$4 sm:$0xff]   ;;  %v11068_v57 = vpop.f32.mrf.mxu0  ;;  %v11111_v47 = vpop.f32.mrf.mxu1 }
 0x5dd   :  { %11441 = vmatprep.subr.bf16.mxu1 %v22865_v27  ;;  %v22875_v27 = vld [vmem:[#allocation5 + $0x31a8] ss:$72 sps:$4 sm:$0xff]  }
 0x5df   :  { %11399 = vmatpush2.bf16.msra.mxu0 %v22860_v19  ;;  %v11022_v19 = vadd.f32 %v11021_v11, %v10979_v59 }
 0x5e0   :  { %11442 = vmatpush2.bf16.msra.mxu1 %v22863_v55  ;;  %11400 = vmatprep.subr.bf16.mxu0 %v22868_v3  ;;  %v10983_v55 = vadd.f32 %v10982_v23, %v10940_v22 }
 0x5e1   :  { %11443 = vmatprep.subr.bf16.mxu1 %v22871_v14  ;;  %v11065_v3 = vadd.f32 %v11064_v15, %v11022_v19  ;;  %v22878_v14 = vld [vmem:[#allocation5 + $0x3a18] ss:$72 sps:$4 sm:$0xff]   ;;  %v22884_v15 = vld [vmem:[#allocation5 + $0x3988] ss:$72 sps:$4 sm:$0xff]  }
 0x5e3   :  { %11401 = vmatpush2.bf16.msra.mxu0 %v22866_v0  ;;  %v22889_v0 = vld [vmem:[#allocation5 + $0x428c] ss:$72 sps:$4 sm:$0xff]   ;;  %v11108_v11 = vadd.f32 %v11107_v24, %v11065_v3  ;;  %v22893_v3 = vld [vmem:[#allocation5 + $0x41f8] ss:$72 sps:$4 sm:$0xff]  }
 0x5e4   :  { %11444 = vmatpush2.bf16.msra.mxu1 %v22869_v46  ;;  %11402 = vmatprep.subr.bf16.mxu0 %v22874_v37  ;;  %v11026_v46 = vadd.f32 %v11025_v62, %v10983_v55  ;;  %v22895_v62 = vld [vmem:[#allocation5 + $0x41fc] ss:$72 sps:$4 sm:$0xff]   ;;  %v22890_v55 = vld [vmem:[#allocation5 + $0x38f8] ss:$72 sps:$4 sm:$0xff]  }
 0x5e5   :  { %11445 = vmatprep.subr.bf16.mxu1 %v22877_v30  ;;  %v22887_v30 = vld [vmem:[#allocation5 + $0x4288] ss:$72 sps:$4 sm:$0xff]  }
 0x5e6   :  { %v11069_v23 = vadd.f32 %v11068_v57, %v11026_v46  ;;  %v22901_v57 = vld [vmem:[#allocation5 + $0x416c] ss:$72 sps:$4 sm:$0xff]  }
 0x5e7   :  { %11403 = vmatpush2.bf16.msra.mxu0 %v22872_v18  ;;  %v22892_v18 = vld [vmem:[#allocation5 + $0x38fc] ss:$72 sps:$4 sm:$0xff]  }
 0x5e8   :  { %11446 = vmatpush2.bf16.msra.mxu1 %v22875_v27  ;;  %11458 = vmatprep.subr.bf16.mxu0 %v22880_v40  ;;  %v11112_v24 = vadd.f32 %v11111_v47, %v11069_v23  ;;  %v22896_v47 = vld [vmem:[#allocation5 + $0x3868] ss:$72 sps:$4 sm:$0xff]  }
 0x5e9   :  { %11501 = vmatprep.subr.bf16.mxu1 %v22883_v35  ;;  %v22899_v23 = vld [vmem:[#allocation5 + $0x4168] ss:$72 sps:$4 sm:$0xff]  }
 0x5ea   :  { %v24820_v36 = vpop.f32.mrf.mxu0  ;;  %11405 = vmatmul.mubr.bf16.vlgmr.msra.gmra.mxu0 %v24430_v48 }
 0x5eb   :  { %v24822_v37 = vpop.f32.mrf.mxu1  ;;  %11448 = vmatmul.mubr.bf16.vlgmr.msra.gmra.mxu1 %v24434_v49  ;;  %11459 = vmatpush1.bf16.msra.mxu0 %v22878_v14 }
 0x5ec   :  { %11502 = vmatpush1.bf16.msra.mxu1 %v22881_v12  ;;  %v11150_v59 = vpop.f32.mrf.mxu0  ;;  %11460 = vmatprep.subr.bf16.mxu0 %v22886_v38  ;;  %v22898_v12 = vld [vmem:[#allocation5 + $0x386c] ss:$72 sps:$4 sm:$0xff]   ;;  %v11544_v38 = vmul.f32 %v24764_v26, %v24764_v26 }
 0x5ed   :  { %v11193_v22 = vpop.f32.mrf.mxu1  ;;  %11503 = vmatprep.subr.bf16.mxu1 %v22889_v0  ;;  %v11151_v27 = vadd.f32 %v11150_v59, %v11108_v11  ;;  %11490 = vmatprep.mubr.bf16.mxu0 %v24442_v56 }
 0x5ee   :  { %11533 = vmatprep.mubr.bf16.mxu1 %v24446_v28  ;;  %v24828_v40 = vpop.f32.mrf.mxu0 }
 0x5ef   :  { %v24830_v35 = vpop.f32.mrf.mxu1  ;;  %v11194_v19 = vadd.f32 %v11193_v22, %v11151_v27  ;;  %11461 = vmatpush1.bf16.msra.mxu0 %v22884_v15  ;;  %v22904_v15 = vld [vmem:[#allocation5 + $0x37dc] ss:$72 sps:$4 sm:$0xff]   ;;  %v11547_v22 = vmul.f32 %v24772_v44, %v24772_v44  ;;  %v22905_v27 = vld [vmem:[#allocation5 + $0x40d8] ss:$72 sps:$4 sm:$0xff]  }
 0x5f0   :  { %11504 = vmatpush1.bf16.msra.mxu1 %v22887_v30  ;;  %v11154_v14 = vpop.f32.mrf.mxu0  ;;  %11462 = vmatprep.subr.bf16.mxu0 %v22892_v18  ;;  %v22907_v30 = vld [vmem:[#allocation5 + $0x40dc] ss:$72 sps:$4 sm:$0xff]  }
 0x5f1   :  { %11505 = vmatprep.subr.bf16.mxu1 %v22895_v62  ;;  %v11550_v0 = vmul.f32 %v11194_v19, %v11194_v19  ;;  %v11155_v46 = vadd.f32 %v11154_v14, %v11112_v24  ;;  %v11197_v11 = vpop.f32.mrf.mxu1  ;;  %v22902_v62 = vld [vmem:[#allocation5 + $0x37d8] ss:$72 sps:$4 sm:$0xff]   ;;  %v22910_v24 = vld [vmem:[#allocation5 + $0x374c] ss:$72 sps:$4 sm:$0xff]   ;;  %v22916_v44 = vld [vmem:[#allocation5 + $0x36bc] ss:$72 sps:$4 sm:$0xff]  }
 0x5f2   :  { %v22913_v19 = vld [vmem:[#allocation5 + $0x404c] ss:$72 sps:$4 sm:$0xff]   ;;  %v22919_v14 = vld [vmem:[#allocation5 + $0x3fbc] ss:$72 sps:$4 sm:$0xff]  }
 0x5f3   :  { %v24834_v59 = vadd.f32 %v11550_v0, %v11544_v38  ;;  %v11198_v28 = vadd.f32 %v11197_v11, %v11155_v46  ;;  %11463 = vmatpush1.bf16.msra.mxu0 %v22890_v55  ;;  %v22908_v55 = vld [vmem:[#allocation5 + $0x3748] ss:$72 sps:$4 sm:$0xff]   ;;  %v22925_v38 = vld [vmem:[#allocation5 + $0x3f2c] ss:$72 sps:$4 sm:$0xff]  }
 0x5f4   :  { %11506 = vmatpush1.bf16.msra.mxu1 %v22893_v3  ;;  %11464 = vmatprep.subr.bf16.mxu0 %v22898_v12  ;;  %v22911_v3 = vld [vmem:[#allocation5 + $0x4048] ss:$72 sps:$4 sm:$0xff]   ;;  %v22917_v12 = vld [vmem:[#allocation5 + $0x3fb8] ss:$72 sps:$4 sm:$0xff]  }
 0x5f5   :  { %11507 = vmatprep.subr.bf16.mxu1 %v22901_v57  ;;  %24210 = vrsqrt.f32 %v24834_v59  ;;  %v11553_v26 = vmul.f32 %v11198_v28, %v11198_v28  ;;  %v22914_v28 = vld [vmem:[#allocation5 + $0x36b8] ss:$72 sps:$4 sm:$0xff]   ;;  %v22922_v57 = vld [vmem:[#allocation5 + $0x362c] ss:$72 sps:$4 sm:$0xff]   ;;  %v22920_v46 = vld [vmem:[#allocation5 + $0x3628] ss:$72 sps:$4 sm:$0xff]  }
 0x5f6   :  { %v22923_v11 = vld [vmem:[#allocation5 + $0x3f28] ss:$72 sps:$4 sm:$0xff]   ;;  %vm11564_vm12 = vcmp.eq.f32.partialorder %v24834_v59, inf  ;;  %vm11566_vm14 = vcmp.eq.f32.partialorder %v24834_v59, 0.0 }
 0x5f7   :  { %v11559_v18 = vadd.f32 %v11553_v26, %v11547_v22  ;;  %11465 = vmatpush1.bf16.msra.mxu0 %v22896_v47  ;;  %v22926_v22 = vld [vmem:[#allocation5 + $0x3e98] ss:$72 sps:$4 sm:$0xff]  }
 0x5f8   :  { %11508 = vmatpush1.bf16.msra.mxu1 %v22899_v23  ;;  %11466 = vmatprep.subr.bf16.mxu0 %v22904_v15  ;;  %v22928_v23 = vld [vmem:[#allocation5 + $0x3e9c] ss:$72 sps:$4 sm:$0xff]   ;;  %v22929_v26 = vld [vmem:[#allocation5 + $0x4798] ss:$72 sps:$4 sm:$0xff]  }
 0x5f9   :  { %11509 = vmatprep.subr.bf16.mxu1 %v22907_v30  ;;  %24212 = vrsqrt.f32 %v11559_v18  ;;  %v22931_v15 = vld [vmem:[#allocation5 + $0x479c] ss:$72 sps:$4 sm:$0xff]   ;;  %vm11585_vm13 = vcmp.eq.f32.partialorder %v11559_v18, inf  ;;  %vm11587_vm15 = vcmp.eq.f32.partialorder %v11559_v18, 0.0 }
 0x5fb   :  { %11467 = vmatpush1.bf16.msra.mxu0 %v22902_v62  ;;  %v22934_v62 = vld [vmem:[#allocation5 + $0x3e0c] ss:$72 sps:$4 sm:$0xff]  }
 0x5fc   :  { %11510 = vmatpush1.bf16.msra.mxu1 %v22905_v27  ;;  %11468 = vmatprep.subr.bf16.mxu0 %v22910_v24 }
 0x5fd   :  { %11511 = vmatprep.subr.bf16.mxu1 %v22913_v19  ;;  %v22937_v19 = vld [vmem:[#allocation5 + $0x470c] ss:$72 sps:$4 sm:$0xff]  }
 0x5ff   :  { %11469 = vmatpush1.bf16.msra.mxu0 %v22908_v55  ;;  %v11567_v55 = vand.u32 2147483648, %v24834_v59 }
 0x600   :  { %11512 = vmatpush1.bf16.msra.mxu1 %v22911_v3  ;;  %11470 = vmatprep.subr.bf16.mxu0 %v22916_v44  ;;  %v11588_v3 = vand.u32 2147483648, %v11559_v18 }
 0x601   :  { %11513 = vmatprep.subr.bf16.mxu1 %v22919_v14 }
 0x602   :  { %v24211_v0 = vpop.eup %24210 }
 0x603   :  { %11471 = vmatpush1.bf16.msra.mxu0 %v22914_v28  ;;  %v11563_v47 = vmul.f32 %v24211_v0, %v24834_v59  ;;  %v22940_v0 = vld [vmem:[#allocation5 + $0x3d7c] ss:$72 sps:$4 sm:$0xff]  }
 0x604   :  { %11514 = vmatpush1.bf16.msra.mxu1 %v22917_v12  ;;  %11472 = vmatprep.subr.bf16.mxu0 %v22922_v57  ;;  %v22932_v12 = vld [vmem:[#allocation5 + $0x3e08] ss:$72 sps:$4 sm:$0xff]  }
 0x605   :  { %11515 = vmatprep.subr.bf16.mxu1 %v22925_v38  ;;  %v11565_v27 = vsel %vm11564_vm12, %v24834_v59, %v11563_v47  ;;  %v22935_v57 = vld [vmem:[#allocation5 + $0x4708] ss:$72 sps:$4 sm:$0xff]   ;;  %v22938_v59 = vld [vmem:[#allocation5 + $0x3d78] ss:$72 sps:$4 sm:$0xff]   ;;  %v22949_v47 = vld [vmem:[#allocation5 + $0x45ec] ss:$72 sps:$4 sm:$0xff]  }
 0x606   :  { %v24213_v30 = vpop.eup %24212  ;;  %v24844_v14 = vsel %vm11566_vm14, %v11567_v55, %v11565_v27  ;;  %v22958_v27 = vld [vmem:[#allocation5 + $0x3bcc] ss:$72 sps:$4 sm:$0xff]   ;;  %v22959_v55 = vld [vmem:[#allocation5 + $0x44c8] ss:$72 sps:$4 sm:$0xff]  }
 0x607   :  { %11473 = vmatpush1.bf16.msra.mxu0 %v22920_v46  ;;  %v11584_v24 = vmul.f32 %v24213_v30, %v11559_v18  ;;  %v22943_v46 = vld [vmem:[#allocation5 + $0x467c] ss:$72 sps:$4 sm:$0xff]  }
 0x608   :  { %11516 = vmatpush1.bf16.msra.mxu1 %v22923_v11  ;;  %11474 = vmatprep.subr.bf16.mxu0 %v22928_v23  ;;  %v22941_v11 = vld [vmem:[#allocation5 + $0x4678] ss:$72 sps:$4 sm:$0xff]   ;;  %v22944_v23 = vld [vmem:[#allocation5 + $0x3ce8] ss:$72 sps:$4 sm:$0xff]   ;;  %v22952_v30 = vld [vmem:[#allocation5 + $0x3c5c] ss:$72 sps:$4 sm:$0xff]  }
 0x609   :  { %11517 = vmatprep.subr.bf16.mxu1 %v22931_v15  ;;  %v11586_v44 = vsel %vm11585_vm13, %v11559_v18, %v11584_v24  ;;  %v22946_v18 = vld [vmem:[#allocation5 + $0x3cec] ss:$72 sps:$4 sm:$0xff]   ;;  %v22947_v15 = vld [vmem:[#allocation5 + $0x45e8] ss:$72 sps:$4 sm:$0xff]  }
 0x60a   :  { %v24846_v28 = vsel %vm11587_vm15, %v11588_v3, %v11586_v44  ;;  %v22961_v24 = vld [vmem:[#allocation5 + $0x44cc] ss:$72 sps:$4 sm:$0xff]   ;;  %v22964_v3 = vld [vmem:[#allocation5 + $0x3b3c] ss:$72 sps:$4 sm:$0xff]  }
 0x60b   :  { %11475 = vmatpush2.bf16.msra.mxu0 %v22926_v22  ;;  %v22955_v22 = vld [vmem:[#allocation5 + $0x455c] ss:$72 sps:$4 sm:$0xff]  }
 0x60c   :  { %11518 = vmatpush2.bf16.msra.mxu1 %v22929_v26  ;;  %11476 = vmatprep.subr.bf16.mxu0 %v22934_v62  ;;  %v22950_v26 = vld [vmem:[#allocation5 + $0x3c58] ss:$72 sps:$4 sm:$0xff]   ;;  %v22967_v44 = vld [vmem:[#allocation5 + $0x443c] ss:$72 sps:$4 sm:$0xff]  }
 0x60d   :  { %11519 = vmatprep.subr.bf16.mxu1 %v22937_v19  ;;  %v22953_v62 = vld [vmem:[#allocation5 + $0x4558] ss:$72 sps:$4 sm:$0xff]   ;;  %v22956_v19 = vld [vmem:[#allocation5 + $0x3bc8] ss:$72 sps:$4 sm:$0xff]  }
 0x60f   :  { %11477 = vmatpush2.bf16.msra.mxu0 %v22932_v12  ;;  %v22962_v12 = vld [vmem:[#allocation5 + $0x3b38] ss:$72 sps:$4 sm:$0xff]  }
 0x610   :  { %11520 = vmatpush2.bf16.msra.mxu1 %v22935_v57  ;;  %11478 = vmatprep.subr.bf16.mxu0 %v22940_v0  ;;  %v22965_v57 = vld [vmem:[#allocation5 + $0x4438] ss:$72 sps:$4 sm:$0xff]   ;;  %v22970_v0 = vld [vmem:[#allocation5 + $0x3aac] ss:$72 sps:$4 sm:$0xff]  }
 0x611   :  { %11521 = vmatprep.subr.bf16.mxu1 %v22943_v46  ;;  %v22973_v46 = vld [vmem:[#allocation5 + $0x43ac] ss:$72 sps:$4 sm:$0xff]  }
 0x613   :  { %11479 = vmatpush2.bf16.msra.mxu0 %v22938_v59  ;;  %v22968_v59 = vld [vmem:[#allocation5 + $0x3aa8] ss:$72 sps:$4 sm:$0xff]  }
 0x614   :  { %11522 = vmatpush2.bf16.msra.mxu1 %v22941_v11  ;;  %11480 = vmatprep.subr.bf16.mxu0 %v22946_v18  ;;  %v22971_v11 = vld [vmem:[#allocation5 + $0x43a8] ss:$72 sps:$4 sm:$0xff]   ;;  %v22974_v18 = vld [vmem:[#allocation7 + $0x138] sm:$0xff]  }
 0x615   :  { %11523 = vmatprep.subr.bf16.mxu1 %v22949_v47  ;;  %v22975_v47 = vld [vmem:[#allocation7 + $0xf8] sm:$0xff]  }
 0x617   :  { %11481 = vmatpush2.bf16.msra.mxu0 %v22944_v23  ;;  %v22976_v23 = vld [vmem:[#allocation7 + $0x178] sm:$0xff]  }
 0x618   :  { %11524 = vmatpush2.bf16.msra.mxu1 %v22947_v15  ;;  %11482 = vmatprep.subr.bf16.mxu0 %v22952_v30  ;;  %v25109_v15 = vmov 0.0   ;;  %v22977_v30 = vld [vmem:[#allocation7 + $0x130] sm:$0xff]  }
 0x619   :  { %11525 = vmatprep.subr.bf16.mxu1 %v22955_v22  ;;  %v22978_v22 = vld [vmem:[#allocation7 + $0xf0] sm:$0xff]  }
 0x61b   :  { %11483 = vmatpush2.bf16.msra.mxu0 %v22950_v26  ;;  %v22979_v26 = vld [vmem:[#allocation7 + $0x170] sm:$0xff]  }
 0x61c   :  { %11526 = vmatpush2.bf16.msra.mxu1 %v22953_v62  ;;  %11484 = vmatprep.subr.bf16.mxu0 %v22958_v27  ;;  %v22980_v62 = vld [vmem:[#allocation7 + $0x128] sm:$0xff]  }
 0x61d   :  { %11527 = vmatprep.subr.bf16.mxu1 %v22961_v24  ;;  %v22981_v27 = vld [vmem:[#allocation7 + $0xe8] sm:$0xff]  }
 0x61e   :  { %v22982_v24 = vld [vmem:[#allocation7 + $0x168] sm:$0xff]  }
 0x61f   :  { %11485 = vmatpush2.bf16.msra.mxu0 %v22956_v19  ;;  %v22983_v19 = vld [vmem:[#allocation7 + $0x120] sm:$0xff]  }
 0x620   :  { %11528 = vmatpush2.bf16.msra.mxu1 %v22959_v55  ;;  %11486 = vmatprep.subr.bf16.mxu0 %v22964_v3  ;;  %v22984_v55 = vld [vmem:[#allocation7 + $0xe0] sm:$0xff]  }
 0x621   :  { %11529 = vmatprep.subr.bf16.mxu1 %v22967_v44  ;;  %v22985_v3 = vld [vmem:[#allocation7 + $0x160] sm:$0xff]   ;;  %v22986_v44 = vld [vmem:[#allocation7 + $0x118] sm:$0xff]  }
 0x623   :  { %11487 = vmatpush2.bf16.msra.mxu0 %v22962_v12  ;;  %v22987_v12 = vld [vmem:[#allocation7 + $0xd8] sm:$0xff]  }
 0x624   :  { %11530 = vmatpush2.bf16.msra.mxu1 %v22965_v57  ;;  %11488 = vmatprep.subr.bf16.mxu0 %v22970_v0  ;;  %v22988_v57 = vld [vmem:[#allocation7 + $0x158] sm:$0xff]   ;;  %v22989_v0 = vld [vmem:[#allocation7 + $0x110] sm:$0xff]  }
 0x625   :  { %11531 = vmatprep.subr.bf16.mxu1 %v22973_v46  ;;  %v22990_v46 = vld [vmem:[#allocation7 + $0xd0] sm:$0xff]  }
 0x627   :  { %11489 = vmatpush2.bf16.msra.mxu0 %v22968_v59  ;;  %v22991_v59 = vld [vmem:[#allocation7 + $0x150] sm:$0xff]  }
 0x628   :  { %11532 = vmatpush2.bf16.msra.mxu1 %v22971_v11  ;;  %20504 = vmatprep.subr.bf16.mxu0 %v22974_v18  ;;  %v22992_v11 = vld [vmem:[#allocation7 + $0x108] sm:$0xff]  }
 0x629   :  { %20597 = vmatprep.subr.bf16.mxu1 %v25109_v15  ;;  %v22993_v18 = vld [vmem:[#allocation7 + $0xc8] sm:$0xff]  }
 0x62a   :  { %11491 = vmatmul.mubr.bf16.vlgmr.msra.gmra.mxu0 %v24454_v4 }
 0x62b   :  { %11534 = vmatmul.mubr.bf16.vlgmr.msra.gmra.mxu1 %v24458_v5  ;;  %20505 = vmatpush3.bf16.msra.mxu0 %v22975_v47  ;;  %v22994_v47 = vld [vmem:[#allocation7 + $0x148] sm:$0xff]   ;;  %v10938_v5 = vadd.f32 %v24800_v58, %v24798_v6 }
 0x62c   :  { %20598 = vmatpush3.bf16.msra.mxu1 %v22976_v23  ;;  %20506 = vmatprep.subr.bf16.mxu0 %v22977_v30  ;;  %v22995_v23 = vld [vmem:[#allocation7 + $0x100] sm:$0xff]  }
 0x62d   :  { %20599 = vmatprep.subr.bf16.mxu1 %v25109_v15  ;;  %v22996_v30 = vld [vmem:[#allocation7 + $0xc0] sm:$0xff]   ;;  %20613 = vmatprep.mubr.msk.bf16.mxu1 %vm24333_vm0, %v25109_v15  ;;  %v10981_v48 = vadd.f32 %v24806_v10, %v10938_v5 }
 0x62f   :  { %20507 = vmatpush3.bf16.msra.mxu0 %v22978_v22  ;;  %v22997_v22 = vld [vmem:[#allocation7 + $0x140] sm:$0xff]  }
 0x630   :  { %20600 = vmatpush3.bf16.msra.mxu1 %v22979_v26  ;;  %20508 = vmatprep.subr.bf16.mxu0 %v22980_v62  ;;  %v22998_v26 = vld [vmem:[#allocation7 + $0x78] sm:$0xff]   ;;  %v11234_v62 = vpop.f32.mrf.mxu0 }
 0x631   :  { %20601 = vmatprep.subr.bf16.mxu1 %v25109_v15 }
 0x633   :  { %20509 = vmatpush3.bf16.msra.mxu0 %v22981_v27  ;;  %v11277_v27 = vpop.f32.mrf.mxu1 }
 0x634   :  { %20602 = vmatpush3.bf16.msra.mxu1 %v22982_v24  ;;  %20510 = vmatprep.subr.bf16.mxu0 %v22983_v19  ;;  %v11236_v24 = vpop.f32.mrf.mxu0  ;;  %v11278_v38 = vadd.f32 %v11277_v27, %v11234_v62  ;;  %v11024_v62 = vadd.f32 %v24808_v45, %v10981_v48  ;;  %v10811_v48 = vadd.f32 %v24786_v50, %v24759_v32 }
 0x635   :  { %20603 = vmatprep.subr.bf16.mxu1 %v25109_v15  ;;  %v11279_v19 = vpop.f32.mrf.mxu1 }
 0x636   :  { %v11280_v4 = vadd.f32 %v11279_v19, %v11236_v24  ;;  %v11067_v5 = vadd.f32 %v24816_v43, %v11024_v62  ;;  %v10854_v32 = vadd.f32 %v24788_v51, %v10811_v48 }
 0x637   :  { %20511 = vmatpush3.bf16.msra.mxu0 %v22984_v55  ;;  %v11238_v55 = vpop.f32.mrf.mxu0 }
 0x638   :  { %20604 = vmatpush3.bf16.msra.mxu1 %v22985_v3  ;;  %20512 = vmatprep.subr.bf16.mxu0 %v22986_v44  ;;  %v11281_v3 = vpop.f32.mrf.mxu1  ;;  %v11110_v45 = vadd.f32 %v24818_v2, %v11067_v5 }
 0x639   :  { %20605 = vmatprep.subr.bf16.mxu1 %v25109_v15  ;;  %v11240_v44 = vpop.f32.mrf.mxu0  ;;  %v11282_v21 = vadd.f32 %v11281_v3, %v11238_v55 }
 0x63b   :  { %20513 = vmatpush3.bf16.msra.mxu0 %v22987_v12  ;;  %v11283_v12 = vpop.f32.mrf.mxu1 }
 0x63c   :  { %20606 = vmatpush3.bf16.msra.mxu1 %v22988_v57  ;;  %20514 = vmatprep.subr.bf16.mxu0 %v22989_v0  ;;  %v11284_v20 = vadd.f32 %v11283_v12, %v11240_v44 }
 0x63d   :  { %20607 = vmatprep.subr.bf16.mxu1 %v25109_v15 }
 0x63f   :  { %20515 = vmatpush3.bf16.msra.mxu0 %v22990_v46 }
 0x640   :  { %20608 = vmatpush3.bf16.msra.mxu1 %v22991_v59  ;;  %20516 = vmatprep.subr.bf16.mxu0 %v22992_v11 }
 0x641   :  { %20609 = vmatprep.subr.bf16.mxu1 %v25109_v15 }
 0x643   :  { %20517 = vmatpush3.bf16.msra.mxu0 %v22993_v18 }
 0x644   :  { %20610 = vmatpush3.bf16.msra.mxu1 %v22994_v47  ;;  %20518 = vmatprep.subr.bf16.mxu0 %v22995_v23  ;;  %v10934_v47 = vadd.f32 %v24792_v16, %v24790_v29 }
 0x645   :  { %20611 = vmatprep.subr.bf16.mxu1 %v25109_v15 }
 0x647   :  { %20519 = vmatpush3.bf16.msra.mxu0 %v22996_v30 }
 0x648   :  { %20612 = vmatpush3.bf16.msra.mxu1 %v22997_v22  ;;  %20535 = vmatprep.subr.bf16.mxu0 %v22998_v26  ;;  %v10977_v22 = vadd.f32 %v24802_v61, %v10934_v47 }
 0x649   :  { %20617 = vmatprep.subr.bf16.mxu1 %v25109_v15 }
 0x64a   :  { %v11020_v49 = vadd.f32 %v24804_v7, %v10977_v22 }
 0x64c   :  { %v11063_v16 = vadd.f32 %v24810_v31, %v11020_v49 }
 0x64e   :  { %v11106_v7 = vadd.f32 %v24812_v63, %v11063_v16 }
 0x66a   :  { %v11320_v57 = vpop.f32.mrf.mxu0 }
 0x66b   :  { %v11363_v0 = vpop.f32.mrf.mxu1  ;;  %v11321_v56 = vadd.f32 %v11320_v57, %v11278_v38 }
 0x66c   :  { %v11322_v46 = vpop.f32.mrf.mxu0 }
 0x66d   :  { %v11365_v59 = vpop.f32.mrf.mxu1  ;;  %v11323_v29 = vadd.f32 %v11322_v46, %v11280_v4  ;;  %v11364_v61 = vadd.f32 %v11363_v0, %v11321_v56  ;;  %v11149_v4 = vadd.f32 %v24820_v36, %v11106_v7  ;;  %v11545_v46 = vmul.f32 %v24769_v60, %v24769_v60 }
 0x66e   :  { %v11324_v11 = vpop.f32.mrf.mxu0 }
 0x66f   :  { %v11367_v18 = vpop.f32.mrf.mxu1  ;;  %v11325_v47 = vadd.f32 %v11324_v11, %v11282_v21  ;;  %v11366_v6 = vadd.f32 %v11365_v59, %v11323_v29  ;;  %v11192_v43 = vadd.f32 %v24822_v37, %v11149_v4  ;;  %v11548_v29 = vmul.f32 %v10854_v32, %v10854_v32  ;;  %v23003_v32 = vld [vmem:[#allocation7 + $0xb0] sm:$0xff]  }
 0x670   :  { %v11326_v23 = vpop.f32.mrf.mxu0 }
 0x671   :  { %v11369_v30 = vpop.f32.mrf.mxu1  ;;  %v11327_v58 = vadd.f32 %v11326_v23, %v11284_v20  ;;  %v11368_v10 = vadd.f32 %v11367_v18, %v11325_v47  ;;  %v11546_v23 = vmul.f32 %v11192_v43, %v11192_v43 }
 0x673   :  { %v11370_v31 = vadd.f32 %v11369_v30, %v11327_v58 }
 0x6aa   :  { %v11406_v26 = vpop.f32.mrf.mxu0 }
 0x6ab   :  { %v11449_v15 = vpop.f32.mrf.mxu1  ;;  %v11407_v38 = vadd.f32 %v11406_v26, %v11364_v61 }
 0x6ac   :  { %v11408_v34 = vpop.f32.mrf.mxu0 }
 0x6ad   :  { %v11451_v33 = vpop.f32.mrf.mxu1  ;;  %v11409_v24 = vadd.f32 %v11408_v34, %v11366_v6  ;;  %v11450_v56 = vadd.f32 %v11449_v15, %v11407_v38  ;;  %v11153_v34 = vadd.f32 %v24828_v40, %v11110_v45 }
 0x6ae   :  { %v11410_v27 = vpop.f32.mrf.mxu0 }
 0x6af   :  { %v11453_v42 = vpop.f32.mrf.mxu1  ;;  %v11411_v21 = vadd.f32 %v11410_v27, %v11368_v10  ;;  %v11452_v3 = vadd.f32 %v11451_v33, %v11409_v24  ;;  %v11196_v37 = vadd.f32 %v24830_v35, %v11153_v34 }
 0x6b0   :  { %v11412_v19 = vpop.f32.mrf.mxu0 }
 0x6b1   :  { %v11455_v49 = vpop.f32.mrf.mxu1  ;;  %v11413_v63 = vadd.f32 %v11412_v19, %v11370_v31  ;;  %v11454_v57 = vadd.f32 %v11453_v42, %v11411_v21  ;;  %v11549_v47 = vmul.f32 %v11196_v37, %v11196_v37  ;;  %v23014_v37 = vld [vmem:[#allocation7 + $0x10] sm:$0xff]  }
 0x6b3   :  { %v11456_v59 = vadd.f32 %v11455_v49, %v11413_v63  ;;  %v22999_v63 = vld [vmem:[#allocation7 + $0x38] sm:$0xff]  }
 0x6ea   :  { %v11492_v20 = vpop.f32.mrf.mxu0 }
 0x6eb   :  { %v11535_v55 = vpop.f32.mrf.mxu1  ;;  %v11493_v44 = vadd.f32 %v11492_v20, %v11450_v56 }
 0x6ec   :  { %v11494_v36 = vpop.f32.mrf.mxu0 }
 0x6ed   :  { %v11537_v12 = vpop.f32.mrf.mxu1  ;;  %v11536_v0 = vadd.f32 %v11535_v55, %v11493_v44  ;;  %v11495_v15 = vadd.f32 %v11494_v36, %v11452_v3  ;;  %v23000_v36 = vld [vmem:[#allocation7 + $0xb8] sm:$0xff]  }
 0x6ee   :  { %v11496_v2 = vpop.f32.mrf.mxu0 }
 0x6ef   :  { %v11539_v50 = vpop.f32.mrf.mxu1  ;;  %v11551_v33 = vmul.f32 %v11536_v0, %v11536_v0  ;;  %v11538_v11 = vadd.f32 %v11537_v12, %v11495_v15  ;;  %v11497_v18 = vadd.f32 %v11496_v2, %v11454_v57  ;;  %v23001_v57 = vld [vmem:[#allocation7 + $0x70] sm:$0xff]   ;;  %v25142_v0 = vpack.c.bf16 %v24846_v28, %v24844_v14  ;;  %v23004_v2 = vld [vmem:[#allocation7 + $0x68] sm:$0xff]   ;;  %v23007_v28 = vld [vmem:[#allocation7 + $0x60] sm:$0xff]  }
 0x6f0   :  { %v11498_v40 = vpop.f32.mrf.mxu0  ;;  %v23002_v15 = vld [vmem:[#allocation7 + $0x30] sm:$0xff]   ;;  %v23006_v14 = vld [vmem:[#allocation7 + $0xa8] sm:$0xff]  }
 0x6f1   :  { %v11557_v30 = vadd.f32 %v11551_v33, %v11545_v46  ;;  %v11552_v22 = vmul.f32 %v11538_v11, %v11538_v11  ;;  %v11540_v42 = vadd.f32 %v11539_v50, %v11497_v18  ;;  %v11499_v26 = vadd.f32 %v11498_v40, %v11456_v59  ;;  %v11541_v16 = vpop.f32.mrf.mxu1  ;;  %v23005_v59 = vld [vmem:[#allocation7 + $0x28] sm:$0xff]   ;;  %v23010_v33 = vld [vmem:[#allocation7 + $0x58] sm:$0xff]   ;;  %v23015_v40 = vld [vmem:[#allocation7 + $0x90] sm:$0xff]  }
 0x6f2   :  { %v25143_v46 = vpack.c.bf16 %v24702_v39, %v24700_v25  ;;  %v25144_v50 = vmov 0.0   ;;  %v23008_v25 = vld [vmem:[#allocation7 + $0x20] sm:$0xff]   ;;  %v23011_v11 = vld [vmem:[#allocation7 + $0x18] sm:$0xff]  }
 0x6f3   :  { %24214 = vrsqrt.f32 %v11557_v30  ;;  %v11558_v60 = vadd.f32 %v11552_v22, %v11546_v23  ;;  %v11554_v61 = vmul.f32 %v11540_v42, %v11540_v42  ;;  %v11542_v51 = vadd.f32 %v11541_v16, %v11499_v26  ;;  %v23009_v39 = vld [vmem:[#allocation7 + $0xa0] sm:$0xff]   ;;  %v23012_v18 = vld [vmem:[#allocation7 + $0x98] sm:$0xff]   ;;  %v23013_v23 = vld [vmem:[#allocation7 + $0x50] sm:$0xff]  }
 0x6f4   :  { %vm11571_vm1 = vcmp.eq.f32.partialorder %v11557_v30, inf  ;;  %vm11573_vm2 = vcmp.eq.f32.partialorder %v11557_v30, 0.0  ;;  %v11574_v24 = vand.u32 2147483648, %v11557_v30  ;;  %v23017_v22 = vld [vmem:[#allocation7 + $0x8] sm:$0xff]   ;;  %v23019_v26 = vld [vmem:[#allocation7 + $0x40] sm:$0xff]  }
 0x6f5   :  { %24216 = vrsqrt.f32 %v11558_v60  ;;  %v11560_v62 = vadd.f32 %v11554_v61, %v11548_v29  ;;  %v11555_v27 = vmul.f32 %v11542_v51, %v11542_v51  ;;  %vm11578_vm4 = vcmp.eq.f32.partialorder %v11558_v60, inf  ;;  %v23018_v42 = vld [vmem:[#allocation7 + $0x88] sm:$0xff]   ;;  %v23020_v29 = vld [vmem:[#allocation7] sm:$0xff]  }
 0x6f6   :  { %v11581_v31 = vand.u32 2147483648, %v11558_v60  ;;  %vm11580_vm7 = vcmp.eq.f32.partialorder %v11558_v60, 0.0  ;;  %v23021_v16 = vld [vmem:[#allocation7 + $0x80] sm:$0xff]  }
 0x6f7   :  { %24218 = vrsqrt.f32 %v11560_v62  ;;  %v11561_v6 = vadd.f32 %v11555_v27, %v11549_v47  ;;  %vm11592_vm3 = vcmp.eq.f32.partialorder %v11560_v62, inf  ;;  %v11595_v49 = vand.u32 2147483648, %v11560_v62  ;;  %v23027_v61 = vld [vmem:[#allocation5 + $0xd24] ss:$72 sps:$4 sm:$0xff]   ;;  %v23022_v51 = vld [vmem:[#allocation5 + $0x420] ss:$72 sps:$4 sm:$0xff]  }
 0x6f8   :  { %vm11594_vm5 = vcmp.eq.f32.partialorder %v11560_v62, 0.0  ;;  %v23025_v47 = vld [vmem:[#allocation5 + $0xd20] ss:$72 sps:$4 sm:$0xff]   ;;  %v23033_v27 = vld [vmem:[#allocation5 + $0xc94] ss:$72 sps:$4 sm:$0xff]  }
 0x6f9   :  { %24220 = vrsqrt.f32 %v11561_v6  ;;  %vm11599_vm6 = vcmp.eq.f32.partialorder %v11561_v6, inf  ;;  %v11602_v55 = vand.u32 2147483648, %v11561_v6  ;;  %vm11601_vm8 = vcmp.eq.f32.partialorder %v11561_v6, 0.0 }
 0x700   :  { %v24215_v58 = vpop.eup %24214 }
 0x701   :  { %v11570_v35 = vmul.f32 %v24215_v58, %v11557_v30  ;;  %v25146_v58 = vpack.c.bf16 %v24713_v52, %v24711_v13  ;;  %v23045_v13 = vld [vmem:[#allocation5 + $0xb74] ss:$72 sps:$4 sm:$0xff]   ;;  %v23040_v52 = vld [vmem:[#allocation5 + $0x270] ss:$72 sps:$4 sm:$0xff]  }
 0x702   :  { %v24217_v38 = vpop.eup %24216 }
 0x703   :  { %v11577_v7 = vmul.f32 %v24217_v38, %v11558_v60  ;;  %v11572_v10 = vsel %vm11571_vm1, %v11557_v30, %v11570_v35  ;;  %v23016_v30 = vld [vmem:[#allocation7 + $0x48] sm:$0xff]   ;;  %v23028_v35 = vld [vmem:[#allocation5 + $0x390] ss:$72 sps:$4 sm:$0xff]  }
 0x704   :  { %v24219_v5 = vpop.eup %24218  ;;  %v11575_v45 = vsel %vm11573_vm2, %v11574_v24, %v11572_v10  ;;  %v23031_v38 = vld [vmem:[#allocation5 + $0xc90] ss:$72 sps:$4 sm:$0xff]   ;;  %v23034_v10 = vld [vmem:[#allocation5 + $0x300] ss:$72 sps:$4 sm:$0xff]  }
 0x705   :  { %v11591_v4 = vmul.f32 %v24219_v5, %v11560_v62  ;;  %v11579_v21 = vsel %vm11578_vm4, %v11558_v60, %v11577_v7  ;;  %v23024_v60 = vld [vmem:[#allocation5 + $0x424] ss:$72 sps:$4 sm:$0xff]   ;;  %v23043_v24 = vld [vmem:[#allocation5 + $0xb70] ss:$72 sps:$4 sm:$0xff]  }
 0x706   :  { %v24221_v19 = vpop.eup %24220  ;;  %v11582_v43 = vsel %vm11580_vm7, %v11581_v31, %v11579_v21  ;;  %v23036_v7 = vld [vmem:[#allocation5 + $0x304] ss:$72 sps:$4 sm:$0xff]   ;;  %v23049_v31 = vld [vmem:[#allocation5 + $0xae0] ss:$72 sps:$4 sm:$0xff]   ;;  %v23057_v21 = vld [vmem:[#allocation5 + $0xa54] ss:$72 sps:$4 sm:$0xff]  }
 0x707   :  { %v11593_v56 = vsel %vm11592_vm3, %v11560_v62, %v11591_v4  ;;  %v11598_v48 = vmul.f32 %v24221_v19, %v11561_v6  ;;  %v23030_v62 = vld [vmem:[#allocation5 + $0x394] ss:$72 sps:$4 sm:$0xff]   ;;  %v23039_v5 = vld [vmem:[#allocation5 + $0xc04] ss:$72 sps:$4 sm:$0xff]  }
 0x708   :  { %v11596_v20 = vsel %vm11594_vm5, %v11595_v49, %v11593_v56  ;;  %v23048_v4 = vld [vmem:[#allocation5 + $0x1e4] ss:$72 sps:$4 sm:$0xff]   ;;  %v23046_v49 = vld [vmem:[#allocation5 + $0x1e0] ss:$72 sps:$4 sm:$0xff]   ;;  %v23054_v56 = vld [vmem:[#allocation5 + $0x154] ss:$72 sps:$4 sm:$0xff]  }
 0x709   :  { %v11605_v3 = vpack.c.bf16 %v11596_v20, %v11575_v45  ;;  %v11600_v44 = vsel %vm11599_vm6, %v11561_v6, %v11598_v48  ;;  %v25145_v6 = vpack.c.bf16 %v24598_v17, %v24596_v1  ;;  %v23037_v1 = vld [vmem:[#allocation5 + $0xc00] ss:$72 sps:$4 sm:$0xff]   ;;  %v23042_v17 = vld [vmem:[#allocation5 + $0x274] ss:$72 sps:$4 sm:$0xff]   ;;  %v23051_v19 = vld [vmem:[#allocation5 + $0xae4] ss:$72 sps:$4 sm:$0xff]  }
 0x70a   :  { %v11603_v34 = vsel %vm11601_vm8, %v11602_v55, %v11600_v44  ;;  %v23052_v48 = vld [vmem:[#allocation5 + $0x150] ss:$72 sps:$4 sm:$0xff]   ;;  %v23060_v20 = vld [vmem:[#allocation5 + $0xc4] ss:$72 sps:$4 sm:$0xff]   ;;  %v23066_v44 = vld [vmem:[#allocation5 + $0x34] ss:$72 sps:$4 sm:$0xff]  }
 0x70b   :  { %11831 = vmatprep.mubr.bf16.mxu0 %v11605_v3  ;;  %v11606_v12 = vpack.c.bf16 %v11603_v34, %v11582_v43  ;;  %v23055_v45 = vld [vmem:[#allocation5 + $0xa50] ss:$72 sps:$4 sm:$0xff]   ;;  %v23063_v55 = vld [vmem:[#allocation5 + $0x9c4] ss:$72 sps:$4 sm:$0xff]   ;;  %v23058_v3 = vld [vmem:[#allocation5 + $0xc0] ss:$72 sps:$4 sm:$0xff]  }
 0x70c   :  { %11832 = vmatmul.mubr.bf16.vlgmr.msra.gmra.mxu0 %v25142_v0  ;;  %v23069_v43 = vld [vmem:[#allocation5 + $0x934] ss:$72 sps:$4 sm:$0xff]   ;;  %v23064_v34 = vld [vmem:[#allocation5 + $0x30] ss:$72 sps:$4 sm:$0xff]   ;;  %v23070_v0 = vld [vmem:[#allocation5 + $0x8a0] ss:$72 sps:$4 sm:$0xff]  }
 0x70d   :  { %20536 = vmatpush3.bf16.msra.mxu0 %v22999_v63  ;;  %20614 = vmatmul.mubr.bf16.vlgmr.msra.gmra.mxu1 %v11606_v12  ;;  %v23061_v63 = vld [vmem:[#allocation5 + $0x9c0] ss:$72 sps:$4 sm:$0xff]   ;;  %v23072_v12 = vld [vmem:[#allocation5 + $0x8a4] ss:$72 sps:$4 sm:$0xff]  }
 0x70e   :  { %12057 = vmatprep.mubr.bf16.mxu0 %v25143_v46  ;;  %20618 = vmatpush3.bf16.msra.mxu1 %v23000_v36  ;;  %v23067_v36 = vld [vmem:[#allocation5 + $0x930] ss:$72 sps:$4 sm:$0xff]   ;;  %v23078_v46 = vld [vmem:[#allocation5 + $0x814] ss:$72 sps:$4 sm:$0xff]  }
 0x70f   :  { %20537 = vmatprep.subr.bf16.mxu0 %v23001_v57  ;;  %20619 = vmatprep.subr.bf16.mxu1 %v25144_v50  ;;  %v23075_v57 = vld [vmem:[#allocation5 + $0x11a4] ss:$72 sps:$4 sm:$0xff]  }
 0x710   :  { %20633 = vmatprep.mubr.msk.bf16.mxu1 %vm24333_vm0, %v25144_v50 }
 0x711   :  { %20538 = vmatpush3.bf16.msra.mxu0 %v23002_v15  ;;  %v23073_v15 = vld [vmem:[#allocation5 + $0x11a0] ss:$72 sps:$4 sm:$0xff]  }
 0x712   :  { %20620 = vmatpush3.bf16.msra.mxu1 %v23003_v32  ;;  %20539 = vmatprep.subr.bf16.mxu0 %v23004_v2  ;;  %v23081_v32 = vld [vmem:[#allocation5 + $0x1114] ss:$72 sps:$4 sm:$0xff]   ;;  %v23076_v2 = vld [vmem:[#allocation5 + $0x810] ss:$72 sps:$4 sm:$0xff]  }
 0x713   :  { %20621 = vmatprep.subr.bf16.mxu1 %v25144_v50 }
 0x715   :  { %20540 = vmatpush3.bf16.msra.mxu0 %v23005_v59  ;;  %v23079_v59 = vld [vmem:[#allocation5 + $0x1110] ss:$72 sps:$4 sm:$0xff]  }
 0x716   :  { %20622 = vmatpush3.bf16.msra.mxu1 %v23006_v14  ;;  %20541 = vmatprep.subr.bf16.mxu0 %v23007_v28  ;;  %v23084_v14 = vld [vmem:[#allocation5 + $0x784] ss:$72 sps:$4 sm:$0xff]  }
 0x717   :  { %20623 = vmatprep.subr.bf16.mxu1 %v25144_v50  ;;  %v23087_v28 = vld [vmem:[#allocation5 + $0x1084] ss:$72 sps:$4 sm:$0xff]  }
 0x719   :  { %20542 = vmatpush3.bf16.msra.mxu0 %v23008_v25  ;;  %v23082_v25 = vld [vmem:[#allocation5 + $0x780] ss:$72 sps:$4 sm:$0xff]  }
 0x71a   :  { %20624 = vmatpush3.bf16.msra.mxu1 %v23009_v39  ;;  %20543 = vmatprep.subr.bf16.mxu0 %v23010_v33  ;;  %v23085_v39 = vld [vmem:[#allocation5 + $0x1080] ss:$72 sps:$4 sm:$0xff]   ;;  %v23090_v33 = vld [vmem:[#allocation5 + $0x6f4] ss:$72 sps:$4 sm:$0xff]  }
 0x71b   :  { %20625 = vmatprep.subr.bf16.mxu1 %v25144_v50 }
 0x71d   :  { %20544 = vmatpush3.bf16.msra.mxu0 %v23011_v11  ;;  %v23093_v11 = vld [vmem:[#allocation5 + $0xff4] ss:$72 sps:$4 sm:$0xff]  }
 0x71e   :  { %20626 = vmatpush3.bf16.msra.mxu1 %v23012_v18  ;;  %20545 = vmatprep.subr.bf16.mxu0 %v23013_v23  ;;  %v23088_v18 = vld [vmem:[#allocation5 + $0x6f0] ss:$72 sps:$4 sm:$0xff]  }
 0x71f   :  { %20627 = vmatprep.subr.bf16.mxu1 %v25144_v50  ;;  %v23091_v23 = vld [vmem:[#allocation5 + $0xff0] ss:$72 sps:$4 sm:$0xff]  }
 0x721   :  { %20546 = vmatpush3.bf16.msra.mxu0 %v23014_v37  ;;  %v23096_v37 = vld [vmem:[#allocation5 + $0x664] ss:$72 sps:$4 sm:$0xff]  }
 0x722   :  { %20628 = vmatpush3.bf16.msra.mxu1 %v23015_v40  ;;  %20547 = vmatprep.subr.bf16.mxu0 %v23016_v30  ;;  %v23099_v40 = vld [vmem:[#allocation5 + $0xf64] ss:$72 sps:$4 sm:$0xff]   ;;  %v23094_v30 = vld [vmem:[#allocation5 + $0x660] ss:$72 sps:$4 sm:$0xff]  }
 0x723   :  { %20629 = vmatprep.subr.bf16.mxu1 %v25144_v50 }
 0x725   :  { %20548 = vmatpush3.bf16.msra.mxu0 %v23017_v22  ;;  %v23097_v22 = vld [vmem:[#allocation5 + $0xf60] ss:$72 sps:$4 sm:$0xff]  }
 0x726   :  { %20630 = vmatpush3.bf16.msra.mxu1 %v23018_v42  ;;  %20549 = vmatprep.subr.bf16.mxu0 %v23019_v26  ;;  %v23102_v42 = vld [vmem:[#allocation5 + $0x5d4] ss:$72 sps:$4 sm:$0xff]  }
 0x727   :  { %20631 = vmatprep.subr.bf16.mxu1 %v25144_v50  ;;  %v23105_v26 = vld [vmem:[#allocation5 + $0xed4] ss:$72 sps:$4 sm:$0xff]  }
 0x729   :  { %20550 = vmatpush3.bf16.msra.mxu0 %v23020_v29  ;;  %v23100_v29 = vld [vmem:[#allocation5 + $0x5d0] ss:$72 sps:$4 sm:$0xff]  }
 0x72a   :  { %20632 = vmatpush3.bf16.msra.mxu1 %v23021_v16  ;;  %16715 = vmatprep.subr.bf16.mxu0 %v23024_v60  ;;  %v23103_v16 = vld [vmem:[#allocation5 + $0xed0] ss:$72 sps:$4 sm:$0xff]   ;;  %v23108_v60 = vld [vmem:[#allocation5 + $0x544] ss:$72 sps:$4 sm:$0xff]  }
 0x72b   :  { %16758 = vmatprep.subr.bf16.mxu1 %v23027_v61  ;;  %v23111_v61 = vld [vmem:[#allocation5 + $0xe44] ss:$72 sps:$4 sm:$0xff]  }
 0x72c   :  { %12058 = vmatmul.mubr.bf16.vlgmr.msra.gmra.mxu0 %v25145_v6  ;;  %v23112_v6 = vld [vmem:[#allocation5 + $0x4b0] ss:$72 sps:$4 sm:$0xff]  }
 0x72d   :  { %20634 = vmatmul.mubr.bf16.vlgmr.msra.gmra.mxu1 %v25146_v58  ;;  %16716 = vmatpush1.bf16.msra.mxu0 %v23022_v51  ;;  %v23106_v51 = vld [vmem:[#allocation5 + $0x540] ss:$72 sps:$4 sm:$0xff]   ;;  %v23115_v58 = vld [vmem:[#allocation5 + $0xdb0] ss:$72 sps:$4 sm:$0xff]  }
 0x72e   :  { %16759 = vmatpush1.bf16.msra.mxu1 %v23025_v47  ;;  %16717 = vmatprep.subr.bf16.mxu0 %v23030_v62  ;;  %v23109_v47 = vld [vmem:[#allocation5 + $0xe40] ss:$72 sps:$4 sm:$0xff]   ;;  %v23114_v62 = vld [vmem:[#allocation5 + $0x4b4] ss:$72 sps:$4 sm:$0xff]  }
 0x72f   :  { %16760 = vmatprep.subr.bf16.mxu1 %v23033_v27  ;;  %16747 = vmatprep.mubr.bf16.mxu0 %v24366_v53  ;;  %v23117_v27 = vld [vmem:[#allocation5 + $0xdb4] ss:$72 sps:$4 sm:$0xff]  }
 0x730   :  { %16790 = vmatprep.mubr.bf16.mxu1 %v24368_v54 }
 0x731   :  { %16718 = vmatpush1.bf16.msra.mxu0 %v23028_v35  ;;  %v23120_v35 = vld [vmem:[#allocation5 + $0x1624] ss:$72 sps:$4 sm:$0xff]  }
 0x732   :  { %16761 = vmatpush1.bf16.msra.mxu1 %v23031_v38  ;;  %16719 = vmatprep.subr.bf16.mxu0 %v23036_v7  ;;  %v23123_v38 = vld [vmem:[#allocation5 + $0x1f24] ss:$72 sps:$4 sm:$0xff]   ;;  %v23118_v7 = vld [vmem:[#allocation5 + $0x1620] ss:$72 sps:$4 sm:$0xff]  }
 0x733   :  { %16762 = vmatprep.subr.bf16.mxu1 %v23039_v5  ;;  %v23121_v5 = vld [vmem:[#allocation5 + $0x1f20] ss:$72 sps:$4 sm:$0xff]  }
 0x735   :  { %16720 = vmatpush1.bf16.msra.mxu0 %v23034_v10  ;;  %v23126_v10 = vld [vmem:[#allocation5 + $0x1594] ss:$72 sps:$4 sm:$0xff]  }
 0x736   :  { %16763 = vmatpush1.bf16.msra.mxu1 %v23037_v1  ;;  %16721 = vmatprep.subr.bf16.mxu0 %v23042_v17  ;;  %v23129_v1 = vld [vmem:[#allocation5 + $0x1e94] ss:$72 sps:$4 sm:$0xff]   ;;  %v23124_v17 = vld [vmem:[#allocation5 + $0x1590] ss:$72 sps:$4 sm:$0xff]  }
 0x737   :  { %16764 = vmatprep.subr.bf16.mxu1 %v23045_v13  ;;  %v23127_v13 = vld [vmem:[#allocation5 + $0x1e90] ss:$72 sps:$4 sm:$0xff]  }
 0x739   :  { %16722 = vmatpush1.bf16.msra.mxu0 %v23040_v52  ;;  %v23132_v52 = vld [vmem:[#allocation5 + $0x1504] ss:$72 sps:$4 sm:$0xff]  }
 0x73a   :  { %16765 = vmatpush1.bf16.msra.mxu1 %v23043_v24  ;;  %16723 = vmatprep.subr.bf16.mxu0 %v23048_v4  ;;  %v23135_v24 = vld [vmem:[#allocation5 + $0x1e04] ss:$72 sps:$4 sm:$0xff]   ;;  %v25147_v4 = vld [vmem:[#allocation12_spill] sm:$0xff] }
 0x73b   :  { %16766 = vmatprep.subr.bf16.mxu1 %v23051_v19  ;;  %v23130_v19 = vld [vmem:[#allocation5 + $0x1500] ss:$72 sps:$4 sm:$0xff]  }
 0x73d   :  { %16724 = vmatpush1.bf16.msra.mxu0 %v23046_v49  ;;  %v23133_v49 = vld [vmem:[#allocation5 + $0x1e00] ss:$72 sps:$4 sm:$0xff]  }
 0x73e   :  { %16767 = vmatpush1.bf16.msra.mxu1 %v23049_v31  ;;  %16725 = vmatprep.subr.bf16.mxu0 %v23054_v56  ;;  %v23138_v31 = vld [vmem:[#allocation5 + $0x1474] ss:$72 sps:$4 sm:$0xff]  }
 0x73f   :  { %16768 = vmatprep.subr.bf16.mxu1 %v23057_v21  ;;  %v23141_v56 = vld [vmem:[#allocation5 + $0x1d74] ss:$72 sps:$4 sm:$0xff]   ;;  %v23136_v21 = vld [vmem:[#allocation5 + $0x1470] ss:$72 sps:$4 sm:$0xff]  }
 0x741   :  { %16726 = vmatpush1.bf16.msra.mxu0 %v23052_v48  ;;  %v23139_v48 = vld [vmem:[#allocation5 + $0x1d70] ss:$72 sps:$4 sm:$0xff]  }
 0x742   :  { %16769 = vmatpush1.bf16.msra.mxu1 %v23055_v45  ;;  %16727 = vmatprep.subr.bf16.mxu0 %v23060_v20  ;;  %v23144_v45 = vld [vmem:[#allocation5 + $0x13e4] ss:$72 sps:$4 sm:$0xff]  }
 0x743   :  { %16770 = vmatprep.subr.bf16.mxu1 %v23063_v55  ;;  %v23147_v20 = vld [vmem:[#allocation5 + $0x1ce4] ss:$72 sps:$4 sm:$0xff]   ;;  %v23142_v55 = vld [vmem:[#allocation5 + $0x13e0] ss:$72 sps:$4 sm:$0xff]  }
 0x745   :  { %16728 = vmatpush1.bf16.msra.mxu0 %v23058_v3  ;;  %v23145_v3 = vld [vmem:[#allocation5 + $0x1ce0] ss:$72 sps:$4 sm:$0xff]  }
 0x746   :  { %16771 = vmatpush1.bf16.msra.mxu1 %v23061_v63  ;;  %16729 = vmatprep.subr.bf16.mxu0 %v23066_v44  ;;  %v23150_v63 = vld [vmem:[#allocation5 + $0x1354] ss:$72 sps:$4 sm:$0xff]  }
 0x747   :  { %16772 = vmatprep.subr.bf16.mxu1 %v23069_v43  ;;  %v23153_v44 = vld [vmem:[#allocation5 + $0x1c54] ss:$72 sps:$4 sm:$0xff]   ;;  %v23148_v43 = vld [vmem:[#allocation5 + $0x1350] ss:$72 sps:$4 sm:$0xff]  }
 0x749   :  { %16730 = vmatpush1.bf16.msra.mxu0 %v23064_v34  ;;  %v23151_v34 = vld [vmem:[#allocation5 + $0x1c50] ss:$72 sps:$4 sm:$0xff]  }
 0x74a   :  { %16773 = vmatpush1.bf16.msra.mxu1 %v23067_v36  ;;  %16731 = vmatprep.subr.bf16.mxu0 %v23072_v12  ;;  %v23156_v36 = vld [vmem:[#allocation5 + $0x12c4] ss:$72 sps:$4 sm:$0xff]  }
 0x74b   :  { %16774 = vmatprep.subr.bf16.mxu1 %v23075_v57  ;;  %v23159_v12 = vld [vmem:[#allocation5 + $0x1bc4] ss:$72 sps:$4 sm:$0xff]   ;;  %v23154_v57 = vld [vmem:[#allocation5 + $0x12c0] ss:$72 sps:$4 sm:$0xff]  }
 0x74d   :  { %16732 = vmatpush2.bf16.msra.mxu0 %v23070_v0  ;;  %v23157_v0 = vld [vmem:[#allocation5 + $0x1bc0] ss:$72 sps:$4 sm:$0xff]  }
 0x74e   :  { %16775 = vmatpush2.bf16.msra.mxu1 %v23073_v15  ;;  %16733 = vmatprep.subr.bf16.mxu0 %v23078_v46  ;;  %v23162_v15 = vld [vmem:[#allocation5 + $0x1234] ss:$72 sps:$4 sm:$0xff]  }
 0x74f   :  { %16776 = vmatprep.subr.bf16.mxu1 %v23081_v32  ;;  %v23165_v46 = vld [vmem:[#allocation5 + $0x1b34] ss:$72 sps:$4 sm:$0xff]   ;;  %v23160_v32 = vld [vmem:[#allocation5 + $0x1230] ss:$72 sps:$4 sm:$0xff]  }
 0x751   :  { %16734 = vmatpush2.bf16.msra.mxu0 %v23076_v2  ;;  %v23163_v2 = vld [vmem:[#allocation5 + $0x1b30] ss:$72 sps:$4 sm:$0xff]  }
 0x752   :  { %16777 = vmatpush2.bf16.msra.mxu1 %v23079_v59  ;;  %16735 = vmatprep.subr.bf16.mxu0 %v23084_v14  ;;  %v23168_v59 = vld [vmem:[#allocation5 + $0x1aa4] ss:$72 sps:$4 sm:$0xff]  }
 0x753   :  { %16778 = vmatprep.subr.bf16.mxu1 %v23087_v28  ;;  %v23171_v14 = vld [vmem:[#allocation5 + $0x23a4] ss:$72 sps:$4 sm:$0xff]   ;;  %v23166_v28 = vld [vmem:[#allocation5 + $0x1aa0] ss:$72 sps:$4 sm:$0xff]  }
 0x755   :  { %16736 = vmatpush2.bf16.msra.mxu0 %v23082_v25  ;;  %v23169_v25 = vld [vmem:[#allocation5 + $0x23a0] ss:$72 sps:$4 sm:$0xff]  }
 0x756   :  { %16779 = vmatpush2.bf16.msra.mxu1 %v23085_v39  ;;  %16737 = vmatprep.subr.bf16.mxu0 %v23090_v33  ;;  %v23174_v39 = vld [vmem:[#allocation5 + $0x1a14] ss:$72 sps:$4 sm:$0xff]  }
 0x757   :  { %16780 = vmatprep.subr.bf16.mxu1 %v23093_v11  ;;  %v23177_v33 = vld [vmem:[#allocation5 + $0x2314] ss:$72 sps:$4 sm:$0xff]   ;;  %v23172_v11 = vld [vmem:[#allocation5 + $0x1a10] ss:$72 sps:$4 sm:$0xff]  }
 0x759   :  { %16738 = vmatpush2.bf16.msra.mxu0 %v23088_v18  ;;  %v23175_v18 = vld [vmem:[#allocation5 + $0x2310] ss:$72 sps:$4 sm:$0xff]  }
 0x75a   :  { %16781 = vmatpush2.bf16.msra.mxu1 %v23091_v23  ;;  %16739 = vmatprep.subr.bf16.mxu0 %v23096_v37  ;;  %v23180_v23 = vld [vmem:[#allocation5 + $0x1984] ss:$72 sps:$4 sm:$0xff]  }
 0x75b   :  { %16782 = vmatprep.subr.bf16.mxu1 %v23099_v40  ;;  %v23183_v37 = vld [vmem:[#allocation5 + $0x2284] ss:$72 sps:$4 sm:$0xff]   ;;  %v23178_v40 = vld [vmem:[#allocation5 + $0x1980] ss:$72 sps:$4 sm:$0xff]  }
 0x75d   :  { %16740 = vmatpush2.bf16.msra.mxu0 %v23094_v30  ;;  %v23181_v30 = vld [vmem:[#allocation5 + $0x2280] ss:$72 sps:$4 sm:$0xff]  }
 0x75e   :  { %16783 = vmatpush2.bf16.msra.mxu1 %v23097_v22  ;;  %16741 = vmatprep.subr.bf16.mxu0 %v23102_v42  ;;  %v23186_v22 = vld [vmem:[#allocation5 + $0x18f4] ss:$72 sps:$4 sm:$0xff]  }
 0x75f   :  { %16784 = vmatprep.subr.bf16.mxu1 %v23105_v26  ;;  %v23189_v42 = vld [vmem:[#allocation5 + $0x21f4] ss:$72 sps:$4 sm:$0xff]   ;;  %v23184_v26 = vld [vmem:[#allocation5 + $0x18f0] ss:$72 sps:$4 sm:$0xff]  }
 0x761   :  { %16742 = vmatpush2.bf16.msra.mxu0 %v23100_v29  ;;  %v23187_v29 = vld [vmem:[#allocation5 + $0x21f0] ss:$72 sps:$4 sm:$0xff]  }
 0x762   :  { %16785 = vmatpush2.bf16.msra.mxu1 %v23103_v16  ;;  %16743 = vmatprep.subr.bf16.mxu0 %v23108_v60  ;;  %v23192_v16 = vld [vmem:[#allocation5 + $0x1864] ss:$72 sps:$4 sm:$0xff]  }
 0x763   :  { %16786 = vmatprep.subr.bf16.mxu1 %v23111_v61  ;;  %v23195_v60 = vld [vmem:[#allocation5 + $0x2164] ss:$72 sps:$4 sm:$0xff]   ;;  %v23190_v61 = vld [vmem:[#allocation5 + $0x1860] ss:$72 sps:$4 sm:$0xff]  }
 0x765   :  { %16744 = vmatpush2.bf16.msra.mxu0 %v23106_v51  ;;  %v23193_v51 = vld [vmem:[#allocation5 + $0x2160] ss:$72 sps:$4 sm:$0xff]  }
 0x766   :  { %16787 = vmatpush2.bf16.msra.mxu1 %v23109_v47  ;;  %16745 = vmatprep.subr.bf16.mxu0 %v23114_v62  ;;  %v23198_v47 = vld [vmem:[#allocation5 + $0x17d4] ss:$72 sps:$4 sm:$0xff]  }
 0x767   :  { %16788 = vmatprep.subr.bf16.mxu1 %v23117_v27  ;;  %v23201_v62 = vld [vmem:[#allocation5 + $0x20d4] ss:$72 sps:$4 sm:$0xff]   ;;  %v23196_v27 = vld [vmem:[#allocation5 + $0x17d0] ss:$72 sps:$4 sm:$0xff]  }
 0x769   :  { %16746 = vmatpush2.bf16.msra.mxu0 %v23112_v6  ;;  %v23199_v6 = vld [vmem:[#allocation5 + $0x20d0] ss:$72 sps:$4 sm:$0xff]  }
 0x76a   :  { %16789 = vmatpush2.bf16.msra.mxu1 %v23115_v58  ;;  %16801 = vmatprep.subr.bf16.mxu0 %v23120_v35  ;;  %v23204_v58 = vld [vmem:[#allocation5 + $0x1744] ss:$72 sps:$4 sm:$0xff]  }
 0x76b   :  { %16844 = vmatprep.subr.bf16.mxu1 %v23123_v38  ;;  %v23207_v35 = vld [vmem:[#allocation5 + $0x2044] ss:$72 sps:$4 sm:$0xff]   ;;  %v23202_v38 = vld [vmem:[#allocation5 + $0x1740] ss:$72 sps:$4 sm:$0xff]  }
 0x76c   :  { %16748 = vmatmul.mubr.bf16.vlgmr.msra.gmra.mxu0 %v24372_v8 }
 0x76d   :  { %16791 = vmatmul.mubr.bf16.vlgmr.msra.gmra.mxu1 %v24374_v9  ;;  %16802 = vmatpush1.bf16.msra.mxu0 %v23118_v7  ;;  %v23205_v7 = vld [vmem:[#allocation5 + $0x2040] ss:$72 sps:$4 sm:$0xff]  }
 0x76e   :  { %16845 = vmatpush1.bf16.msra.mxu1 %v23121_v5  ;;  %16803 = vmatprep.subr.bf16.mxu0 %v23126_v10  ;;  %v23210_v5 = vld [vmem:[#allocation5 + $0x16b4] ss:$72 sps:$4 sm:$0xff]  }
 0x76f   :  { %16846 = vmatprep.subr.bf16.mxu1 %v23129_v1  ;;  %16833 = vmatprep.mubr.bf16.mxu0 %v24388_v41  ;;  %v23213_v10 = vld [vmem:[#allocation5 + $0x1fb4] ss:$72 sps:$4 sm:$0xff]   ;;  %v23208_v1 = vld [vmem:[#allocation5 + $0x16b0] ss:$72 sps:$4 sm:$0xff]  }
 0x770   :  { %16876 = vmatprep.mubr.bf16.mxu1 %v25147_v4 }
 0x771   :  { %16804 = vmatpush1.bf16.msra.mxu0 %v23124_v17  ;;  %v23211_v17 = vld [vmem:[#allocation5 + $0x1fb0] ss:$72 sps:$4 sm:$0xff]  }
 0x772   :  { %16847 = vmatpush1.bf16.msra.mxu1 %v23127_v13  ;;  %16805 = vmatprep.subr.bf16.mxu0 %v23132_v52  ;;  %v23216_v13 = vld [vmem:[#allocation5 + $0x2824] ss:$72 sps:$4 sm:$0xff]  }
 0x773   :  { %16848 = vmatprep.subr.bf16.mxu1 %v23135_v24  ;;  %v23219_v52 = vld [vmem:[#allocation5 + $0x3124] ss:$72 sps:$4 sm:$0xff]   ;;  %v23214_v24 = vld [vmem:[#allocation5 + $0x2820] ss:$72 sps:$4 sm:$0xff]  }
 0x775   :  { %16806 = vmatpush1.bf16.msra.mxu0 %v23130_v19  ;;  %v23217_v19 = vld [vmem:[#allocation5 + $0x3120] ss:$72 sps:$4 sm:$0xff]  }
 0x776   :  { %16849 = vmatpush1.bf16.msra.mxu1 %v23133_v49  ;;  %16807 = vmatprep.subr.bf16.mxu0 %v23138_v31  ;;  %v23222_v49 = vld [vmem:[#allocation5 + $0x2794] ss:$72 sps:$4 sm:$0xff]  }
 0x777   :  { %16850 = vmatprep.subr.bf16.mxu1 %v23141_v56  ;;  %v23225_v31 = vld [vmem:[#allocation5 + $0x3094] ss:$72 sps:$4 sm:$0xff]  }
 0x778   :  { %v25148_v56 = vld [vmem:[#allocation13_spill] sm:$0xff] }
 0x779   :  { %16808 = vmatpush1.bf16.msra.mxu0 %v23136_v21  ;;  %v25149_v21 = vld [vmem:[#allocation14_spill] sm:$0xff] }
 0x77a   :  { %16851 = vmatpush1.bf16.msra.mxu1 %v23139_v48  ;;  %16809 = vmatprep.subr.bf16.mxu0 %v23144_v45  ;;  %v23220_v48 = vld [vmem:[#allocation5 + $0x2790] ss:$72 sps:$4 sm:$0xff]  }
 0x77b   :  { %16852 = vmatprep.subr.bf16.mxu1 %v23147_v20  ;;  %v23223_v45 = vld [vmem:[#allocation5 + $0x3090] ss:$72 sps:$4 sm:$0xff]   ;;  %v23228_v20 = vld [vmem:[#allocation5 + $0x2704] ss:$72 sps:$4 sm:$0xff]  }
 0x77d   :  { %16810 = vmatpush1.bf16.msra.mxu0 %v23142_v55  ;;  %v23231_v55 = vld [vmem:[#allocation5 + $0x3004] ss:$72 sps:$4 sm:$0xff]  }
 0x77e   :  { %16853 = vmatpush1.bf16.msra.mxu1 %v23145_v3  ;;  %16811 = vmatprep.subr.bf16.mxu0 %v23150_v63  ;;  %v25150_v3 = vld [vmem:[#allocation15_spill] sm:$0xff]  ;;  %v25151_v63 = vld [vmem:[#allocation16_spill] sm:$0xff] }
 0x77f   :  { %16854 = vmatprep.subr.bf16.mxu1 %v23153_v44  ;;  %v23226_v44 = vld [vmem:[#allocation5 + $0x2700] ss:$72 sps:$4 sm:$0xff]  }
 0x781   :  { %16812 = vmatpush1.bf16.msra.mxu0 %v23148_v43  ;;  %v23229_v43 = vld [vmem:[#allocation5 + $0x3000] ss:$72 sps:$4 sm:$0xff]  }
 0x782   :  { %16855 = vmatpush1.bf16.msra.mxu1 %v23151_v34  ;;  %16813 = vmatprep.subr.bf16.mxu0 %v23156_v36  ;;  %v23234_v34 = vld [vmem:[#allocation5 + $0x2674] ss:$72 sps:$4 sm:$0xff]  }
 0x783   :  { %16856 = vmatprep.subr.bf16.mxu1 %v23159_v12  ;;  %v23237_v36 = vld [vmem:[#allocation5 + $0x2f74] ss:$72 sps:$4 sm:$0xff]   ;;  %v23232_v12 = vld [vmem:[#allocation5 + $0x2670] ss:$72 sps:$4 sm:$0xff]  }
 0x785   :  { %16814 = vmatpush1.bf16.msra.mxu0 %v23154_v57  ;;  %v23235_v57 = vld [vmem:[#allocation5 + $0x2f70] ss:$72 sps:$4 sm:$0xff]  }
 0x786   :  { %16857 = vmatpush1.bf16.msra.mxu1 %v23157_v0  ;;  %16815 = vmatprep.subr.bf16.mxu0 %v23162_v15  ;;  %v23240_v0 = vld [vmem:[#allocation5 + $0x25e4] ss:$72 sps:$4 sm:$0xff]  }
 0x787   :  { %16858 = vmatprep.subr.bf16.mxu1 %v23165_v46  ;;  %v23243_v15 = vld [vmem:[#allocation5 + $0x2ee4] ss:$72 sps:$4 sm:$0xff]   ;;  %v23238_v46 = vld [vmem:[#allocation5 + $0x25e0] ss:$72 sps:$4 sm:$0xff]  }
 0x789   :  { %16816 = vmatpush1.bf16.msra.mxu0 %v23160_v32  ;;  %v23241_v32 = vld [vmem:[#allocation5 + $0x2ee0] ss:$72 sps:$4 sm:$0xff]  }
 0x78a   :  { %16859 = vmatpush1.bf16.msra.mxu1 %v23163_v2  ;;  %16817 = vmatprep.subr.bf16.mxu0 %v23168_v59  ;;  %v23246_v2 = vld [vmem:[#allocation5 + $0x2554] ss:$72 sps:$4 sm:$0xff]  }
 0x78b   :  { %16860 = vmatprep.subr.bf16.mxu1 %v23171_v14  ;;  %v23249_v59 = vld [vmem:[#allocation5 + $0x2e54] ss:$72 sps:$4 sm:$0xff]   ;;  %v23244_v14 = vld [vmem:[#allocation5 + $0x2550] ss:$72 sps:$4 sm:$0xff]  }
 0x78d   :  { %16818 = vmatpush2.bf16.msra.mxu0 %v23166_v28  ;;  %v23247_v28 = vld [vmem:[#allocation5 + $0x2e50] ss:$72 sps:$4 sm:$0xff]  }
 0x78e   :  { %16861 = vmatpush2.bf16.msra.mxu1 %v23169_v25  ;;  %16819 = vmatprep.subr.bf16.mxu0 %v23174_v39  ;;  %v23252_v25 = vld [vmem:[#allocation5 + $0x24c4] ss:$72 sps:$4 sm:$0xff]  }
 0x78f   :  { %16862 = vmatprep.subr.bf16.mxu1 %v23177_v33  ;;  %v23255_v39 = vld [vmem:[#allocation5 + $0x2dc4] ss:$72 sps:$4 sm:$0xff]   ;;  %v23250_v33 = vld [vmem:[#allocation5 + $0x24c0] ss:$72 sps:$4 sm:$0xff]  }
 0x791   :  { %16820 = vmatpush2.bf16.msra.mxu0 %v23172_v11  ;;  %v23253_v11 = vld [vmem:[#allocation5 + $0x2dc0] ss:$72 sps:$4 sm:$0xff]  }
 0x792   :  { %16863 = vmatpush2.bf16.msra.mxu1 %v23175_v18  ;;  %16821 = vmatprep.subr.bf16.mxu0 %v23180_v23  ;;  %v23258_v18 = vld [vmem:[#allocation5 + $0x2434] ss:$72 sps:$4 sm:$0xff]  }
 0x793   :  { %16864 = vmatprep.subr.bf16.mxu1 %v23183_v37  ;;  %v23261_v23 = vld [vmem:[#allocation5 + $0x2d34] ss:$72 sps:$4 sm:$0xff]   ;;  %v23256_v37 = vld [vmem:[#allocation5 + $0x2430] ss:$72 sps:$4 sm:$0xff]  }
 0x795   :  { %16822 = vmatpush2.bf16.msra.mxu0 %v23178_v40  ;;  %v23259_v40 = vld [vmem:[#allocation5 + $0x2d30] ss:$72 sps:$4 sm:$0xff]  }
 0x796   :  { %16865 = vmatpush2.bf16.msra.mxu1 %v23181_v30  ;;  %16823 = vmatprep.subr.bf16.mxu0 %v23186_v22  ;;  %v23264_v30 = vld [vmem:[#allocation5 + $0x2ca4] ss:$72 sps:$4 sm:$0xff]  }
 0x797   :  { %16866 = vmatprep.subr.bf16.mxu1 %v23189_v42  ;;  %v23267_v22 = vld [vmem:[#allocation5 + $0x35a4] ss:$72 sps:$4 sm:$0xff]   ;;  %v23262_v42 = vld [vmem:[#allocation5 + $0x2ca0] ss:$72 sps:$4 sm:$0xff]  }
 0x799   :  { %16824 = vmatpush2.bf16.msra.mxu0 %v23184_v26  ;;  %v23265_v26 = vld [vmem:[#allocation5 + $0x35a0] ss:$72 sps:$4 sm:$0xff]  }
 0x79a   :  { %16867 = vmatpush2.bf16.msra.mxu1 %v23187_v29  ;;  %16825 = vmatprep.subr.bf16.mxu0 %v23192_v16  ;;  %v23270_v29 = vld [vmem:[#allocation5 + $0x2c14] ss:$72 sps:$4 sm:$0xff]  }
 0x79b   :  { %16868 = vmatprep.subr.bf16.mxu1 %v23195_v60  ;;  %v23273_v16 = vld [vmem:[#allocation5 + $0x3514] ss:$72 sps:$4 sm:$0xff]  }
 0x79d   :  { %16826 = vmatpush2.bf16.msra.mxu0 %v23190_v61 }
 0x79e   :  { %16869 = vmatpush2.bf16.msra.mxu1 %v23193_v51  ;;  %16827 = vmatprep.subr.bf16.mxu0 %v23198_v47  ;;  %v23268_v51 = vld [vmem:[#allocation5 + $0x2c10] ss:$72 sps:$4 sm:$0xff]  }
 0x79f   :  { %16870 = vmatprep.subr.bf16.mxu1 %v23201_v62  ;;  %v23271_v62 = vld [vmem:[#allocation5 + $0x3510] ss:$72 sps:$4 sm:$0xff]  }
 0x7a1   :  { %16828 = vmatpush2.bf16.msra.mxu0 %v23196_v27  ;;  %v23276_v27 = vld [vmem:[#allocation5 + $0x2b84] ss:$72 sps:$4 sm:$0xff]  }
 0x7a2   :  { %16871 = vmatpush2.bf16.msra.mxu1 %v23199_v6  ;;  %16829 = vmatprep.subr.bf16.mxu0 %v23204_v58 }
 0x7a3   :  { %16872 = vmatprep.subr.bf16.mxu1 %v23207_v35  ;;  %v23279_v35 = vld [vmem:[#allocation5 + $0x3484] ss:$72 sps:$4 sm:$0xff]  }
 0x7a5   :  { %16830 = vmatpush2.bf16.msra.mxu0 %v23202_v38 }
 0x7a6   :  { %16873 = vmatpush2.bf16.msra.mxu1 %v23205_v7  ;;  %16831 = vmatprep.subr.bf16.mxu0 %v23210_v5 }
 0x7a7   :  { %16874 = vmatprep.subr.bf16.mxu1 %v23213_v10  ;;  %v23274_v10 = vld [vmem:[#allocation5 + $0x2b80] ss:$72 sps:$4 sm:$0xff]  }
 0x7a9   :  { %16832 = vmatpush2.bf16.msra.mxu0 %v23208_v1 }
 0x7aa   :  { %16875 = vmatpush2.bf16.msra.mxu1 %v23211_v17  ;;  %16887 = vmatprep.subr.bf16.mxu0 %v23216_v13  ;;  %v23277_v17 = vld [vmem:[#allocation5 + $0x3480] ss:$72 sps:$4 sm:$0xff]   ;;  %v23282_v13 = vld [vmem:[#allocation5 + $0x2af4] ss:$72 sps:$4 sm:$0xff]  }
 0x7ab   :  { %16930 = vmatprep.subr.bf16.mxu1 %v23219_v52 }
 0x7ac   :  { %16834 = vmatmul.mubr.bf16.vlgmr.msra.gmra.mxu0 %v25148_v56 }
 0x7ad   :  { %16877 = vmatmul.mubr.bf16.vlgmr.msra.gmra.mxu1 %v25149_v21  ;;  %16888 = vmatpush1.bf16.msra.mxu0 %v23214_v24 }
 0x7ae   :  { %16931 = vmatpush1.bf16.msra.mxu1 %v23217_v19  ;;  %16889 = vmatprep.subr.bf16.mxu0 %v23222_v49  ;;  %v23285_v19 = vld [vmem:[#allocation5 + $0x33f4] ss:$72 sps:$4 sm:$0xff]  }
 0x7af   :  { %16932 = vmatprep.subr.bf16.mxu1 %v23225_v31  ;;  %16919 = vmatprep.mubr.bf16.mxu0 %v25150_v3  ;;  %v23280_v31 = vld [vmem:[#allocation5 + $0x2af0] ss:$72 sps:$4 sm:$0xff]  }
 0x7b0   :  { %16962 = vmatprep.mubr.bf16.mxu1 %v25151_v63 }
 0x7b1   :  { %16890 = vmatpush1.bf16.msra.mxu0 %v23220_v48  ;;  %v23283_v48 = vld [vmem:[#allocation5 + $0x33f0] ss:$72 sps:$4 sm:$0xff]  }
 0x7b2   :  { %16933 = vmatpush1.bf16.msra.mxu1 %v23223_v45  ;;  %16891 = vmatprep.subr.bf16.mxu0 %v23228_v20  ;;  %v23288_v45 = vld [vmem:[#allocation5 + $0x2a64] ss:$72 sps:$4 sm:$0xff]  }
 0x7b3   :  { %16934 = vmatprep.subr.bf16.mxu1 %v23231_v55  ;;  %v23291_v20 = vld [vmem:[#allocation5 + $0x3364] ss:$72 sps:$4 sm:$0xff]   ;;  %v23286_v55 = vld [vmem:[#allocation5 + $0x2a60] ss:$72 sps:$4 sm:$0xff]  }
 0x7b5   :  { %16892 = vmatpush1.bf16.msra.mxu0 %v23226_v44  ;;  %v23289_v44 = vld [vmem:[#allocation5 + $0x3360] ss:$72 sps:$4 sm:$0xff]  }
 0x7b6   :  { %16935 = vmatpush1.bf16.msra.mxu1 %v23229_v43  ;;  %16893 = vmatprep.subr.bf16.mxu0 %v23234_v34  ;;  %v23294_v43 = vld [vmem:[#allocation5 + $0x29d4] ss:$72 sps:$4 sm:$0xff]  }
 0x7b7   :  { %16936 = vmatprep.subr.bf16.mxu1 %v23237_v36  ;;  %v23297_v34 = vld [vmem:[#allocation5 + $0x32d4] ss:$72 sps:$4 sm:$0xff]   ;;  %v23292_v36 = vld [vmem:[#allocation5 + $0x29d0] ss:$72 sps:$4 sm:$0xff]  }
 0x7b9   :  { %16894 = vmatpush1.bf16.msra.mxu0 %v23232_v12  ;;  %v23295_v12 = vld [vmem:[#allocation5 + $0x32d0] ss:$72 sps:$4 sm:$0xff]  }
 0x7ba   :  { %16937 = vmatpush1.bf16.msra.mxu1 %v23235_v57  ;;  %16895 = vmatprep.subr.bf16.mxu0 %v23240_v0  ;;  %v23300_v57 = vld [vmem:[#allocation5 + $0x2944] ss:$72 sps:$4 sm:$0xff]  }
 0x7bb   :  { %16938 = vmatprep.subr.bf16.mxu1 %v23243_v15  ;;  %v23303_v0 = vld [vmem:[#allocation5 + $0x3244] ss:$72 sps:$4 sm:$0xff]   ;;  %v23298_v15 = vld [vmem:[#allocation5 + $0x2940] ss:$72 sps:$4 sm:$0xff]  }
 0x7bd   :  { %16896 = vmatpush1.bf16.msra.mxu0 %v23238_v46  ;;  %v23301_v46 = vld [vmem:[#allocation5 + $0x3240] ss:$72 sps:$4 sm:$0xff]  }
 0x7be   :  { %16939 = vmatpush1.bf16.msra.mxu1 %v23241_v32  ;;  %16897 = vmatprep.subr.bf16.mxu0 %v23246_v2  ;;  %v23306_v32 = vld [vmem:[#allocation5 + $0x28b4] ss:$72 sps:$4 sm:$0xff]  }
 0x7bf   :  { %16940 = vmatprep.subr.bf16.mxu1 %v23249_v59  ;;  %v23309_v2 = vld [vmem:[#allocation5 + $0x31b4] ss:$72 sps:$4 sm:$0xff]   ;;  %v23304_v59 = vld [vmem:[#allocation5 + $0x28b0] ss:$72 sps:$4 sm:$0xff]  }
 0x7c1   :  { %16898 = vmatpush1.bf16.msra.mxu0 %v23244_v14  ;;  %v23307_v14 = vld [vmem:[#allocation5 + $0x31b0] ss:$72 sps:$4 sm:$0xff]  }
 0x7c2   :  { %16941 = vmatpush1.bf16.msra.mxu1 %v23247_v28  ;;  %16899 = vmatprep.subr.bf16.mxu0 %v23252_v25  ;;  %v23312_v28 = vld [vmem:[#allocation5 + $0x3a24] ss:$72 sps:$4 sm:$0xff]  }
 0x7c3   :  { %16942 = vmatprep.subr.bf16.mxu1 %v23255_v39  ;;  %v23315_v25 = vld [vmem:[#allocation5 + $0x4324] ss:$72 sps:$4 sm:$0xff]   ;;  %v23310_v39 = vld [vmem:[#allocation5 + $0x3a20] ss:$72 sps:$4 sm:$0xff]  }
 0x7c5   :  { %16900 = vmatpush1.bf16.msra.mxu0 %v23250_v33  ;;  %v23313_v33 = vld [vmem:[#allocation5 + $0x4320] ss:$72 sps:$4 sm:$0xff]  }
 0x7c6   :  { %16943 = vmatpush1.bf16.msra.mxu1 %v23253_v11  ;;  %16901 = vmatprep.subr.bf16.mxu0 %v23258_v18  ;;  %v23318_v11 = vld [vmem:[#allocation5 + $0x3994] ss:$72 sps:$4 sm:$0xff]  }
 0x7c7   :  { %16944 = vmatprep.subr.bf16.mxu1 %v23261_v23  ;;  %v23321_v18 = vld [vmem:[#allocation5 + $0x4294] ss:$72 sps:$4 sm:$0xff]  }
 0x7c9   :  { %16902 = vmatpush1.bf16.msra.mxu0 %v23256_v37  ;;  %v25152_v37 = vld [vmem:[#allocation17_spill] sm:$0xff] }
 0x7ca   :  { %16945 = vmatpush1.bf16.msra.mxu1 %v23259_v40  ;;  %16903 = vmatprep.subr.bf16.mxu0 %v23264_v30  ;;  %v25153_v30 = vld [vmem:[#allocation18_spill] sm:$0xff] }
 0x7cb   :  { %16946 = vmatprep.subr.bf16.mxu1 %v23267_v22  ;;  %v23316_v22 = vld [vmem:[#allocation5 + $0x3990] ss:$72 sps:$4 sm:$0xff]  }
 0x7cc   :  { %v20520_v60 = vpop.f32.mrf.mxu0 }
 0x7cd   :  { %16904 = vmatpush2.bf16.msra.mxu0 %v23262_v42  ;;  %v11874_v61 = vpop.f32.mrf.mxu1 }
 0x7ce   :  { %16947 = vmatpush2.bf16.msra.mxu1 %v23265_v26  ;;  %v20521_v47 = vpop.f32.mrf.mxu0  ;;  %16905 = vmatprep.subr.bf16.mxu0 %v23270_v29  ;;  %v23319_v26 = vld [vmem:[#allocation5 + $0x4290] ss:$72 sps:$4 sm:$0xff]   ;;  %v23324_v29 = vld [vmem:[#allocation5 + $0x3904] ss:$72 sps:$4 sm:$0xff]  }
 0x7cf   :  { %v20522_v6 = vadd.f32 %v20521_v47, %v20520_v60  ;;  %v20615_v58 = vpop.f32.mrf.mxu1  ;;  %16948 = vmatprep.subr.bf16.mxu1 %v23273_v16 }
 0x7d0   :  { %v20523_v38 = vpop.f32.mrf.mxu0  ;;  %v23322_v58 = vld [vmem:[#allocation5 + $0x3900] ss:$72 sps:$4 sm:$0xff]  }
 0x7d1   :  { %v24915_v7 = vadd.f32 %v20522_v6, %v11874_v61  ;;  %16906 = vmatpush2.bf16.msra.mxu0 %v23268_v51  ;;  %v11877_v5 = vpop.f32.mrf.mxu1  ;;  %v23327_v61 = vld [vmem:[#allocation5 + $0x4204] ss:$72 sps:$4 sm:$0xff]  }
 0x7d2   :  { %16949 = vmatpush2.bf16.msra.mxu1 %v23271_v62  ;;  %v20524_v1 = vpop.f32.mrf.mxu0  ;;  %16907 = vmatprep.subr.bf16.mxu0 %v23276_v27  ;;  %v25154_v51 = vld [vmem:[#allocation19_spill] sm:$0xff]  ;;  %v25155_v62 = vld [vmem:[#allocation20_spill] sm:$0xff] }
 0x7d3   :  { %v20525_v52 = vadd.f32 %v20524_v1, %v20523_v38  ;;  %v20616_v24 = vpop.f32.mrf.mxu1  ;;  %16950 = vmatprep.subr.bf16.mxu1 %v23279_v35  ;;  %v23325_v38 = vld [vmem:[#allocation5 + $0x4200] ss:$72 sps:$4 sm:$0xff]  }
 0x7d4   :  { %v23328_v24 = vld [vmem:[#allocation5 + $0x3870] ss:$72 sps:$4 sm:$0xff]  }
 0x7d5   :  { %v24917_v49 = vadd.f32 %v20525_v52, %v11877_v5  ;;  %16908 = vmatpush2.bf16.msra.mxu0 %v23274_v10  ;;  %v23330_v5 = vld [vmem:[#allocation5 + $0x3874] ss:$72 sps:$4 sm:$0xff]  }
 0x7d6   :  { %16951 = vmatpush2.bf16.msra.mxu1 %v23277_v17  ;;  %16909 = vmatprep.subr.bf16.mxu0 %v23282_v13  ;;  %v23333_v13 = vld [vmem:[#allocation5 + $0x4174] ss:$72 sps:$4 sm:$0xff]  }
 0x7d7   :  { %16952 = vmatprep.subr.bf16.mxu1 %v23285_v19  ;;  %v23336_v19 = vld [vmem:[#allocation5 + $0x37e4] ss:$72 sps:$4 sm:$0xff]  }
 0x7d9   :  { %16910 = vmatpush2.bf16.msra.mxu0 %v23280_v31 }
 0x7da   :  { %16953 = vmatpush2.bf16.msra.mxu1 %v23283_v48  ;;  %16911 = vmatprep.subr.bf16.mxu0 %v23288_v45  ;;  %v23339_v48 = vld [vmem:[#allocation5 + $0x40e4] ss:$72 sps:$4 sm:$0xff]   ;;  %v23334_v45 = vld [vmem:[#allocation5 + $0x37e0] ss:$72 sps:$4 sm:$0xff]  }
 0x7db   :  { %16954 = vmatprep.subr.bf16.mxu1 %v23291_v20  ;;  %v23337_v20 = vld [vmem:[#allocation5 + $0x40e0] ss:$72 sps:$4 sm:$0xff]  }
 0x7dd   :  { %16912 = vmatpush2.bf16.msra.mxu0 %v23286_v55  ;;  %v23342_v55 = vld [vmem:[#allocation5 + $0x3754] ss:$72 sps:$4 sm:$0xff]  }
 0x7de   :  { %16955 = vmatpush2.bf16.msra.mxu1 %v23289_v44  ;;  %16913 = vmatprep.subr.bf16.mxu0 %v23294_v43  ;;  %v23345_v44 = vld [vmem:[#allocation5 + $0x4054] ss:$72 sps:$4 sm:$0xff]   ;;  %v23343_v43 = vld [vmem:[#allocation5 + $0x4050] ss:$72 sps:$4 sm:$0xff]  }
 0x7df   :  { %16956 = vmatprep.subr.bf16.mxu1 %v23297_v34  ;;  %v23348_v34 = vld [vmem:[#allocation5 + $0x36c4] ss:$72 sps:$4 sm:$0xff]  }
 0x7e1   :  { %16914 = vmatpush2.bf16.msra.mxu0 %v23292_v36  ;;  %v23351_v36 = vld [vmem:[#allocation5 + $0x3fc4] ss:$72 sps:$4 sm:$0xff]  }
 0x7e2   :  { %16957 = vmatpush2.bf16.msra.mxu1 %v23295_v12  ;;  %16915 = vmatprep.subr.bf16.mxu0 %v23300_v57  ;;  %v23346_v12 = vld [vmem:[#allocation5 + $0x36c0] ss:$72 sps:$4 sm:$0xff]  }
 0x7e3   :  { %16958 = vmatprep.subr.bf16.mxu1 %v23303_v0  ;;  %v23349_v57 = vld [vmem:[#allocation5 + $0x3fc0] ss:$72 sps:$4 sm:$0xff]   ;;  %v23354_v0 = vld [vmem:[#allocation5 + $0x3634] ss:$72 sps:$4 sm:$0xff]  }
 0x7e5   :  { %16916 = vmatpush2.bf16.msra.mxu0 %v23298_v15  ;;  %v23357_v15 = vld [vmem:[#allocation5 + $0x3f34] ss:$72 sps:$4 sm:$0xff]  }
 0x7e6   :  { %16959 = vmatpush2.bf16.msra.mxu1 %v23301_v46  ;;  %16917 = vmatprep.subr.bf16.mxu0 %v23306_v32  ;;  %v23352_v46 = vld [vmem:[#allocation5 + $0x3630] ss:$72 sps:$4 sm:$0xff]  }
 0x7e7   :  { %16960 = vmatprep.subr.bf16.mxu1 %v23309_v2  ;;  %v23355_v32 = vld [vmem:[#allocation5 + $0x3f30] ss:$72 sps:$4 sm:$0xff]   ;;  %v23360_v2 = vld [vmem:[#allocation5 + $0x3ea4] ss:$72 sps:$4 sm:$0xff]  }
 0x7e9   :  { %16918 = vmatpush2.bf16.msra.mxu0 %v23304_v59  ;;  %v23363_v59 = vld [vmem:[#allocation5 + $0x47a4] ss:$72 sps:$4 sm:$0xff]  }
 0x7ea   :  { %16961 = vmatpush2.bf16.msra.mxu1 %v23307_v14  ;;  %16973 = vmatprep.subr.bf16.mxu0 %v23312_v28  ;;  %v23358_v14 = vld [vmem:[#allocation5 + $0x3ea0] ss:$72 sps:$4 sm:$0xff]  }
 0x7eb   :  { %17016 = vmatprep.subr.bf16.mxu1 %v23315_v25  ;;  %v23361_v28 = vld [vmem:[#allocation5 + $0x47a0] ss:$72 sps:$4 sm:$0xff]   ;;  %v23366_v25 = vld [vmem:[#allocation5 + $0x3e14] ss:$72 sps:$4 sm:$0xff]  }
 0x7ec   :  { %v20551_v23 = vpop.f32.mrf.mxu0  ;;  %16920 = vmatmul.mubr.bf16.vlgmr.msra.gmra.mxu0 %v25152_v37 }
 0x7ed   :  { %v12100_v40 = vpop.f32.mrf.mxu1  ;;  %16963 = vmatmul.mubr.bf16.vlgmr.msra.gmra.mxu1 %v25153_v30  ;;  %16974 = vmatpush1.bf16.msra.mxu0 %v23310_v39  ;;  %v23369_v39 = vld [vmem:[#allocation5 + $0x4714] ss:$72 sps:$4 sm:$0xff]  }
 0x7ee   :  { %v20552_v42 = vpop.f32.mrf.mxu0  ;;  %17017 = vmatpush1.bf16.msra.mxu1 %v23313_v33  ;;  %16975 = vmatprep.subr.bf16.mxu0 %v23318_v11  ;;  %v23364_v33 = vld [vmem:[#allocation5 + $0x3e10] ss:$72 sps:$4 sm:$0xff]  }
 0x7ef   :  { %v20553_v16 = vadd.f32 %v20552_v42, %v20551_v23  ;;  %v20635_v60 = vpop.f32.mrf.mxu1  ;;  %17018 = vmatprep.subr.bf16.mxu1 %v23321_v18  ;;  %17005 = vmatprep.mubr.bf16.mxu0 %v25154_v51  ;;  %v23367_v11 = vld [vmem:[#allocation5 + $0x4710] ss:$72 sps:$4 sm:$0xff]   ;;  %v23372_v18 = vld [vmem:[#allocation5 + $0x3d84] ss:$72 sps:$4 sm:$0xff]   ;;  %v23378_v42 = vld [vmem:[#allocation5 + $0x3cf4] ss:$72 sps:$4 sm:$0xff]  }
 0x7f0   :  { %v20554_v47 = vpop.f32.mrf.mxu0  ;;  %17048 = vmatprep.mubr.bf16.mxu1 %v25155_v62  ;;  %v23375_v23 = vld [vmem:[#allocation5 + $0x4684] ss:$72 sps:$4 sm:$0xff]  }
 0x7f1   :  { %v12060_v27 = vadd.f32 %v20553_v16, %v24915_v7  ;;  %v12103_v6 = vpop.f32.mrf.mxu1  ;;  %16976 = vmatpush1.bf16.msra.mxu0 %v23316_v22  ;;  %v23331_v7 = vld [vmem:[#allocation5 + $0x4170] ss:$72 sps:$4 sm:$0xff]   ;;  %v23373_v22 = vld [vmem:[#allocation5 + $0x4680] ss:$72 sps:$4 sm:$0xff]   ;;  %v23384_v60 = vld [vmem:[#allocation5 + $0x3c64] ss:$72 sps:$4 sm:$0xff]  }
 0x7f2   :  { %v20555_v35 = vpop.f32.mrf.mxu0  ;;  %17019 = vmatpush1.bf16.msra.mxu1 %v23319_v26  ;;  %16977 = vmatprep.subr.bf16.mxu0 %v23324_v29  ;;  %v23381_v26 = vld [vmem:[#allocation5 + $0x45f4] ss:$72 sps:$4 sm:$0xff]   ;;  %v23376_v29 = vld [vmem:[#allocation5 + $0x3cf0] ss:$72 sps:$4 sm:$0xff]  }
 0x7f3   :  { %v24924_v10 = vadd.f32 %v12100_v40, %v12060_v27  ;;  %v20556_v1 = vadd.f32 %v20555_v35, %v20554_v47  ;;  %v20636_v17 = vpop.f32.mrf.mxu1  ;;  %17020 = vmatprep.subr.bf16.mxu1 %v23327_v61  ;;  %v23370_v40 = vld [vmem:[#allocation5 + $0x3d80] ss:$72 sps:$4 sm:$0xff]   ;;  %v23379_v16 = vld [vmem:[#allocation5 + $0x45f0] ss:$72 sps:$4 sm:$0xff]   ;;  %v23387_v61 = vld [vmem:[#allocation5 + $0x4564] ss:$72 sps:$4 sm:$0xff]  }
 0x7f4   :  { %v23382_v47 = vld [vmem:[#allocation5 + $0x3c60] ss:$72 sps:$4 sm:$0xff]   ;;  %v23388_v35 = vld [vmem:[#allocation5 + $0x3bd0] ss:$72 sps:$4 sm:$0xff]  }
 0x7f5   :  { %v12063_v52 = vadd.f32 %v20556_v1, %v24917_v49  ;;  %16978 = vmatpush1.bf16.msra.mxu0 %v23322_v58  ;;  %v23340_v49 = vld [vmem:[#allocation5 + $0x3750] ss:$72 sps:$4 sm:$0xff]   ;;  %v23385_v27 = vld [vmem:[#allocation5 + $0x4560] ss:$72 sps:$4 sm:$0xff]   ;;  %v23393_v58 = vld [vmem:[#allocation5 + $0x44d4] ss:$72 sps:$4 sm:$0xff]  }
 0x7f6   :  { %17021 = vmatpush1.bf16.msra.mxu1 %v23325_v38  ;;  %16979 = vmatprep.subr.bf16.mxu0 %v23330_v5  ;;  %v23391_v38 = vld [vmem:[#allocation5 + $0x44d0] ss:$72 sps:$4 sm:$0xff]   ;;  %v23396_v5 = vld [vmem:[#allocation5 + $0x3b44] ss:$72 sps:$4 sm:$0xff]   ;;  %v23394_v17 = vld [vmem:[#allocation5 + $0x3b40] ss:$72 sps:$4 sm:$0xff]  }
 0x7f7   :  { %v24927_v31 = vadd.f32 %v12103_v6, %v12063_v52  ;;  %17022 = vmatprep.subr.bf16.mxu1 %v23333_v13  ;;  %v23390_v6 = vld [vmem:[#allocation5 + $0x3bd4] ss:$72 sps:$4 sm:$0xff]   ;;  %v23399_v1 = vld [vmem:[#allocation5 + $0x4444] ss:$72 sps:$4 sm:$0xff]   ;;  %v23397_v13 = vld [vmem:[#allocation5 + $0x4440] ss:$72 sps:$4 sm:$0xff]  }
 0x7f8   :  { %v23402_v52 = vld [vmem:[#allocation5 + $0x3ab4] ss:$72 sps:$4 sm:$0xff]  }
 0x7f9   :  { %16980 = vmatpush1.bf16.msra.mxu0 %v23328_v24  ;;  %v23405_v24 = vld [vmem:[#allocation5 + $0x43b4] ss:$72 sps:$4 sm:$0xff]  }
 0x7fa   :  { %17023 = vmatpush1.bf16.msra.mxu1 %v23331_v7  ;;  %16981 = vmatprep.subr.bf16.mxu0 %v23336_v19  ;;  %v23400_v7 = vld [vmem:[#allocation5 + $0x3ab0] ss:$72 sps:$4 sm:$0xff]  }
 0x7fb   :  { %17024 = vmatprep.subr.bf16.mxu1 %v23339_v48  ;;  %v23403_v19 = vld [vmem:[#allocation5 + $0x43b0] ss:$72 sps:$4 sm:$0xff]   ;;  %v23408_v48 = vld [vmem:[#allocation5 + $0x42c] ss:$72 sps:$4 sm:$0xff]  }
 0x7fd   :  { %16982 = vmatpush1.bf16.msra.mxu0 %v23334_v45  ;;  %v23411_v45 = vld [vmem:[#allocation5 + $0xd2c] ss:$72 sps:$4 sm:$0xff]  }
 0x7fe   :  { %17025 = vmatpush1.bf16.msra.mxu1 %v23337_v20  ;;  %16983 = vmatprep.subr.bf16.mxu0 %v23342_v55  ;;  %v23406_v20 = vld [vmem:[#allocation5 + $0x428] ss:$72 sps:$4 sm:$0xff]  }
 0x7ff   :  { %17026 = vmatprep.subr.bf16.mxu1 %v23345_v44  ;;  %v23409_v55 = vld [vmem:[#allocation5 + $0xd28] ss:$72 sps:$4 sm:$0xff]   ;;  %v23414_v44 = vld [vmem:[#allocation5 + $0x39c] ss:$72 sps:$4 sm:$0xff]  }
 0x801   :  { %16984 = vmatpush1.bf16.msra.mxu0 %v23340_v49  ;;  %v23417_v49 = vld [vmem:[#allocation5 + $0xc9c] ss:$72 sps:$4 sm:$0xff]  }
 0x802   :  { %17027 = vmatpush1.bf16.msra.mxu1 %v23343_v43  ;;  %16985 = vmatprep.subr.bf16.mxu0 %v23348_v34  ;;  %v25156_v34 = vld [vmem:[#allocation21_spill] sm:$0xff] }
 0x803   :  { %17028 = vmatprep.subr.bf16.mxu1 %v23351_v36 }
 0x805   :  { %16986 = vmatpush1.bf16.msra.mxu0 %v23346_v12  ;;  %v25157_v12 = vld [vmem:[#allocation22_spill] sm:$0xff] }
 0x806   :  { %17029 = vmatpush1.bf16.msra.mxu1 %v23349_v57  ;;  %16987 = vmatprep.subr.bf16.mxu0 %v23354_v0  ;;  %v23412_v57 = vld [vmem:[#allocation5 + $0x398] ss:$72 sps:$4 sm:$0xff]  }
 0x807   :  { %17030 = vmatprep.subr.bf16.mxu1 %v23357_v15 }
 0x809   :  { %16988 = vmatpush1.bf16.msra.mxu0 %v23352_v46  ;;  %v23415_v46 = vld [vmem:[#allocation5 + $0xc98] ss:$72 sps:$4 sm:$0xff]  }
 0x80a   :  { %17031 = vmatpush1.bf16.msra.mxu1 %v23355_v32  ;;  %16989 = vmatprep.subr.bf16.mxu0 %v23360_v2  ;;  %v23420_v32 = vld [vmem:[#allocation5 + $0x30c] ss:$72 sps:$4 sm:$0xff]  }
 0x80b   :  { %17032 = vmatprep.subr.bf16.mxu1 %v23363_v59  ;;  %v23423_v59 = vld [vmem:[#allocation5 + $0xc0c] ss:$72 sps:$4 sm:$0xff]  }
 0x80d   :  { %16990 = vmatpush2.bf16.msra.mxu0 %v23358_v14 }
 0x80e   :  { %17033 = vmatpush2.bf16.msra.mxu1 %v23361_v28  ;;  %16991 = vmatprep.subr.bf16.mxu0 %v23366_v25 }
 0x80f   :  { %17034 = vmatprep.subr.bf16.mxu1 %v23369_v39  ;;  %v23418_v39 = vld [vmem:[#allocation5 + $0x308] ss:$72 sps:$4 sm:$0xff]  }
 0x811   :  { %16992 = vmatpush2.bf16.msra.mxu0 %v23364_v33 }
 0x812   :  { %17035 = vmatpush2.bf16.msra.mxu1 %v23367_v11  ;;  %16993 = vmatprep.subr.bf16.mxu0 %v23372_v18  ;;  %v23421_v18 = vld [vmem:[#allocation5 + $0xc08] ss:$72 sps:$4 sm:$0xff]  }
 0x813   :  { %17036 = vmatprep.subr.bf16.mxu1 %v23375_v23  ;;  %v23426_v23 = vld [vmem:[#allocation5 + $0x27c] ss:$72 sps:$4 sm:$0xff]  }
 0x815   :  { %16994 = vmatpush2.bf16.msra.mxu0 %v23370_v40 }
 0x816   :  { %17037 = vmatpush2.bf16.msra.mxu1 %v23373_v22  ;;  %16995 = vmatprep.subr.bf16.mxu0 %v23378_v42  ;;  %v23429_v22 = vld [vmem:[#allocation5 + $0xb7c] ss:$72 sps:$4 sm:$0xff]  }
 0x817   :  { %17038 = vmatprep.subr.bf16.mxu1 %v23381_v26  ;;  %v23424_v26 = vld [vmem:[#allocation5 + $0x278] ss:$72 sps:$4 sm:$0xff]  }
 0x819   :  { %16996 = vmatpush2.bf16.msra.mxu0 %v23376_v29  ;;  %v23427_v29 = vld [vmem:[#allocation5 + $0xb78] ss:$72 sps:$4 sm:$0xff]  }
 0x81a   :  { %17039 = vmatpush2.bf16.msra.mxu1 %v23379_v16  ;;  %16997 = vmatprep.subr.bf16.mxu0 %v23384_v60  ;;  %v23432_v16 = vld [vmem:[#allocation5 + $0x1ec] ss:$72 sps:$4 sm:$0xff]  }
 0x81b   :  { %17040 = vmatprep.subr.bf16.mxu1 %v23387_v61  ;;  %v23435_v60 = vld [vmem:[#allocation5 + $0xaec] ss:$72 sps:$4 sm:$0xff]   ;;  %v23430_v61 = vld [vmem:[#allocation5 + $0x1e8] ss:$72 sps:$4 sm:$0xff]  }
 0x81d   :  { %16998 = vmatpush2.bf16.msra.mxu0 %v23382_v47  ;;  %v23433_v47 = vld [vmem:[#allocation5 + $0xae8] ss:$72 sps:$4 sm:$0xff]  }
 0x81e   :  { %17041 = vmatpush2.bf16.msra.mxu1 %v23385_v27  ;;  %16999 = vmatprep.subr.bf16.mxu0 %v23390_v6  ;;  %v23438_v27 = vld [vmem:[#allocation5 + $0x15c] ss:$72 sps:$4 sm:$0xff]  }
 0x81f   :  { %17042 = vmatprep.subr.bf16.mxu1 %v23393_v58  ;;  %v23441_v6 = vld [vmem:[#allocation5 + $0xa5c] ss:$72 sps:$4 sm:$0xff]   ;;  %v23436_v58 = vld [vmem:[#allocation5 + $0x158] ss:$72 sps:$4 sm:$0xff]  }
 0x821   :  { %17000 = vmatpush2.bf16.msra.mxu0 %v23388_v35  ;;  %v23439_v35 = vld [vmem:[#allocation5 + $0xa58] ss:$72 sps:$4 sm:$0xff]  }
 0x822   :  { %17043 = vmatpush2.bf16.msra.mxu1 %v23391_v38  ;;  %17001 = vmatprep.subr.bf16.mxu0 %v23396_v5  ;;  %v23444_v38 = vld [vmem:[#allocation5 + $0xcc] ss:$72 sps:$4 sm:$0xff]  }
 0x823   :  { %17044 = vmatprep.subr.bf16.mxu1 %v23399_v1  ;;  %v23447_v5 = vld [vmem:[#allocation5 + $0x9cc] ss:$72 sps:$4 sm:$0xff]   ;;  %v23442_v1 = vld [vmem:[#allocation5 + $0xc8] ss:$72 sps:$4 sm:$0xff]  }
 0x825   :  { %17002 = vmatpush2.bf16.msra.mxu0 %v23394_v17  ;;  %v23445_v17 = vld [vmem:[#allocation5 + $0x9c8] ss:$72 sps:$4 sm:$0xff]  }
 0x826   :  { %17045 = vmatpush2.bf16.msra.mxu1 %v23397_v13  ;;  %17003 = vmatprep.subr.bf16.mxu0 %v23402_v52  ;;  %v23450_v13 = vld [vmem:[#allocation5 + $0x3c] ss:$72 sps:$4 sm:$0xff]  }
 0x827   :  { %17046 = vmatprep.subr.bf16.mxu1 %v23405_v24  ;;  %v23453_v52 = vld [vmem:[#allocation5 + $0x93c] ss:$72 sps:$4 sm:$0xff]   ;;  %v23448_v24 = vld [vmem:[#allocation5 + $0x38] ss:$72 sps:$4 sm:$0xff]  }
 0x829   :  { %17004 = vmatpush2.bf16.msra.mxu0 %v23400_v7  ;;  %v23451_v7 = vld [vmem:[#allocation5 + $0x938] ss:$72 sps:$4 sm:$0xff]  }
 0x82a   :  { %17047 = vmatpush2.bf16.msra.mxu1 %v23403_v19  ;;  %17059 = vmatprep.subr.bf16.mxu0 %v23408_v48  ;;  %v23456_v19 = vld [vmem:[#allocation5 + $0x8ac] ss:$72 sps:$4 sm:$0xff]  }
 0x82b   :  { %17102 = vmatprep.subr.bf16.mxu1 %v23411_v45  ;;  %v23459_v48 = vld [vmem:[#allocation5 + $0x11ac] ss:$72 sps:$4 sm:$0xff]   ;;  %v23454_v45 = vld [vmem:[#allocation5 + $0x8a8] ss:$72 sps:$4 sm:$0xff]  }
 0x82c   :  { %v16749_v43 = vpop.f32.mrf.mxu0  ;;  %17006 = vmatmul.mubr.bf16.vlgmr.msra.gmra.mxu0 %v25156_v34 }
 0x82d   :  { %v16792_v36 = vpop.f32.mrf.mxu1  ;;  %17049 = vmatmul.mubr.bf16.vlgmr.msra.gmra.mxu1 %v25157_v12  ;;  %17060 = vmatpush1.bf16.msra.mxu0 %v23406_v20  ;;  %v23457_v20 = vld [vmem:[#allocation5 + $0x11a8] ss:$72 sps:$4 sm:$0xff]  }
 0x82e   :  { %v24931_v0 = vadd.f32 %v16792_v36, %v16749_v43  ;;  %v16751_v15 = vpop.f32.mrf.mxu0  ;;  %17103 = vmatpush1.bf16.msra.mxu1 %v23409_v55  ;;  %17061 = vmatprep.subr.bf16.mxu0 %v23414_v44  ;;  %v23462_v55 = vld [vmem:[#allocation5 + $0x81c] ss:$72 sps:$4 sm:$0xff]   ;;  %v23463_v43 = vld [vmem:[#allocation5 + $0x1118] ss:$72 sps:$4 sm:$0xff]   ;;  %v23468_v36 = vld [vmem:[#allocation5 + $0x78c] ss:$72 sps:$4 sm:$0xff]  }
 0x82f   :  { %v16794_v2 = vpop.f32.mrf.mxu1  ;;  %17104 = vmatprep.subr.bf16.mxu1 %v23417_v49  ;;  %17091 = vmatprep.mubr.bf16.mxu0 %v24366_v53  ;;  %v23465_v44 = vld [vmem:[#allocation5 + $0x111c] ss:$72 sps:$4 sm:$0xff]   ;;  %v23460_v49 = vld [vmem:[#allocation5 + $0x818] ss:$72 sps:$4 sm:$0xff]  }
 0x830   :  { %v24934_v14 = vadd.f32 %v16794_v2, %v16751_v15  ;;  %v16753_v28 = vpop.f32.mrf.mxu0  ;;  %17134 = vmatprep.mubr.bf16.mxu1 %v24368_v54  ;;  %v23466_v15 = vld [vmem:[#allocation5 + $0x788] ss:$72 sps:$4 sm:$0xff]   ;;  %v23477_v2 = vld [vmem:[#allocation5 + $0xffc] ss:$72 sps:$4 sm:$0xff]  }
 0x831   :  { %v16796_v25 = vpop.f32.mrf.mxu1  ;;  %17062 = vmatpush1.bf16.msra.mxu0 %v23412_v57  ;;  %v23471_v57 = vld [vmem:[#allocation5 + $0x108c] ss:$72 sps:$4 sm:$0xff]  }
 0x832   :  { %v24937_v33 = vadd.f32 %v16796_v25, %v16753_v28  ;;  %v16755_v11 = vpop.f32.mrf.mxu0  ;;  %17105 = vmatpush1.bf16.msra.mxu1 %v23415_v46  ;;  %17063 = vmatprep.subr.bf16.mxu0 %v23420_v32  ;;  %v23469_v46 = vld [vmem:[#allocation5 + $0x1088] ss:$72 sps:$4 sm:$0xff]   ;;  %v23474_v32 = vld [vmem:[#allocation5 + $0x6fc] ss:$72 sps:$4 sm:$0xff]   ;;  %v23475_v28 = vld [vmem:[#allocation5 + $0xff8] ss:$72 sps:$4 sm:$0xff]  }
 0x833   :  { %v16798_v40 = vpop.f32.mrf.mxu1  ;;  %17106 = vmatprep.subr.bf16.mxu1 %v23423_v59  ;;  %v23472_v59 = vld [vmem:[#allocation5 + $0x6f8] ss:$72 sps:$4 sm:$0xff]   ;;  %v23480_v25 = vld [vmem:[#allocation5 + $0x66c] ss:$72 sps:$4 sm:$0xff]  }
 0x834   :  { %v24939_v42 = vadd.f32 %v16798_v40, %v16755_v11  ;;  %v23478_v11 = vld [vmem:[#allocation5 + $0x668] ss:$72 sps:$4 sm:$0xff]   ;;  %v23489_v40 = vld [vmem:[#allocation5 + $0xedc] ss:$72 sps:$4 sm:$0xff]  }
 0x835   :  { %17064 = vmatpush1.bf16.msra.mxu0 %v23418_v39  ;;  %v23483_v39 = vld [vmem:[#allocation5 + $0xf6c] ss:$72 sps:$4 sm:$0xff]  }
 0x836   :  { %17107 = vmatpush1.bf16.msra.mxu1 %v23421_v18  ;;  %17065 = vmatprep.subr.bf16.mxu0 %v23426_v23  ;;  %v23481_v18 = vld [vmem:[#allocation5 + $0xf68] ss:$72 sps:$4 sm:$0xff]   ;;  %v23486_v23 = vld [vmem:[#allocation5 + $0x5dc] ss:$72 sps:$4 sm:$0xff]  }
 0x837   :  { %17108 = vmatprep.subr.bf16.mxu1 %v23429_v22  ;;  %v23484_v22 = vld [vmem:[#allocation5 + $0x5d8] ss:$72 sps:$4 sm:$0xff]  }
 0x839   :  { %17066 = vmatpush1.bf16.msra.mxu0 %v23424_v26  ;;  %v23487_v26 = vld [vmem:[#allocation5 + $0xed8] ss:$72 sps:$4 sm:$0xff]  }
 0x83a   :  { %17109 = vmatpush1.bf16.msra.mxu1 %v23427_v29  ;;  %17067 = vmatprep.subr.bf16.mxu0 %v23432_v16  ;;  %v23492_v29 = vld [vmem:[#allocation5 + $0x54c] ss:$72 sps:$4 sm:$0xff]  }
 0x83b   :  { %17110 = vmatprep.subr.bf16.mxu1 %v23435_v60  ;;  %v23495_v16 = vld [vmem:[#allocation5 + $0xe4c] ss:$72 sps:$4 sm:$0xff]   ;;  %v23490_v60 = vld [vmem:[#allocation5 + $0x548] ss:$72 sps:$4 sm:$0xff]  }
 0x83d   :  { %17068 = vmatpush1.bf16.msra.mxu0 %v23430_v61  ;;  %v23493_v61 = vld [vmem:[#allocation5 + $0xe48] ss:$72 sps:$4 sm:$0xff]  }
 0x83e   :  { %17111 = vmatpush1.bf16.msra.mxu1 %v23433_v47  ;;  %17069 = vmatprep.subr.bf16.mxu0 %v23438_v27  ;;  %v23498_v47 = vld [vmem:[#allocation5 + $0x4bc] ss:$72 sps:$4 sm:$0xff]  }
 0x83f   :  { %17112 = vmatprep.subr.bf16.mxu1 %v23441_v6  ;;  %v23501_v27 = vld [vmem:[#allocation5 + $0xdbc] ss:$72 sps:$4 sm:$0xff]   ;;  %v23496_v6 = vld [vmem:[#allocation5 + $0x4b8] ss:$72 sps:$4 sm:$0xff]  }
 0x841   :  { %17070 = vmatpush1.bf16.msra.mxu0 %v23436_v58  ;;  %v23499_v58 = vld [vmem:[#allocation5 + $0xdb8] ss:$72 sps:$4 sm:$0xff]  }
 0x842   :  { %17113 = vmatpush1.bf16.msra.mxu1 %v23439_v35  ;;  %17071 = vmatprep.subr.bf16.mxu0 %v23444_v38  ;;  %v23504_v35 = vld [vmem:[#allocation5 + $0x162c] ss:$72 sps:$4 sm:$0xff]  }
 0x843   :  { %17114 = vmatprep.subr.bf16.mxu1 %v23447_v5  ;;  %v23507_v38 = vld [vmem:[#allocation5 + $0x1f2c] ss:$72 sps:$4 sm:$0xff]   ;;  %v23502_v5 = vld [vmem:[#allocation5 + $0x1628] ss:$72 sps:$4 sm:$0xff]  }
 0x845   :  { %17072 = vmatpush1.bf16.msra.mxu0 %v23442_v1  ;;  %v23505_v1 = vld [vmem:[#allocation5 + $0x1f28] ss:$72 sps:$4 sm:$0xff]  }
 0x846   :  { %17115 = vmatpush1.bf16.msra.mxu1 %v23445_v17  ;;  %17073 = vmatprep.subr.bf16.mxu0 %v23450_v13  ;;  %v23510_v17 = vld [vmem:[#allocation5 + $0x159c] ss:$72 sps:$4 sm:$0xff]  }
 0x847   :  { %17116 = vmatprep.subr.bf16.mxu1 %v23453_v52  ;;  %v23513_v13 = vld [vmem:[#allocation5 + $0x1e9c] ss:$72 sps:$4 sm:$0xff]  }
 0x849   :  { %17074 = vmatpush1.bf16.msra.mxu0 %v23448_v24 }
 0x84a   :  { %17117 = vmatpush1.bf16.msra.mxu1 %v23451_v7  ;;  %17075 = vmatprep.subr.bf16.mxu0 %v23456_v19  ;;  %v23508_v19 = vld [vmem:[#allocation5 + $0x1598] ss:$72 sps:$4 sm:$0xff]  }
 0x84b   :  { %17118 = vmatprep.subr.bf16.mxu1 %v23459_v48 }
 0x84d   :  { %17076 = vmatpush2.bf16.msra.mxu0 %v23454_v45  ;;  %v23511_v45 = vld [vmem:[#allocation5 + $0x1e98] ss:$72 sps:$4 sm:$0xff]  }
 0x84e   :  { %17119 = vmatpush2.bf16.msra.mxu1 %v23457_v20  ;;  %17077 = vmatprep.subr.bf16.mxu0 %v23462_v55  ;;  %v23516_v20 = vld [vmem:[#allocation5 + $0x150c] ss:$72 sps:$4 sm:$0xff]  }
 0x84f   :  { %17120 = vmatprep.subr.bf16.mxu1 %v23465_v44 }
 0x851   :  { %17078 = vmatpush2.bf16.msra.mxu0 %v23460_v49 }
 0x852   :  { %17121 = vmatpush2.bf16.msra.mxu1 %v23463_v43  ;;  %17079 = vmatprep.subr.bf16.mxu0 %v23468_v36  ;;  %v23519_v43 = vld [vmem:[#allocation5 + $0x1e0c] ss:$72 sps:$4 sm:$0xff]  }
 0x853   :  { %17122 = vmatprep.subr.bf16.mxu1 %v23471_v57 }
 0x855   :  { %17080 = vmatpush2.bf16.msra.mxu0 %v23466_v15 }
 0x856   :  { %17123 = vmatpush2.bf16.msra.mxu1 %v23469_v46  ;;  %17081 = vmatprep.subr.bf16.mxu0 %v23474_v32  ;;  %v23514_v46 = vld [vmem:[#allocation5 + $0x1508] ss:$72 sps:$4 sm:$0xff]  }
 0x857   :  { %17124 = vmatprep.subr.bf16.mxu1 %v23477_v2  ;;  %v23517_v2 = vld [vmem:[#allocation5 + $0x1e08] ss:$72 sps:$4 sm:$0xff]  }
 0x859   :  { %17082 = vmatpush2.bf16.msra.mxu0 %v23472_v59 }
 0x85a   :  { %17125 = vmatpush2.bf16.msra.mxu1 %v23475_v28  ;;  %17083 = vmatprep.subr.bf16.mxu0 %v23480_v25 }
 0x85b   :  { %17126 = vmatprep.subr.bf16.mxu1 %v23483_v39  ;;  %v23525_v39 = vld [vmem:[#allocation5 + $0x1d7c] ss:$72 sps:$4 sm:$0xff]  }
 0x85d   :  { %17084 = vmatpush2.bf16.msra.mxu0 %v23478_v11 }
 0x85e   :  { %17127 = vmatpush2.bf16.msra.mxu1 %v23481_v18  ;;  %17085 = vmatprep.subr.bf16.mxu0 %v23486_v23  ;;  %v23520_v18 = vld [vmem:[#allocation5 + $0x1478] ss:$72 sps:$4 sm:$0xff]   ;;  %v23528_v23 = vld [vmem:[#allocation5 + $0x13ec] ss:$72 sps:$4 sm:$0xff]  }
 0x85f   :  { %17128 = vmatprep.subr.bf16.mxu1 %v23489_v40  ;;  %v23531_v40 = vld [vmem:[#allocation5 + $0x1cec] ss:$72 sps:$4 sm:$0xff]  }
 0x861   :  { %17086 = vmatpush2.bf16.msra.mxu0 %v23484_v22  ;;  %v23526_v22 = vld [vmem:[#allocation5 + $0x13e8] ss:$72 sps:$4 sm:$0xff]  }
 0x862   :  { %17129 = vmatpush2.bf16.msra.mxu1 %v23487_v26  ;;  %17087 = vmatprep.subr.bf16.mxu0 %v23492_v29  ;;  %v23529_v26 = vld [vmem:[#allocation5 + $0x1ce8] ss:$72 sps:$4 sm:$0xff]   ;;  %v23534_v29 = vld [vmem:[#allocation5 + $0x135c] ss:$72 sps:$4 sm:$0xff]  }
 0x863   :  { %17130 = vmatprep.subr.bf16.mxu1 %v23495_v16  ;;  %v23532_v16 = vld [vmem:[#allocation5 + $0x1358] ss:$72 sps:$4 sm:$0xff]  }
 0x865   :  { %17088 = vmatpush2.bf16.msra.mxu0 %v23490_v60  ;;  %v23535_v60 = vld [vmem:[#allocation5 + $0x1c58] ss:$72 sps:$4 sm:$0xff]  }
 0x866   :  { %17131 = vmatpush2.bf16.msra.mxu1 %v23493_v61  ;;  %17089 = vmatprep.subr.bf16.mxu0 %v23498_v47  ;;  %v23540_v61 = vld [vmem:[#allocation5 + $0x12cc] ss:$72 sps:$4 sm:$0xff]  }
 0x867   :  { %17132 = vmatprep.subr.bf16.mxu1 %v23501_v27  ;;  %v23543_v47 = vld [vmem:[#allocation5 + $0x1bcc] ss:$72 sps:$4 sm:$0xff]   ;;  %v23538_v27 = vld [vmem:[#allocation5 + $0x12c8] ss:$72 sps:$4 sm:$0xff]  }
 0x869   :  { %17090 = vmatpush2.bf16.msra.mxu0 %v23496_v6  ;;  %v23541_v6 = vld [vmem:[#allocation5 + $0x1bc8] ss:$72 sps:$4 sm:$0xff]  }
 0x86a   :  { %17133 = vmatpush2.bf16.msra.mxu1 %v23499_v58  ;;  %17145 = vmatprep.subr.bf16.mxu0 %v23504_v35  ;;  %v23546_v58 = vld [vmem:[#allocation5 + $0x123c] ss:$72 sps:$4 sm:$0xff]  }
 0x86b   :  { %17188 = vmatprep.subr.bf16.mxu1 %v23507_v38  ;;  %v23549_v35 = vld [vmem:[#allocation5 + $0x1b3c] ss:$72 sps:$4 sm:$0xff]   ;;  %v23544_v38 = vld [vmem:[#allocation5 + $0x1238] ss:$72 sps:$4 sm:$0xff]  }
 0x86c   :  { %v16835_v52 = vpop.f32.mrf.mxu0  ;;  %17092 = vmatmul.mubr.bf16.vlgmr.msra.gmra.mxu0 %v24372_v8 }
 0x86d   :  { %v16836_v24 = vadd.f32 %v16835_v52, %v24931_v0  ;;  %v16878_v7 = vpop.f32.mrf.mxu1  ;;  %17135 = vmatmul.mubr.bf16.vlgmr.msra.gmra.mxu1 %v24374_v9  ;;  %17146 = vmatpush1.bf16.msra.mxu0 %v23502_v5  ;;  %v23547_v5 = vld [vmem:[#allocation5 + $0x1b38] ss:$72 sps:$4 sm:$0xff]   ;;  %v23553_v52 = vld [vmem:[#allocation5 + $0x23a8] ss:$72 sps:$4 sm:$0xff]  }
 0x86e   :  { %v16837_v48 = vpop.f32.mrf.mxu0  ;;  %17189 = vmatpush1.bf16.msra.mxu1 %v23505_v1  ;;  %17147 = vmatprep.subr.bf16.mxu0 %v23510_v17  ;;  %v23552_v1 = vld [vmem:[#allocation5 + $0x1aac] ss:$72 sps:$4 sm:$0xff]  }
 0x86f   :  { %v24944_v55 = vadd.f32 %v16878_v7, %v16836_v24  ;;  %v16838_v44 = vadd.f32 %v16837_v48, %v24934_v14  ;;  %v16880_v49 = vpop.f32.mrf.mxu1  ;;  %17190 = vmatprep.subr.bf16.mxu1 %v23513_v13  ;;  %17177 = vmatprep.mubr.bf16.mxu0 %v24388_v41  ;;  %v23522_v14 = vld [vmem:[#allocation5 + $0x147c] ss:$72 sps:$4 sm:$0xff]   ;;  %v23555_v17 = vld [vmem:[#allocation5 + $0x23ac] ss:$72 sps:$4 sm:$0xff]   ;;  %v23550_v13 = vld [vmem:[#allocation5 + $0x1aa8] ss:$72 sps:$4 sm:$0xff]  }
 0x870   :  { %v16839_v0 = vpop.f32.mrf.mxu0  ;;  %17220 = vmatprep.mubr.bf16.mxu1 %v25147_v4  ;;  %v23558_v24 = vld [vmem:[#allocation5 + $0x1a1c] ss:$72 sps:$4 sm:$0xff]   ;;  %v23559_v48 = vld [vmem:[#allocation5 + $0x2318] ss:$72 sps:$4 sm:$0xff]  }
 0x871   :  { %v24949_v36 = vadd.f32 %v16880_v49, %v16838_v44  ;;  %v16840_v57 = vadd.f32 %v16839_v0, %v24937_v33  ;;  %v16882_v15 = vpop.f32.mrf.mxu1  ;;  %17148 = vmatpush1.bf16.msra.mxu0 %v23508_v19  ;;  %v23523_v33 = vld [vmem:[#allocation5 + $0x1d78] ss:$72 sps:$4 sm:$0xff]   ;;  %v23561_v7 = vld [vmem:[#allocation5 + $0x231c] ss:$72 sps:$4 sm:$0xff]   ;;  %v23562_v44 = vld [vmem:[#allocation5 + $0x1988] ss:$72 sps:$4 sm:$0xff]  }
 0x872   :  { %v16841_v32 = vpop.f32.mrf.mxu0  ;;  %17191 = vmatpush1.bf16.msra.mxu1 %v23511_v45  ;;  %17149 = vmatprep.subr.bf16.mxu0 %v23516_v20  ;;  %v23556_v19 = vld [vmem:[#allocation5 + $0x1a18] ss:$72 sps:$4 sm:$0xff]   ;;  %v23564_v45 = vld [vmem:[#allocation5 + $0x198c] ss:$72 sps:$4 sm:$0xff]   ;;  %v23565_v49 = vld [vmem:[#allocation5 + $0x2288] ss:$72 sps:$4 sm:$0xff]  }
 0x873   :  { %v24952_v59 = vadd.f32 %v16882_v15, %v16840_v57  ;;  %v16842_v28 = vadd.f32 %v16841_v32, %v24939_v42  ;;  %v16884_v25 = vpop.f32.mrf.mxu1  ;;  %17192 = vmatprep.subr.bf16.mxu1 %v23519_v43  ;;  %v23537_v42 = vld [vmem:[#allocation5 + $0x1c5c] ss:$72 sps:$4 sm:$0xff]   ;;  %v23567_v20 = vld [vmem:[#allocation5 + $0x228c] ss:$72 sps:$4 sm:$0xff]   ;;  %v23568_v57 = vld [vmem:[#allocation5 + $0x18f8] ss:$72 sps:$4 sm:$0xff]  }
 0x874   :  { %v23570_v43 = vld [vmem:[#allocation5 + $0x18fc] ss:$72 sps:$4 sm:$0xff]   ;;  %v23571_v15 = vld [vmem:[#allocation5 + $0x21f8] ss:$72 sps:$4 sm:$0xff]   ;;  %v23579_v32 = vld [vmem:[#allocation5 + $0x216c] ss:$72 sps:$4 sm:$0xff]  }
 0x875   :  { %v24955_v11 = vadd.f32 %v16884_v25, %v16842_v28  ;;  %17150 = vmatpush1.bf16.msra.mxu0 %v23514_v46  ;;  %v23573_v0 = vld [vmem:[#allocation5 + $0x21fc] ss:$72 sps:$4 sm:$0xff]   ;;  %v23576_v46 = vld [vmem:[#allocation5 + $0x186c] ss:$72 sps:$4 sm:$0xff]  }
 0x876   :  { %17193 = vmatpush1.bf16.msra.mxu1 %v23517_v2  ;;  %17151 = vmatprep.subr.bf16.mxu0 %v23522_v14  ;;  %v23574_v2 = vld [vmem:[#allocation5 + $0x1868] ss:$72 sps:$4 sm:$0xff]   ;;  %v23582_v28 = vld [vmem:[#allocation5 + $0x17dc] ss:$72 sps:$4 sm:$0xff]  }
 0x877   :  { %17194 = vmatprep.subr.bf16.mxu1 %v23525_v39  ;;  %v23577_v14 = vld [vmem:[#allocation5 + $0x2168] ss:$72 sps:$4 sm:$0xff]   ;;  %v23585_v25 = vld [vmem:[#allocation5 + $0x20dc] ss:$72 sps:$4 sm:$0xff]   ;;  %v23580_v39 = vld [vmem:[#allocation5 + $0x17d8] ss:$72 sps:$4 sm:$0xff]  }
 0x879   :  { %17152 = vmatpush1.bf16.msra.mxu0 %v23520_v18  ;;  %v23583_v18 = vld [vmem:[#allocation5 + $0x20d8] ss:$72 sps:$4 sm:$0xff]  }
 0x87a   :  { %17195 = vmatpush1.bf16.msra.mxu1 %v23523_v33  ;;  %17153 = vmatprep.subr.bf16.mxu0 %v23528_v23  ;;  %v23588_v33 = vld [vmem:[#allocation5 + $0x174c] ss:$72 sps:$4 sm:$0xff]  }
 0x87b   :  { %17196 = vmatprep.subr.bf16.mxu1 %v23531_v40  ;;  %v23591_v23 = vld [vmem:[#allocation5 + $0x204c] ss:$72 sps:$4 sm:$0xff]   ;;  %v23586_v40 = vld [vmem:[#allocation5 + $0x1748] ss:$72 sps:$4 sm:$0xff]  }
 0x87d   :  { %17154 = vmatpush1.bf16.msra.mxu0 %v23526_v22  ;;  %v23589_v22 = vld [vmem:[#allocation5 + $0x2048] ss:$72 sps:$4 sm:$0xff]  }
 0x87e   :  { %17197 = vmatpush1.bf16.msra.mxu1 %v23529_v26  ;;  %17155 = vmatprep.subr.bf16.mxu0 %v23534_v29  ;;  %v23594_v26 = vld [vmem:[#allocation5 + $0x16bc] ss:$72 sps:$4 sm:$0xff]  }
 0x87f   :  { %17198 = vmatprep.subr.bf16.mxu1 %v23537_v42  ;;  %v23597_v29 = vld [vmem:[#allocation5 + $0x1fbc] ss:$72 sps:$4 sm:$0xff]   ;;  %v23592_v42 = vld [vmem:[#allocation5 + $0x16b8] ss:$72 sps:$4 sm:$0xff]  }
 0x881   :  { %17156 = vmatpush1.bf16.msra.mxu0 %v23532_v16  ;;  %v23595_v16 = vld [vmem:[#allocation5 + $0x1fb8] ss:$72 sps:$4 sm:$0xff]  }
 0x882   :  { %17199 = vmatpush1.bf16.msra.mxu1 %v23535_v60  ;;  %17157 = vmatprep.subr.bf16.mxu0 %v23540_v61  ;;  %v23600_v60 = vld [vmem:[#allocation5 + $0x282c] ss:$72 sps:$4 sm:$0xff]  }
 0x883   :  { %17200 = vmatprep.subr.bf16.mxu1 %v23543_v47  ;;  %v23603_v61 = vld [vmem:[#allocation5 + $0x312c] ss:$72 sps:$4 sm:$0xff]   ;;  %v23598_v47 = vld [vmem:[#allocation5 + $0x2828] ss:$72 sps:$4 sm:$0xff]  }
 0x885   :  { %17158 = vmatpush1.bf16.msra.mxu0 %v23538_v27  ;;  %v23601_v27 = vld [vmem:[#allocation5 + $0x3128] ss:$72 sps:$4 sm:$0xff]  }
 0x886   :  { %17201 = vmatpush1.bf16.msra.mxu1 %v23541_v6  ;;  %17159 = vmatprep.subr.bf16.mxu0 %v23546_v58  ;;  %v23606_v6 = vld [vmem:[#allocation5 + $0x279c] ss:$72 sps:$4 sm:$0xff]  }
 0x887   :  { %17202 = vmatprep.subr.bf16.mxu1 %v23549_v35  ;;  %v23609_v58 = vld [vmem:[#allocation5 + $0x309c] ss:$72 sps:$4 sm:$0xff]  }
 0x889   :  { %17160 = vmatpush1.bf16.msra.mxu0 %v23544_v38 }
 0x88a   :  { %17203 = vmatpush1.bf16.msra.mxu1 %v23547_v5  ;;  %17161 = vmatprep.subr.bf16.mxu0 %v23552_v1  ;;  %v23604_v1 = vld [vmem:[#allocation5 + $0x2798] ss:$72 sps:$4 sm:$0xff]  }
 0x88b   :  { %17204 = vmatprep.subr.bf16.mxu1 %v23555_v17 }
 0x88d   :  { %17162 = vmatpush2.bf16.msra.mxu0 %v23550_v13  ;;  %v23607_v13 = vld [vmem:[#allocation5 + $0x3098] ss:$72 sps:$4 sm:$0xff]  }
 0x88e   :  { %17205 = vmatpush2.bf16.msra.mxu1 %v23553_v52  ;;  %17163 = vmatprep.subr.bf16.mxu0 %v23558_v24  ;;  %v23612_v52 = vld [vmem:[#allocation5 + $0x270c] ss:$72 sps:$4 sm:$0xff]  }
 0x88f   :  { %17206 = vmatprep.subr.bf16.mxu1 %v23561_v7 }
 0x891   :  { %17164 = vmatpush2.bf16.msra.mxu0 %v23556_v19 }
 0x892   :  { %17207 = vmatpush2.bf16.msra.mxu1 %v23559_v48  ;;  %17165 = vmatprep.subr.bf16.mxu0 %v23564_v45  ;;  %v23615_v48 = vld [vmem:[#allocation5 + $0x300c] ss:$72 sps:$4 sm:$0xff]  }
 0x893   :  { %17208 = vmatprep.subr.bf16.mxu1 %v23567_v20 }
 0x895   :  { %17166 = vmatpush2.bf16.msra.mxu0 %v23562_v44 }
 0x896   :  { %17209 = vmatpush2.bf16.msra.mxu1 %v23565_v49  ;;  %17167 = vmatprep.subr.bf16.mxu0 %v23570_v43  ;;  %v23610_v49 = vld [vmem:[#allocation5 + $0x2708] ss:$72 sps:$4 sm:$0xff]  }
 0x897   :  { %17210 = vmatprep.subr.bf16.mxu1 %v23573_v0  ;;  %v23613_v0 = vld [vmem:[#allocation5 + $0x3008] ss:$72 sps:$4 sm:$0xff]  }
 0x899   :  { %17168 = vmatpush2.bf16.msra.mxu0 %v23568_v57 }
 0x89a   :  { %17211 = vmatpush2.bf16.msra.mxu1 %v23571_v15  ;;  %17169 = vmatprep.subr.bf16.mxu0 %v23576_v46 }
 0x89b   :  { %17212 = vmatprep.subr.bf16.mxu1 %v23579_v32  ;;  %v23621_v32 = vld [vmem:[#allocation5 + $0x2f7c] ss:$72 sps:$4 sm:$0xff]  }
 0x89d   :  { %17170 = vmatpush2.bf16.msra.mxu0 %v23574_v2 }
 0x89e   :  { %17213 = vmatpush2.bf16.msra.mxu1 %v23577_v14  ;;  %17171 = vmatprep.subr.bf16.mxu0 %v23582_v28  ;;  %v23616_v14 = vld [vmem:[#allocation5 + $0x2678] ss:$72 sps:$4 sm:$0xff]   ;;  %v23624_v28 = vld [vmem:[#allocation5 + $0x25ec] ss:$72 sps:$4 sm:$0xff]  }
 0x89f   :  { %17214 = vmatprep.subr.bf16.mxu1 %v23585_v25  ;;  %v23627_v25 = vld [vmem:[#allocation5 + $0x2eec] ss:$72 sps:$4 sm:$0xff]  }
 0x8a1   :  { %17172 = vmatpush2.bf16.msra.mxu0 %v23580_v39  ;;  %v23622_v39 = vld [vmem:[#allocation5 + $0x25e8] ss:$72 sps:$4 sm:$0xff]  }
 0x8a2   :  { %17215 = vmatpush2.bf16.msra.mxu1 %v23583_v18  ;;  %17173 = vmatprep.subr.bf16.mxu0 %v23588_v33  ;;  %v23625_v18 = vld [vmem:[#allocation5 + $0x2ee8] ss:$72 sps:$4 sm:$0xff]   ;;  %v23630_v33 = vld [vmem:[#allocation5 + $0x255c] ss:$72 sps:$4 sm:$0xff]  }
 0x8a3   :  { %17216 = vmatprep.subr.bf16.mxu1 %v23591_v23  ;;  %v23628_v23 = vld [vmem:[#allocation5 + $0x2558] ss:$72 sps:$4 sm:$0xff]  }
 0x8a5   :  { %17174 = vmatpush2.bf16.msra.mxu0 %v23586_v40  ;;  %v23631_v40 = vld [vmem:[#allocation5 + $0x2e58] ss:$72 sps:$4 sm:$0xff]  }
 0x8a6   :  { %17217 = vmatpush2.bf16.msra.mxu1 %v23589_v22  ;;  %17175 = vmatprep.subr.bf16.mxu0 %v23594_v26  ;;  %v23636_v22 = vld [vmem:[#allocation5 + $0x24cc] ss:$72 sps:$4 sm:$0xff]  }
 0x8a7   :  { %17218 = vmatprep.subr.bf16.mxu1 %v23597_v29  ;;  %v23639_v26 = vld [vmem:[#allocation5 + $0x2dcc] ss:$72 sps:$4 sm:$0xff]   ;;  %v23634_v29 = vld [vmem:[#allocation5 + $0x24c8] ss:$72 sps:$4 sm:$0xff]  }
 0x8a9   :  { %17176 = vmatpush2.bf16.msra.mxu0 %v23592_v42  ;;  %v23637_v42 = vld [vmem:[#allocation5 + $0x2dc8] ss:$72 sps:$4 sm:$0xff]  }
 0x8aa   :  { %17219 = vmatpush2.bf16.msra.mxu1 %v23595_v16  ;;  %17231 = vmatprep.subr.bf16.mxu0 %v23600_v60  ;;  %v23642_v16 = vld [vmem:[#allocation5 + $0x243c] ss:$72 sps:$4 sm:$0xff]  }
 0x8ab   :  { %17274 = vmatprep.subr.bf16.mxu1 %v23603_v61  ;;  %v23645_v60 = vld [vmem:[#allocation5 + $0x2d3c] ss:$72 sps:$4 sm:$0xff]   ;;  %v23640_v61 = vld [vmem:[#allocation5 + $0x2438] ss:$72 sps:$4 sm:$0xff]  }
 0x8ac   :  { %v16921_v35 = vpop.f32.mrf.mxu0  ;;  %17178 = vmatmul.mubr.bf16.vlgmr.msra.gmra.mxu0 %v25148_v56 }
 0x8ad   :  { %v16922_v38 = vadd.f32 %v16921_v35, %v24944_v55  ;;  %v16964_v5 = vpop.f32.mrf.mxu1  ;;  %17221 = vmatmul.mubr.bf16.vlgmr.msra.gmra.mxu1 %v25149_v21  ;;  %17232 = vmatpush1.bf16.msra.mxu0 %v23598_v47  ;;  %v23643_v47 = vld [vmem:[#allocation5 + $0x2d38] ss:$72 sps:$4 sm:$0xff]   ;;  %v23649_v35 = vld [vmem:[#allocation5 + $0x35a8] ss:$72 sps:$4 sm:$0xff]  }
 0x8ae   :  { %v16923_v17 = vpop.f32.mrf.mxu0  ;;  %17275 = vmatpush1.bf16.msra.mxu1 %v23601_v27  ;;  %17233 = vmatprep.subr.bf16.mxu0 %v23606_v6  ;;  %v23648_v27 = vld [vmem:[#allocation5 + $0x2cac] ss:$72 sps:$4 sm:$0xff]  }
 0x8af   :  { %v24960_v24 = vadd.f32 %v16964_v5, %v16922_v38  ;;  %v16924_v7 = vadd.f32 %v16923_v17, %v24949_v36  ;;  %v16966_v19 = vpop.f32.mrf.mxu1  ;;  %17276 = vmatprep.subr.bf16.mxu1 %v23609_v58  ;;  %17263 = vmatprep.mubr.bf16.mxu0 %v25150_v3  ;;  %v23618_v36 = vld [vmem:[#allocation5 + $0x267c] ss:$72 sps:$4 sm:$0xff]   ;;  %v23651_v6 = vld [vmem:[#allocation5 + $0x35ac] ss:$72 sps:$4 sm:$0xff]   ;;  %v23646_v58 = vld [vmem:[#allocation5 + $0x2ca8] ss:$72 sps:$4 sm:$0xff]  }
 0x8b0   :  { %v16925_v55 = vpop.f32.mrf.mxu0  ;;  %17306 = vmatprep.mubr.bf16.mxu1 %v25151_v63  ;;  %v23654_v38 = vld [vmem:[#allocation5 + $0x2c1c] ss:$72 sps:$4 sm:$0xff]   ;;  %v23655_v17 = vld [vmem:[#allocation5 + $0x3518] ss:$72 sps:$4 sm:$0xff]  }
 0x8b1   :  { %v24965_v45 = vadd.f32 %v16966_v19, %v16924_v7  ;;  %v16926_v20 = vadd.f32 %v16925_v55, %v24952_v59  ;;  %v16968_v44 = vpop.f32.mrf.mxu1  ;;  %17234 = vmatpush1.bf16.msra.mxu0 %v23604_v1  ;;  %v23619_v59 = vld [vmem:[#allocation5 + $0x2f78] ss:$72 sps:$4 sm:$0xff]   ;;  %v23657_v5 = vld [vmem:[#allocation5 + $0x351c] ss:$72 sps:$4 sm:$0xff]   ;;  %v23658_v7 = vld [vmem:[#allocation5 + $0x2b88] ss:$72 sps:$4 sm:$0xff]  }
 0x8b2   :  { %v16927_v43 = vpop.f32.mrf.mxu0  ;;  %17277 = vmatpush1.bf16.msra.mxu1 %v23607_v13  ;;  %17235 = vmatprep.subr.bf16.mxu0 %v23612_v52  ;;  %v23652_v1 = vld [vmem:[#allocation5 + $0x2c18] ss:$72 sps:$4 sm:$0xff]   ;;  %v23660_v13 = vld [vmem:[#allocation5 + $0x2b8c] ss:$72 sps:$4 sm:$0xff]   ;;  %v23661_v19 = vld [vmem:[#allocation5 + $0x3488] ss:$72 sps:$4 sm:$0xff]  }
 0x8b3   :  { %v24968_v57 = vadd.f32 %v16968_v44, %v16926_v20  ;;  %v16928_v15 = vadd.f32 %v16927_v43, %v24955_v11  ;;  %v16970_v46 = vpop.f32.mrf.mxu1  ;;  %17278 = vmatprep.subr.bf16.mxu1 %v23615_v48  ;;  %v23633_v11 = vld [vmem:[#allocation5 + $0x2e5c] ss:$72 sps:$4 sm:$0xff]   ;;  %v23663_v52 = vld [vmem:[#allocation5 + $0x348c] ss:$72 sps:$4 sm:$0xff]   ;;  %v23664_v20 = vld [vmem:[#allocation5 + $0x2af8] ss:$72 sps:$4 sm:$0xff]  }
 0x8b4   :  { %v23666_v48 = vld [vmem:[#allocation5 + $0x2afc] ss:$72 sps:$4 sm:$0xff]   ;;  %v23667_v44 = vld [vmem:[#allocation5 + $0x33f8] ss:$72 sps:$4 sm:$0xff]   ;;  %v23675_v43 = vld [vmem:[#allocation5 + $0x336c] ss:$72 sps:$4 sm:$0xff]  }
 0x8b5   :  { %v24971_v2 = vadd.f32 %v16970_v46, %v16928_v15  ;;  %17236 = vmatpush1.bf16.msra.mxu0 %v23610_v49  ;;  %v23669_v55 = vld [vmem:[#allocation5 + $0x33fc] ss:$72 sps:$4 sm:$0xff]   ;;  %v23672_v49 = vld [vmem:[#allocation5 + $0x2a6c] ss:$72 sps:$4 sm:$0xff]  }
 0x8b6   :  { %17279 = vmatpush1.bf16.msra.mxu1 %v23613_v0  ;;  %17237 = vmatprep.subr.bf16.mxu0 %v23618_v36  ;;  %v23670_v0 = vld [vmem:[#allocation5 + $0x2a68] ss:$72 sps:$4 sm:$0xff]   ;;  %v23678_v15 = vld [vmem:[#allocation5 + $0x29dc] ss:$72 sps:$4 sm:$0xff]  }
 0x8b7   :  { %17280 = vmatprep.subr.bf16.mxu1 %v23621_v32  ;;  %v23673_v36 = vld [vmem:[#allocation5 + $0x3368] ss:$72 sps:$4 sm:$0xff]   ;;  %v23681_v46 = vld [vmem:[#allocation5 + $0x32dc] ss:$72 sps:$4 sm:$0xff]   ;;  %v23676_v32 = vld [vmem:[#allocation5 + $0x29d8] ss:$72 sps:$4 sm:$0xff]  }
 0x8b9   :  { %17238 = vmatpush1.bf16.msra.mxu0 %v23616_v14  ;;  %v23679_v14 = vld [vmem:[#allocation5 + $0x32d8] ss:$72 sps:$4 sm:$0xff]  }
 0x8ba   :  { %17281 = vmatpush1.bf16.msra.mxu1 %v23619_v59  ;;  %17239 = vmatprep.subr.bf16.mxu0 %v23624_v28  ;;  %v23684_v59 = vld [vmem:[#allocation5 + $0x294c] ss:$72 sps:$4 sm:$0xff]  }
 0x8bb   :  { %17282 = vmatprep.subr.bf16.mxu1 %v23627_v25  ;;  %v23687_v28 = vld [vmem:[#allocation5 + $0x324c] ss:$72 sps:$4 sm:$0xff]   ;;  %v23682_v25 = vld [vmem:[#allocation5 + $0x2948] ss:$72 sps:$4 sm:$0xff]  }
 0x8bd   :  { %17240 = vmatpush1.bf16.msra.mxu0 %v23622_v39  ;;  %v23685_v39 = vld [vmem:[#allocation5 + $0x3248] ss:$72 sps:$4 sm:$0xff]  }
 0x8be   :  { %17283 = vmatpush1.bf16.msra.mxu1 %v23625_v18  ;;  %17241 = vmatprep.subr.bf16.mxu0 %v23630_v33  ;;  %v23690_v18 = vld [vmem:[#allocation5 + $0x28bc] ss:$72 sps:$4 sm:$0xff]  }
 0x8bf   :  { %17284 = vmatprep.subr.bf16.mxu1 %v23633_v11  ;;  %v23693_v33 = vld [vmem:[#allocation5 + $0x31bc] ss:$72 sps:$4 sm:$0xff]   ;;  %v23688_v11 = vld [vmem:[#allocation5 + $0x28b8] ss:$72 sps:$4 sm:$0xff]  }
 0x8c1   :  { %17242 = vmatpush1.bf16.msra.mxu0 %v23628_v23  ;;  %v23691_v23 = vld [vmem:[#allocation5 + $0x31b8] ss:$72 sps:$4 sm:$0xff]  }
 0x8c2   :  { %17285 = vmatpush1.bf16.msra.mxu1 %v23631_v40  ;;  %17243 = vmatprep.subr.bf16.mxu0 %v23636_v22  ;;  %v23696_v40 = vld [vmem:[#allocation5 + $0x3a2c] ss:$72 sps:$4 sm:$0xff]  }
 0x8c3   :  { %17286 = vmatprep.subr.bf16.mxu1 %v23639_v26  ;;  %v23699_v22 = vld [vmem:[#allocation5 + $0x432c] ss:$72 sps:$4 sm:$0xff]   ;;  %v23694_v26 = vld [vmem:[#allocation5 + $0x3a28] ss:$72 sps:$4 sm:$0xff]  }
 0x8c5   :  { %17244 = vmatpush1.bf16.msra.mxu0 %v23634_v29  ;;  %v23697_v29 = vld [vmem:[#allocation5 + $0x4328] ss:$72 sps:$4 sm:$0xff]  }
 0x8c6   :  { %17287 = vmatpush1.bf16.msra.mxu1 %v23637_v42  ;;  %17245 = vmatprep.subr.bf16.mxu0 %v23642_v16  ;;  %v23702_v42 = vld [vmem:[#allocation5 + $0x399c] ss:$72 sps:$4 sm:$0xff]  }
 0x8c7   :  { %17288 = vmatprep.subr.bf16.mxu1 %v23645_v60  ;;  %v23705_v16 = vld [vmem:[#allocation5 + $0x429c] ss:$72 sps:$4 sm:$0xff]  }
 0x8c9   :  { %17246 = vmatpush1.bf16.msra.mxu0 %v23640_v61 }
 0x8ca   :  { %17289 = vmatpush1.bf16.msra.mxu1 %v23643_v47  ;;  %17247 = vmatprep.subr.bf16.mxu0 %v23648_v27  ;;  %v23700_v27 = vld [vmem:[#allocation5 + $0x3998] ss:$72 sps:$4 sm:$0xff]  }
 0x8cb   :  { %17290 = vmatprep.subr.bf16.mxu1 %v23651_v6 }
 0x8cd   :  { %17248 = vmatpush2.bf16.msra.mxu0 %v23646_v58  ;;  %v23703_v58 = vld [vmem:[#allocation5 + $0x4298] ss:$72 sps:$4 sm:$0xff]  }
 0x8ce   :  { %17291 = vmatpush2.bf16.msra.mxu1 %v23649_v35  ;;  %17249 = vmatprep.subr.bf16.mxu0 %v23654_v38  ;;  %v23708_v35 = vld [vmem:[#allocation5 + $0x390c] ss:$72 sps:$4 sm:$0xff]  }
 0x8cf   :  { %17292 = vmatprep.subr.bf16.mxu1 %v23657_v5 }
 0x8d1   :  { %17250 = vmatpush2.bf16.msra.mxu0 %v23652_v1 }
 0x8d2   :  { %17293 = vmatpush2.bf16.msra.mxu1 %v23655_v17  ;;  %17251 = vmatprep.subr.bf16.mxu0 %v23660_v13  ;;  %v23711_v17 = vld [vmem:[#allocation5 + $0x420c] ss:$72 sps:$4 sm:$0xff]  }
 0x8d3   :  { %17294 = vmatprep.subr.bf16.mxu1 %v23663_v52 }
 0x8d5   :  { %17252 = vmatpush2.bf16.msra.mxu0 %v23658_v7 }
 0x8d6   :  { %17295 = vmatpush2.bf16.msra.mxu1 %v23661_v19  ;;  %17253 = vmatprep.subr.bf16.mxu0 %v23666_v48  ;;  %v23706_v19 = vld [vmem:[#allocation5 + $0x3908] ss:$72 sps:$4 sm:$0xff]  }
 0x8d7   :  { %17296 = vmatprep.subr.bf16.mxu1 %v23669_v55  ;;  %v23709_v48 = vld [vmem:[#allocation5 + $0x4208] ss:$72 sps:$4 sm:$0xff]   ;;  %v23714_v55 = vld [vmem:[#allocation5 + $0x387c] ss:$72 sps:$4 sm:$0xff]  }
 0x8d9   :  { %17254 = vmatpush2.bf16.msra.mxu0 %v23664_v20  ;;  %v23717_v20 = vld [vmem:[#allocation5 + $0x417c] ss:$72 sps:$4 sm:$0xff]  }
 0x8da   :  { %17297 = vmatpush2.bf16.msra.mxu1 %v23667_v44  ;;  %17255 = vmatprep.subr.bf16.mxu0 %v23672_v49  ;;  %v23712_v44 = vld [vmem:[#allocation5 + $0x3878] ss:$72 sps:$4 sm:$0xff]  }
 0x8db   :  { %17298 = vmatprep.subr.bf16.mxu1 %v23675_v43  ;;  %v23715_v49 = vld [vmem:[#allocation5 + $0x4178] ss:$72 sps:$4 sm:$0xff]   ;;  %v23720_v43 = vld [vmem:[#allocation5 + $0x37ec] ss:$72 sps:$4 sm:$0xff]  }
 0x8dd   :  { %17256 = vmatpush2.bf16.msra.mxu0 %v23670_v0  ;;  %v23723_v0 = vld [vmem:[#allocation5 + $0x40ec] ss:$72 sps:$4 sm:$0xff]  }
 0x8de   :  { %17299 = vmatpush2.bf16.msra.mxu1 %v23673_v36  ;;  %17257 = vmatprep.subr.bf16.mxu0 %v23678_v15  ;;  %v23721_v36 = vld [vmem:[#allocation5 + $0x40e8] ss:$72 sps:$4 sm:$0xff]   ;;  %v23726_v15 = vld [vmem:[#allocation5 + $0x375c] ss:$72 sps:$4 sm:$0xff]  }
 0x8df   :  { %17300 = vmatprep.subr.bf16.mxu1 %v23681_v46  ;;  %v23729_v46 = vld [vmem:[#allocation5 + $0x405c] ss:$72 sps:$4 sm:$0xff]  }
 0x8e1   :  { %17258 = vmatpush2.bf16.msra.mxu0 %v23676_v32  ;;  %v23724_v32 = vld [vmem:[#allocation5 + $0x3758] ss:$72 sps:$4 sm:$0xff]  }
 0x8e2   :  { %17301 = vmatpush2.bf16.msra.mxu1 %v23679_v14  ;;  %17259 = vmatprep.subr.bf16.mxu0 %v23684_v59  ;;  %v23727_v14 = vld [vmem:[#allocation5 + $0x4058] ss:$72 sps:$4 sm:$0xff]   ;;  %v23732_v59 = vld [vmem:[#allocation5 + $0x36cc] ss:$72 sps:$4 sm:$0xff]  }
 0x8e3   :  { %17302 = vmatprep.subr.bf16.mxu1 %v23687_v28  ;;  %v23735_v28 = vld [vmem:[#allocation5 + $0x3fcc] ss:$72 sps:$4 sm:$0xff]  }
 0x8e5   :  { %17260 = vmatpush2.bf16.msra.mxu0 %v23682_v25  ;;  %v23730_v25 = vld [vmem:[#allocation5 + $0x36c8] ss:$72 sps:$4 sm:$0xff]  }
 0x8e6   :  { %17303 = vmatpush2.bf16.msra.mxu1 %v23685_v39  ;;  %17261 = vmatprep.subr.bf16.mxu0 %v23690_v18  ;;  %v23733_v39 = vld [vmem:[#allocation5 + $0x3fc8] ss:$72 sps:$4 sm:$0xff]   ;;  %v23738_v18 = vld [vmem:[#allocation5 + $0x363c] ss:$72 sps:$4 sm:$0xff]  }
 0x8e7   :  { %17304 = vmatprep.subr.bf16.mxu1 %v23693_v33  ;;  %v23741_v33 = vld [vmem:[#allocation5 + $0x3f3c] ss:$72 sps:$4 sm:$0xff]  }
 0x8e9   :  { %17262 = vmatpush2.bf16.msra.mxu0 %v23688_v11  ;;  %v23736_v11 = vld [vmem:[#allocation5 + $0x3638] ss:$72 sps:$4 sm:$0xff]  }
 0x8ea   :  { %17305 = vmatpush2.bf16.msra.mxu1 %v23691_v23  ;;  %17317 = vmatprep.subr.bf16.mxu0 %v23696_v40  ;;  %v23739_v23 = vld [vmem:[#allocation5 + $0x3f38] ss:$72 sps:$4 sm:$0xff]   ;;  %v23744_v40 = vld [vmem:[#allocation5 + $0x3eac] ss:$72 sps:$4 sm:$0xff]  }
 0x8eb   :  { %17360 = vmatprep.subr.bf16.mxu1 %v23699_v22  ;;  %v23747_v22 = vld [vmem:[#allocation5 + $0x47ac] ss:$72 sps:$4 sm:$0xff]  }
 0x8ec   :  { %v17007_v60 = vpop.f32.mrf.mxu0  ;;  %17264 = vmatmul.mubr.bf16.vlgmr.msra.gmra.mxu0 %v25152_v37 }
 0x8ed   :  { %v17008_v61 = vadd.f32 %v17007_v60, %v24960_v24  ;;  %v17050_v47 = vpop.f32.mrf.mxu1  ;;  %17307 = vmatmul.mubr.bf16.vlgmr.msra.gmra.mxu1 %v25153_v30  ;;  %17318 = vmatpush1.bf16.msra.mxu0 %v23694_v26  ;;  %v23742_v26 = vld [vmem:[#allocation5 + $0x3ea8] ss:$72 sps:$4 sm:$0xff]   ;;  %v23748_v60 = vld [vmem:[#allocation5 + $0x3e18] ss:$72 sps:$4 sm:$0xff]  }
 0x8ee   :  { %v17009_v6 = vpop.f32.mrf.mxu0  ;;  %17361 = vmatpush1.bf16.msra.mxu1 %v23697_v29  ;;  %17319 = vmatprep.subr.bf16.mxu0 %v23702_v42  ;;  %v23745_v29 = vld [vmem:[#allocation5 + $0x47a8] ss:$72 sps:$4 sm:$0xff]   ;;  %v23750_v42 = vld [vmem:[#allocation5 + $0x3e1c] ss:$72 sps:$4 sm:$0xff]  }
 0x8ef   :  { %v24976_v38 = vadd.f32 %v17050_v47, %v17008_v61  ;;  %v17010_v5 = vadd.f32 %v17009_v6, %v24965_v45  ;;  %v17052_v1 = vpop.f32.mrf.mxu1  ;;  %17362 = vmatprep.subr.bf16.mxu1 %v23705_v16  ;;  %17349 = vmatprep.mubr.bf16.mxu0 %v25154_v51  ;;  %v23753_v16 = vld [vmem:[#allocation5 + $0x471c] ss:$72 sps:$4 sm:$0xff]   ;;  %v23751_v61 = vld [vmem:[#allocation5 + $0x4718] ss:$72 sps:$4 sm:$0xff]   ;;  %v23756_v47 = vld [vmem:[#allocation5 + $0x3d8c] ss:$72 sps:$4 sm:$0xff]  }
 0x8f0   :  { %v17011_v24 = vpop.f32.mrf.mxu0  ;;  %17392 = vmatprep.mubr.bf16.mxu1 %v25155_v62  ;;  %v23754_v6 = vld [vmem:[#allocation5 + $0x3d88] ss:$72 sps:$4 sm:$0xff]  }
 0x8f1   :  { %v24981_v13 = vadd.f32 %v17052_v1, %v17010_v5  ;;  %v17012_v52 = vadd.f32 %v17011_v24, %v24968_v57  ;;  %v17054_v7 = vpop.f32.mrf.mxu1  ;;  %17320 = vmatpush1.bf16.msra.mxu0 %v23700_v27  ;;  %v23718_v57 = vld [vmem:[#allocation5 + $0x37e8] ss:$72 sps:$4 sm:$0xff]   ;;  %v23759_v27 = vld [vmem:[#allocation5 + $0x468c] ss:$72 sps:$4 sm:$0xff]   ;;  %v23765_v5 = vld [vmem:[#allocation5 + $0x45fc] ss:$72 sps:$4 sm:$0xff]  }
 0x8f2   :  { %17363 = vmatpush1.bf16.msra.mxu1 %v23703_v58  ;;  %17321 = vmatprep.subr.bf16.mxu0 %v23708_v35  ;;  %v23757_v58 = vld [vmem:[#allocation5 + $0x4688] ss:$72 sps:$4 sm:$0xff]   ;;  %v23762_v35 = vld [vmem:[#allocation5 + $0x3cfc] ss:$72 sps:$4 sm:$0xff]   ;;  %v23760_v1 = vld [vmem:[#allocation5 + $0x3cf8] ss:$72 sps:$4 sm:$0xff]  }
 0x8f3   :  { %v24984_v45 = vadd.f32 %v17054_v7, %v17012_v52  ;;  %17364 = vmatprep.subr.bf16.mxu1 %v23711_v17  ;;  %v23763_v17 = vld [vmem:[#allocation5 + $0x45f8] ss:$72 sps:$4 sm:$0xff]   ;;  %v23768_v24 = vld [vmem:[#allocation5 + $0x3c6c] ss:$72 sps:$4 sm:$0xff]   ;;  %v23766_v7 = vld [vmem:[#allocation5 + $0x3c68] ss:$72 sps:$4 sm:$0xff]  }
 0x8f4   :  { %v23771_v52 = vld [vmem:[#allocation5 + $0x456c] ss:$72 sps:$4 sm:$0xff]  }
 0x8f5   :  { %17322 = vmatpush1.bf16.msra.mxu0 %v23706_v19  ;;  %v23769_v19 = vld [vmem:[#allocation5 + $0x4568] ss:$72 sps:$4 sm:$0xff]  }
 0x8f6   :  { %17365 = vmatpush1.bf16.msra.mxu1 %v23709_v48  ;;  %17323 = vmatprep.subr.bf16.mxu0 %v23714_v55  ;;  %v23774_v48 = vld [vmem:[#allocation5 + $0x3bdc] ss:$72 sps:$4 sm:$0xff]  }
 0x8f7   :  { %17366 = vmatprep.subr.bf16.mxu1 %v23717_v20  ;;  %v23777_v55 = vld [vmem:[#allocation5 + $0x44dc] ss:$72 sps:$4 sm:$0xff]   ;;  %v23772_v20 = vld [vmem:[#allocation5 + $0x3bd8] ss:$72 sps:$4 sm:$0xff]  }
 0x8f9   :  { %17324 = vmatpush1.bf16.msra.mxu0 %v23712_v44  ;;  %v23775_v44 = vld [vmem:[#allocation5 + $0x44d8] ss:$72 sps:$4 sm:$0xff]  }
 0x8fa   :  { %17367 = vmatpush1.bf16.msra.mxu1 %v23715_v49  ;;  %17325 = vmatprep.subr.bf16.mxu0 %v23720_v43  ;;  %v23780_v49 = vld [vmem:[#allocation5 + $0x3b4c] ss:$72 sps:$4 sm:$0xff]  }
 0x8fb   :  { %17368 = vmatprep.subr.bf16.mxu1 %v23723_v0  ;;  %v23783_v43 = vld [vmem:[#allocation5 + $0x444c] ss:$72 sps:$4 sm:$0xff]   ;;  %v23778_v0 = vld [vmem:[#allocation5 + $0x3b48] ss:$72 sps:$4 sm:$0xff]  }
 0x8fd   :  { %17326 = vmatpush1.bf16.msra.mxu0 %v23718_v57  ;;  %v23781_v57 = vld [vmem:[#allocation5 + $0x4448] ss:$72 sps:$4 sm:$0xff]  }
 0x8fe   :  { %17369 = vmatpush1.bf16.msra.mxu1 %v23721_v36  ;;  %17327 = vmatprep.subr.bf16.mxu0 %v23726_v15  ;;  %v23786_v36 = vld [vmem:[#allocation5 + $0x3abc] ss:$72 sps:$4 sm:$0xff]  }
 0x8ff   :  { %17370 = vmatprep.subr.bf16.mxu1 %v23729_v46  ;;  %v23789_v15 = vld [vmem:[#allocation5 + $0x43bc] ss:$72 sps:$4 sm:$0xff]   ;;  %v23784_v46 = vld [vmem:[#allocation5 + $0x3ab8] ss:$72 sps:$4 sm:$0xff]  }
 0x901   :  { %17328 = vmatpush1.bf16.msra.mxu0 %v23724_v32  ;;  %v23787_v32 = vld [vmem:[#allocation5 + $0x43b8] ss:$72 sps:$4 sm:$0xff]  }
 0x902   :  { %17371 = vmatpush1.bf16.msra.mxu1 %v23727_v14  ;;  %17329 = vmatprep.subr.bf16.mxu0 %v23732_v59  ;;  %v23792_v14 = vld [vmem:[#allocation5 + $0x434] ss:$72 sps:$4 sm:$0xff]  }
 0x903   :  { %17372 = vmatprep.subr.bf16.mxu1 %v23735_v28  ;;  %v23795_v59 = vld [vmem:[#allocation5 + $0xd34] ss:$72 sps:$4 sm:$0xff]   ;;  %v23790_v28 = vld [vmem:[#allocation5 + $0x430] ss:$72 sps:$4 sm:$0xff]  }
 0x905   :  { %17330 = vmatpush1.bf16.msra.mxu0 %v23730_v25  ;;  %v23793_v25 = vld [vmem:[#allocation5 + $0xd30] ss:$72 sps:$4 sm:$0xff]  }
 0x906   :  { %17373 = vmatpush1.bf16.msra.mxu1 %v23733_v39  ;;  %17331 = vmatprep.subr.bf16.mxu0 %v23738_v18  ;;  %v23798_v39 = vld [vmem:[#allocation5 + $0x3a4] ss:$72 sps:$4 sm:$0xff]  }
 0x907   :  { %17374 = vmatprep.subr.bf16.mxu1 %v23741_v33  ;;  %v23801_v18 = vld [vmem:[#allocation5 + $0xca4] ss:$72 sps:$4 sm:$0xff]   ;;  %v23796_v33 = vld [vmem:[#allocation5 + $0x3a0] ss:$72 sps:$4 sm:$0xff]  }
 0x909   :  { %17332 = vmatpush1.bf16.msra.mxu0 %v23736_v11  ;;  %v23799_v11 = vld [vmem:[#allocation5 + $0xca0] ss:$72 sps:$4 sm:$0xff]  }
 0x90a   :  { %17375 = vmatpush1.bf16.msra.mxu1 %v23739_v23  ;;  %17333 = vmatprep.subr.bf16.mxu0 %v23744_v40  ;;  %v23804_v23 = vld [vmem:[#allocation5 + $0x314] ss:$72 sps:$4 sm:$0xff]  }
 0x90b   :  { %17376 = vmatprep.subr.bf16.mxu1 %v23747_v22  ;;  %v23807_v40 = vld [vmem:[#allocation5 + $0xc14] ss:$72 sps:$4 sm:$0xff]   ;;  %v23802_v22 = vld [vmem:[#allocation5 + $0x310] ss:$72 sps:$4 sm:$0xff]  }
 0x90d   :  { %17334 = vmatpush2.bf16.msra.mxu0 %v23742_v26  ;;  %v23805_v26 = vld [vmem:[#allocation5 + $0xc10] ss:$72 sps:$4 sm:$0xff]  }
 0x90e   :  { %17377 = vmatpush2.bf16.msra.mxu1 %v23745_v29  ;;  %17335 = vmatprep.subr.bf16.mxu0 %v23750_v42  ;;  %v23810_v29 = vld [vmem:[#allocation5 + $0x284] ss:$72 sps:$4 sm:$0xff]  }
 0x90f   :  { %17378 = vmatprep.subr.bf16.mxu1 %v23753_v16  ;;  %v23813_v42 = vld [vmem:[#allocation5 + $0xb84] ss:$72 sps:$4 sm:$0xff]   ;;  %v23808_v16 = vld [vmem:[#allocation5 + $0x280] ss:$72 sps:$4 sm:$0xff]  }
 0x911   :  { %17336 = vmatpush2.bf16.msra.mxu0 %v23748_v60  ;;  %v23811_v60 = vld [vmem:[#allocation5 + $0xb80] ss:$72 sps:$4 sm:$0xff]  }
 0x912   :  { %17379 = vmatpush2.bf16.msra.mxu1 %v23751_v61  ;;  %17337 = vmatprep.subr.bf16.mxu0 %v23756_v47  ;;  %v23816_v61 = vld [vmem:[#allocation5 + $0x1f4] ss:$72 sps:$4 sm:$0xff]  }
 0x913   :  { %17380 = vmatprep.subr.bf16.mxu1 %v23759_v27  ;;  %v23819_v47 = vld [vmem:[#allocation5 + $0xaf4] ss:$72 sps:$4 sm:$0xff]   ;;  %v23822_v27 = vld [vmem:[#allocation5 + $0x164] ss:$72 sps:$4 sm:$0xff]  }
 0x915   :  { %17338 = vmatpush2.bf16.msra.mxu0 %v23754_v6  ;;  %v23825_v6 = vld [vmem:[#allocation5 + $0xa64] ss:$72 sps:$4 sm:$0xff]  }
 0x916   :  { %17381 = vmatpush2.bf16.msra.mxu1 %v23757_v58  ;;  %17339 = vmatprep.subr.bf16.mxu0 %v23762_v35  ;;  %v23820_v58 = vld [vmem:[#allocation5 + $0x160] ss:$72 sps:$4 sm:$0xff]  }
 0x917   :  { %17382 = vmatprep.subr.bf16.mxu1 %v23765_v5  ;;  %v23823_v35 = vld [vmem:[#allocation5 + $0xa60] ss:$72 sps:$4 sm:$0xff]   ;;  %v23828_v5 = vld [vmem:[#allocation5 + $0xd4] ss:$72 sps:$4 sm:$0xff]  }
 0x919   :  { %17340 = vmatpush2.bf16.msra.mxu0 %v23760_v1  ;;  %v23831_v1 = vld [vmem:[#allocation5 + $0x9d4] ss:$72 sps:$4 sm:$0xff]  }
 0x91a   :  { %17383 = vmatpush2.bf16.msra.mxu1 %v23763_v17  ;;  %17341 = vmatprep.subr.bf16.mxu0 %v23768_v24  ;;  %v23826_v17 = vld [vmem:[#allocation5 + $0xd0] ss:$72 sps:$4 sm:$0xff]  }
 0x91b   :  { %17384 = vmatprep.subr.bf16.mxu1 %v23771_v52  ;;  %v23829_v24 = vld [vmem:[#allocation5 + $0x9d0] ss:$72 sps:$4 sm:$0xff]   ;;  %v23834_v52 = vld [vmem:[#allocation5 + $0x44] ss:$72 sps:$4 sm:$0xff]  }
 0x91d   :  { %17342 = vmatpush2.bf16.msra.mxu0 %v23766_v7  ;;  %v23837_v7 = vld [vmem:[#allocation5 + $0x944] ss:$72 sps:$4 sm:$0xff]  }
 0x91e   :  { %17385 = vmatpush2.bf16.msra.mxu1 %v23769_v19  ;;  %17343 = vmatprep.subr.bf16.mxu0 %v23774_v48  ;;  %v23832_v19 = vld [vmem:[#allocation5 + $0x40] ss:$72 sps:$4 sm:$0xff]  }
 0x91f   :  { %17386 = vmatprep.subr.bf16.mxu1 %v23777_v55  ;;  %v23835_v48 = vld [vmem:[#allocation5 + $0x940] ss:$72 sps:$4 sm:$0xff]   ;;  %v23840_v55 = vld [vmem:[#allocation5 + $0x8b4] ss:$72 sps:$4 sm:$0xff]  }
 0x921   :  { %17344 = vmatpush2.bf16.msra.mxu0 %v23772_v20  ;;  %v23843_v20 = vld [vmem:[#allocation5 + $0x11b4] ss:$72 sps:$4 sm:$0xff]  }
 0x922   :  { %17387 = vmatpush2.bf16.msra.mxu1 %v23775_v44  ;;  %17345 = vmatprep.subr.bf16.mxu0 %v23780_v49  ;;  %v23838_v44 = vld [vmem:[#allocation5 + $0x8b0] ss:$72 sps:$4 sm:$0xff]  }
 0x923   :  { %17388 = vmatprep.subr.bf16.mxu1 %v23783_v43  ;;  %v23841_v49 = vld [vmem:[#allocation5 + $0x11b0] ss:$72 sps:$4 sm:$0xff]   ;;  %v23846_v43 = vld [vmem:[#allocation5 + $0x824] ss:$72 sps:$4 sm:$0xff]  }
 0x925   :  { %17346 = vmatpush2.bf16.msra.mxu0 %v23778_v0  ;;  %v23849_v0 = vld [vmem:[#allocation5 + $0x1124] ss:$72 sps:$4 sm:$0xff]  }
 0x926   :  { %17389 = vmatpush2.bf16.msra.mxu1 %v23781_v57  ;;  %17347 = vmatprep.subr.bf16.mxu0 %v23786_v36  ;;  %v23844_v57 = vld [vmem:[#allocation5 + $0x820] ss:$72 sps:$4 sm:$0xff]  }
 0x927   :  { %17390 = vmatprep.subr.bf16.mxu1 %v23789_v15  ;;  %v23847_v36 = vld [vmem:[#allocation5 + $0x1120] ss:$72 sps:$4 sm:$0xff]   ;;  %v23852_v15 = vld [vmem:[#allocation5 + $0x794] ss:$72 sps:$4 sm:$0xff]  }
 0x929   :  { %17348 = vmatpush2.bf16.msra.mxu0 %v23784_v46  ;;  %v23855_v46 = vld [vmem:[#allocation5 + $0x1094] ss:$72 sps:$4 sm:$0xff]  }
 0x92a   :  { %17391 = vmatpush2.bf16.msra.mxu1 %v23787_v32  ;;  %17403 = vmatprep.subr.bf16.mxu0 %v23792_v14  ;;  %v23850_v32 = vld [vmem:[#allocation5 + $0x790] ss:$72 sps:$4 sm:$0xff]  }
 0x92b   :  { %17446 = vmatprep.subr.bf16.mxu1 %v23795_v59  ;;  %v23853_v14 = vld [vmem:[#allocation5 + $0x1090] ss:$72 sps:$4 sm:$0xff]   ;;  %v23858_v59 = vld [vmem:[#allocation5 + $0x704] ss:$72 sps:$4 sm:$0xff]  }
 0x92c   :  { %17350 = vmatmul.mubr.bf16.vlgmr.msra.gmra.mxu0 %v25156_v34 }
 0x92d   :  { %17393 = vmatmul.mubr.bf16.vlgmr.msra.gmra.mxu1 %v25157_v12  ;;  %17404 = vmatpush1.bf16.msra.mxu0 %v23790_v28  ;;  %v23861_v28 = vld [vmem:[#allocation5 + $0x1004] ss:$72 sps:$4 sm:$0xff]  }
 0x92e   :  { %17447 = vmatpush1.bf16.msra.mxu1 %v23793_v25  ;;  %17405 = vmatprep.subr.bf16.mxu0 %v23798_v39  ;;  %v23856_v25 = vld [vmem:[#allocation5 + $0x700] ss:$72 sps:$4 sm:$0xff]  }
 0x92f   :  { %17448 = vmatprep.subr.bf16.mxu1 %v23801_v18  ;;  %17435 = vmatprep.mubr.bf16.mxu0 %v24366_v53  ;;  %v23814_v53 = vld [vmem:[#allocation5 + $0x1f0] ss:$72 sps:$4 sm:$0xff]   ;;  %v23859_v39 = vld [vmem:[#allocation5 + $0x1000] ss:$72 sps:$4 sm:$0xff]   ;;  %v23864_v18 = vld [vmem:[#allocation5 + $0x674] ss:$72 sps:$4 sm:$0xff]  }
 0x930   :  { %17478 = vmatprep.mubr.bf16.mxu1 %v24368_v54  ;;  %v23817_v54 = vld [vmem:[#allocation5 + $0xaf0] ss:$72 sps:$4 sm:$0xff]  }
 0x931   :  { %17406 = vmatpush1.bf16.msra.mxu0 %v23796_v33  ;;  %v23867_v33 = vld [vmem:[#allocation5 + $0xf74] ss:$72 sps:$4 sm:$0xff]  }
 0x932   :  { %17449 = vmatpush1.bf16.msra.mxu1 %v23799_v11  ;;  %17407 = vmatprep.subr.bf16.mxu0 %v23804_v23  ;;  %v23862_v11 = vld [vmem:[#allocation5 + $0x670] ss:$72 sps:$4 sm:$0xff]  }
 0x933   :  { %17450 = vmatprep.subr.bf16.mxu1 %v23807_v40  ;;  %v23865_v23 = vld [vmem:[#allocation5 + $0xf70] ss:$72 sps:$4 sm:$0xff]   ;;  %v23870_v40 = vld [vmem:[#allocation5 + $0x5e4] ss:$72 sps:$4 sm:$0xff]  }
 0x935   :  { %17408 = vmatpush1.bf16.msra.mxu0 %v23802_v22  ;;  %v23873_v22 = vld [vmem:[#allocation5 + $0xee4] ss:$72 sps:$4 sm:$0xff]  }
 0x936   :  { %17451 = vmatpush1.bf16.msra.mxu1 %v23805_v26  ;;  %17409 = vmatprep.subr.bf16.mxu0 %v23810_v29  ;;  %v23868_v26 = vld [vmem:[#allocation5 + $0x5e0] ss:$72 sps:$4 sm:$0xff]  }
 0x937   :  { %17452 = vmatprep.subr.bf16.mxu1 %v23813_v42  ;;  %v23871_v29 = vld [vmem:[#allocation5 + $0xee0] ss:$72 sps:$4 sm:$0xff]   ;;  %v23876_v42 = vld [vmem:[#allocation5 + $0x554] ss:$72 sps:$4 sm:$0xff]  }
 0x939   :  { %17410 = vmatpush1.bf16.msra.mxu0 %v23808_v16  ;;  %v23879_v16 = vld [vmem:[#allocation5 + $0xe54] ss:$72 sps:$4 sm:$0xff]  }
 0x93a   :  { %17453 = vmatpush1.bf16.msra.mxu1 %v23811_v60  ;;  %17411 = vmatprep.subr.bf16.mxu0 %v23816_v61  ;;  %v23874_v60 = vld [vmem:[#allocation5 + $0x550] ss:$72 sps:$4 sm:$0xff]  }
 0x93b   :  { %17454 = vmatprep.subr.bf16.mxu1 %v23819_v47  ;;  %v23877_v61 = vld [vmem:[#allocation5 + $0xe50] ss:$72 sps:$4 sm:$0xff]   ;;  %v23882_v47 = vld [vmem:[#allocation5 + $0x4c4] ss:$72 sps:$4 sm:$0xff]  }
 0x93d   :  { %17412 = vmatpush1.bf16.msra.mxu0 %v23814_v53  ;;  %v23885_v53 = vld [vmem:[#allocation5 + $0xdc4] ss:$72 sps:$4 sm:$0xff]  }
 0x93e   :  { %17455 = vmatpush1.bf16.msra.mxu1 %v23817_v54  ;;  %17413 = vmatprep.subr.bf16.mxu0 %v23822_v27  ;;  %v23880_v54 = vld [vmem:[#allocation5 + $0x4c0] ss:$72 sps:$4 sm:$0xff]  }
 0x93f   :  { %17456 = vmatprep.subr.bf16.mxu1 %v23825_v6  ;;  %v23883_v27 = vld [vmem:[#allocation5 + $0xdc0] ss:$72 sps:$4 sm:$0xff]   ;;  %v23888_v6 = vld [vmem:[#allocation5 + $0x1634] ss:$72 sps:$4 sm:$0xff]  }
 0x941   :  { %17414 = vmatpush1.bf16.msra.mxu0 %v23820_v58  ;;  %v23891_v58 = vld [vmem:[#allocation5 + $0x1f34] ss:$72 sps:$4 sm:$0xff]  }
 0x942   :  { %17457 = vmatpush1.bf16.msra.mxu1 %v23823_v35  ;;  %17415 = vmatprep.subr.bf16.mxu0 %v23828_v5  ;;  %v23886_v35 = vld [vmem:[#allocation5 + $0x1630] ss:$72 sps:$4 sm:$0xff]  }
 0x943   :  { %17458 = vmatprep.subr.bf16.mxu1 %v23831_v1  ;;  %v23889_v5 = vld [vmem:[#allocation5 + $0x1f30] ss:$72 sps:$4 sm:$0xff]   ;;  %v23894_v1 = vld [vmem:[#allocation5 + $0x15a4] ss:$72 sps:$4 sm:$0xff]  }
 0x945   :  { %17416 = vmatpush1.bf16.msra.mxu0 %v23826_v17  ;;  %v23897_v17 = vld [vmem:[#allocation5 + $0x1ea4] ss:$72 sps:$4 sm:$0xff]  }
 0x946   :  { %17459 = vmatpush1.bf16.msra.mxu1 %v23829_v24  ;;  %17417 = vmatprep.subr.bf16.mxu0 %v23834_v52  ;;  %v23892_v24 = vld [vmem:[#allocation5 + $0x15a0] ss:$72 sps:$4 sm:$0xff]  }
 0x947   :  { %17460 = vmatprep.subr.bf16.mxu1 %v23837_v7  ;;  %v23895_v52 = vld [vmem:[#allocation5 + $0x1ea0] ss:$72 sps:$4 sm:$0xff]   ;;  %v23900_v7 = vld [vmem:[#allocation5 + $0x1514] ss:$72 sps:$4 sm:$0xff]  }
 0x949   :  { %17418 = vmatpush1.bf16.msra.mxu0 %v23832_v19  ;;  %v23903_v19 = vld [vmem:[#allocation5 + $0x1e14] ss:$72 sps:$4 sm:$0xff]  }
 0x94a   :  { %17461 = vmatpush1.bf16.msra.mxu1 %v23835_v48  ;;  %17419 = vmatprep.subr.bf16.mxu0 %v23840_v55  ;;  %v23898_v48 = vld [vmem:[#allocation5 + $0x1510] ss:$72 sps:$4 sm:$0xff]  }
 0x94b   :  { %17462 = vmatprep.subr.bf16.mxu1 %v23843_v20  ;;  %v23901_v55 = vld [vmem:[#allocation5 + $0x1e10] ss:$72 sps:$4 sm:$0xff]   ;;  %v23904_v20 = vld [vmem:[#allocation5 + $0x1480] ss:$72 sps:$4 sm:$0xff]  }
 0x94d   :  { %17420 = vmatpush2.bf16.msra.mxu0 %v23838_v44  ;;  %v23907_v44 = vld [vmem:[#allocation5 + $0x1d80] ss:$72 sps:$4 sm:$0xff]  }
 0x94e   :  { %17463 = vmatpush2.bf16.msra.mxu1 %v23841_v49  ;;  %17421 = vmatprep.subr.bf16.mxu0 %v23846_v43  ;;  %v23912_v49 = vld [vmem:[#allocation5 + $0x13f4] ss:$72 sps:$4 sm:$0xff]  }
 0x94f   :  { %17464 = vmatprep.subr.bf16.mxu1 %v23849_v0  ;;  %v23915_v43 = vld [vmem:[#allocation5 + $0x1cf4] ss:$72 sps:$4 sm:$0xff]   ;;  %v23918_v0 = vld [vmem:[#allocation5 + $0x1364] ss:$72 sps:$4 sm:$0xff]  }
 0x951   :  { %17422 = vmatpush2.bf16.msra.mxu0 %v23844_v57  ;;  %v23921_v57 = vld [vmem:[#allocation5 + $0x1c64] ss:$72 sps:$4 sm:$0xff]  }
 0x952   :  { %17465 = vmatpush2.bf16.msra.mxu1 %v23847_v36  ;;  %17423 = vmatprep.subr.bf16.mxu0 %v23852_v15  ;;  %v23916_v36 = vld [vmem:[#allocation5 + $0x1360] ss:$72 sps:$4 sm:$0xff]  }
 0x953   :  { %17466 = vmatprep.subr.bf16.mxu1 %v23855_v46  ;;  %v23919_v15 = vld [vmem:[#allocation5 + $0x1c60] ss:$72 sps:$4 sm:$0xff]   ;;  %v23924_v46 = vld [vmem:[#allocation5 + $0x12d4] ss:$72 sps:$4 sm:$0xff]  }
 0x955   :  { %17424 = vmatpush2.bf16.msra.mxu0 %v23850_v32  ;;  %v23927_v32 = vld [vmem:[#allocation5 + $0x1bd4] ss:$72 sps:$4 sm:$0xff]  }
 0x956   :  { %17467 = vmatpush2.bf16.msra.mxu1 %v23853_v14  ;;  %17425 = vmatprep.subr.bf16.mxu0 %v23858_v59  ;;  %v23922_v14 = vld [vmem:[#allocation5 + $0x12d0] ss:$72 sps:$4 sm:$0xff]  }
 0x957   :  { %17468 = vmatprep.subr.bf16.mxu1 %v23861_v28  ;;  %v23925_v59 = vld [vmem:[#allocation5 + $0x1bd0] ss:$72 sps:$4 sm:$0xff]   ;;  %v23930_v28 = vld [vmem:[#allocation5 + $0x1244] ss:$72 sps:$4 sm:$0xff]  }
 0x959   :  { %17426 = vmatpush2.bf16.msra.mxu0 %v23856_v25  ;;  %v23933_v25 = vld [vmem:[#allocation5 + $0x1b44] ss:$72 sps:$4 sm:$0xff]  }
 0x95a   :  { %17469 = vmatpush2.bf16.msra.mxu1 %v23859_v39  ;;  %17427 = vmatprep.subr.bf16.mxu0 %v23864_v18  ;;  %v23928_v39 = vld [vmem:[#allocation5 + $0x1240] ss:$72 sps:$4 sm:$0xff]  }
 0x95b   :  { %17470 = vmatprep.subr.bf16.mxu1 %v23867_v33  ;;  %v23931_v18 = vld [vmem:[#allocation5 + $0x1b40] ss:$72 sps:$4 sm:$0xff]   ;;  %v23936_v33 = vld [vmem:[#allocation5 + $0x1ab4] ss:$72 sps:$4 sm:$0xff]  }
 0x95d   :  { %17428 = vmatpush2.bf16.msra.mxu0 %v23862_v11  ;;  %v23939_v11 = vld [vmem:[#allocation5 + $0x23b4] ss:$72 sps:$4 sm:$0xff]  }
 0x95e   :  { %17471 = vmatpush2.bf16.msra.mxu1 %v23865_v23  ;;  %17429 = vmatprep.subr.bf16.mxu0 %v23870_v40  ;;  %v23934_v23 = vld [vmem:[#allocation5 + $0x1ab0] ss:$72 sps:$4 sm:$0xff]  }
 0x95f   :  { %17472 = vmatprep.subr.bf16.mxu1 %v23873_v22  ;;  %v23937_v40 = vld [vmem:[#allocation5 + $0x23b0] ss:$72 sps:$4 sm:$0xff]   ;;  %v23942_v22 = vld [vmem:[#allocation5 + $0x1a24] ss:$72 sps:$4 sm:$0xff]  }
 0x961   :  { %17430 = vmatpush2.bf16.msra.mxu0 %v23868_v26  ;;  %v23945_v26 = vld [vmem:[#allocation5 + $0x2324] ss:$72 sps:$4 sm:$0xff]  }
 0x962   :  { %17473 = vmatpush2.bf16.msra.mxu1 %v23871_v29  ;;  %17431 = vmatprep.subr.bf16.mxu0 %v23876_v42  ;;  %v23940_v29 = vld [vmem:[#allocation5 + $0x1a20] ss:$72 sps:$4 sm:$0xff]  }
 0x963   :  { %17474 = vmatprep.subr.bf16.mxu1 %v23879_v16  ;;  %v23943_v42 = vld [vmem:[#allocation5 + $0x2320] ss:$72 sps:$4 sm:$0xff]   ;;  %v23948_v16 = vld [vmem:[#allocation5 + $0x1994] ss:$72 sps:$4 sm:$0xff]  }
 0x965   :  { %17432 = vmatpush2.bf16.msra.mxu0 %v23874_v60  ;;  %v23951_v60 = vld [vmem:[#allocation5 + $0x2294] ss:$72 sps:$4 sm:$0xff]  }
 0x966   :  { %17475 = vmatpush2.bf16.msra.mxu1 %v23877_v61  ;;  %17433 = vmatprep.subr.bf16.mxu0 %v23882_v47  ;;  %v23946_v61 = vld [vmem:[#allocation5 + $0x1990] ss:$72 sps:$4 sm:$0xff]  }
 0x967   :  { %17476 = vmatprep.subr.bf16.mxu1 %v23885_v53  ;;  %v23949_v47 = vld [vmem:[#allocation5 + $0x2290] ss:$72 sps:$4 sm:$0xff]   ;;  %v23954_v53 = vld [vmem:[#allocation5 + $0x1904] ss:$72 sps:$4 sm:$0xff]  }
 0x969   :  { %17434 = vmatpush2.bf16.msra.mxu0 %v23880_v54  ;;  %v23957_v54 = vld [vmem:[#allocation5 + $0x2204] ss:$72 sps:$4 sm:$0xff]  }
 0x96a   :  { %17477 = vmatpush2.bf16.msra.mxu1 %v23883_v27  ;;  %17489 = vmatprep.subr.bf16.mxu0 %v23888_v6  ;;  %v23952_v27 = vld [vmem:[#allocation5 + $0x1900] ss:$72 sps:$4 sm:$0xff]  }
 0x96b   :  { %17532 = vmatprep.subr.bf16.mxu1 %v23891_v58  ;;  %v23955_v6 = vld [vmem:[#allocation5 + $0x2200] ss:$72 sps:$4 sm:$0xff]   ;;  %v23960_v58 = vld [vmem:[#allocation5 + $0x1874] ss:$72 sps:$4 sm:$0xff]  }
 0x96c   :  { %17436 = vmatmul.mubr.bf16.vlgmr.msra.gmra.mxu0 %v24372_v8  ;;  %v23906_v8 = vld [vmem:[#allocation5 + $0x1484] ss:$72 sps:$4 sm:$0xff]  }
 0x96d   :  { %17479 = vmatmul.mubr.bf16.vlgmr.msra.gmra.mxu1 %v24374_v9  ;;  %17490 = vmatpush1.bf16.msra.mxu0 %v23886_v35  ;;  %v23909_v9 = vld [vmem:[#allocation5 + $0x1d84] ss:$72 sps:$4 sm:$0xff]   ;;  %v23963_v35 = vld [vmem:[#allocation5 + $0x2174] ss:$72 sps:$4 sm:$0xff]  }
 0x96e   :  { %17533 = vmatpush1.bf16.msra.mxu1 %v23889_v5  ;;  %17491 = vmatprep.subr.bf16.mxu0 %v23894_v1  ;;  %v23958_v5 = vld [vmem:[#allocation5 + $0x1870] ss:$72 sps:$4 sm:$0xff]  }
 0x96f   :  { %17534 = vmatprep.subr.bf16.mxu1 %v23897_v17  ;;  %17521 = vmatprep.mubr.bf16.mxu0 %v24388_v41  ;;  %v23910_v41 = vld [vmem:[#allocation5 + $0x13f0] ss:$72 sps:$4 sm:$0xff]   ;;  %v23966_v17 = vld [vmem:[#allocation5 + $0x17e4] ss:$72 sps:$4 sm:$0xff]  }
 0x970   :  { %17564 = vmatprep.mubr.bf16.mxu1 %v25147_v4  ;;  %v23913_v4 = vld [vmem:[#allocation5 + $0x1cf0] ss:$72 sps:$4 sm:$0xff]  }
 0x971   :  { %17492 = vmatpush1.bf16.msra.mxu0 %v23892_v24  ;;  %v23961_v1 = vld [vmem:[#allocation5 + $0x2170] ss:$72 sps:$4 sm:$0xff]   ;;  %v23969_v24 = vld [vmem:[#allocation5 + $0x20e4] ss:$72 sps:$4 sm:$0xff]  }
 0x972   :  { %17535 = vmatpush1.bf16.msra.mxu1 %v23895_v52  ;;  %17493 = vmatprep.subr.bf16.mxu0 %v23900_v7  ;;  %v23964_v52 = vld [vmem:[#allocation5 + $0x17e0] ss:$72 sps:$4 sm:$0xff]  }
 0x973   :  { %17536 = vmatprep.subr.bf16.mxu1 %v23903_v19  ;;  %v23967_v7 = vld [vmem:[#allocation5 + $0x20e0] ss:$72 sps:$4 sm:$0xff]   ;;  %v23972_v19 = vld [vmem:[#allocation5 + $0x1754] ss:$72 sps:$4 sm:$0xff]  }
 0x975   :  { %17494 = vmatpush1.bf16.msra.mxu0 %v23898_v48  ;;  %v23975_v48 = vld [vmem:[#allocation5 + $0x2054] ss:$72 sps:$4 sm:$0xff]  }
 0x976   :  { %17537 = vmatpush1.bf16.msra.mxu1 %v23901_v55  ;;  %17495 = vmatprep.subr.bf16.mxu0 %v23906_v8  ;;  %v23970_v55 = vld [vmem:[#allocation5 + $0x1750] ss:$72 sps:$4 sm:$0xff]  }
 0x977   :  { %17538 = vmatprep.subr.bf16.mxu1 %v23909_v9  ;;  %v23973_v8 = vld [vmem:[#allocation5 + $0x2050] ss:$72 sps:$4 sm:$0xff]   ;;  %v23978_v9 = vld [vmem:[#allocation5 + $0x16c4] ss:$72 sps:$4 sm:$0xff]  }
 0x979   :  { %17496 = vmatpush1.bf16.msra.mxu0 %v23904_v20  ;;  %v23981_v20 = vld [vmem:[#allocation5 + $0x1fc4] ss:$72 sps:$4 sm:$0xff]  }
 0x97a   :  { %17539 = vmatpush1.bf16.msra.mxu1 %v23907_v44  ;;  %17497 = vmatprep.subr.bf16.mxu0 %v23912_v49  ;;  %v23976_v44 = vld [vmem:[#allocation5 + $0x16c0] ss:$72 sps:$4 sm:$0xff]  }
 0x97b   :  { %17540 = vmatprep.subr.bf16.mxu1 %v23915_v43  ;;  %v23979_v49 = vld [vmem:[#allocation5 + $0x1fc0] ss:$72 sps:$4 sm:$0xff]   ;;  %v23984_v43 = vld [vmem:[#allocation5 + $0x2834] ss:$72 sps:$4 sm:$0xff]  }
 0x97d   :  { %17498 = vmatpush1.bf16.msra.mxu0 %v23910_v41  ;;  %v23987_v41 = vld [vmem:[#allocation5 + $0x3134] ss:$72 sps:$4 sm:$0xff]  }
 0x97e   :  { %17541 = vmatpush1.bf16.msra.mxu1 %v23913_v4  ;;  %17499 = vmatprep.subr.bf16.mxu0 %v23918_v0  ;;  %v23982_v4 = vld [vmem:[#allocation5 + $0x2830] ss:$72 sps:$4 sm:$0xff]  }
 0x97f   :  { %17542 = vmatprep.subr.bf16.mxu1 %v23921_v57  ;;  %v23985_v0 = vld [vmem:[#allocation5 + $0x3130] ss:$72 sps:$4 sm:$0xff]   ;;  %v23990_v57 = vld [vmem:[#allocation5 + $0x27a4] ss:$72 sps:$4 sm:$0xff]  }
 0x981   :  { %17500 = vmatpush1.bf16.msra.mxu0 %v23916_v36  ;;  %v23993_v36 = vld [vmem:[#allocation5 + $0x30a4] ss:$72 sps:$4 sm:$0xff]  }
 0x982   :  { %17543 = vmatpush1.bf16.msra.mxu1 %v23919_v15  ;;  %17501 = vmatprep.subr.bf16.mxu0 %v23924_v46  ;;  %v23988_v15 = vld [vmem:[#allocation5 + $0x27a0] ss:$72 sps:$4 sm:$0xff]  }
 0x983   :  { %17544 = vmatprep.subr.bf16.mxu1 %v23927_v32  ;;  %v23991_v46 = vld [vmem:[#allocation5 + $0x30a0] ss:$72 sps:$4 sm:$0xff]   ;;  %v23996_v32 = vld [vmem:[#allocation5 + $0x2714] ss:$72 sps:$4 sm:$0xff]  }
 0x985   :  { %17502 = vmatpush1.bf16.msra.mxu0 %v23922_v14  ;;  %v23999_v14 = vld [vmem:[#allocation5 + $0x3014] ss:$72 sps:$4 sm:$0xff]  }
 0x986   :  { %17545 = vmatpush1.bf16.msra.mxu1 %v23925_v59  ;;  %17503 = vmatprep.subr.bf16.mxu0 %v23930_v28  ;;  %v23994_v59 = vld [vmem:[#allocation5 + $0x2710] ss:$72 sps:$4 sm:$0xff]  }
 0x987   :  { %17546 = vmatprep.subr.bf16.mxu1 %v23933_v25  ;;  %v23997_v28 = vld [vmem:[#allocation5 + $0x3010] ss:$72 sps:$4 sm:$0xff]   ;;  %v24000_v25 = vld [vmem:[#allocation5 + $0x2680] ss:$72 sps:$4 sm:$0xff]  }
 0x989   :  { %17504 = vmatpush1.bf16.msra.mxu0 %v23928_v39  ;;  %v24003_v39 = vld [vmem:[#allocation5 + $0x2f80] ss:$72 sps:$4 sm:$0xff]  }
 0x98a   :  { %17547 = vmatpush1.bf16.msra.mxu1 %v23931_v18  ;;  %17505 = vmatprep.subr.bf16.mxu0 %v23936_v33  ;;  %v24008_v18 = vld [vmem:[#allocation5 + $0x25f4] ss:$72 sps:$4 sm:$0xff]  }
 0x98b   :  { %17548 = vmatprep.subr.bf16.mxu1 %v23939_v11  ;;  %v24011_v33 = vld [vmem:[#allocation5 + $0x2ef4] ss:$72 sps:$4 sm:$0xff]   ;;  %v24014_v11 = vld [vmem:[#allocation5 + $0x2564] ss:$72 sps:$4 sm:$0xff]  }
 0x98d   :  { %17506 = vmatpush2.bf16.msra.mxu0 %v23934_v23  ;;  %v24017_v23 = vld [vmem:[#allocation5 + $0x2e64] ss:$72 sps:$4 sm:$0xff]  }
 0x98e   :  { %17549 = vmatpush2.bf16.msra.mxu1 %v23937_v40  ;;  %17507 = vmatprep.subr.bf16.mxu0 %v23942_v22  ;;  %v24012_v40 = vld [vmem:[#allocation5 + $0x2560] ss:$72 sps:$4 sm:$0xff]  }
 0x98f   :  { %17550 = vmatprep.subr.bf16.mxu1 %v23945_v26  ;;  %v24015_v22 = vld [vmem:[#allocation5 + $0x2e60] ss:$72 sps:$4 sm:$0xff]   ;;  %v24020_v26 = vld [vmem:[#allocation5 + $0x24d4] ss:$72 sps:$4 sm:$0xff]  }
 0x991   :  { %17508 = vmatpush2.bf16.msra.mxu0 %v23940_v29  ;;  %v24023_v29 = vld [vmem:[#allocation5 + $0x2dd4] ss:$72 sps:$4 sm:$0xff]  }
 0x992   :  { %17551 = vmatpush2.bf16.msra.mxu1 %v23943_v42  ;;  %17509 = vmatprep.subr.bf16.mxu0 %v23948_v16  ;;  %v24998_v42 = vpop.f32.mrf.mxu0  ;;  %v25000_v16 = vpop.f32.mrf.mxu1 }
 0x993   :  { %17552 = vmatprep.subr.bf16.mxu1 %v23951_v60  ;;  %v24018_v60 = vld [vmem:[#allocation5 + $0x24d0] ss:$72 sps:$4 sm:$0xff]  }
 0x995   :  { %17510 = vmatpush2.bf16.msra.mxu0 %v23946_v61  ;;  %v25002_v61 = vpop.f32.mrf.mxu0 }
 0x996   :  { %17553 = vmatpush2.bf16.msra.mxu1 %v23949_v47  ;;  %17511 = vmatprep.subr.bf16.mxu0 %v23954_v53  ;;  %v24021_v47 = vld [vmem:[#allocation5 + $0x2dd0] ss:$72 sps:$4 sm:$0xff]   ;;  %v24026_v53 = vld [vmem:[#allocation5 + $0x2444] ss:$72 sps:$4 sm:$0xff]  }
 0x997   :  { %17554 = vmatprep.subr.bf16.mxu1 %v23957_v54  ;;  %v25004_v54 = vpop.f32.mrf.mxu1 }
 0x999   :  { %17512 = vmatpush2.bf16.msra.mxu0 %v23952_v27  ;;  %v24029_v27 = vld [vmem:[#allocation5 + $0x2d44] ss:$72 sps:$4 sm:$0xff]  }
 0x99a   :  { %17555 = vmatpush2.bf16.msra.mxu1 %v23955_v6  ;;  %17513 = vmatprep.subr.bf16.mxu0 %v23960_v58  ;;  %v24024_v6 = vld [vmem:[#allocation5 + $0x2440] ss:$72 sps:$4 sm:$0xff]   ;;  %v25006_v58 = vpop.f32.mrf.mxu0 }
 0x99b   :  { %17556 = vmatprep.subr.bf16.mxu1 %v23963_v35  ;;  %v24027_v35 = vld [vmem:[#allocation5 + $0x2d40] ss:$72 sps:$4 sm:$0xff]  }
 0x99d   :  { %17514 = vmatpush2.bf16.msra.mxu0 %v23958_v5  ;;  %v24032_v5 = vld [vmem:[#allocation5 + $0x2cb4] ss:$72 sps:$4 sm:$0xff]  }
 0x99e   :  { %17557 = vmatpush2.bf16.msra.mxu1 %v23961_v1  ;;  %17515 = vmatprep.subr.bf16.mxu0 %v23966_v17  ;;  %v25008_v1 = vpop.f32.mrf.mxu1  ;;  %v24035_v17 = vld [vmem:[#allocation5 + $0x35b4] ss:$72 sps:$4 sm:$0xff]  }
 0x99f   :  { %17558 = vmatprep.subr.bf16.mxu1 %v23969_v24  ;;  %v24030_v24 = vld [vmem:[#allocation5 + $0x2cb0] ss:$72 sps:$4 sm:$0xff]  }
 0x9a1   :  { %17516 = vmatpush2.bf16.msra.mxu0 %v23964_v52  ;;  %v25010_v52 = vpop.f32.mrf.mxu0 }
 0x9a2   :  { %17559 = vmatpush2.bf16.msra.mxu1 %v23967_v7  ;;  %17517 = vmatprep.subr.bf16.mxu0 %v23972_v19  ;;  %v24033_v7 = vld [vmem:[#allocation5 + $0x35b0] ss:$72 sps:$4 sm:$0xff]   ;;  %v24038_v19 = vld [vmem:[#allocation5 + $0x2c24] ss:$72 sps:$4 sm:$0xff]  }
 0x9a3   :  { %17560 = vmatprep.subr.bf16.mxu1 %v23975_v48  ;;  %v25012_v48 = vpop.f32.mrf.mxu1 }
 0x9a5   :  { %17518 = vmatpush2.bf16.msra.mxu0 %v23970_v55  ;;  %v24041_v55 = vld [vmem:[#allocation5 + $0x3524] ss:$72 sps:$4 sm:$0xff]  }
 0x9a6   :  { %17561 = vmatpush2.bf16.msra.mxu1 %v23973_v8  ;;  %17519 = vmatprep.subr.bf16.mxu0 %v23978_v9  ;;  %v24036_v8 = vld [vmem:[#allocation5 + $0x2c20] ss:$72 sps:$4 sm:$0xff]   ;;  %v17099_v9 = vpop.f32.mrf.mxu0 }
 0x9a7   :  { %17562 = vmatprep.subr.bf16.mxu1 %v23981_v20  ;;  %v24039_v20 = vld [vmem:[#allocation5 + $0x3520] ss:$72 sps:$4 sm:$0xff]  }
 0x9a9   :  { %17520 = vmatpush2.bf16.msra.mxu0 %v23976_v44  ;;  %v24044_v44 = vld [vmem:[#allocation5 + $0x2b94] ss:$72 sps:$4 sm:$0xff]  }
 0x9aa   :  { %17563 = vmatpush2.bf16.msra.mxu1 %v23979_v49  ;;  %17575 = vmatprep.subr.bf16.mxu0 %v23984_v43  ;;  %v17142_v49 = vpop.f32.mrf.mxu1  ;;  %v24047_v43 = vld [vmem:[#allocation5 + $0x3494] ss:$72 sps:$4 sm:$0xff]  }
 0x9ab   :  { %17618 = vmatprep.subr.bf16.mxu1 %v23987_v41  ;;  %v25014_v41 = vpop.f32.mrf.mxu0 }
 0x9ac   :  { %17522 = vmatmul.mubr.bf16.vlgmr.msra.gmra.mxu0 %v25148_v56  ;;  %v24002_v56 = vld [vmem:[#allocation5 + $0x2684] ss:$72 sps:$4 sm:$0xff]  }
 0x9ad   :  { %17565 = vmatmul.mubr.bf16.vlgmr.msra.gmra.mxu1 %v25149_v21  ;;  %17576 = vmatpush1.bf16.msra.mxu0 %v23982_v4  ;;  %v24005_v21 = vld [vmem:[#allocation5 + $0x2f84] ss:$72 sps:$4 sm:$0xff]   ;;  %v25016_v4 = vpop.f32.mrf.mxu1 }
 0x9ae   :  { %17619 = vmatpush1.bf16.msra.mxu1 %v23985_v0  ;;  %17577 = vmatprep.subr.bf16.mxu0 %v23990_v57  ;;  %v24042_v0 = vld [vmem:[#allocation5 + $0x2b90] ss:$72 sps:$4 sm:$0xff]  }
 0x9af   :  { %17620 = vmatprep.subr.bf16.mxu1 %v23993_v36  ;;  %17607 = vmatprep.mubr.bf16.mxu0 %v25150_v3  ;;  %v24006_v3 = vld [vmem:[#allocation5 + $0x25f0] ss:$72 sps:$4 sm:$0xff]   ;;  %v24050_v36 = vld [vmem:[#allocation5 + $0x2b04] ss:$72 sps:$4 sm:$0xff]  }
 0x9b0   :  { %17650 = vmatprep.mubr.bf16.mxu1 %v25151_v63  ;;  %v24009_v63 = vld [vmem:[#allocation5 + $0x2ef0] ss:$72 sps:$4 sm:$0xff]  }
 0x9b1   :  { %17578 = vmatpush1.bf16.msra.mxu0 %v23988_v15  ;;  %v24045_v57 = vld [vmem:[#allocation5 + $0x3490] ss:$72 sps:$4 sm:$0xff]   ;;  %v24053_v15 = vld [vmem:[#allocation5 + $0x3404] ss:$72 sps:$4 sm:$0xff]  }
 0x9b2   :  { %17621 = vmatpush1.bf16.msra.mxu1 %v23991_v46  ;;  %17579 = vmatprep.subr.bf16.mxu0 %v23996_v32  ;;  %v17181_v46 = vpop.f32.mrf.mxu0  ;;  %v17224_v32 = vpop.f32.mrf.mxu1 }
 0x9b3   :  { %17622 = vmatprep.subr.bf16.mxu1 %v23999_v14  ;;  %v24048_v14 = vld [vmem:[#allocation5 + $0x2b00] ss:$72 sps:$4 sm:$0xff]  }
 0x9b5   :  { %17580 = vmatpush1.bf16.msra.mxu0 %v23994_v59  ;;  %v24051_v59 = vld [vmem:[#allocation5 + $0x3400] ss:$72 sps:$4 sm:$0xff]  }
 0x9b6   :  { %17623 = vmatpush1.bf16.msra.mxu1 %v23997_v28  ;;  %17581 = vmatprep.subr.bf16.mxu0 %v24002_v56  ;;  %v24056_v28 = vld [vmem:[#allocation5 + $0x2a74] ss:$72 sps:$4 sm:$0xff]  }
 0x9b7   :  { %17624 = vmatprep.subr.bf16.mxu1 %v24005_v21  ;;  %v24059_v56 = vld [vmem:[#allocation5 + $0x3374] ss:$72 sps:$4 sm:$0xff]   ;;  %v25018_v21 = vpop.f32.mrf.mxu0 }
 0x9b9   :  { %17582 = vmatpush1.bf16.msra.mxu0 %v24000_v25  ;;  %v25020_v25 = vpop.f32.mrf.mxu1 }
 0x9ba   :  { %17625 = vmatpush1.bf16.msra.mxu1 %v24003_v39  ;;  %17583 = vmatprep.subr.bf16.mxu0 %v24008_v18  ;;  %v24054_v39 = vld [vmem:[#allocation5 + $0x2a70] ss:$72 sps:$4 sm:$0xff]  }
 0x9bb   :  { %17626 = vmatprep.subr.bf16.mxu1 %v24011_v33  ;;  %v24057_v18 = vld [vmem:[#allocation5 + $0x3370] ss:$72 sps:$4 sm:$0xff]   ;;  %v24062_v33 = vld [vmem:[#allocation5 + $0x29e4] ss:$72 sps:$4 sm:$0xff]  }
 0x9bd   :  { %17584 = vmatpush1.bf16.msra.mxu0 %v24006_v3  ;;  %v24065_v3 = vld [vmem:[#allocation5 + $0x32e4] ss:$72 sps:$4 sm:$0xff]  }
 0x9be   :  { %17627 = vmatpush1.bf16.msra.mxu1 %v24009_v63  ;;  %17585 = vmatprep.subr.bf16.mxu0 %v24014_v11  ;;  %v17185_v63 = vpop.f32.mrf.mxu0  ;;  %v17228_v11 = vpop.f32.mrf.mxu1 }
 0x9bf   :  { %17628 = vmatprep.subr.bf16.mxu1 %v24017_v23  ;;  %v24060_v23 = vld [vmem:[#allocation5 + $0x29e0] ss:$72 sps:$4 sm:$0xff]  }
 0x9c1   :  { %17586 = vmatpush1.bf16.msra.mxu0 %v24012_v40  ;;  %v25022_v40 = vpop.f32.mrf.mxu0 }
 0x9c2   :  { %17629 = vmatpush1.bf16.msra.mxu1 %v24015_v22  ;;  %17587 = vmatprep.subr.bf16.mxu0 %v24020_v26  ;;  %v24063_v22 = vld [vmem:[#allocation5 + $0x32e0] ss:$72 sps:$4 sm:$0xff]   ;;  %v24068_v26 = vld [vmem:[#allocation5 + $0x2954] ss:$72 sps:$4 sm:$0xff]  }
 0x9c3   :  { %17630 = vmatprep.subr.bf16.mxu1 %v24023_v29  ;;  %v25024_v29 = vpop.f32.mrf.mxu1 }
 0x9c5   :  { %17588 = vmatpush1.bf16.msra.mxu0 %v24018_v60  ;;  %v24071_v60 = vld [vmem:[#allocation5 + $0x3254] ss:$72 sps:$4 sm:$0xff]  }
 0x9c6   :  { %17631 = vmatpush1.bf16.msra.mxu1 %v24021_v47  ;;  %17589 = vmatprep.subr.bf16.mxu0 %v24026_v53  ;;  %v17139_v47 = vadd.f32 %v25008_v1, %v25006_v58  ;;  %v24066_v53 = vld [vmem:[#allocation5 + $0x2950] ss:$72 sps:$4 sm:$0xff]   ;;  %v24080_v58 = vld [vmem:[#allocation5 + $0x3a34] ss:$72 sps:$4 sm:$0xff]  }
 0x9c7   :  { %17632 = vmatprep.subr.bf16.mxu1 %v24029_v27  ;;  %v17267_v27 = vpop.f32.mrf.mxu0 }
 0x9c9   :  { %17590 = vmatpush1.bf16.msra.mxu0 %v24024_v6  ;;  %v24069_v6 = vld [vmem:[#allocation5 + $0x3250] ss:$72 sps:$4 sm:$0xff]  }
 0x9ca   :  { %17633 = vmatpush1.bf16.msra.mxu1 %v24027_v35  ;;  %17591 = vmatprep.subr.bf16.mxu0 %v24032_v5  ;;  %v24074_v35 = vld [vmem:[#allocation5 + $0x28c4] ss:$72 sps:$4 sm:$0xff]   ;;  %v17182_v5 = vadd.f32 %v17181_v46, %v17139_v47 }
 0x9cb   :  { %17634 = vmatprep.subr.bf16.mxu1 %v24035_v17  ;;  %v17310_v17 = vpop.f32.mrf.mxu1 }
 0x9cc   :  { %v17225_v1 = vadd.f32 %v17224_v32, %v17182_v5 }
 0x9cd   :  { %17592 = vmatpush2.bf16.msra.mxu0 %v24030_v24  ;;  %v24077_v24 = vld [vmem:[#allocation5 + $0x31c4] ss:$72 sps:$4 sm:$0xff]  }
 0x9ce   :  { %17635 = vmatpush2.bf16.msra.mxu1 %v24033_v7  ;;  %17593 = vmatprep.subr.bf16.mxu0 %v24038_v19  ;;  %v17143_v7 = vadd.f32 %v17142_v49, %v17099_v9  ;;  %v24072_v19 = vld [vmem:[#allocation5 + $0x28c0] ss:$72 sps:$4 sm:$0xff]   ;;  %v24081_v9 = vld [vmem:[#allocation5 + $0x4330] ss:$72 sps:$4 sm:$0xff]   ;;  %v24086_v49 = vld [vmem:[#allocation5 + $0x39a4] ss:$72 sps:$4 sm:$0xff]  }
 0x9cf   :  { %17636 = vmatprep.subr.bf16.mxu1 %v24041_v55  ;;  %v25028_v55 = vpop.f32.mrf.mxu0 }
 0x9d1   :  { %17594 = vmatpush2.bf16.msra.mxu0 %v24036_v8  ;;  %v24075_v8 = vld [vmem:[#allocation5 + $0x31c0] ss:$72 sps:$4 sm:$0xff]  }
 0x9d2   :  { %17637 = vmatpush2.bf16.msra.mxu1 %v24039_v20  ;;  %17595 = vmatprep.subr.bf16.mxu0 %v24044_v44  ;;  %v17186_v20 = vadd.f32 %v17185_v63, %v17143_v7  ;;  %v25030_v44 = vpop.f32.mrf.mxu1  ;;  %v24096_v7 = vld [vmem:[#allocation5 + $0x3880] ss:$72 sps:$4 sm:$0xff]  }
 0x9d3   :  { %17638 = vmatprep.subr.bf16.mxu1 %v24047_v43  ;;  %v24083_v43 = vld [vmem:[#allocation5 + $0x4334] ss:$72 sps:$4 sm:$0xff]  }
 0x9d4   :  { %v17314_v46 = vpop.f32.mrf.mxu1 }
 0x9d5   :  { %17596 = vmatpush2.bf16.msra.mxu0 %v24042_v0  ;;  %v17268_v0 = vadd.f32 %v17267_v27, %v17225_v1  ;;  %v24098_v27 = vld [vmem:[#allocation5 + $0x3884] ss:$72 sps:$4 sm:$0xff]   ;;  %v24107_v1 = vld [vmem:[#allocation5 + $0x40f4] ss:$72 sps:$4 sm:$0xff]  }
 0x9d6   :  { %17639 = vmatpush2.bf16.msra.mxu1 %v24045_v57  ;;  %17597 = vmatprep.subr.bf16.mxu0 %v24050_v36  ;;  %v24078_v57 = vld [vmem:[#allocation5 + $0x3a30] ss:$72 sps:$4 sm:$0xff]   ;;  %v17271_v36 = vpop.f32.mrf.mxu0 }
 0x9d7   :  { %17640 = vmatprep.subr.bf16.mxu1 %v24053_v15  ;;  %v17229_v15 = vadd.f32 %v17228_v11, %v17186_v20  ;;  %v17311_v32 = vadd.f32 %v17310_v17, %v17268_v0  ;;  %v24101_v17 = vld [vmem:[#allocation5 + $0x4184] ss:$72 sps:$4 sm:$0xff]   ;;  %v24105_v0 = vld [vmem:[#allocation5 + $0x40f0] ss:$72 sps:$4 sm:$0xff]  }
 0x9d9   :  { %17598 = vmatpush2.bf16.msra.mxu0 %v24048_v14  ;;  %v24089_v14 = vld [vmem:[#allocation5 + $0x42a4] ss:$72 sps:$4 sm:$0xff]  }
 0x9da   :  { %17641 = vmatpush2.bf16.msra.mxu1 %v24051_v59  ;;  %17599 = vmatprep.subr.bf16.mxu0 %v24056_v28  ;;  %v17272_v28 = vadd.f32 %v17271_v36, %v17229_v15  ;;  %v24113_v36 = vld [vmem:[#allocation5 + $0x4064] ss:$72 sps:$4 sm:$0xff]   ;;  %v24119_v15 = vld [vmem:[#allocation5 + $0x3fd4] ss:$72 sps:$4 sm:$0xff]  }
 0x9db   :  { %17642 = vmatprep.subr.bf16.mxu1 %v24059_v56 }
 0x9dd   :  { %17600 = vmatpush2.bf16.msra.mxu0 %v24054_v39  ;;  %v24084_v39 = vld [vmem:[#allocation5 + $0x39a0] ss:$72 sps:$4 sm:$0xff]  }
 0x9de   :  { %17643 = vmatpush2.bf16.msra.mxu1 %v24057_v18  ;;  %17601 = vmatprep.subr.bf16.mxu0 %v24062_v33  ;;  %v24087_v33 = vld [vmem:[#allocation5 + $0x42a0] ss:$72 sps:$4 sm:$0xff]  }
 0x9df   :  { %17644 = vmatprep.subr.bf16.mxu1 %v24065_v3  ;;  %v24092_v3 = vld [vmem:[#allocation5 + $0x3914] ss:$72 sps:$4 sm:$0xff]  }
 0x9e1   :  { %17602 = vmatpush2.bf16.msra.mxu0 %v24060_v23  ;;  %v24095_v23 = vld [vmem:[#allocation5 + $0x4214] ss:$72 sps:$4 sm:$0xff]  }
 0x9e2   :  { %17645 = vmatpush2.bf16.msra.mxu1 %v24063_v22  ;;  %17603 = vmatprep.subr.bf16.mxu0 %v24068_v26  ;;  %v17315_v22 = vadd.f32 %v17314_v46, %v17272_v28  ;;  %v24114_v46 = vld [vmem:[#allocation5 + $0x36d0] ss:$72 sps:$4 sm:$0xff]   ;;  %v24125_v28 = vld [vmem:[#allocation5 + $0x3f44] ss:$72 sps:$4 sm:$0xff]  }
 0x9e3   :  { %17646 = vmatprep.subr.bf16.mxu1 %v24071_v60  ;;  %v24090_v60 = vld [vmem:[#allocation5 + $0x3910] ss:$72 sps:$4 sm:$0xff]  }
 0x9e5   :  { %17604 = vmatpush2.bf16.msra.mxu0 %v24066_v53  ;;  %v24093_v53 = vld [vmem:[#allocation5 + $0x4210] ss:$72 sps:$4 sm:$0xff]  }
 0x9e6   :  { %17647 = vmatpush2.bf16.msra.mxu1 %v24069_v6  ;;  %17605 = vmatprep.subr.bf16.mxu0 %v24074_v35  ;;  %v17747_v6 = vmul.f32 %v24976_v38, %v24976_v38 }
 0x9e7   :  { %17648 = vmatprep.subr.bf16.mxu1 %v24077_v24 }
 0x9e9   :  { %17606 = vmatpush2.bf16.msra.mxu0 %v24072_v19  ;;  %v24099_v19 = vld [vmem:[#allocation5 + $0x4180] ss:$72 sps:$4 sm:$0xff]  }
 0x9ea   :  { %17649 = vmatpush2.bf16.msra.mxu1 %v24075_v8  ;;  %17661 = vmatprep.subr.bf16.mxu0 %v24080_v58  ;;  %v24104_v8 = vld [vmem:[#allocation5 + $0x37f4] ss:$72 sps:$4 sm:$0xff]   ;;  %v17750_v58 = vmul.f32 %v24984_v45, %v24984_v45  ;;  %v24111_v45 = vld [vmem:[#allocation5 + $0x4060] ss:$72 sps:$4 sm:$0xff]  }
 0x9eb   :  { %17704 = vmatprep.subr.bf16.mxu1 %v24083_v43  ;;  %v24102_v43 = vld [vmem:[#allocation5 + $0x37f0] ss:$72 sps:$4 sm:$0xff]  }
 0x9ec   :  { %v25032_v59 = vpop.f32.mrf.mxu0  ;;  %17608 = vmatmul.mubr.bf16.vlgmr.msra.gmra.mxu0 %v25152_v37 }
 0x9ed   :  { %v25035_v56 = vpop.f32.mrf.mxu1  ;;  %17651 = vmatmul.mubr.bf16.vlgmr.msra.gmra.mxu1 %v25153_v30  ;;  %17662 = vmatpush1.bf16.msra.mxu0 %v24078_v57  ;;  %v24110_v57 = vld [vmem:[#allocation5 + $0x3764] ss:$72 sps:$4 sm:$0xff]  }
 0x9ee   :  { %v17353_v18 = vpop.f32.mrf.mxu0  ;;  %17705 = vmatpush1.bf16.msra.mxu1 %v24081_v9  ;;  %17663 = vmatprep.subr.bf16.mxu0 %v24086_v49  ;;  %v24108_v9 = vld [vmem:[#allocation5 + $0x3760] ss:$72 sps:$4 sm:$0xff]   ;;  %v24116_v49 = vld [vmem:[#allocation5 + $0x36d4] ss:$72 sps:$4 sm:$0xff]  }
 0x9ef   :  { %v17354_v63 = vadd.f32 %v17353_v18, %v17311_v32  ;;  %v17396_v11 = vpop.f32.mrf.mxu1  ;;  %17706 = vmatprep.subr.bf16.mxu1 %v24089_v14  ;;  %17693 = vmatprep.mubr.bf16.mxu0 %v25154_v51  ;;  %v24117_v14 = vld [vmem:[#allocation5 + $0x3fd0] ss:$72 sps:$4 sm:$0xff]   ;;  %v24122_v32 = vld [vmem:[#allocation5 + $0x3644] ss:$72 sps:$4 sm:$0xff]   ;;  %v24120_v18 = vld [vmem:[#allocation5 + $0x3640] ss:$72 sps:$4 sm:$0xff]  }
 0x9f0   :  { %v25039_v37 = vpop.f32.mrf.mxu0  ;;  %17736 = vmatprep.mubr.bf16.mxu1 %v25155_v62 }
 0x9f1   :  { %v17397_v26 = vadd.f32 %v17396_v11, %v17354_v63  ;;  %v25042_v30 = vpop.f32.mrf.mxu1  ;;  %17664 = vmatpush1.bf16.msra.mxu0 %v24084_v39  ;;  %v24128_v63 = vld [vmem:[#allocation5 + $0x3eb4] ss:$72 sps:$4 sm:$0xff]  }
 0x9f2   :  { %v17357_v47 = vpop.f32.mrf.mxu0  ;;  %17707 = vmatpush1.bf16.msra.mxu1 %v24087_v33  ;;  %17665 = vmatprep.subr.bf16.mxu0 %v24092_v3  ;;  %v24123_v3 = vld [vmem:[#allocation5 + $0x3f40] ss:$72 sps:$4 sm:$0xff]   ;;  %v24131_v11 = vld [vmem:[#allocation5 + $0x47b4] ss:$72 sps:$4 sm:$0xff]  }
 0x9f3   :  { %v17753_v35 = vmul.f32 %v17397_v26, %v17397_v26  ;;  %v17358_v51 = vadd.f32 %v17357_v47, %v17315_v22  ;;  %v17400_v5 = vpop.f32.mrf.mxu1  ;;  %17708 = vmatprep.subr.bf16.mxu1 %v24095_v23  ;;  %v24126_v22 = vld [vmem:[#allocation5 + $0x3eb0] ss:$72 sps:$4 sm:$0xff]  }
 0x9f4   :  { %v24129_v26 = vld [vmem:[#allocation5 + $0x47b0] ss:$72 sps:$4 sm:$0xff]  }
 0x9f5   :  { %v25046_v62 = vadd.f32 %v17753_v35, %v17747_v6  ;;  %v17401_v24 = vadd.f32 %v17400_v5, %v17358_v51  ;;  %17666 = vmatpush1.bf16.msra.mxu0 %v24090_v60  ;;  %v24137_v35 = vld [vmem:[#allocation5 + $0x4724] ss:$72 sps:$4 sm:$0xff]  }
 0x9f6   :  { %17709 = vmatpush1.bf16.msra.mxu1 %v24093_v53  ;;  %17667 = vmatprep.subr.bf16.mxu0 %v24098_v27  ;;  %v24134_v53 = vld [vmem:[#allocation5 + $0x3e24] ss:$72 sps:$4 sm:$0xff]  }
 0x9f7   :  { %24222 = vrsqrt.f32 %v25046_v62  ;;  %v17756_v38 = vmul.f32 %v17401_v24, %v17401_v24  ;;  %17710 = vmatprep.subr.bf16.mxu1 %v24101_v17  ;;  %vm17767_vm9 = vcmp.eq.f32.partialorder %v25046_v62, inf  ;;  %v17770_v27 = vand.u32 2147483648, %v25046_v62  ;;  %v24132_v24 = vld [vmem:[#allocation5 + $0x3e20] ss:$72 sps:$4 sm:$0xff]  }
 0x9f8   :  { %vm17769_vm11 = vcmp.eq.f32.partialorder %v25046_v62, 0.0 }
 0x9f9   :  { %v17762_v20 = vadd.f32 %v17756_v38, %v17750_v58  ;;  %17668 = vmatpush1.bf16.msra.mxu0 %v24096_v7  ;;  %v24143_v58 = vld [vmem:[#allocation5 + $0x4694] ss:$72 sps:$4 sm:$0xff]   ;;  %v24138_v38 = vld [vmem:[#allocation5 + $0x3d90] ss:$72 sps:$4 sm:$0xff]  }
 0x9fa   :  { %17711 = vmatpush1.bf16.msra.mxu1 %v24099_v19  ;;  %17669 = vmatprep.subr.bf16.mxu0 %v24104_v8  ;;  %v24135_v19 = vld [vmem:[#allocation5 + $0x4720] ss:$72 sps:$4 sm:$0xff]   ;;  %v24140_v8 = vld [vmem:[#allocation5 + $0x3d94] ss:$72 sps:$4 sm:$0xff]  }
 0x9fb   :  { %24224 = vrsqrt.f32 %v17762_v20  ;;  %17712 = vmatprep.subr.bf16.mxu1 %v24107_v1  ;;  %vm17788_vm10 = vcmp.eq.f32.partialorder %v17762_v20, inf  ;;  %v17791_v6 = vand.u32 2147483648, %v17762_v20  ;;  %vm17790_vm12 = vcmp.eq.f32.partialorder %v17762_v20, 0.0  ;;  %v24146_v1 = vld [vmem:[#allocation5 + $0x3d04] ss:$72 sps:$4 sm:$0xff]  }
 0x9fd   :  { %17670 = vmatpush1.bf16.msra.mxu0 %v24102_v43  ;;  %v24144_v43 = vld [vmem:[#allocation5 + $0x3d00] ss:$72 sps:$4 sm:$0xff]  }
 0x9fe   :  { %17713 = vmatpush1.bf16.msra.mxu1 %v24105_v0  ;;  %17671 = vmatprep.subr.bf16.mxu0 %v24110_v57  ;;  %v24147_v0 = vld [vmem:[#allocation5 + $0x4600] ss:$72 sps:$4 sm:$0xff]   ;;  %v24152_v57 = vld [vmem:[#allocation5 + $0x3c74] ss:$72 sps:$4 sm:$0xff]  }
 0x9ff   :  { %17714 = vmatprep.subr.bf16.mxu1 %v24113_v36  ;;  %v24155_v36 = vld [vmem:[#allocation5 + $0x4574] ss:$72 sps:$4 sm:$0xff]  }
 0xa01   :  { %17672 = vmatpush1.bf16.msra.mxu0 %v24108_v9  ;;  %v24150_v9 = vld [vmem:[#allocation5 + $0x3c70] ss:$72 sps:$4 sm:$0xff]  }
 0xa02   :  { %17715 = vmatpush1.bf16.msra.mxu1 %v24111_v45  ;;  %17673 = vmatprep.subr.bf16.mxu0 %v24116_v49  ;;  %v24153_v45 = vld [vmem:[#allocation5 + $0x4570] ss:$72 sps:$4 sm:$0xff]   ;;  %v24158_v49 = vld [vmem:[#allocation5 + $0x3be4] ss:$72 sps:$4 sm:$0xff]  }
 0xa03   :  { %17716 = vmatprep.subr.bf16.mxu1 %v24119_v15  ;;  %v24161_v15 = vld [vmem:[#allocation5 + $0x44e4] ss:$72 sps:$4 sm:$0xff]  }
 0xa04   :  { %v24223_v39 = vpop.eup %24222 }
 0xa05   :  { %17674 = vmatpush1.bf16.msra.mxu0 %v24114_v46  ;;  %v17766_v33 = vmul.f32 %v24223_v39, %v25046_v62  ;;  %v24156_v46 = vld [vmem:[#allocation5 + $0x3be0] ss:$72 sps:$4 sm:$0xff]   ;;  %v24162_v39 = vld [vmem:[#allocation5 + $0x3b50] ss:$72 sps:$4 sm:$0xff]  }
 0xa06   :  { %17717 = vmatpush1.bf16.msra.mxu1 %v24117_v14  ;;  %17675 = vmatprep.subr.bf16.mxu0 %v24122_v32  ;;  %v24159_v14 = vld [vmem:[#allocation5 + $0x44e0] ss:$72 sps:$4 sm:$0xff]   ;;  %v24164_v32 = vld [vmem:[#allocation5 + $0x3b54] ss:$72 sps:$4 sm:$0xff]  }
 0xa07   :  { %17718 = vmatprep.subr.bf16.mxu1 %v24125_v28  ;;  %v17768_v60 = vsel %vm17767_vm9, %v25046_v62, %v17766_v33  ;;  %v24141_v62 = vld [vmem:[#allocation5 + $0x4690] ss:$72 sps:$4 sm:$0xff]   ;;  %v24167_v28 = vld [vmem:[#allocation5 + $0x4454] ss:$72 sps:$4 sm:$0xff]   ;;  %v24170_v33 = vld [vmem:[#allocation5 + $0x3ac4] ss:$72 sps:$4 sm:$0xff]  }
 0xa08   :  { %v24225_v23 = vpop.eup %24224  ;;  %v25056_v5 = vsel %vm17769_vm11, %v17770_v27, %v17768_v60  ;;  %v24177_v60 = vld [vmem:[#allocation7 + $0x1f0] sm:$0xff]   ;;  %v24181_v27 = vld [vmem:[#allocation7 + $0x1a8] sm:$0xff]  }
 0xa09   :  { %17676 = vmatpush1.bf16.msra.mxu0 %v24120_v18  ;;  %v17787_v47 = vmul.f32 %v24225_v23, %v17762_v20  ;;  %v24165_v18 = vld [vmem:[#allocation5 + $0x4450] ss:$72 sps:$4 sm:$0xff]  }
 0xa0a   :  { %17719 = vmatpush1.bf16.msra.mxu1 %v24123_v3  ;;  %17677 = vmatprep.subr.bf16.mxu0 %v24128_v63  ;;  %v24173_v3 = vld [vmem:[#allocation5 + $0x43c4] ss:$72 sps:$4 sm:$0xff]   ;;  %v24168_v63 = vld [vmem:[#allocation5 + $0x3ac0] ss:$72 sps:$4 sm:$0xff]   ;;  %v24174_v23 = vld [vmem:[#allocation7 + $0x1f8] sm:$0xff]  }
 0xa0b   :  { %17720 = vmatprep.subr.bf16.mxu1 %v24131_v11  ;;  %v17789_v51 = vsel %vm17788_vm10, %v17762_v20, %v17787_v47  ;;  %v24149_v20 = vld [vmem:[#allocation5 + $0x4604] ss:$72 sps:$4 sm:$0xff]   ;;  %v24171_v11 = vld [vmem:[#allocation5 + $0x43c0] ss:$72 sps:$4 sm:$0xff]   ;;  %v24178_v47 = vld [vmem:[#allocation7 + $0x1b0] sm:$0xff]  }
 0xa0c   :  { %v25058_v17 = vsel %vm17790_vm12, %v17791_v6, %v17789_v51  ;;  %v24183_v6 = vld [vmem:[#allocation7 + $0x1e0] sm:$0xff]  }
 0xa0d   :  { %17678 = vmatpush2.bf16.msra.mxu0 %v24126_v22  ;;  %v17807_v7 = vpack.c.bf16 %v25058_v17, %v25056_v5  ;;  %v24175_v22 = vld [vmem:[#allocation7 + $0x1b8] sm:$0xff]   ;;  %v24185_v51 = vld [vmem:[#allocation7 + $0x220] sm:$0xff]  }
 0xa0e   :  { %17721 = vmatpush2.bf16.msra.mxu1 %v24129_v26  ;;  %17679 = vmatprep.subr.bf16.mxu0 %v24134_v53  ;;  %v24176_v26 = vld [vmem:[#allocation7 + $0x238] sm:$0xff]   ;;  %v24179_v53 = vld [vmem:[#allocation7 + $0x230] sm:$0xff]  }
 0xa0f   :  { %17722 = vmatprep.subr.bf16.mxu1 %v24137_v35  ;;  %v24184_v35 = vld [vmem:[#allocation7 + $0x1a0] sm:$0xff]  }
 0xa11   :  { %17680 = vmatpush2.bf16.msra.mxu0 %v24132_v24  ;;  %v24186_v24 = vld [vmem:[#allocation7 + $0x1d8] sm:$0xff]  }
 0xa12   :  { %17723 = vmatpush2.bf16.msra.mxu1 %v24135_v19  ;;  %17681 = vmatprep.subr.bf16.mxu0 %v24140_v8  ;;  %v24187_v19 = vld [vmem:[#allocation7 + $0x198] sm:$0xff]  }
 0xa13   :  { %17724 = vmatprep.subr.bf16.mxu1 %v24143_v58  ;;  %v24188_v8 = vld [vmem:[#allocation7 + $0x218] sm:$0xff]   ;;  %v24189_v58 = vld [vmem:[#allocation7 + $0x1d0] sm:$0xff]  }
 0xa15   :  { %17682 = vmatpush2.bf16.msra.mxu0 %v24138_v38  ;;  %v24190_v38 = vld [vmem:[#allocation7 + $0x190] sm:$0xff]  }
 0xa16   :  { %17725 = vmatpush2.bf16.msra.mxu1 %v24141_v62  ;;  %17683 = vmatprep.subr.bf16.mxu0 %v24146_v1  ;;  %v24191_v62 = vld [vmem:[#allocation7 + $0x210] sm:$0xff]   ;;  %v24192_v1 = vld [vmem:[#allocation7 + $0x1c8] sm:$0xff]  }
 0xa17   :  { %17726 = vmatprep.subr.bf16.mxu1 %v24149_v20  ;;  %v24193_v20 = vld [vmem:[#allocation7 + $0x188] sm:$0xff]  }
 0xa19   :  { %17684 = vmatpush2.bf16.msra.mxu0 %v24144_v43  ;;  %v24194_v43 = vld [vmem:[#allocation7 + $0x208] sm:$0xff]  }
 0xa1a   :  { %17727 = vmatpush2.bf16.msra.mxu1 %v24147_v0  ;;  %17685 = vmatprep.subr.bf16.mxu0 %v24152_v57  ;;  %v24195_v0 = vld [vmem:[#allocation7 + $0x1c0] sm:$0xff]  }
 0xa1b   :  { %17728 = vmatprep.subr.bf16.mxu1 %v24155_v36  ;;  %v24196_v57 = vld [vmem:[#allocation7 + $0x180] sm:$0xff]  }
 0xa1c   :  { %v24197_v36 = vld [vmem:[#allocation7 + $0x200] sm:$0xff]  }
 0xa1d   :  { %17686 = vmatpush2.bf16.msra.mxu0 %v24150_v9 }
 0xa1e   :  { %17729 = vmatpush2.bf16.msra.mxu1 %v24153_v45  ;;  %17687 = vmatprep.subr.bf16.mxu0 %v24158_v49 }
 0xa1f   :  { %17730 = vmatprep.subr.bf16.mxu1 %v24161_v15 }
 0xa21   :  { %17688 = vmatpush2.bf16.msra.mxu0 %v24156_v46 }
 0xa22   :  { %17731 = vmatpush2.bf16.msra.mxu1 %v24159_v14  ;;  %17689 = vmatprep.subr.bf16.mxu0 %v24164_v32 }
 0xa23   :  { %17732 = vmatprep.subr.bf16.mxu1 %v24167_v28 }
 0xa25   :  { %17690 = vmatpush2.bf16.msra.mxu0 %v24162_v39 }
 0xa26   :  { %17733 = vmatpush2.bf16.msra.mxu1 %v24165_v18  ;;  %17691 = vmatprep.subr.bf16.mxu0 %v24170_v33 }
 0xa27   :  { %17734 = vmatprep.subr.bf16.mxu1 %v24173_v3 }
 0xa29   :  { %17692 = vmatpush2.bf16.msra.mxu0 %v24168_v63 }
 0xa2a   :  { %17735 = vmatpush2.bf16.msra.mxu1 %v24171_v11  ;;  %20566 = vmatprep.subr.bf16.mxu0 %v24174_v23  ;;  %v17137_v23 = vadd.f32 %v25004_v54, %v25002_v61 }
 0xa2b   :  { %20637 = vmatprep.subr.bf16.mxu1 %v25144_v50 }
 0xa2c   :  { %17694 = vmatmul.mubr.bf16.vlgmr.msra.gmra.mxu0 %v25156_v34  ;;  %v24180_v34 = vld [vmem:[#allocation7 + $0x1e8] sm:$0xff]   ;;  %v17437_v9 = vpop.f32.mrf.mxu0 }
 0xa2d   :  { %17737 = vmatmul.mubr.bf16.vlgmr.msra.gmra.mxu1 %v25157_v12  ;;  %20567 = vmatpush3.bf16.msra.mxu0 %v24175_v22  ;;  %v24182_v12 = vld [vmem:[#allocation7 + $0x228] sm:$0xff]   ;;  %v17480_v45 = vpop.f32.mrf.mxu1 }
 0xa2e   :  { %20653 = vmatprep.mubr.msk.bf16.mxu1 %vm24333_vm0, %v25144_v50  ;;  %20638 = vmatpush3.bf16.msra.mxu1 %v24176_v26  ;;  %v17439_v49 = vpop.f32.mrf.mxu0  ;;  %v17180_v26 = vadd.f32 %v25014_v41, %v17137_v23 }
 0xa2f   :  { %20639 = vmatprep.subr.bf16.mxu1 %v25144_v50  ;;  %20568 = vmatprep.subr.bf16.mxu0 %v24177_v60  ;;  %v17482_v15 = vpop.f32.mrf.mxu1 }
 0xa30   :  { %v17441_v46 = vpop.f32.mrf.mxu0 }
 0xa31   :  { %20569 = vmatpush3.bf16.msra.mxu0 %v24178_v47  ;;  %v17484_v14 = vpop.f32.mrf.mxu1  ;;  %v17481_v47 = vadd.f32 %v17480_v45, %v17437_v9 }
 0xa32   :  { %20640 = vmatpush3.bf16.msra.mxu1 %v24179_v53  ;;  %20570 = vmatprep.subr.bf16.mxu0 %v24180_v34  ;;  %v17443_v32 = vpop.f32.mrf.mxu0  ;;  %v17141_v34 = vadd.f32 %v25012_v48, %v25010_v52 }
 0xa33   :  { %20641 = vmatprep.subr.bf16.mxu1 %v25144_v50  ;;  %v17486_v28 = vpop.f32.mrf.mxu1 }
 0xa35   :  { %20571 = vmatpush3.bf16.msra.mxu0 %v24181_v27  ;;  %v17483_v27 = vadd.f32 %v17482_v15, %v17439_v49 }
 0xa36   :  { %20642 = vmatpush3.bf16.msra.mxu1 %v24182_v12  ;;  %20572 = vmatprep.subr.bf16.mxu0 %v24183_v6  ;;  %v17223_v6 = vadd.f32 %v25016_v4, %v17180_v26 }
 0xa37   :  { %20643 = vmatprep.subr.bf16.mxu1 %v25144_v50 }
 0xa38   :  { %v17266_v54 = vadd.f32 %v25022_v40, %v17223_v6 }
 0xa39   :  { %20573 = vmatpush3.bf16.msra.mxu0 %v24184_v35  ;;  %v17184_v35 = vadd.f32 %v25018_v21, %v17141_v34 }
 0xa3a   :  { %20644 = vmatpush3.bf16.msra.mxu1 %v24185_v51  ;;  %20574 = vmatprep.subr.bf16.mxu0 %v24186_v24  ;;  %v17485_v24 = vadd.f32 %v17484_v14, %v17441_v46  ;;  %v17309_v4 = vadd.f32 %v25024_v29, %v17266_v54 }
 0xa3b   :  { %20645 = vmatprep.subr.bf16.mxu1 %v25144_v50 }
 0xa3d   :  { %20575 = vmatpush3.bf16.msra.mxu0 %v24187_v19 }
 0xa3e   :  { %20646 = vmatpush3.bf16.msra.mxu1 %v24188_v8  ;;  %20576 = vmatprep.subr.bf16.mxu0 %v24189_v58  ;;  %v17487_v8 = vadd.f32 %v17486_v28, %v17443_v32 }
 0xa3f   :  { %20647 = vmatprep.subr.bf16.mxu1 %v25144_v50 }
 0xa41   :  { %20577 = vmatpush3.bf16.msra.mxu0 %v24190_v38  ;;  %v17227_v38 = vadd.f32 %v25020_v25, %v17184_v35  ;;  %v17014_v25 = vadd.f32 %v24998_v42, %v24971_v2 }
 0xa42   :  { %20648 = vmatpush3.bf16.msra.mxu1 %v24191_v62  ;;  %20578 = vmatprep.subr.bf16.mxu0 %v24192_v1 }
 0xa43   :  { %20649 = vmatprep.subr.bf16.mxu1 %v25144_v50  ;;  %v17270_v21 = vadd.f32 %v25028_v55, %v17227_v38  ;;  %v17057_v2 = vadd.f32 %v25000_v16, %v17014_v25 }
 0xa45   :  { %20579 = vmatpush3.bf16.msra.mxu0 %v24193_v20  ;;  %v17313_v15 = vadd.f32 %v25030_v44, %v17270_v21  ;;  %v17751_v6 = vmul.f32 %v17057_v2, %v17057_v2 }
 0xa46   :  { %20650 = vmatpush3.bf16.msra.mxu1 %v24194_v43  ;;  %20580 = vmatprep.subr.bf16.mxu0 %v24195_v0 }
 0xa47   :  { %20651 = vmatprep.subr.bf16.mxu1 %v25144_v50 }
 0xa49   :  { %20581 = vmatpush3.bf16.msra.mxu0 %v24196_v57  ;;  %v17352_v57 = vadd.f32 %v25032_v59, %v17309_v4 }
 0xa4a   :  { %20652 = vmatpush3.bf16.msra.mxu1 %v24197_v36 }
 0xa4b   :  { %v17395_v55 = vadd.f32 %v25035_v56, %v17352_v57 }
 0xa6c   :  { %v17523_v39 = vpop.f32.mrf.mxu0 }
 0xa6d   :  { %v17566_v18 = vpop.f32.mrf.mxu1  ;;  %v17524_v12 = vadd.f32 %v17523_v39, %v17481_v47  ;;  %v17356_v39 = vadd.f32 %v25039_v37, %v17313_v15 }
 0xa6e   :  { %v17525_v33 = vpop.f32.mrf.mxu0 }
 0xa6f   :  { %v17568_v3 = vpop.f32.mrf.mxu1  ;;  %v17526_v19 = vadd.f32 %v17525_v33, %v17483_v27  ;;  %v17567_v41 = vadd.f32 %v17566_v18, %v17524_v12  ;;  %v17399_v56 = vadd.f32 %v25042_v30, %v17356_v39 }
 0xa70   :  { %v17527_v63 = vpop.f32.mrf.mxu0 }
 0xa71   :  { %v17570_v11 = vpop.f32.mrf.mxu1  ;;  %v17528_v58 = vadd.f32 %v17527_v63, %v17485_v24  ;;  %v17569_v1 = vadd.f32 %v17568_v3, %v17526_v19 }
 0xa72   :  { %v17529_v50 = vpop.f32.mrf.mxu0 }
 0xa73   :  { %v17572_v22 = vpop.f32.mrf.mxu1  ;;  %v17530_v52 = vadd.f32 %v17529_v50, %v17487_v8  ;;  %v17571_v43 = vadd.f32 %v17570_v11, %v17528_v58  ;;  %v17748_v11 = vmul.f32 %v24981_v13, %v24981_v13 }
 0xa75   :  { %v17573_v40 = vadd.f32 %v17572_v22, %v17530_v52 }
 0xaac   :  { %v17609_v60 = vpop.f32.mrf.mxu0 }
 0xaad   :  { %v17652_v53 = vpop.f32.mrf.mxu1  ;;  %v17610_v48 = vadd.f32 %v17609_v60, %v17567_v41  ;;  %v17749_v60 = vmul.f32 %v17395_v55, %v17395_v55 }
 0xaae   :  { %v17611_v51 = vpop.f32.mrf.mxu0 }
 0xaaf   :  { %v17654_v61 = vpop.f32.mrf.mxu1  ;;  %v17612_v0 = vadd.f32 %v17611_v51, %v17569_v1  ;;  %v17653_v9 = vadd.f32 %v17652_v53, %v17610_v48  ;;  %v17752_v51 = vmul.f32 %v17399_v56, %v17399_v56 }
 0xab0   :  { %v17613_v62 = vpop.f32.mrf.mxu0 }
 0xab1   :  { %v17656_v20 = vpop.f32.mrf.mxu1  ;;  %v17614_v45 = vadd.f32 %v17613_v62, %v17571_v43  ;;  %v17655_v14 = vadd.f32 %v17654_v61, %v17612_v0 }
 0xab2   :  { %v17615_v36 = vpop.f32.mrf.mxu0 }
 0xab3   :  { %v17658_v49 = vpop.f32.mrf.mxu1  ;;  %v17616_v32 = vadd.f32 %v17615_v36, %v17573_v40  ;;  %v17657_v18 = vadd.f32 %v17656_v20, %v17614_v45 }
 0xab5   :  { %v17659_v44 = vadd.f32 %v17658_v49, %v17616_v32 }
 0xaec   :  { %v17695_v46 = vpop.f32.mrf.mxu0 }
 0xaed   :  { %v17696_v29 = vadd.f32 %v17695_v46, %v17653_v9  ;;  %v17738_v28 = vpop.f32.mrf.mxu1 }
 0xaee   :  { %v17697_v59 = vpop.f32.mrf.mxu0 }
 0xaef   :  { %v17739_v33 = vadd.f32 %v17738_v28, %v17696_v29  ;;  %v17698_v3 = vadd.f32 %v17697_v59, %v17655_v14  ;;  %v17740_v63 = vpop.f32.mrf.mxu1 }
 0xaf0   :  { %v17699_v42 = vpop.f32.mrf.mxu0 }
 0xaf1   :  { %v17754_v23 = vmul.f32 %v17739_v33, %v17739_v33  ;;  %v17741_v50 = vadd.f32 %v17740_v63, %v17698_v3  ;;  %v17700_v22 = vadd.f32 %v17699_v42, %v17657_v18  ;;  %v17742_v26 = vpop.f32.mrf.mxu1 }
 0xaf2   :  { %v17701_v37 = vpop.f32.mrf.mxu0 }
 0xaf3   :  { %v17760_v47 = vadd.f32 %v17754_v23, %v17748_v11  ;;  %v17755_v53 = vmul.f32 %v17741_v50, %v17741_v50  ;;  %v17743_v34 = vadd.f32 %v17742_v26, %v17700_v22  ;;  %v17702_v27 = vadd.f32 %v17701_v37, %v17659_v44  ;;  %v17744_v12 = vpop.f32.mrf.mxu1 }
 0xaf5   :  { %24226 = vrsqrt.f32 %v17760_v47  ;;  %v17761_v13 = vadd.f32 %v17755_v53, %v17749_v60  ;;  %v17757_v35 = vmul.f32 %v17743_v34, %v17743_v34  ;;  %v17745_v16 = vadd.f32 %v17744_v12, %v17702_v27 }
 0xaf6   :  { %vm17774_vm13 = vcmp.eq.f32.partialorder %v17760_v47, inf  ;;  %vm17776_vm14 = vcmp.eq.f32.partialorder %v17760_v47, 0.0  ;;  %v17777_v62 = vand.u32 2147483648, %v17760_v47 }
 0xaf7   :  { %24228 = vrsqrt.f32 %v17761_v13  ;;  %v17763_v24 = vadd.f32 %v17757_v35, %v17751_v6  ;;  %v17758_v19 = vmul.f32 %v17745_v16, %v17745_v16  ;;  %vm17781_vm0 = vcmp.eq.f32.partialorder %v17761_v13, inf }
 0xaf8   :  { %v17784_v20 = vand.u32 2147483648, %v17761_v13  ;;  %vm17783_vm3 = vcmp.eq.f32.partialorder %v17761_v13, 0.0 }
 0xaf9   :  { %24230 = vrsqrt.f32 %v17763_v24  ;;  %v17764_v61 = vadd.f32 %v17758_v19, %v17752_v51  ;;  %vm17795_vm15 = vcmp.eq.f32.partialorder %v17763_v24, inf  ;;  %v17798_v48 = vand.u32 2147483648, %v17763_v24 }
 0xafa   :  { %vm17797_vm1 = vcmp.eq.f32.partialorder %v17763_v24, 0.0 }
 0xafb   :  { %24232 = vrsqrt.f32 %v17764_v61  ;;  %vm17802_vm2 = vcmp.eq.f32.partialorder %v17764_v61, inf  ;;  %v17805_v36 = vand.u32 2147483648, %v17764_v61  ;;  %vm17804_vm4 = vcmp.eq.f32.partialorder %v17764_v61, 0.0 }
 0xb02   :  { %v24227_v54 = vpop.eup %24226 }
 0xb03   :  { %v17773_v30 = vmul.f32 %v24227_v54, %v17760_v47 }
 0xb04   :  { %v24229_v8 = vpop.eup %24228 }
 0xb05   :  { %v17780_v41 = vmul.f32 %v24229_v8, %v17761_v13  ;;  %v17775_v38 = vsel %vm17774_vm13, %v17760_v47, %v17773_v30 }
 0xb06   :  { %v24231_v58 = vpop.eup %24230  ;;  %v17778_v0 = vsel %vm17776_vm14, %v17777_v62, %v17775_v38 }
 0xb07   :  { %v17794_v1 = vmul.f32 %v24231_v58, %v17763_v24  ;;  %v17782_v21 = vsel %vm17781_vm0, %v17761_v13, %v17780_v41 }
 0xb08   :  { %v24233_v52 = vpop.eup %24232  ;;  %v17785_v45 = vsel %vm17783_vm3, %v17784_v20, %v17782_v21 }
 0xb09   :  { %v17796_v4 = vsel %vm17795_vm15, %v17763_v24, %v17794_v1  ;;  %v17801_v43 = vmul.f32 %v24233_v52, %v17764_v61 }
 0xb0a   :  { %v17799_v57 = vsel %vm17797_vm1, %v17798_v48, %v17796_v4 }
 0xb0b   :  { %v17808_v40 = vpack.c.bf16 %v17799_v57, %v17778_v0  ;;  %v17803_v9 = vsel %vm17802_vm2, %v17764_v61, %v17801_v43 }
 0xb0c   :  { %v17806_v49 = vsel %vm17804_vm4, %v17805_v36, %v17803_v9 }
 0xb0d   :  { %18034 = vmatprep.mubr.bf16.mxu0 %v17808_v40  ;;  %v17809_v25 = vpack.c.bf16 %v17806_v49, %v17785_v45 }
 0xb0e   :  { %18035 = vmatmul.mubr.bf16.vlgmr.msra.gmra.mxu0 %v17807_v7 }
 0xb0f   :  { %20654 = vmatmul.mubr.bf16.vlgmr.msra.gmra.mxu1 %v17809_v25 }
 0xbce   :  { %v20582_v15 = vpop.f32.mrf.mxu0 }
 0xbcf   :  { %v18077_v46 = vpop.f32.mrf.mxu1 }
 0xbd0   :  { %v20583_v14 = vpop.f32.mrf.mxu0 }
 0xbd1   :  { %v20584_v32 = vadd.f32 %v20583_v14, %v20582_v15  ;;  %v20655_v29 = vpop.f32.mrf.mxu1 }
 0xbd2   :  { %v20585_v28 = vpop.f32.mrf.mxu0 }
 0xbd3   :  { %v18078_v55 = vadd.f32 %v20584_v32, %v18077_v46  ;;  %v18080_v39 = vpop.f32.mrf.mxu1 }
 0xbd4   :  { %v20586_v59 = vpop.f32.mrf.mxu0 }
 0xbd5   :  { %v18084_v18 = vadd.f32 %v18078_v55, %v24924_v10  ;;  %v20587_v33 = vadd.f32 %v20586_v59, %v20585_v28  ;;  %v20656_v3 = vpop.f32.mrf.mxu1 }
 0xbd7   :  { %v18086_v63 = vadd.f32 1e-08, %v18084_v18  ;;  %v18081_v11 = vadd.f32 %v20587_v33, %v18080_v39 }
 0xbd9   :  { %24234 = vlog2.f32 %v18086_v63  ;;  %v18085_v5 = vadd.f32 %v18081_v11, %v24927_v31 }
 0xbdb   :  { %v18087_v17 = vadd.f32 1e-08, %v18085_v5 }
 0xbdd   :  { %24236 = vlog2.f32 %v18087_v17 }
 0xbe6   :  { %v24235_v7 = vpop.eup %24234 }
 0xbe7   :  { %v18089_v2 = vmul.f32 0.6931472, %v24235_v7 }
 0xbe9   :  { %18092 = vst [vmem:[#allocation8] sm:$0xff] %v18089_v2 }
 0xbea   :  { %v24237_v42 = vpop.eup %24236 }
 0xbeb   :  { %v18091_v44 = vmul.f32 0.6931472, %v24237_v42 }
 0xbed   :  { %18093 = vst [vmem:[#allocation8 + $0x8] sm:$0xff] %v18091_v44 }
 0xbee   :  { %24309 = shalt.err (!%p24306_p5)
}
 0xbef   :  { %s24335_s5 = smov 128   ;;  %s24336_s6 = smov 8  }
 0xbf0   :  { %18105 = dma.vmem_to_hbm [thread:$0]  %s18100_s2, 256, %s25106_s3, [#allocation4], %s24335_s5, %s24335_s5, %s24336_s6  }
 0xbf1   :  { %24322 = dma.done.wait [#allocation4], 256  }
 0xbf2   :  { %24323 = vsyncadd [#allocation4], 4294967040 }
 0xbf3   :  { %18109 = vsyncpa [#allocation3], 1 }
 0xbf4   :  { %18110 = vsyncpa [#allocation6], 1 }
 0xbf5   :  { %18111 = vsyncpa [#allocation4], 1 }

</bundles_post_ra>
